<compile_context>
chip_gen: v5e
topology: v5e:2x2
jax: 0.10.0
libtpu: 0.0.40
codegen_flags: <defaults>
</compile_context>

<pallas_src>
import math

import numpy as np
import jax
import jax.numpy as jnp
from jax.experimental import pallas as pl
from jax.experimental.pallas import tpu as pltpu

EPS = 1e-5
_TAPS = [(dy, dx) for dy in range(3) for dx in range(3)]   # conv tap order (kh, kw)
_MiB = 1024 * 1024


def _interp_matrix(n_in, n_out):
    """1-D bilinear (align_corners=True) interpolation matrix, (n_out, n_in)."""
    m = np.zeros((n_out, n_in), np.float64)
    scale = 0.0 if n_out == 1 else (n_in - 1) / (n_out - 1)
    for p in range(n_out):
        src = p * scale
        i0 = min(int(math.floor(src)), n_in - 1)
        i1 = min(i0 + 1, n_in - 1)
        f = src - i0
        m[p, i0] += 1.0 - f
        m[p, i1] += f
    return m


def _tap_masks(N, OH, OW):
    """(9, N*OH*OW) f32 validity masks on the flat (n, oh, ow) lane layout."""
    yy, xx = np.meshgrid(np.arange(OH), np.arange(OW), indexing="ij")
    rows = []
    for dy, dx in _TAPS:
        ok = ((yy + dy - 1 >= 0) & (yy + dy - 1 < OH) &
              (xx + dx - 1 >= 0) & (xx + dx - 1 < OW))
        rows.append(np.tile(ok.reshape(-1), N))        # same mask for every image
    return np.stack(rows, axis=0).astype(np.float32)


def _vmem_limit(est_bytes):
    """~2x the live footprint, >=16 MiB, capped at 48 MiB (v7x physical VMEM is 64 MiB;
    leave headroom for compiler scratch / pipelining buffers)."""
    return int(min(48 * _MiB, max(16 * _MiB, 2 * est_bytes)))


def make_up_forward(N, Cin, H, W, Cout, matmul_dtype=jnp.float32):
    """Pallas forward for Up(Cin, Cout, bilinear=True) (== UpSampler.forward)."""
    Cmid = Cin // 2
    OH, OW = 2 * H, 2 * W
    S = OH * OW
    L = N * S                                   # images concatenated along lanes
    B = Cin * N                                 # planes handled by the upsample kernel
    f32_mm = np.dtype(matmul_dtype) == np.dtype(np.float32)
    prec = jax.lax.Precision.HIGHEST if f32_mm else None   # HIGHEST only for f32 path
    bpe = np.dtype(matmul_dtype).itemsize

    # ------------------ kernel 1: separable bilinear x2 upsample ------------------
    def up_kernel(x_ref, mw_ref, mh_ref, o_ref):
        x = x_ref[...]                                              # (B, H, W)
        mw = jnp.broadcast_to(mw_ref[...], (B, W, OW))              # (B, W, OW)
        mh = jnp.broadcast_to(mh_ref[...], (B, OH, H))              # (B, OH, H)
        # width interp then height interp; f32 accumulation on the MXU.
        t = jnp.einsum("bhw,bwv->bhv", x, mw,
                       preferred_element_type=jnp.float32, precision=prec)
        up = jnp.einsum("boh,bhv->bov", mh, t.astype(matmul_dtype),
                        preferred_element_type=jnp.float32, precision=prec)
        o_ref[...] = up.astype(o_ref.dtype)

    up_est = (B * (H * W + W * OW + OH * H + OH * OW)) * bpe + 2 * B * OH * OW * 4
    up_call = pl.pallas_call(
        up_kernel,
        out_shape=jax.ShapeDtypeStruct((B, OH, OW), matmul_dtype),
        compiler_params=pltpu.CompilerParams(vmem_limit_bytes=_vmem_limit(up_est)),
    )

    # --------- kernel 2: (conv3x3 -> BN -> ReLU) x2 on the flat (C, N*S) layout ---
    def dc_kernel(up_ref, masks_ref, w1_ref, g1_ref, be1_ref,
                  w2_ref, g2_ref, be2_ref, o_ref):
        masks = masks_ref[...]                                      # (9, L) f32

        def conv3x3(h, w9, cout):
            # h: (cin, L) matmul_dtype; w9: (9*cout, cin) -> (cout, L) f32.
            # matmul-then-roll: channel contraction first (one MXU matmul), then the
            # 9 tap results are lane-rotated and masked-accumulated (roll/mask commute
            # with the channel contraction).
            z9 = jnp.dot(w9, h, preferred_element_type=jnp.float32,
                         precision=prec)                            # (9*cout, L)
            y = z9[4 * cout:5 * cout, :]                            # centre tap (1,1)
            for k, (dy, dx) in enumerate(_TAPS):
                if dy == 1 and dx == 1:
                    continue
                s = (dy - 1) * OW + (dx - 1)
                zk = z9[k * cout:(k + 1) * cout, :]
                rk = pltpu.roll(zk, (-s) % L, 1)        # rk[q] = zk[(q + s) % L]
                y = y + rk * masks[k:k + 1, :]          # out-of-plane / cross-image -> 0
            return y

        def bn_relu(y, g, be):
            # training-mode BatchNorm2d: biased batch stats over (N, OH, OW) == lanes;
            # two-pass variance for numerical robustness.
            inv_cnt = 1.0 / float(L)
            mean = jnp.sum(y, axis=1, keepdims=True) * inv_cnt      # (c, 1)
            d = y - mean
            var = jnp.sum(d * d, axis=1, keepdims=True) * inv_cnt
            return jnp.maximum(d * (jax.lax.rsqrt(var + EPS) * g) + be, 0.0)

        h1 = bn_relu(conv3x3(up_ref[...].astype(matmul_dtype), w1_ref[...], Cmid),
                     g1_ref[...], be1_ref[...])                     # (Cmid, L) f32
        h2 = bn_relu(conv3x3(h1.astype(matmul_dtype), w2_ref[...], Cout),
                     g2_ref[...], be2_ref[...])                     # (Cout, L) f32
        o_ref[...] = h2

    dc_est = L * (Cin * bpe + 9 * 4
                  + 9 * Cmid * 4 + 3 * Cmid * 4
                  + 9 * Cout * 4 + 3 * Cout * 4)
    dc_call = pl.pallas_call(
        dc_kernel,
        out_shape=jax.ShapeDtypeStruct((Cout, L), jnp.float32),
        compiler_params=pltpu.CompilerParams(vmem_limit_bytes=_vmem_limit(dc_est)),
    )

    # ---------------------------- constants (host-side) ---------------------------
    mwT_j = jnp.asarray(_interp_matrix(W, OW).T, dtype=matmul_dtype)    # (W, OW)
    mh_j = jnp.asarray(_interp_matrix(H, OH), dtype=matmul_dtype)       # (OH, H)
    masks_j = jnp.asarray(_tap_masks(N, OH, OW))                        # (9, L)

    def forward(x_nchw, params):
        # NCHW -> channel-major (Cin*N, H, W) planes for the upsample kernel.
        x = jnp.transpose(x_nchw, (1, 0, 2, 3)).reshape(B, H, W).astype(matmul_dtype)
        up = up_call(x, mwT_j, mh_j)                    # (Cin*N, OH, OW)
        # Row-major reshape (free): (Cin*N, OH, OW) -> (Cin, N*OH*OW) flat layout.
        up_flat = up.reshape(Cin, L)

        # OIHW (cout, cin, 3, 3) -> (9*cout, cin): row block k = kh*3+kw (tap-major),
        # matching _TAPS / the mask rows / the roll shifts used in the kernel.
        w1 = jnp.transpose(params["w1"], (2, 3, 0, 1)).reshape(9 * Cmid, Cin)
        w2 = jnp.transpose(params["w2"], (2, 3, 0, 1)).reshape(9 * Cout, Cmid)
        g1 = params["g1"].reshape(Cmid, 1).astype(jnp.float32)
        be1 = params["be1"].reshape(Cmid, 1).astype(jnp.float32)
        g2 = params["g2"].reshape(Cout, 1).astype(jnp.float32)
        be2 = params["be2"].reshape(Cout, 1).astype(jnp.float32)
        # Conv biases (b1, b2) are intentionally not passed: training-mode BN subtracts
        # the batch mean, which cancels them exactly.
        y = dc_call(up_flat, masks_j,
                    w1.astype(matmul_dtype), g1, be1,
                    w2.astype(matmul_dtype), g2, be2)   # (Cout, N*S)
        return jnp.transpose(y.reshape(Cout, N, OH, OW), (1, 0, 2, 3))   # NCHW

    return jax.jit(forward)


def ref_up_forward(x, params):
    """Pure-JAX reference of the same forward (faithful, incl. conv bias)."""
    N, Cin, H, W = x.shape
    OH, OW = 2 * H, 2 * W

    def coeffs(n_in, n_out):
        scale = 0.0 if n_out == 1 else (n_in - 1) / (n_out - 1)
        i0, i1, w0, w1 = [], [], [], []
        for p in range(n_out):
            src = p * scale
            a = min(int(math.floor(src)), n_in - 1)
            b = min(a + 1, n_in - 1)
            f = src - a
            i0.append(a); i1.append(b); w0.append(1.0 - f); w1.append(f)
        return (np.array(i0), np.array(i1),
                np.array(w0, np.float32), np.array(w1, np.float32))

    ih0, ih1, wh0, wh1 = coeffs(H, OH)
    iw0, iw1, ww0, ww1 = coeffs(W, OW)
    x = x.astype(jnp.float32)
    xw = x[:, :, :, iw0] * ww0 + x[:, :, :, iw1] * ww1              # (N, Cin, H, OW)
    up = (xw[:, :, ih0, :] * wh0[None, None, :, None] +
          xw[:, :, ih1, :] * wh1[None, None, :, None])              # (N, Cin, OH, OW)

    def conv_bn_relu(h, w, b, g, be):
        y = jax.lax.conv_general_dilated(
            h, w, (1, 1), "SAME",
            dimension_numbers=("NCHW", "OIHW", "NCHW"),
            precision=jax.lax.Precision.HIGHEST)
        y = y + b[None, :, None, None]
        mean = y.mean(axis=(0, 2, 3), keepdims=True)
        var = ((y - mean) ** 2).mean(axis=(0, 2, 3), keepdims=True)
        y = (y - mean) * jax.lax.rsqrt(var + EPS) * g[None, :, None, None] \
            + be[None, :, None, None]
        return jnp.maximum(y, 0.0)

    h1 = conv_bn_relu(up, params["w1"], params["b1"], params["g1"], params["be1"])
    h2 = conv_bn_relu(h1, params["w2"], params["b2"], params["g2"], params["be2"])
    return h2


if __name__ == "__main__":
    # UpSampler(in_dim=4, mid_dim=*, out_dim=4) -> Up(4, 4, bilinear=True)
    N, Cin, H, W = 2, 4, 16, 16
    Cout = 4
    Cmid = Cin // 2

    key = jax.random.PRNGKey(0)
    kx, k1, k2, k3, k4 = jax.random.split(key, 5)
    x = jax.random.normal(kx, (N, Cin, H, W), jnp.float32)

    # PyTorch-layout parameters: conv weights OIHW, per-channel bias/gamma/beta.
    params = dict(
        w1=0.2 * jax.random.normal(k1, (Cmid, Cin, 3, 3), jnp.float32),
        b1=0.1 * jax.random.normal(k2, (Cmid,), jnp.float32),
        g1=jnp.ones((Cmid,), jnp.float32),    # BN gamma init
        be1=jnp.zeros((Cmid,), jnp.float32),  # BN beta init
        w2=0.2 * jax.random.normal(k3, (Cout, Cmid, 3, 3), jnp.float32),
        b2=0.1 * jax.random.normal(k4, (Cout,), jnp.float32),
        g2=jnp.ones((Cout,), jnp.float32),
        be2=jnp.zeros((Cout,), jnp.float32),
    )

    ref = jax.block_until_ready(ref_up_forward(x, params))

    # f32 matmul operands (Precision.HIGHEST): strict check.
    fwd = make_up_forward(N, Cin, H, W, Cout)
    out = jax.block_until_ready(fwd(x, params))
    assert out.shape == (N, Cout, 2 * H, 2 * W), out.shape
    err = float(jnp.max(jnp.abs(out - ref)))
    assert err < 1e-3, f"f32 Pallas kernel mismatch vs reference: max|diff|={err}"

    # bf16 matmul operands (f32 accumulation) for the v5e/v6e/v7x MXU: looser check
    # (bf16 operand rounding through the upsample + both convs, exact math otherwise).
    fwd_bf16 = make_up_forward(N, Cin, H, W, Cout, matmul_dtype=jnp.bfloat16)
    out_bf16 = jax.block_until_ready(fwd_bf16(x, params))
    err_bf16 = float(jnp.max(jnp.abs(out_bf16 - ref)))
    assert err_bf16 < 6e-2, f"bf16 Pallas kernel mismatch vs reference: max|diff|={err_bf16}"

    print("KERNEL_OK")
</pallas_src>

<mosaic_0001>
module attributes {stable_mosaic.version = 11 : i64} {
  func.func @up_kernel(%arg0: memref<8x16x16xf32, #tpu.memory_space<vmem>>, %arg1: memref<16x32xf32, #tpu.memory_space<vmem>>, %arg2: memref<32x16xf32, #tpu.memory_space<vmem>>, %arg3: memref<8x32x32xf32, #tpu.memory_space<vmem>>) attributes {dimension_semantics = [], scalar_prefetch = 0 : i64, scratch_operands = 0 : i64, tpu.core_type = #tpu.core_type<tc>} {
    %c0 = arith.constant 0 : index
    %c0_0 = arith.constant 0 : index
    %c0_1 = arith.constant 0 : index
    %0 = vector.load %arg0[%c0, %c0_0, %c0_1] : memref<8x16x16xf32, #tpu.memory_space<vmem>>, vector<8x16x16xf32>
    %c0_2 = arith.constant 0 : index
    %c0_3 = arith.constant 0 : index
    %1 = vector.load %arg1[%c0_2, %c0_3] : memref<16x32xf32, #tpu.memory_space<vmem>>, vector<16x32xf32>
    %2 = vector.shape_cast %1 : vector<16x32xf32> to vector<1x16x32xf32>
    %3 = vector.broadcast %2 : vector<1x16x32xf32> to vector<8x16x32xf32>
    %c0_4 = arith.constant 0 : index
    %c0_5 = arith.constant 0 : index
    %4 = vector.load %arg2[%c0_4, %c0_5] : memref<32x16xf32, #tpu.memory_space<vmem>>, vector<32x16xf32>
    %5 = vector.shape_cast %4 : vector<32x16xf32> to vector<1x32x16xf32>
    %6 = vector.broadcast %5 : vector<1x32x16xf32> to vector<8x32x16xf32>
    "tpu.trace_start"() <{level = 10 : i32, message = "bhw,bwv->bhv"}> : () -> ()
    %cst = arith.constant dense<0.000000e+00> : vector<8x16x32xf32>
    %7 = tpu.matmul %0, %3, %cst {dimension_numbers = #tpu.dot_dimension_numbers<[2], [1], [1], [2], [0, 0, 0, 1, 1, 2], [0], [0]>, precision = #tpu.contract_precision<fp32>} : vector<8x16x16xf32>, vector<8x16x32xf32>, vector<8x16x32xf32> -> vector<8x16x32xf32>
    "tpu.trace_stop"() : () -> ()
    "tpu.trace_start"() <{level = 10 : i32, message = "boh,bhv->bov"}> : () -> ()
    %cst_6 = arith.constant dense<0.000000e+00> : vector<8x32x32xf32>
    %8 = tpu.matmul %6, %7, %cst_6 {dimension_numbers = #tpu.dot_dimension_numbers<[2], [1], [1], [2], [0, 0, 0, 1, 1, 2], [0], [0]>, precision = #tpu.contract_precision<fp32>} : vector<8x32x16xf32>, vector<8x16x32xf32>, vector<8x32x32xf32> -> vector<8x32x32xf32>
    "tpu.trace_stop"() : () -> ()
    %c0_7 = arith.constant 0 : index
    %c0_8 = arith.constant 0 : index
    %c0_9 = arith.constant 0 : index
    %9 = vector.load %arg3[%c0_7, %c0_8, %c0_9] : memref<8x32x32xf32, #tpu.memory_space<vmem>>, vector<8x32x32xf32>
    tpu.vector_store %arg3[%c0_7, %c0_8, %c0_9], %8 {strides = array<i32>} : memref<8x32x32xf32, #tpu.memory_space<vmem>>, vector<8x32x32xf32>,
    return
  }
}

module attributes {stable_mosaic.version = 11 : i64} {
  func.func @dc_kernel(%arg0: memref<4x2048xf32, #tpu.memory_space<vmem>>, %arg1: memref<9x2048xf32, #tpu.memory_space<vmem>>, %arg2: memref<18x4xf32, #tpu.memory_space<vmem>>, %arg3: memref<2x1xf32, #tpu.memory_space<vmem>>, %arg4: memref<2x1xf32, #tpu.memory_space<vmem>>, %arg5: memref<36x2xf32, #tpu.memory_space<vmem>>, %arg6: memref<4x1xf32, #tpu.memory_space<vmem>>, %arg7: memref<4x1xf32, #tpu.memory_space<vmem>>, %arg8: memref<4x2048xf32, #tpu.memory_space<vmem>>) attributes {dimension_semantics = [], scalar_prefetch = 0 : i64, scratch_operands = 0 : i64, tpu.core_type = #tpu.core_type<tc>} {
    %c0 = arith.constant 0 : index
    %c0_0 = arith.constant 0 : index
    %0 = vector.load %arg1[%c0, %c0_0] : memref<9x2048xf32, #tpu.memory_space<vmem>>, vector<9x2048xf32>
    %c0_1 = arith.constant 0 : index
    %c0_2 = arith.constant 0 : index
    %1 = vector.load %arg0[%c0_1, %c0_2] : memref<4x2048xf32, #tpu.memory_space<vmem>>, vector<4x2048xf32>
    %c0_3 = arith.constant 0 : index
    %c0_4 = arith.constant 0 : index
    %2 = vector.load %arg2[%c0_3, %c0_4] : memref<18x4xf32, #tpu.memory_space<vmem>>, vector<18x4xf32>
    %cst = arith.constant dense<0.000000e+00> : vector<18x2048xf32>
    %3 = tpu.matmul %2, %1, %cst {dimension_numbers = #tpu.dot_dimension_numbers<[1], [0], [0], [1], [0, 0, 1, 1], [], []>, precision = #tpu.contract_precision<fp32>} : vector<18x4xf32>, vector<4x2048xf32>, vector<18x2048xf32> -> vector<18x2048xf32>
    %4 = vector.extract_strided_slice %3 {offsets = [8, 0], sizes = [2, 2048], strides = [1, 1]} : vector<18x2048xf32> to vector<2x2048xf32>
    %5 = vector.extract_strided_slice %3 {offsets = [0, 0], sizes = [2, 2048], strides = [1, 1]} : vector<18x2048xf32> to vector<2x2048xf32>
    %c33_i32 = arith.constant 33 : i32
    %6 = tpu.dynamic_rotate %5 by %c33_i32 dim 1 : vector<2x2048xf32>, i32 -> vector<2x2048xf32>
    %7 = vector.extract_strided_slice %0 {offsets = [0, 0], sizes = [1, 2048], strides = [1, 1]} : vector<9x2048xf32> to vector<1x2048xf32>
    %8 = vector.broadcast %7 : vector<1x2048xf32> to vector<2x2048xf32>
    %9 = arith.mulf %6, %8 : vector<2x2048xf32>
    %10 = arith.addf %4, %9 : vector<2x2048xf32>
    %11 = vector.extract_strided_slice %3 {offsets = [2, 0], sizes = [2, 2048], strides = [1, 1]} : vector<18x2048xf32> to vector<2x2048xf32>
    %c32_i32 = arith.constant 32 : i32
    %12 = tpu.dynamic_rotate %11 by %c32_i32 dim 1 : vector<2x2048xf32>, i32 -> vector<2x2048xf32>
    %13 = vector.extract_strided_slice %0 {offsets = [1, 0], sizes = [1, 2048], strides = [1, 1]} : vector<9x2048xf32> to vector<1x2048xf32>
    %14 = vector.broadcast %13 : vector<1x2048xf32> to vector<2x2048xf32>
    %15 = arith.mulf %12, %14 : vector<2x2048xf32>
    %16 = arith.addf %10, %15 : vector<2x2048xf32>
    %17 = vector.extract_strided_slice %3 {offsets = [4, 0], sizes = [2, 2048], strides = [1, 1]} : vector<18x2048xf32> to vector<2x2048xf32>
    %c31_i32 = arith.constant 31 : i32
    %18 = tpu.dynamic_rotate %17 by %c31_i32 dim 1 : vector<2x2048xf32>, i32 -> vector<2x2048xf32>
    %19 = vector.extract_strided_slice %0 {offsets = [2, 0], sizes = [1, 2048], strides = [1, 1]} : vector<9x2048xf32> to vector<1x2048xf32>
    %20 = vector.broadcast %19 : vector<1x2048xf32> to vector<2x2048xf32>
    %21 = arith.mulf %18, %20 : vector<2x2048xf32>
    %22 = arith.addf %16, %21 : vector<2x2048xf32>
    %23 = vector.extract_strided_slice %3 {offsets = [6, 0], sizes = [2, 2048], strides = [1, 1]} : vector<18x2048xf32> to vector<2x2048xf32>
    %c1_i32 = arith.constant 1 : i32
    %24 = tpu.dynamic_rotate %23 by %c1_i32 dim 1 : vector<2x2048xf32>, i32 -> vector<2x2048xf32>
    %25 = vector.extract_strided_slice %0 {offsets = [3, 0], sizes = [1, 2048], strides = [1, 1]} : vector<9x2048xf32> to vector<1x2048xf32>
    %26 = vector.broadcast %25 : vector<1x2048xf32> to vector<2x2048xf32>
    %27 = arith.mulf %24, %26 : vector<2x2048xf32>
    %28 = arith.addf %22, %27 : vector<2x2048xf32>
    %29 = vector.extract_strided_slice %3 {offsets = [10, 0], sizes = [2, 2048], strides = [1, 1]} : vector<18x2048xf32> to vector<2x2048xf32>
    %c2047_i32 = arith.constant 2047 : i32
    %30 = tpu.dynamic_rotate %29 by %c2047_i32 dim 1 : vector<2x2048xf32>, i32 -> vector<2x2048xf32>
    %31 = vector.extract_strided_slice %0 {offsets = [5, 0], sizes = [1, 2048], strides = [1, 1]} : vector<9x2048xf32> to vector<1x2048xf32>
    %32 = vector.broadcast %31 : vector<1x2048xf32> to vector<2x2048xf32>
    %33 = arith.mulf %30, %32 : vector<2x2048xf32>
    %34 = arith.addf %28, %33 : vector<2x2048xf32>
    %35 = vector.extract_strided_slice %3 {offsets = [12, 0], sizes = [2, 2048], strides = [1, 1]} : vector<18x2048xf32> to vector<2x2048xf32>
    %c2017_i32 = arith.constant 2017 : i32
    %36 = tpu.dynamic_rotate %35 by %c2017_i32 dim 1 : vector<2x2048xf32>, i32 -> vector<2x2048xf32>
    %37 = vector.extract_strided_slice %0 {offsets = [6, 0], sizes = [1, 2048], strides = [1, 1]} : vector<9x2048xf32> to vector<1x2048xf32>
    %38 = vector.broadcast %37 : vector<1x2048xf32> to vector<2x2048xf32>
    %39 = arith.mulf %36, %38 : vector<2x2048xf32>
    %40 = arith.addf %34, %39 : vector<2x2048xf32>
    %41 = vector.extract_strided_slice %3 {offsets = [14, 0], sizes = [2, 2048], strides = [1, 1]} : vector<18x2048xf32> to vector<2x2048xf32>
    %c2016_i32 = arith.constant 2016 : i32
    %42 = tpu.dynamic_rotate %41 by %c2016_i32 dim 1 : vector<2x2048xf32>, i32 -> vector<2x2048xf32>
    %43 = vector.extract_strided_slice %0 {offsets = [7, 0], sizes = [1, 2048], strides = [1, 1]} : vector<9x2048xf32> to vector<1x2048xf32>
    %44 = vector.broadcast %43 : vector<1x2048xf32> to vector<2x2048xf32>
    %45 = arith.mulf %42, %44 : vector<2x2048xf32>
    %46 = arith.addf %40, %45 : vector<2x2048xf32>
    %47 = vector.extract_strided_slice %3 {offsets = [16, 0], sizes = [2, 2048], strides = [1, 1]} : vector<18x2048xf32> to vector<2x2048xf32>
    %c2015_i32 = arith.constant 2015 : i32
    %48 = tpu.dynamic_rotate %47 by %c2015_i32 dim 1 : vector<2x2048xf32>, i32 -> vector<2x2048xf32>
    %49 = vector.extract_strided_slice %0 {offsets = [8, 0], sizes = [1, 2048], strides = [1, 1]} : vector<9x2048xf32> to vector<1x2048xf32>
    %50 = vector.broadcast %49 : vector<1x2048xf32> to vector<2x2048xf32>
    %51 = arith.mulf %48, %50 : vector<2x2048xf32>
    %52 = arith.addf %46, %51 : vector<2x2048xf32>
    %c0_5 = arith.constant 0 : index
    %c0_6 = arith.constant 0 : index
    %53 = vector.load %arg3[%c0_5, %c0_6] : memref<2x1xf32, #tpu.memory_space<vmem>>, vector<2x1xf32>
    %c0_7 = arith.constant 0 : index
    %c0_8 = arith.constant 0 : index
    %54 = vector.load %arg4[%c0_7, %c0_8] : memref<2x1xf32, #tpu.memory_space<vmem>>, vector<2x1xf32>
    %cst_9 = arith.constant dense<0.000000e+00> : vector<2xf32>
    %55 = vector.multi_reduction <add>, %52, %cst_9 [1] : vector<2x2048xf32> to vector<2xf32>
    %56 = vector.shape_cast %55 : vector<2xf32> to vector<2x1xf32>
    %cst_10 = arith.constant 4.8828125E-4 : f32
    %57 = vector.broadcast %cst_10 : f32 to vector<2x1xf32>
    %58 = arith.mulf %56, %57 : vector<2x1xf32>
    %59 = vector.broadcast %58 : vector<2x1xf32> to vector<2x2048xf32>
    %60 = arith.subf %52, %59 : vector<2x2048xf32>
    %61 = arith.mulf %60, %60 : vector<2x2048xf32>
    %cst_11 = arith.constant dense<0.000000e+00> : vector<2xf32>
    %62 = vector.multi_reduction <add>, %61, %cst_11 [1] : vector<2x2048xf32> to vector<2xf32>
    %63 = vector.shape_cast %62 : vector<2xf32> to vector<2x1xf32>
    %cst_12 = arith.constant 4.8828125E-4 : f32
    %64 = vector.broadcast %cst_12 : f32 to vector<2x1xf32>
    %65 = arith.mulf %63, %64 : vector<2x1xf32>
    %cst_13 = arith.constant 9.99999974E-6 : f32
    %66 = vector.broadcast %cst_13 : f32 to vector<2x1xf32>
    %67 = arith.addf %65, %66 : vector<2x1xf32>
    %68 = math.rsqrt %67 : vector<2x1xf32>
    %69 = arith.mulf %68, %53 : vector<2x1xf32>
    %70 = vector.broadcast %69 : vector<2x1xf32> to vector<2x2048xf32>
    %71 = arith.mulf %60, %70 : vector<2x2048xf32>
    %72 = vector.broadcast %54 : vector<2x1xf32> to vector<2x2048xf32>
    %73 = arith.addf %71, %72 : vector<2x2048xf32>
    %cst_14 = arith.constant 0.000000e+00 : f32
    %74 = vector.broadcast %cst_14 : f32 to vector<2x2048xf32>
    %75 = arith.maximumf %73, %74 : vector<2x2048xf32>
    %c0_15 = arith.constant 0 : index
    %c0_16 = arith.constant 0 : index
    %76 = vector.load %arg5[%c0_15, %c0_16] : memref<36x2xf32, #tpu.memory_space<vmem>>, vector<36x2xf32>
    %cst_17 = arith.constant dense<0.000000e+00> : vector<36x2048xf32>
    %77 = tpu.matmul %76, %75, %cst_17 {dimension_numbers = #tpu.dot_dimension_numbers<[1], [0], [0], [1], [0, 0, 1, 1], [], []>, precision = #tpu.contract_precision<fp32>} : vector<36x2xf32>, vector<2x2048xf32>, vector<36x2048xf32> -> vector<36x2048xf32>
    %78 = vector.extract_strided_slice %77 {offsets = [16, 0], sizes = [4, 2048], strides = [1, 1]} : vector<36x2048xf32> to vector<4x2048xf32>
    %79 = vector.extract_strided_slice %77 {offsets = [0, 0], sizes = [4, 2048], strides = [1, 1]} : vector<36x2048xf32> to vector<4x2048xf32>
    %c33_i32_18 = arith.constant 33 : i32
    %80 = tpu.dynamic_rotate %79 by %c33_i32_18 dim 1 : vector<4x2048xf32>, i32 -> vector<4x2048xf32>
    %81 = vector.extract_strided_slice %0 {offsets = [0, 0], sizes = [1, 2048], strides = [1, 1]} : vector<9x2048xf32> to vector<1x2048xf32>
    %82 = vector.broadcast %81 : vector<1x2048xf32> to vector<4x2048xf32>
    %83 = arith.mulf %80, %82 : vector<4x2048xf32>
    %84 = arith.addf %78, %83 : vector<4x2048xf32>
    %85 = vector.extract_strided_slice %77 {offsets = [4, 0], sizes = [4, 2048], strides = [1, 1]} : vector<36x2048xf32> to vector<4x2048xf32>
    %c32_i32_19 = arith.constant 32 : i32
    %86 = tpu.dynamic_rotate %85 by %c32_i32_19 dim 1 : vector<4x2048xf32>, i32 -> vector<4x2048xf32>
    %87 = vector.extract_strided_slice %0 {offsets = [1, 0], sizes = [1, 2048], strides = [1, 1]} : vector<9x2048xf32> to vector<1x2048xf32>
    %88 = vector.broadcast %87 : vector<1x2048xf32> to vector<4x2048xf32>
    %89 = arith.mulf %86, %88 : vector<4x2048xf32>
    %90 = arith.addf %84, %89 : vector<4x2048xf32>
    %91 = vector.extract_strided_slice %77 {offsets = [8, 0], sizes = [4, 2048], strides = [1, 1]} : vector<36x2048xf32> to vector<4x2048xf32>
    %c31_i32_20 = arith.constant 31 : i32
    %92 = tpu.dynamic_rotate %91 by %c31_i32_20 dim 1 : vector<4x2048xf32>, i32 -> vector<4x2048xf32>
    %93 = vector.extract_strided_slice %0 {offsets = [2, 0], sizes = [1, 2048], strides = [1, 1]} : vector<9x2048xf32> to vector<1x2048xf32>
    %94 = vector.broadcast %93 : vector<1x2048xf32> to vector<4x2048xf32>
    %95 = arith.mulf %92, %94 : vector<4x2048xf32>
    %96 = arith.addf %90, %95 : vector<4x2048xf32>
    %97 = vector.extract_strided_slice %77 {offsets = [12, 0], sizes = [4, 2048], strides = [1, 1]} : vector<36x2048xf32> to vector<4x2048xf32>
    %c1_i32_21 = arith.constant 1 : i32
    %98 = tpu.dynamic_rotate %97 by %c1_i32_21 dim 1 : vector<4x2048xf32>, i32 -> vector<4x2048xf32>
    %99 = vector.extract_strided_slice %0 {offsets = [3, 0], sizes = [1, 2048], strides = [1, 1]} : vector<9x2048xf32> to vector<1x2048xf32>
    %100 = vector.broadcast %99 : vector<1x2048xf32> to vector<4x2048xf32>
    %101 = arith.mulf %98, %100 : vector<4x2048xf32>
    %102 = arith.addf %96, %101 : vector<4x2048xf32>
    %103 = vector.extract_strided_slice %77 {offsets = [20, 0], sizes = [4, 2048], strides = [1, 1]} : vector<36x2048xf32> to vector<4x2048xf32>
    %c2047_i32_22 = arith.constant 2047 : i32
    %104 = tpu.dynamic_rotate %103 by %c2047_i32_22 dim 1 : vector<4x2048xf32>, i32 -> vector<4x2048xf32>
    %105 = vector.extract_strided_slice %0 {offsets = [5, 0], sizes = [1, 2048], strides = [1, 1]} : vector<9x2048xf32> to vector<1x2048xf32>
    %106 = vector.broadcast %105 : vector<1x2048xf32> to vector<4x2048xf32>
    %107 = arith.mulf %104, %106 : vector<4x2048xf32>
    %108 = arith.addf %102, %107 : vector<4x2048xf32>
    %109 = vector.extract_strided_slice %77 {offsets = [24, 0], sizes = [4, 2048], strides = [1, 1]} : vector<36x2048xf32> to vector<4x2048xf32>
    %c2017_i32_23 = arith.constant 2017 : i32
    %110 = tpu.dynamic_rotate %109 by %c2017_i32_23 dim 1 : vector<4x2048xf32>, i32 -> vector<4x2048xf32>
    %111 = vector.extract_strided_slice %0 {offsets = [6, 0], sizes = [1, 2048], strides = [1, 1]} : vector<9x2048xf32> to vector<1x2048xf32>
    %112 = vector.broadcast %111 : vector<1x2048xf32> to vector<4x2048xf32>
    %113 = arith.mulf %110, %112 : vector<4x2048xf32>
    %114 = arith.addf %108, %113 : vector<4x2048xf32>
    %115 = vector.extract_strided_slice %77 {offsets = [28, 0], sizes = [4, 2048], strides = [1, 1]} : vector<36x2048xf32> to vector<4x2048xf32>
    %c2016_i32_24 = arith.constant 2016 : i32
    %116 = tpu.dynamic_rotate %115 by %c2016_i32_24 dim 1 : vector<4x2048xf32>, i32 -> vector<4x2048xf32>
    %117 = vector.extract_strided_slice %0 {offsets = [7, 0], sizes = [1, 2048], strides = [1, 1]} : vector<9x2048xf32> to vector<1x2048xf32>
    %118 = vector.broadcast %117 : vector<1x2048xf32> to vector<4x2048xf32>
    %119 = arith.mulf %116, %118 : vector<4x2048xf32>
    %120 = arith.addf %114, %119 : vector<4x2048xf32>
    %121 = vector.extract_strided_slice %77 {offsets = [32, 0], sizes = [4, 2048], strides = [1, 1]} : vector<36x2048xf32> to vector<4x2048xf32>
    %c2015_i32_25 = arith.constant 2015 : i32
    %122 = tpu.dynamic_rotate %121 by %c2015_i32_25 dim 1 : vector<4x2048xf32>, i32 -> vector<4x2048xf32>
    %123 = vector.extract_strided_slice %0 {offsets = [8, 0], sizes = [1, 2048], strides = [1, 1]} : vector<9x2048xf32> to vector<1x2048xf32>
    %124 = vector.broadcast %123 : vector<1x2048xf32> to vector<4x2048xf32>
    %125 = arith.mulf %122, %124 : vector<4x2048xf32>
    %126 = arith.addf %120, %125 : vector<4x2048xf32>
    %c0_26 = arith.constant 0 : index
    %c0_27 = arith.constant 0 : index
    %127 = vector.load %arg6[%c0_26, %c0_27] : memref<4x1xf32, #tpu.memory_space<vmem>>, vector<4x1xf32>
    %c0_28 = arith.constant 0 : index
    %c0_29 = arith.constant 0 : index
    %128 = vector.load %arg7[%c0_28, %c0_29] : memref<4x1xf32, #tpu.memory_space<vmem>>, vector<4x1xf32>
    %cst_30 = arith.constant dense<0.000000e+00> : vector<4xf32>
    %129 = vector.multi_reduction <add>, %126, %cst_30 [1] : vector<4x2048xf32> to vector<4xf32>
    %130 = vector.shape_cast %129 : vector<4xf32> to vector<4x1xf32>
    %cst_31 = arith.constant 4.8828125E-4 : f32
    %131 = vector.broadcast %cst_31 : f32 to vector<4x1xf32>
    %132 = arith.mulf %130, %131 : vector<4x1xf32>
    %133 = vector.broadcast %132 : vector<4x1xf32> to vector<4x2048xf32>
    %134 = arith.subf %126, %133 : vector<4x2048xf32>
    %135 = arith.mulf %134, %134 : vector<4x2048xf32>
    %cst_32 = arith.constant dense<0.000000e+00> : vector<4xf32>
    %136 = vector.multi_reduction <add>, %135, %cst_32 [1] : vector<4x2048xf32> to vector<4xf32>
    %137 = vector.shape_cast %136 : vector<4xf32> to vector<4x1xf32>
    %cst_33 = arith.constant 4.8828125E-4 : f32
    %138 = vector.broadcast %cst_33 : f32 to vector<4x1xf32>
    %139 = arith.mulf %137, %138 : vector<4x1xf32>
    %cst_34 = arith.constant 9.99999974E-6 : f32
    %140 = vector.broadcast %cst_34 : f32 to vector<4x1xf32>
    %141 = arith.addf %139, %140 : vector<4x1xf32>
    %142 = math.rsqrt %141 : vector<4x1xf32>
    %143 = arith.mulf %142, %127 : vector<4x1xf32>
    %144 = vector.broadcast %143 : vector<4x1xf32> to vector<4x2048xf32>
    %145 = arith.mulf %134, %144 : vector<4x2048xf32>
    %146 = vector.broadcast %128 : vector<4x1xf32> to vector<4x2048xf32>
    %147 = arith.addf %145, %146 : vector<4x2048xf32>
    %cst_35 = arith.constant 0.000000e+00 : f32
    %148 = vector.broadcast %cst_35 : f32 to vector<4x2048xf32>
    %149 = arith.maximumf %147, %148 : vector<4x2048xf32>
    %c0_36 = arith.constant 0 : index
    %c0_37 = arith.constant 0 : index
    %150 = vector.load %arg8[%c0_36, %c0_37] : memref<4x2048xf32, #tpu.memory_space<vmem>>, vector<4x2048xf32>
    tpu.vector_store %arg8[%c0_36, %c0_37], %149 {strides = array<i32>} : memref<4x2048xf32, #tpu.memory_space<vmem>>, vector<4x2048xf32>,
    return
  }
}

</mosaic_0001>

<bundles_post_ra>
// kernel: forward.2
= control target key start
LH: loop header
LB: loop body
LE: loop exit
PB: predicated region body
PF: predicated region fallthrough
CT: control target
= control target key end

     0   :  { %vm36_vm0 = vcmask 130048   ;;  %vm3633_vm1 = vcmask 261120   ;;  %s4607_s1 = inlined_call_operand.vmem [shape: f32[16,32], index: 1, kind: input, shape index: {}]   ;;  %s4608_s0 = inlined_call_operand.vmem [shape: f32[8,16,16], index: 0, kind: input, shape index: {}]   ;;  %s4609_s2 = inlined_call_operand.vmem [shape: f32[32,16], index: 2, kind: input, shape index: {}]   ;;  %s4610_s3 = inlined_call_operand.vmem [shape: f32[8,32,32], index: 3, kind: output, shape index: {}]  }
   0x1   :  { %v31_v0 = vld [vmem:[%s4607_s1 + $0x8] sm:$0xff]  ;;  %v30_v1 = vld [vmem:[%s4607_s1] sm:$0xff]  ;;  %v16_v7 = vld [vmem:[%s4608_s0 + $0x10] sm:$0xff] }
   0x2   :  { %v14_v2 = vld [vmem:[%s4608_s0] sm:$0xff]  ;;  %v3699_v3 = vand.u32 4294901760, %v31_v0  ;;  %v3701_v4 = vand.u32 4294901760, %v30_v1  ;;  %v15_v6 = vld [vmem:[%s4608_s0 + $0x8] sm:$0xff]  ;;  %v234_v10 = vsel %vm36_vm0, %v16_v7, 0  ;;  %v17_v20 = vld [vmem:[%s4608_s0 + $0x18] sm:$0xff] }
   0x3   :  { %v38_v5 = vsel %vm36_vm0, %v14_v2, 0  ;;  %v41_v9 = vsel %vm36_vm0, %v15_v6, 0  ;;  %v3725_v15 = vand.u32 4294901760, %v234_v10  ;;  %v237_v28 = vsel %vm36_vm0, %v17_v20, 0  ;;  %v18_v40 = vld [vmem:[%s4608_s0 + $0x20] sm:$0xff]  ;;  %v19_v43 = vld [vmem:[%s4608_s0 + $0x28] sm:$0xff] }
   0x4   :  { %v3710_v8 = vand.u32 4294901760, %v38_v5  ;;  %v3715_v11 = vsub.f32 %v31_v0, %v3699_v3  ;;  %159 = vmatpush.msra.mxu3 %v3699_v3  ;;  %v3719_v12 = vsub.f32 %v30_v1, %v3701_v4  ;;  %58 = vmatpush.msra.mxu0 %v3699_v3  ;;  %v3722_v13 = vand.u32 4294901760, %v41_v9  ;;  %v20_v46 = vld [vmem:[%s4608_s0 + $0x30] sm:$0xff]  ;;  %v21_v53 = vld [vmem:[%s4608_s0 + $0x38] sm:$0xff]  ;;  %v22_v6 = vld [vmem:[%s4608_s0 + $0x40] sm:$0xff] }
   0x5   :  { %v3747_v25 = vsub.f32 %v234_v10, %v3725_v15  ;;  %v265_v32 = vand.u32 4294901760, %v237_v28  ;;  %v430_v41 = vsel %vm36_vm0, %v18_v40, 0  ;;  %v433_v45 = vsel %vm36_vm0, %v19_v43, 0  ;;  %v26_v40 = vld [vmem:[%s4608_s0 + $0x60] sm:$0xff] }
   0x6   :  { %v62_v14 = vsub.f32 %v38_v5, %v3710_v8  ;;  %129 = vmatpush.msra.mxu2 %v3715_v11  ;;  %161 = vmatpush.msra.mxu3 %v3701_v4  ;;  %v3730_v16 = vand.u32 4294901760, %v3715_v11  ;;  %v3733_v17 = vand.u32 4294901760, %v3719_v12  ;;  %v70_v18 = vsub.f32 %v41_v9, %v3722_v13  ;;  %v23_v9 = vld [vmem:[%s4608_s0 + $0x48] sm:$0xff] }
   0x7   :  { %60 = vmatpush.msra.mxu0 %v3701_v4  ;;  %v259_v31 = vand.u32 4294901760, %v3747_v25  ;;  %v266_v35 = vsub.f32 %v237_v28, %v265_v32  ;;  %v3794_v42 = vand.u32 4294901760, %v430_v41  ;;  %v461_v48 = vand.u32 4294901760, %v433_v45 }
   0x8   :  { %v63_v19 = vand.u32 4294901760, %v62_v14  ;;  %132 = vmatpush.msra.mxu2 %v3719_v12  ;;  %v95_v21 = vsub.f32 %v3715_v11, %v3730_v16  ;;  %v101_v22 = vsub.f32 %v3719_v12, %v3733_v17  ;;  %v71_v24 = vand.u32 4294901760, %v70_v18 }
   0x9   :  { %192 = vmatpush.msrb.mxu0 %v3730_v16  ;;  %135 = vmatmul.f32.vlgmr.msra.gmra.mxu2 %v62_v14  ;;  %v260_v34 = vsub.f32 %v3747_v25, %v259_v31  ;;  %v267_v37 = vand.u32 4294901760, %v266_v35  ;;  %v454_v44 = vsub.f32 %v430_v41, %v3794_v42  ;;  %v626_v49 = vsel %vm36_vm0, %v20_v46, 0 }
   0xa   :  { %165 = vmatmul.f32.vlgmr.msra.gmra.mxu3 %v63_v19  ;;  %v64_v23 = vsub.f32 %v62_v14, %v63_v19  ;;  %254 = vmatpush.msrb.mxu2 %v3699_v3  ;;  %v3750_v26 = vand.u32 4294901760, %v95_v21  ;;  %v3752_v27 = vand.u32 4294901760, %v101_v22  ;;  %v72_v30 = vsub.f32 %v70_v18, %v71_v24  ;;  %v24_v14 = vld [vmem:[%s4608_s0 + $0x50] sm:$0xff] }
   0xb   :  { %196 = vmatpush.msrb.mxu0 %v3733_v17  ;;  %v261_v36 = vand.u32 4294901760, %v260_v34  ;;  %v268_v38 = vsub.f32 %v266_v35, %v267_v37  ;;  %v455_v47 = vand.u32 4294901760, %v454_v44  ;;  %v462_v51 = vsub.f32 %v433_v45, %v461_v48 }
   0xc   :  { %v65_v29 = vand.u32 4294901760, %v64_v23  ;;  %97 = vmatpush.msra.mxu1 %v3750_v26  ;;  %293 = vmatpush.msrb.mxu3 %v3750_v26  ;;  %v73_v33 = vand.u32 4294901760, %v72_v30  ;;  %v649_v52 = vand.u32 4294901760, %v626_v49  ;;  %v629_v57 = vsel %vm36_vm0, %v21_v53, 0  ;;  %v25_v23 = vld [vmem:[%s4608_s0 + $0x58] sm:$0xff] }
   0xd   :  { %256 = vmatpush.msrb.mxu2 %v3701_v4  ;;  %v269_v39 = vand.u32 4294901760, %v268_v38  ;;  %v456_v50 = vsub.f32 %v454_v44, %v455_v47  ;;  %v463_v55 = vand.u32 4294901760, %v462_v51  ;;  %v657_v60 = vand.u32 4294901760, %v629_v57 }
   0xe   :  { %66 = vmatmul.f32.vlgmr.msra.gmra.mxu0 %v65_v29  ;;  %103 = vmatpush.msra.mxu1 %v3752_v27  ;;  %v650_v56 = vsub.f32 %v626_v49, %v649_v52  ;;  %v822_v7 = vsel %vm36_vm0, %v22_v6, 0  ;;  %v1018_v19 = vsel %vm36_vm0, %v24_v14, 0  ;;  %v1021_v29 = vsel %vm36_vm0, %v25_v23, 0 }
   0xf   :  { %299 = vmatpush.msrb.mxu3 %v3752_v27  ;;  %105 = vmatmul.f32.vlgmr.msra.gmra.mxu1 %v3710_v8  ;;  %v457_v54 = vand.u32 4294901760, %v456_v50  ;;  %v464_v58 = vsub.f32 %v462_v51, %v463_v55  ;;  %v658_v63 = vsub.f32 %v629_v57, %v657_v60  ;;  %v1041_v22 = vand.u32 4294901760, %v1018_v19 }
  0x10   :  { %388 = vmatpush.msra.mxu2 %v3730_v16  ;;  %221 = vmatpush.msrb.mxu1 %v3699_v3  ;;  %v651_v59 = vand.u32 4294901760, %v650_v56  ;;  %v1214_v41 = vsel %vm36_vm0, %v26_v40, 0 }
  0x11   :  { %325 = vmatpush.msra.mxu0 %v3715_v11  ;;  %140 = vmatmul.f32.gmra.mxu2 %v70_v18  ;;  %v465_v61 = vand.u32 4294901760, %v464_v58  ;;  %v659_v1 = vand.u32 4294901760, %v658_v63  ;;  %v1042_v28 = vsub.f32 %v1018_v19, %v1041_v22 }
  0x12   :  { %171 = vmatmul.f32.gmra.mxu3 %v71_v24  ;;  %223 = vmatpush.msrb.mxu1 %v3701_v4  ;;  %v652_v62 = vsub.f32 %v650_v56, %v651_v59 }
  0x13   :  { %417 = vmatpush.msra.mxu3 %v3699_v3  ;;  %392 = vmatpush.msra.mxu2 %v3733_v17  ;;  %v660_v2 = vsub.f32 %v658_v63, %v659_v1 }
  0x14   :  { %355 = vmatpush.msra.mxu1 %v3699_v3  ;;  %328 = vmatpush.msra.mxu0 %v3719_v12  ;;  %v653_v0 = vand.u32 4294901760, %v652_v62 }
  0x15   :  { %419 = vmatpush.msra.mxu3 %v3701_v4  ;;  %v661_v5 = vand.u32 4294901760, %v660_v2 }
  0x16   :  { %74 = vmatmul.f32.gmra.mxu0 %v73_v33  ;;  %357 = vmatpush.msra.mxu1 %v3701_v4 }
  0x17   :  { %109 = vmatmul.f32.gmra.mxu1 %v3722_v13 }
  0x19   :  { %262 = vmatmul.f32.vlgmr.msrb.gmra.mxu2 %v261_v36 }
  0x1a   :  { %301 = vmatmul.f32.vlgmr.msrb.gmra.mxu3 %v3725_v15  ;;  %521 = vmatpush.msrb.mxu2 %v3715_v11 }
  0x1b   :  { %551 = vmatpush.msrb.mxu3 %v3699_v3 }
  0x1c   :  { %524 = vmatpush.msrb.mxu2 %v3719_v12 }
  0x1d   :  { %553 = vmatpush.msrb.mxu3 %v3701_v4 }
  0x1e   :  { %198 = vmatmul.f32.vlgmr.msrb.gmra.mxu0 %v3710_v8 }
  0x1f   :  { %450 = vmatpush.msrb.mxu0 %v3699_v3  ;;  %225 = vmatmul.f32.vlgmr.msrb.gmra.mxu1 %v3710_v8  ;;  %v3841_v8 = vand.u32 4294901760, %v822_v7 }
  0x20   :  { %489 = vmatpush.msrb.mxu1 %v3750_v26 }
  0x21   :  { %452 = vmatpush.msrb.mxu0 %v3701_v4  ;;  %270 = vmatmul.f32.gmra.mxu2 %v269_v39  ;;  %v846_v10 = vsub.f32 %v822_v7, %v3841_v8 }
  0x22   :  { %305 = vmatmul.f32.gmra.mxu3 %v265_v32  ;;  %495 = vmatpush.msrb.mxu1 %v3752_v27 }
  0x26   :  { %202 = vmatmul.f32.gmra.mxu0 %v3722_v13 }
  0x27   :  { %229 = vmatmul.f32.gmra.mxu1 %v3722_v13  ;;  %v825_v13 = vsel %vm36_vm0, %v23_v9, 0 }
  0x28   :  { %v853_v18 = vand.u32 4294901760, %v825_v13 }
  0x29   :  { %394 = vmatmul.f32.vlgmr.msra.gmra.mxu2 %v3725_v15 }
  0x2a   :  { %421 = vmatmul.f32.vlgmr.msra.gmra.mxu3 %v3725_v15  ;;  %646 = vmatpush.msra.mxu2 %v3699_v3  ;;  %v847_v15 = vand.u32 4294901760, %v846_v10  ;;  %v854_v21 = vsub.f32 %v825_v13, %v853_v18 }
  0x2b   :  { %685 = vmatpush.msra.mxu3 %v3750_v26 }
  0x2c   :  { %648 = vmatpush.msra.mxu2 %v3701_v4  ;;  %v848_v20 = vsub.f32 %v846_v10, %v847_v15 }
  0x2d   :  { %691 = vmatpush.msra.mxu3 %v3752_v27 }
  0x2e   :  { %331 = vmatmul.f32.vlgmr.msra.gmra.mxu0 %v3747_v25  ;;  %v849_v24 = vand.u32 4294901760, %v848_v20  ;;  %v855_v25 = vand.u32 4294901760, %v854_v21 }
  0x2f   :  { %584 = vmatpush.msra.mxu0 %v3730_v16  ;;  %361 = vmatmul.f32.vlgmr.msra.gmra.mxu1 %v259_v31  ;;  %v1043_v31 = vand.u32 4294901760, %v1042_v28 }
  0x30   :  { %613 = vmatpush.msra.mxu1 %v3699_v3  ;;  %v856_v30 = vsub.f32 %v854_v21, %v855_v25 }
  0x31   :  { %588 = vmatpush.msra.mxu0 %v3733_v17  ;;  %398 = vmatmul.f32.gmra.mxu2 %v265_v32  ;;  %v1044_v34 = vsub.f32 %v1042_v28, %v1043_v31 }
  0x32   :  { %425 = vmatmul.f32.gmra.mxu3 %v265_v32  ;;  %615 = vmatpush.msra.mxu1 %v3701_v4  ;;  %v1049_v32 = vand.u32 4294901760, %v1021_v29  ;;  %v857_v33 = vand.u32 4294901760, %v856_v30 }
  0x33   :  { %v1045_v36 = vand.u32 4294901760, %v1044_v34 }
  0x36   :  { %336 = vmatmul.f32.gmra.mxu0 %v266_v35  ;;  %v1050_v35 = vsub.f32 %v1021_v29, %v1049_v32 }
  0x37   :  { %367 = vmatmul.f32.gmra.mxu1 %v267_v37 }
  0x38   :  { %v1051_v37 = vand.u32 4294901760, %v1050_v35 }
  0x39   :  { %527 = vmatmul.f32.vlgmr.msrb.gmra.mxu2 %v454_v44  ;;  %v27_v44 = vld [vmem:[%s4608_s0 + $0x68] sm:$0xff] }
  0x3a   :  { %557 = vmatmul.f32.vlgmr.msrb.gmra.mxu3 %v455_v47  ;;  %780 = vmatpush.msrb.mxu2 %v3730_v16  ;;  %v1052_v38 = vsub.f32 %v1050_v35, %v1051_v37  ;;  %v1217_v49 = vsel %vm36_vm0, %v27_v44, 0 }
  0x3b   :  { %809 = vmatpush.msrb.mxu3 %v3699_v3 }
  0x3c   :  { %784 = vmatpush.msrb.mxu2 %v3733_v17  ;;  %v1053_v39 = vand.u32 4294901760, %v1052_v38 }
  0x3d   :  { %811 = vmatpush.msrb.mxu3 %v3701_v4 }
  0x3e   :  { %458 = vmatmul.f32.vlgmr.msrb.gmra.mxu0 %v457_v54 }
  0x3f   :  { %717 = vmatpush.msrb.mxu0 %v3715_v11  ;;  %497 = vmatmul.f32.vlgmr.msrb.gmra.mxu1 %v3794_v42 }
  0x40   :  { %747 = vmatpush.msrb.mxu1 %v3699_v3 }
  0x41   :  { %720 = vmatpush.msrb.mxu0 %v3719_v12  ;;  %532 = vmatmul.f32.gmra.mxu2 %v462_v51 }
  0x42   :  { %563 = vmatmul.f32.gmra.mxu3 %v463_v55  ;;  %749 = vmatpush.msrb.mxu1 %v3701_v4 }
  0x46   :  { %466 = vmatmul.f32.gmra.mxu0 %v465_v61  ;;  %v29_v61 = vld [vmem:[%s4608_s0 + $0x78] sm:$0xff] }
  0x47   :  { %501 = vmatmul.f32.gmra.mxu1 %v461_v48  ;;  %v1413_v6 = vsel %vm36_vm0, %v29_v61, 0 }
  0x49   :  { %654 = vmatmul.f32.vlgmr.msra.gmra.mxu2 %v653_v0 }
  0x4a   :  { %693 = vmatmul.f32.vlgmr.msra.gmra.mxu3 %v649_v52  ;;  %913 = vmatpush.msra.mxu2 %v3715_v11 }
  0x4b   :  { %943 = vmatpush.msra.mxu3 %v3699_v3 }
  0x4c   :  { %916 = vmatpush.msra.mxu2 %v3719_v12 }
  0x4d   :  { %945 = vmatpush.msra.mxu3 %v3701_v4 }
  0x4e   :  { %590 = vmatmul.f32.vlgmr.msra.gmra.mxu0 %v3794_v42 }
  0x4f   :  { %842 = vmatpush.msra.mxu0 %v3699_v3  ;;  %617 = vmatmul.f32.vlgmr.msra.gmra.mxu1 %v3794_v42  ;;  %v3887_v42 = vand.u32 4294901760, %v1214_v41 }
  0x50   :  { %881 = vmatpush.msra.mxu1 %v3750_v26 }
  0x51   :  { %844 = vmatpush.msra.mxu0 %v3701_v4  ;;  %662 = vmatmul.f32.gmra.mxu2 %v661_v5  ;;  %v1238_v47 = vsub.f32 %v1214_v41, %v3887_v42 }
  0x52   :  { %697 = vmatmul.f32.gmra.mxu3 %v657_v60  ;;  %887 = vmatpush.msra.mxu1 %v3752_v27 }
  0x53   :  { %v1239_v50 = vand.u32 4294901760, %v1238_v47 }
  0x56   :  { %594 = vmatmul.f32.gmra.mxu0 %v461_v48 }
  0x57   :  { %621 = vmatmul.f32.gmra.mxu1 %v461_v48 }
  0x59   :  { %786 = vmatmul.f32.vlgmr.msrb.gmra.mxu2 %v649_v52 }
  0x5a   :  { %813 = vmatmul.f32.vlgmr.msrb.gmra.mxu3 %v649_v52  ;;  %1038 = vmatpush.msrb.mxu2 %v3699_v3 }
  0x5b   :  { %1077 = vmatpush.msrb.mxu3 %v3750_v26 }
  0x5c   :  { %1040 = vmatpush.msrb.mxu2 %v3701_v4 }
  0x5d   :  { %1083 = vmatpush.msrb.mxu3 %v3752_v27 }
  0x5e   :  { %723 = vmatmul.f32.vlgmr.msrb.gmra.mxu0 %v650_v56  ;;  %v1240_v56 = vsub.f32 %v1238_v47, %v1239_v50 }
  0x5f   :  { %976 = vmatpush.msrb.mxu0 %v3730_v16  ;;  %753 = vmatmul.f32.vlgmr.msrb.gmra.mxu1 %v651_v59 }
  0x60   :  { %1005 = vmatpush.msrb.mxu1 %v3699_v3  ;;  %v1241_v62 = vand.u32 4294901760, %v1240_v56 }
  0x61   :  { %980 = vmatpush.msrb.mxu0 %v3733_v17  ;;  %790 = vmatmul.f32.gmra.mxu2 %v657_v60 }
  0x62   :  { %817 = vmatmul.f32.gmra.mxu3 %v657_v60  ;;  %1007 = vmatpush.msrb.mxu1 %v3701_v4 }
  0x66   :  { %728 = vmatmul.f32.gmra.mxu0 %v658_v63 }
  0x67   :  { %759 = vmatmul.f32.gmra.mxu1 %v659_v1 }
  0x69   :  { %919 = vmatmul.f32.vlgmr.msra.gmra.mxu2 %v846_v10 }
  0x6a   :  { %949 = vmatmul.f32.vlgmr.msra.gmra.mxu3 %v847_v15  ;;  %1172 = vmatpush.msra.mxu2 %v3730_v16 }
  0x6b   :  { %1201 = vmatpush.msra.mxu3 %v3699_v3 }
  0x6c   :  { %1176 = vmatpush.msra.mxu2 %v3733_v17 }
  0x6d   :  { %1203 = vmatpush.msra.mxu3 %v3701_v4 }
  0x6e   :  { %850 = vmatmul.f32.vlgmr.msra.gmra.mxu0 %v849_v24 }
  0x6f   :  { %1109 = vmatpush.msra.mxu0 %v3715_v11  ;;  %889 = vmatmul.f32.vlgmr.msra.gmra.mxu1 %v3841_v8 }
  0x70   :  { %1139 = vmatpush.msra.mxu1 %v3699_v3 }
  0x71   :  { %1112 = vmatpush.msra.mxu0 %v3719_v12  ;;  %924 = vmatmul.f32.gmra.mxu2 %v854_v21 }
  0x72   :  { %955 = vmatmul.f32.gmra.mxu3 %v855_v25  ;;  %1141 = vmatpush.msra.mxu1 %v3701_v4 }
  0x76   :  { %858 = vmatmul.f32.gmra.mxu0 %v857_v33 }
  0x77   :  { %893 = vmatmul.f32.gmra.mxu1 %v853_v18 }
  0x79   :  { %1046 = vmatmul.f32.vlgmr.msrb.gmra.mxu2 %v1045_v36 }
  0x7a   :  { %1085 = vmatmul.f32.vlgmr.msrb.gmra.mxu3 %v1041_v22  ;;  %1305 = vmatpush.msrb.mxu2 %v3715_v11 }
  0x7b   :  { %1335 = vmatpush.msrb.mxu3 %v3699_v3 }
  0x7c   :  { %1308 = vmatpush.msrb.mxu2 %v3719_v12 }
  0x7d   :  { %1337 = vmatpush.msrb.mxu3 %v3701_v4 }
  0x7e   :  { %982 = vmatmul.f32.vlgmr.msrb.gmra.mxu0 %v3841_v8 }
  0x7f   :  { %1234 = vmatpush.msrb.mxu0 %v3699_v3  ;;  %1009 = vmatmul.f32.vlgmr.msrb.gmra.mxu1 %v3841_v8 }
  0x80   :  { %1273 = vmatpush.msrb.mxu1 %v3750_v26 }
  0x81   :  { %1236 = vmatpush.msrb.mxu0 %v3701_v4  ;;  %1054 = vmatmul.f32.gmra.mxu2 %v1053_v39 }
  0x82   :  { %1089 = vmatmul.f32.gmra.mxu3 %v1049_v32  ;;  %1279 = vmatpush.msrb.mxu1 %v3752_v27 }
  0x86   :  { %986 = vmatmul.f32.gmra.mxu0 %v853_v18 }
  0x87   :  { %1013 = vmatmul.f32.gmra.mxu1 %v853_v18  ;;  %v3923_v18 = vand.u32 4294901760, %v1413_v6 }
  0x89   :  { %1178 = vmatmul.f32.vlgmr.msra.gmra.mxu2 %v1041_v22  ;;  %v3933_v21 = vsub.f32 %v1413_v6, %v3923_v18 }
  0x8a   :  { %1205 = vmatmul.f32.vlgmr.msra.gmra.mxu3 %v1041_v22  ;;  %1430 = vmatpush.msra.mxu2 %v3699_v3 }
  0x8b   :  { %v67_v43 = vpop.f32.mrf.mxu0  ;;  %1469 = vmatpush.msra.mxu3 %v3750_v26  ;;  %v28_v26 = vld [vmem:[%s4608_s0 + $0x70] sm:$0xff]  ;;  %v1443_v29 = vand.u32 4294901760, %v3933_v21 }
  0x8c   :  { %v106_v45 = vpop.f32.mrf.mxu1  ;;  %v136_v46 = vpop.f32.mrf.mxu2  ;;  %1432 = vmatpush.msra.mxu2 %v3701_v4  ;;  %v1410_v53 = vsel %vm36_vm0, %v28_v26, 0 }
  0x8d   :  { %1475 = vmatpush.msra.mxu3 %v3752_v27  ;;  %v166_v48 = vpop.f32.mrf.mxu3  ;;  %v107_v51 = vadd.f32 %v106_v45, %v67_v43  ;;  %v3904_v27 = vand.u32 4294901760, %v1217_v49  ;;  %v3909_v60 = vand.u32 4294901760, %v1410_v53 }
  0x8e   :  { %1115 = vmatmul.f32.vlgmr.msra.gmra.mxu0 %v1042_v28 }
  0x8f   :  { %1368 = vmatpush.msra.mxu0 %v3730_v16  ;;  %1145 = vmatmul.f32.vlgmr.msra.gmra.mxu1 %v1043_v31  ;;  %v137_v57 = vadd.f32 %v136_v46, %v107_v51  ;;  %v1246_v59 = vsub.f32 %v1217_v49, %v3904_v27  ;;  %v3915_v2 = vsub.f32 %v1410_v53, %v3909_v60 }
  0x90   :  { %1397 = vmatpush.msra.mxu1 %v3699_v3 }
  0x91   :  { %1372 = vmatpush.msra.mxu0 %v3733_v17  ;;  %1182 = vmatmul.f32.gmra.mxu2 %v1049_v32  ;;  %v167_v63 = vadd.f32 %v166_v48, %v137_v57  ;;  %v1247_v1 = vand.u32 4294901760, %v1246_v59  ;;  %v1435_v15 = vand.u32 4294901760, %v3915_v2 }
  0x92   :  { %1209 = vmatmul.f32.gmra.mxu3 %v1049_v32  ;;  %1399 = vmatpush.msra.mxu1 %v3701_v4 }
  0x93   :  { %v75_v52 = vpop.f32.mrf.mxu0  ;;  %v1248_v14 = vsub.f32 %v1246_v59, %v1247_v1  ;;  %v1436_v20 = vsub.f32 %v3915_v2, %v1435_v15 }
  0x94   :  { %v110_v54 = vpop.f32.mrf.mxu1  ;;  %v141_v55 = vpop.f32.mrf.mxu2 }
  0x95   :  { %v172_v58 = vpop.f32.mrf.mxu3  ;;  %v111_v0 = vadd.f32 %v110_v54, %v75_v52  ;;  %v1437_v28 = vand.u32 4294901760, %v1436_v20  ;;  %v32_v52 = vld [vmem:[%s4609_s2] sm:$0xff] }
  0x96   :  { %1120 = vmatmul.f32.gmra.mxu0 %v1050_v35  ;;  %v1606_v57 = vsel %vm36_vm0, %v32_v52, 0 }
  0x97   :  { %1151 = vmatmul.f32.gmra.mxu1 %v1051_v37  ;;  %v142_v10 = vadd.f32 %v141_v55, %v111_v0 }
  0x99   :  { %1311 = vmatmul.f32.vlgmr.msrb.gmra.mxu2 %v1238_v47 }
  0x9a   :  { %1341 = vmatmul.f32.vlgmr.msrb.gmra.mxu3 %v1239_v50  ;;  %1564 = vmatpush.msrb.mxu2 %v3730_v16  ;;  %v173_v16 = vadd.f32 %v172_v58, %v142_v10 }
  0x9b   :  { %v199_v5 = vpop.f32.mrf.mxu0  ;;  %1593 = vmatpush.msrb.mxu3 %v3699_v3 }
  0x9c   :  { %v200_v7 = vadd.f32 %v199_v5, %v167_v63  ;;  %v226_v8 = vpop.f32.mrf.mxu1  ;;  %v263_v9 = vpop.f32.mrf.mxu2  ;;  %1568 = vmatpush.msrb.mxu2 %v3733_v17  ;;  %v1249_v17 = vand.u32 4294901760, %v1248_v14 }
  0x9d   :  { %1595 = vmatpush.msrb.mxu3 %v3701_v4  ;;  %v302_v13 = vpop.f32.mrf.mxu3 }
  0x9e   :  { %1242 = vmatmul.f32.vlgmr.msrb.gmra.mxu0 %v1241_v62  ;;  %v227_v19 = vadd.f32 %v226_v8, %v200_v7  ;;  %v303_v32 = vadd.f32 %v302_v13, %v263_v9  ;;  %v3973_v62 = vand.u32 4294901760, %v1606_v57 }
  0x9f   :  { %1501 = vmatpush.msrb.mxu0 %v3715_v11  ;;  %1281 = vmatmul.f32.vlgmr.msrb.gmra.mxu1 %v3887_v42 }
  0xa0   :  { %1531 = vmatpush.msrb.mxu1 %v3699_v3  ;;  %v3935_v22 = vand.u32 4294901760, %v227_v19 }
  0xa1   :  { %1504 = vmatpush.msrb.mxu0 %v3719_v12  ;;  %1316 = vmatmul.f32.gmra.mxu2 %v1246_v59 }
  0xa2   :  { %1347 = vmatmul.f32.gmra.mxu3 %v1247_v1  ;;  %1533 = vmatpush.msrb.mxu1 %v3701_v4  ;;  %v3940_v30 = vsub.f32 %v227_v19, %v3935_v22  ;;  %v1444_v4 = vsub.f32 %v3933_v21, %v1443_v29  ;;  %v33_v1 = vld [vmem:[%s4609_s2 + $0x8] sm:$0xff] }
  0xa3   :  { %v203_v11 = vpop.f32.mrf.mxu0  ;;  %v1609_v9 = vsel %vm36_vm0, %v33_v1, 0 }
  0xa4   :  { %v204_v23 = vadd.f32 %v203_v11, %v173_v16  ;;  %v230_v12 = vpop.f32.mrf.mxu1  ;;  %v271_v24 = vpop.f32.mrf.mxu2  ;;  %v1690_v35 = vand.u32 4294901760, %v3940_v30  ;;  %v1445_v43 = vand.u32 4294901760, %v1444_v4  ;;  %v3998_v16 = vand.u32 4294901760, %v1609_v9 }
  0xa5   :  { %v306_v25 = vpop.f32.mrf.mxu3 }
  0xa6   :  { %v231_v3 = vadd.f32 %v230_v12, %v204_v23  ;;  %1250 = vmatmul.f32.gmra.mxu0 %v1249_v17  ;;  %v1691_v45 = vsub.f32 %v3940_v30, %v1690_v35  ;;  %v307_v48 = vadd.f32 %v306_v25, %v271_v24  ;;  %v34_v17 = vld [vmem:[%s4609_s2 + $0x10] sm:$0xff]  ;;  %v4008_v24 = vsub.f32 %v1609_v9, %v3998_v16 }
  0xa7   :  { %1285 = vmatmul.f32.gmra.mxu1 %v3904_v27 }
  0xa8   :  { %v3942_v31 = vand.u32 4294901760, %v231_v3  ;;  %v1692_v50 = vand.u32 4294901760, %v1691_v45  ;;  %v4018_v25 = vand.u32 4294901760, %v4008_v24 }
  0xa9   :  { %1438 = vmatmul.f32.vlgmr.msra.gmra.mxu2 %v1437_v28 }
  0xaa   :  { %v1683_v33 = vsub.f32 %v231_v3, %v3942_v31  ;;  %1477 = vmatmul.f32.vlgmr.msra.gmra.mxu3 %v3909_v60  ;;  %v1646_v4 = vsub.f32 %v4008_v24, %v4018_v25 }
  0xab   :  { %1767 = vmatpush.msra.mxu3 %v3942_v31  ;;  %v332_v34 = vpop.f32.mrf.mxu0 }
  0xac   :  { %v1684_v36 = vand.u32 4294901760, %v1683_v33  ;;  %v333_v37 = vadd.f32 %v332_v34, %v303_v32  ;;  %1727 = vmatpush.msra.mxu2 %v1683_v33  ;;  %v362_v38 = vpop.f32.mrf.mxu1  ;;  %v395_v39 = vpop.f32.mrf.mxu2 }
  0xad   :  { %1769 = vmatpush.msra.mxu3 %v3935_v22  ;;  %v422_v41 = vpop.f32.mrf.mxu3 }
  0xae   :  { %v363_v40 = vadd.f32 %v362_v38, %v333_v37  ;;  %1374 = vmatmul.f32.vlgmr.msra.gmra.mxu0 %v3887_v42  ;;  %1730 = vmatpush.msra.mxu2 %v3940_v30  ;;  %v1685_v44 = vsub.f32 %v1683_v33, %v1684_v36  ;;  %v4037_v38 = vand.u32 4294901760, %v1646_v4 }
  0xaf   :  { %1632 = vmatpush.msra.mxu0 %v3942_v31  ;;  %1401 = vmatmul.f32.vlgmr.msra.gmra.mxu1 %v3887_v42 }
  0xb0   :  { %v396_v46 = vadd.f32 %v395_v39, %v363_v40  ;;  %v1686_v47 = vand.u32 4294901760, %v1685_v44 }
  0xb1   :  { %1634 = vmatpush.msra.mxu0 %v3935_v22  ;;  %1446 = vmatmul.f32.gmra.mxu2 %v1445_v43 }
  0xb2   :  { %v423_v49 = vadd.f32 %v422_v41, %v396_v46  ;;  %1481 = vmatmul.f32.gmra.mxu3 %v3923_v18  ;;  %1687 = vmatpush.msra.mxu1 %v1686_v47 }
  0xb3   :  { %v337_v26 = vpop.f32.mrf.mxu0 }
  0xb4   :  { %v338_v51 = vadd.f32 %v337_v26, %v307_v48  ;;  %1693 = vmatpush.msra.mxu1 %v1692_v50  ;;  %v368_v53 = vpop.f32.mrf.mxu1  ;;  %v399_v54 = vpop.f32.mrf.mxu2  ;;  %v3963_v42 = vand.u32 4294901760, %v423_v49 }
  0xb5   :  { %v426_v56 = vpop.f32.mrf.mxu3 }
  0xb6   :  { %v369_v55 = vadd.f32 %v368_v53, %v338_v51  ;;  %1378 = vmatmul.f32.gmra.mxu0 %v3904_v27  ;;  %v3969_v59 = vsub.f32 %v423_v49, %v3963_v42 }
  0xb7   :  { %1405 = vmatmul.f32.gmra.mxu1 %v3904_v27 }
  0xb8   :  { %v400_v58 = vadd.f32 %v399_v54, %v369_v55  ;;  %v1942_v8 = vand.u32 4294901760, %v3969_v59 }
  0xb9   :  { %1570 = vmatmul.f32.vlgmr.msrb.gmra.mxu2 %v3909_v60 }
  0xba   :  { %v427_v61 = vadd.f32 %v426_v56, %v400_v58  ;;  %1597 = vmatmul.f32.vlgmr.msrb.gmra.mxu3 %v3909_v60  ;;  %v3985_v60 = vsub.f32 %v1606_v57, %v3973_v62  ;;  %v1943_v14 = vsub.f32 %v3969_v59, %v1942_v8 }
  0xbb   :  { %v459_v63 = vpop.f32.mrf.mxu0 }
  0xbc   :  { %v1883_v0 = vand.u32 4294901760, %v427_v61  ;;  %v498_v5 = vpop.f32.mrf.mxu1  ;;  %v3978_v6 = vpop.f32.mrf.mxu2  ;;  %v3996_v19 = vand.u32 4294901760, %v3985_v60  ;;  %v1944_v23 = vand.u32 4294901760, %v1943_v14 }
  0xbd   :  { %v3981_v7 = vpop.f32.mrf.mxu3 }
  0xbe   :  { %v1935_v27 = vsub.f32 %v427_v61, %v1883_v0  ;;  %1507 = vmatmul.f32.vlgmr.msrb.gmra.mxu0 %v3915_v2  ;;  %1884 = vmatpush.msrb.mxu2 %v1883_v0  ;;  %v1638_v12 = vsub.f32 %v3985_v60, %v3996_v19 }
  0xbf   :  { %1812 = vmatpush.msrb.mxu0 %v1684_v36  ;;  %1537 = vmatmul.f32.vlgmr.msrb.gmra.mxu1 %v1435_v15 }
  0xc0   :  { %v1936_v10 = vand.u32 4294901760, %v1935_v27  ;;  %1886 = vmatpush.msrb.mxu2 %v3963_v42  ;;  %1849 = vmatpush.msrb.mxu1 %v3942_v31  ;;  %v4015_v3 = vand.u32 4294901760, %v1638_v12 }
  0xc1   :  { %1816 = vmatpush.msrb.mxu0 %v1690_v35  ;;  %1574 = vmatmul.f32.gmra.mxu2 %v3923_v18  ;;  %v499_v35 = vadd.f32 %v498_v5, %v459_v63 }
  0xc2   :  { %1601 = vmatmul.f32.gmra.mxu3 %v3923_v18  ;;  %v1937_v13 = vsub.f32 %v1935_v27, %v1936_v10  ;;  %1851 = vmatpush.msrb.mxu1 %v3935_v22  ;;  %v1612_v22 = vsel %vm36_vm0, %v34_v17, 0 }
  0xc3   :  { %v467_v2 = vpop.f32.mrf.mxu0  ;;  %v4020_v28 = vand.u32 4294901760, %v1612_v22  ;;  %v529_v41 = vadd.f32 %v3978_v6, %v499_v35 }
  0xc4   :  { %v1938_v15 = vand.u32 4294901760, %v1937_v13  ;;  %v502_v20 = vpop.f32.mrf.mxu1  ;;  %v533_v11 = vpop.f32.mrf.mxu2 }
  0xc5   :  { %v564_v18 = vpop.f32.mrf.mxu3  ;;  %v4030_v34 = vsub.f32 %v1612_v22, %v4020_v28  ;;  %v559_v26 = vadd.f32 %v3981_v7, %v529_v41 }
  0xc6   :  { %1512 = vmatmul.f32.gmra.mxu0 %v3933_v21  ;;  %1939 = vmatpush.msrb.mxu3 %v1938_v15  ;;  %v35_v21 = vld [vmem:[%s4609_s2 + $0x18] sm:$0xff] }
  0xc7   :  { %1543 = vmatmul.f32.gmra.mxu1 %v1443_v29  ;;  %v503_v29 = vadd.f32 %v502_v20, %v467_v2  ;;  %v1615_v36 = vsel %vm36_vm0, %v35_v21, 0  ;;  %v4040_v39 = vand.u32 4294901760, %v4030_v34 }
  0xc8   :  { %1945 = vmatpush.msrb.mxu3 %v1944_v23  ;;  %v4042_v40 = vand.u32 4294901760, %v1615_v36 }
  0xc9   :  { %1733 = vmatmul.f32.vlgmr.msra.gmra.mxu2 %v3985_v60  ;;  %v534_v37 = vadd.f32 %v533_v11, %v503_v29  ;;  %v1654_v48 = vsub.f32 %v4030_v34, %v4040_v39 }
  0xca   :  { %1773 = vmatmul.f32.vlgmr.msra.gmra.mxu3 %v3996_v19  ;;  %2064 = vmatpush.msra.mxu2 %v1936_v10  ;;  %v4050_v49 = vsub.f32 %v1615_v36, %v4042_v40 }
  0xcb   :  { %2101 = vmatpush.msra.mxu3 %v1883_v0  ;;  %v591_v30 = vpop.f32.mrf.mxu0  ;;  %v565_v44 = vadd.f32 %v564_v18, %v534_v37  ;;  %v4056_v52 = vand.u32 4294901760, %v1654_v48 }
  0xcc   :  { %2068 = vmatpush.msra.mxu2 %v1942_v8  ;;  %v618_v31 = vpop.f32.mrf.mxu1  ;;  %v655_v32 = vpop.f32.mrf.mxu2  ;;  %v592_v51 = vadd.f32 %v591_v30, %v559_v26  ;;  %v4059_v53 = vand.u32 4294901760, %v4050_v49 }
  0xcd   :  { %2103 = vmatpush.msra.mxu3 %v3963_v42  ;;  %v694_v33 = vpop.f32.mrf.mxu3 }
  0xce   :  { %1640 = vmatmul.f32.vlgmr.msra.gmra.mxu0 %v4015_v3  ;;  %v619_v55 = vadd.f32 %v618_v31, %v592_v51  ;;  %v695_v13 = vadd.f32 %v694_v33, %v655_v32 }
  0xcf   :  { %1979 = vmatpush.msra.mxu0 %v1935_v27  ;;  %1695 = vmatmul.f32.vlgmr.msra.gmra.mxu1 %v3973_v62 }
  0xd0   :  { %2019 = vmatpush.msra.mxu1 %v1883_v0  ;;  %v4067_v63 = vand.u32 4294901760, %v619_v55 }
  0xd1   :  { %1982 = vmatpush.msra.mxu0 %v3969_v59  ;;  %1738 = vmatmul.f32.gmra.mxu2 %v4008_v24  ;;  %v1662_v59 = vsub.f32 %v4050_v49, %v4059_v53 }
  0xd2   :  { %1779 = vmatmul.f32.gmra.mxu3 %v4018_v25  ;;  %2021 = vmatpush.msra.mxu1 %v3963_v42  ;;  %v4077_v6 = vsub.f32 %v619_v55, %v4067_v63 }
  0xd3   :  { %v595_v43 = vpop.f32.mrf.mxu0  ;;  %v4071_v0 = vand.u32 4294901760, %v1662_v59 }
  0xd4   :  { %v622_v45 = vpop.f32.mrf.mxu1  ;;  %v663_v46 = vpop.f32.mrf.mxu2  ;;  %v596_v50 = vadd.f32 %v595_v43, %v565_v44  ;;  %v2194_v2 = vand.u32 4294901760, %v4077_v6 }
  0xd5   :  { %v698_v47 = vpop.f32.mrf.mxu3 }
  0xd6   :  { %1648 = vmatmul.f32.gmra.mxu0 %v4037_v38  ;;  %v623_v54 = vadd.f32 %v622_v45, %v596_v50  ;;  %v699_v10 = vadd.f32 %v698_v47, %v663_v46  ;;  %v2195_v12 = vsub.f32 %v4077_v6, %v2194_v2 }
  0xd7   :  { %1699 = vmatmul.f32.gmra.mxu1 %v3998_v16 }
  0xd8   :  { %v4064_v61 = vand.u32 4294901760, %v623_v54  ;;  %v2196_v33 = vand.u32 4294901760, %v2195_v12 }
  0xd9   :  { %1743 = vmatmul.f32.gmra.mxu2 %v4030_v34 }
  0xda   :  { %1785 = vmatmul.f32.gmra.mxu3 %v4040_v39  ;;  %v4074_v1 = vsub.f32 %v623_v54, %v4064_v61 }
  0xdb   :  { %v724_v42 = vpop.f32.mrf.mxu0 }
  0xdc   :  { %v754_v56 = vpop.f32.mrf.mxu1  ;;  %v787_v57 = vpop.f32.mrf.mxu2  ;;  %v2188_v9 = vand.u32 4294901760, %v4074_v1  ;;  %v725_v15 = vadd.f32 %v724_v42, %v695_v13 }
  0xdd   :  { %v814_v58 = vpop.f32.mrf.mxu3 }
  0xde   :  { %1656 = vmatmul.f32.gmra.mxu0 %v4056_v52  ;;  %v2189_v20 = vsub.f32 %v4074_v1, %v2188_v9  ;;  %v755_v21 = vadd.f32 %v754_v56, %v725_v15 }
  0xdf   :  { %1703 = vmatmul.f32.gmra.mxu1 %v4020_v28 }
  0xe0   :  { %v2190_v29 = vand.u32 4294901760, %v2189_v20  ;;  %v788_v35 = vadd.f32 %v787_v57, %v755_v21 }
  0xe1   :  { %1748 = vmatmul.f32.gmra.mxu2 %v4050_v49 }
  0xe2   :  { %1791 = vmatmul.f32.gmra.mxu3 %v4059_v53  ;;  %v815_v46 = vadd.f32 %v814_v58, %v788_v35 }
  0xe3   :  { %v729_v5 = vpop.f32.mrf.mxu0 }
  0xe4   :  { %v760_v27 = vpop.f32.mrf.mxu1  ;;  %v791_v7 = vpop.f32.mrf.mxu2  ;;  %v730_v14 = vadd.f32 %v729_v5, %v699_v10  ;;  %v4111_v50 = vand.u32 4294901760, %v815_v46 }
  0xe5   :  { %v818_v8 = vpop.f32.mrf.mxu3 }
  0xe6   :  { %1664 = vmatmul.f32.gmra.mxu0 %v4071_v0  ;;  %v761_v11 = vadd.f32 %v760_v27, %v730_v14  ;;  %v4122_v57 = vsub.f32 %v815_v46, %v4111_v50 }
  0xe7   :  { %1707 = vmatmul.f32.gmra.mxu1 %v4042_v40 }
  0xe8   :  { %v792_v32 = vadd.f32 %v791_v7, %v761_v11  ;;  %v2446_v27 = vand.u32 4294901760, %v4122_v57 }
  0xe9   :  { %1892 = vmatmul.f32.vlgmr.msrb.gmra.mxu2 %v4015_v3 }
  0xea   :  { %1947 = vmatmul.f32.vlgmr.msrb.gmra.mxu3 %v3973_v62  ;;  %2231 = vmatpush.msrb.mxu2 %v4074_v1  ;;  %v819_v37 = vadd.f32 %v818_v8, %v792_v32  ;;  %v2447_v15 = vsub.f32 %v4122_v57, %v2446_v27 }
  0xeb   :  { %2271 = vmatpush.msrb.mxu3 %v4064_v61  ;;  %v851_v17 = vpop.f32.mrf.mxu0 }
  0xec   :  { %2234 = vmatpush.msrb.mxu2 %v4077_v6  ;;  %v890_v18 = vpop.f32.mrf.mxu1  ;;  %v920_v23 = vpop.f32.mrf.mxu2  ;;  %v4105_v48 = vand.u32 4294901760, %v819_v37  ;;  %v2448_v11 = vand.u32 4294901760, %v2447_v15 }
  0xed   :  { %2273 = vmatpush.msrb.mxu3 %v4067_v63  ;;  %v891_v22 = vadd.f32 %v890_v18, %v851_v17  ;;  %v950_v30 = vpop.f32.mrf.mxu3 }
  0xee   :  { %1818 = vmatmul.f32.vlgmr.msrb.gmra.mxu0 %v3973_v62  ;;  %v4116_v54 = vsub.f32 %v819_v37, %v4105_v48 }
  0xef   :  { %2136 = vmatpush.msrb.mxu0 %v4064_v61  ;;  %v921_v31 = vadd.f32 %v920_v23, %v891_v22  ;;  %1853 = vmatmul.f32.vlgmr.msrb.gmra.mxu1 %v3973_v62 }
  0xf0   :  { %2191 = vmatpush.msrb.mxu1 %v2190_v29  ;;  %v2440_v59 = vand.u32 4294901760, %v4116_v54 }
  0xf1   :  { %2138 = vmatpush.msrb.mxu0 %v4067_v63  ;;  %v4099_v4 = vadd.f32 %v950_v30, %v921_v31  ;;  %1900 = vmatmul.f32.gmra.mxu2 %v4037_v38 }
  0xf2   :  { %1951 = vmatmul.f32.gmra.mxu3 %v3998_v16  ;;  %2197 = vmatpush.msrb.mxu1 %v2196_v33  ;;  %v2441_v10 = vsub.f32 %v4116_v54, %v2440_v59 }
  0xf3   :  { %v859_v36 = vpop.f32.mrf.mxu0 }
  0xf4   :  { %v894_v41 = vpop.f32.mrf.mxu1  ;;  %v925_v43 = vpop.f32.mrf.mxu2  ;;  %v2442_v17 = vand.u32 4294901760, %v2441_v10 }
  0xf5   :  { %v895_v44 = vadd.f32 %v894_v41, %v859_v36  ;;  %v956_v45 = vpop.f32.mrf.mxu3 }
  0xf6   :  { %1822 = vmatmul.f32.gmra.mxu0 %v3998_v16 }
  0xf7   :  { %v926_v47 = vadd.f32 %v925_v43, %v895_v44  ;;  %1857 = vmatmul.f32.gmra.mxu1 %v3998_v16 }
  0xf9   :  { %v4107_v26 = vadd.f32 %v956_v45, %v926_v47  ;;  %1908 = vmatmul.f32.gmra.mxu2 %v4056_v52 }
  0xfa   :  { %1955 = vmatmul.f32.gmra.mxu3 %v4020_v28 }
  0xfb   :  { %v4113_v51 = vpop.f32.mrf.mxu0 }
  0xfc   :  { %v4118_v42 = vpop.f32.mrf.mxu1  ;;  %v1047_v55 = vpop.f32.mrf.mxu2 }
  0xfd   :  { %v1086_v56 = vpop.f32.mrf.mxu3 }
  0xfe   :  { %1826 = vmatmul.f32.gmra.mxu0 %v4020_v28  ;;  %v1087_v58 = vadd.f32 %v1086_v56, %v1047_v55 }
  0xff   :  { %1861 = vmatmul.f32.gmra.mxu1 %v4020_v28 }
 0x101   :  { %1916 = vmatmul.f32.gmra.mxu2 %v4071_v0 }
 0x102   :  { %1959 = vmatmul.f32.gmra.mxu3 %v4042_v40 }
 0x103   :  { %v4128_v5 = vpop.f32.mrf.mxu0 }
 0x104   :  { %v4131_v7 = vpop.f32.mrf.mxu1  ;;  %v1055_v8 = vpop.f32.mrf.mxu2 }
 0x105   :  { %v1090_v13 = vpop.f32.mrf.mxu3 }
 0x106   :  { %1830 = vmatmul.f32.gmra.mxu0 %v4042_v40  ;;  %v1091_v14 = vadd.f32 %v1090_v13, %v1055_v8 }
 0x107   :  { %1865 = vmatmul.f32.gmra.mxu1 %v4042_v40 }
 0x109   :  { %2070 = vmatmul.f32.vlgmr.msra.gmra.mxu2 %v3973_v62 }
 0x10a   :  { %2105 = vmatmul.f32.vlgmr.msra.gmra.mxu3 %v3973_v62  ;;  %2388 = vmatpush.msra.mxu2 %v4105_v48 }
 0x10b   :  { %2443 = vmatpush.msra.mxu3 %v2442_v17  ;;  %v1116_v20 = vpop.f32.mrf.mxu0 }
 0x10c   :  { %v1117_v18 = vadd.f32 %v1116_v20, %v1087_v58  ;;  %2390 = vmatpush.msra.mxu2 %v4111_v50  ;;  %v1146_v23 = vpop.f32.mrf.mxu1  ;;  %v1179_v12 = vpop.f32.mrf.mxu2 }
 0x10d   :  { %2449 = vmatpush.msra.mxu3 %v2448_v11  ;;  %v1206_v30 = vpop.f32.mrf.mxu3  ;;  %v988_v11 = vadd.f32 %v4128_v5, %v4107_v26 }
 0x10e   :  { %v1147_v22 = vadd.f32 %v1146_v23, %v1117_v18  ;;  %1985 = vmatmul.f32.vlgmr.msra.gmra.mxu0 %v3985_v60 }
 0x10f   :  { %2316 = vmatpush.msra.mxu0 %v2188_v9  ;;  %2025 = vmatmul.f32.vlgmr.msra.gmra.mxu1 %v3996_v19 }
 0x110   :  { %v1180_v21 = vadd.f32 %v1179_v12, %v1147_v22  ;;  %2353 = vmatpush.msra.mxu1 %v4064_v61 }
 0x111   :  { %2320 = vmatpush.msra.mxu0 %v2194_v2  ;;  %2074 = vmatmul.f32.gmra.mxu2 %v3998_v16 }
 0x112   :  { %v4152_v29 = vadd.f32 %v1206_v30, %v1180_v21  ;;  %2109 = vmatmul.f32.gmra.mxu3 %v3998_v16  ;;  %2355 = vmatpush.msra.mxu1 %v4067_v63 }
 0x113   :  { %v1121_v31 = vpop.f32.mrf.mxu0 }
 0x114   :  { %v1122_v32 = vadd.f32 %v1121_v31, %v1091_v14  ;;  %v1152_v1 = vpop.f32.mrf.mxu1  ;;  %v1183_v9 = vpop.f32.mrf.mxu2 }
 0x115   :  { %v1210_v35 = vpop.f32.mrf.mxu3 }
 0x116   :  { %v1153_v33 = vadd.f32 %v1152_v1, %v1122_v32  ;;  %1990 = vmatmul.f32.gmra.mxu0 %v4008_v24 }
 0x117   :  { %2031 = vmatmul.f32.gmra.mxu1 %v4018_v25 }
 0x118   :  { %v1184_v6 = vadd.f32 %v1183_v9, %v1153_v33 }
 0x119   :  { %2078 = vmatmul.f32.gmra.mxu2 %v4020_v28 }
 0x11a   :  { %v4159_v61 = vadd.f32 %v1210_v35, %v1184_v6  ;;  %2113 = vmatmul.f32.gmra.mxu3 %v4020_v28 }
 0x11b   :  { %v1243_v2 = vpop.f32.mrf.mxu0 }
 0x11c   :  { %v1282_v36 = vpop.f32.mrf.mxu1  ;;  %v1312_v63 = vpop.f32.mrf.mxu2 }
 0x11d   :  { %v1283_v37 = vadd.f32 %v1282_v36, %v1243_v2  ;;  %v1342_v41 = vpop.f32.mrf.mxu3 }
 0x11e   :  { %1995 = vmatmul.f32.gmra.mxu0 %v4030_v34 }
 0x11f   :  { %v1313_v43 = vadd.f32 %v1312_v63, %v1283_v37  ;;  %2037 = vmatmul.f32.gmra.mxu1 %v4040_v39 }
 0x121   :  { %v4165_v44 = vadd.f32 %v1342_v41, %v1313_v43  ;;  %2082 = vmatmul.f32.gmra.mxu2 %v4042_v40 }
 0x122   :  { %2117 = vmatmul.f32.gmra.mxu3 %v4042_v40 }
 0x123   :  { %v1251_v45 = vpop.f32.mrf.mxu0 }
 0x124   :  { %v1286_v46 = vpop.f32.mrf.mxu1  ;;  %v1317_v47 = vpop.f32.mrf.mxu2 }
 0x125   :  { %v1287_v55 = vadd.f32 %v1286_v46, %v1251_v45  ;;  %v1348_v56 = vpop.f32.mrf.mxu3 }
 0x126   :  { %2000 = vmatmul.f32.gmra.mxu0 %v4050_v49 }
 0x127   :  { %v1318_v58 = vadd.f32 %v1317_v47, %v1287_v55  ;;  %2043 = vmatmul.f32.gmra.mxu1 %v4059_v53 }
 0x129   :  { %v4171_v8 = vadd.f32 %v1348_v56, %v1318_v58  ;;  %2237 = vmatmul.f32.vlgmr.msrb.gmra.mxu2 %v3985_v60 }
 0x12a   :  { %2277 = vmatmul.f32.vlgmr.msrb.gmra.mxu3 %v3996_v19  ;;  %2568 = vmatpush.msrb.mxu2 %v2440_v59 }
 0x12b   :  { %2605 = vmatpush.msrb.mxu3 %v4105_v48  ;;  %v4178_v10 = vpop.f32.mrf.mxu0 }
 0x12c   :  { %2572 = vmatpush.msrb.mxu2 %v2446_v27  ;;  %v4183_v13 = vpop.f32.mrf.mxu1  ;;  %v1439_v14 = vpop.f32.mrf.mxu2 }
 0x12d   :  { %2607 = vmatpush.msrb.mxu3 %v4111_v50  ;;  %v1478_v15 = vpop.f32.mrf.mxu3 }
 0x12e   :  { %2144 = vmatmul.f32.vlgmr.msrb.gmra.mxu0 %v4015_v3  ;;  %v1479_v17 = vadd.f32 %v1478_v15, %v1439_v14 }
 0x12f   :  { %2483 = vmatpush.msrb.mxu0 %v4116_v54  ;;  %2199 = vmatmul.f32.vlgmr.msrb.gmra.mxu1 %v3973_v62 }
 0x130   :  { %2523 = vmatpush.msrb.mxu1 %v4105_v48  ;;  %v984_v48 = vadd.f32 %v4113_v51, %v4099_v4 }
 0x131   :  { %2486 = vmatpush.msrb.mxu0 %v4122_v57  ;;  %2242 = vmatmul.f32.gmra.mxu2 %v4008_v24 }
 0x132   :  { %2283 = vmatmul.f32.gmra.mxu3 %v4018_v25  ;;  %2525 = vmatpush.msrb.mxu1 %v4111_v50  ;;  %v1015_v50 = vadd.f32 %v4131_v7, %v988_v11  ;;  %v1011_v12 = vadd.f32 %v4118_v42, %v984_v48  ;;  %v4255_v11 = vand.u32 4294901760, %v4152_v29 }
 0x133   :  { %v4193_v59 = vpop.f32.mrf.mxu0 }
 0x134   :  { %v4195_v27 = vpop.f32.mrf.mxu1  ;;  %v1447_v20 = vpop.f32.mrf.mxu2  ;;  %v4208_v5 = vand.u32 4294901760, %v1015_v50  ;;  %v4211_v4 = vand.u32 4294901760, %v1011_v12 }
 0x135   :  { %v1482_v54 = vpop.f32.mrf.mxu3 }
 0x136   :  { %2152 = vmatmul.f32.gmra.mxu0 %v4037_v38  ;;  %v1483_v57 = vadd.f32 %v1482_v54, %v1447_v20  ;;  %v4218_v42 = vsub.f32 %v1015_v50, %v4208_v5  ;;  %v4221_v1 = vsub.f32 %v1011_v12, %v4211_v4  ;;  %v4250_v54 = vand.u32 4294901760, %v4159_v61 }
 0x137   :  { %2203 = vmatmul.f32.gmra.mxu1 %v3998_v16  ;;  %v4264_v12 = vsub.f32 %v4152_v29, %v4255_v11 }
 0x138   :  { %v2692_v2 = vand.u32 4294901760, %v4218_v42  ;;  %v2698_v63 = vand.u32 4294901760, %v4221_v1  ;;  %v4259_v48 = vsub.f32 %v4159_v61, %v4250_v54 }
 0x139   :  { %2247 = vmatmul.f32.gmra.mxu2 %v4030_v34 }
 0x13a   :  { %2289 = vmatmul.f32.gmra.mxu3 %v4040_v39  ;;  %v2693_v43 = vsub.f32 %v4218_v42, %v2692_v2  ;;  %v2699_v47 = vsub.f32 %v4221_v1, %v2698_v63 }
 0x13b   :  { %v1508_v18 = vpop.f32.mrf.mxu0 }
 0x13c   :  { %v1509_v23 = vadd.f32 %v1508_v18, %v1479_v17  ;;  %v1538_v22 = vpop.f32.mrf.mxu1  ;;  %v1571_v30 = vpop.f32.mrf.mxu2  ;;  %v2694_v56 = vand.u32 4294901760, %v2693_v43  ;;  %v2700_v58 = vand.u32 4294901760, %v2699_v47 }
 0x13d   :  { %v1598_v26 = vpop.f32.mrf.mxu3 }
 0x13e   :  { %v1539_v21 = vadd.f32 %v1538_v22, %v1509_v23  ;;  %2160 = vmatmul.f32.gmra.mxu0 %v4056_v52  ;;  %v2944_v22 = vand.u32 4294901760, %v4259_v48 }
 0x13f   :  { %2207 = vmatmul.f32.gmra.mxu1 %v4020_v28 }
 0x140   :  { %v1572_v31 = vadd.f32 %v1571_v30, %v1539_v21  ;;  %v2950_v21 = vand.u32 4294901760, %v4264_v12 }
 0x141   :  { %2252 = vmatmul.f32.gmra.mxu2 %v4050_v49 }
 0x142   :  { %v4213_v51 = vadd.f32 %v1598_v26, %v1572_v31  ;;  %2295 = vmatmul.f32.gmra.mxu3 %v4059_v53 }
 0x143   :  { %v1513_v7 = vpop.f32.mrf.mxu0 }
 0x144   :  { %v1514_v32 = vadd.f32 %v1513_v7, %v1483_v57  ;;  %v1544_v9 = vpop.f32.mrf.mxu1  ;;  %v1575_v33 = vpop.f32.mrf.mxu2  ;;  %v2945_v7 = vsub.f32 %v4259_v48, %v2944_v22 }
 0x145   :  { %v1602_v6 = vpop.f32.mrf.mxu3 }
 0x146   :  { %v1545_v35 = vadd.f32 %v1544_v9, %v1514_v32  ;;  %2168 = vmatmul.f32.gmra.mxu0 %v4071_v0  ;;  %v2951_v9 = vsub.f32 %v4264_v12, %v2950_v21 }
 0x147   :  { %2211 = vmatmul.f32.gmra.mxu1 %v4042_v40 }
 0x148   :  { %v1576_v36 = vadd.f32 %v1575_v33, %v1545_v35  ;;  %v2946_v33 = vand.u32 4294901760, %v2945_v7 }
 0x149   :  { %2396 = vmatmul.f32.vlgmr.msra.gmra.mxu2 %v4015_v3 }
 0x14a   :  { %v4227_v37 = vadd.f32 %v1602_v6, %v1576_v36  ;;  %2451 = vmatmul.f32.vlgmr.msra.gmra.mxu3 %v3973_v62  ;;  %2735 = vmatpush.msra.mxu2 %v4218_v42 }
 0x14b   :  { %2775 = vmatpush.msra.mxu3 %v4208_v5  ;;  %v1641_v41 = vpop.f32.mrf.mxu0 }
 0x14c   :  { %2738 = vmatpush.msra.mxu2 %v4221_v1  ;;  %v1696_v45 = vpop.f32.mrf.mxu1  ;;  %v1734_v46 = vpop.f32.mrf.mxu2 }
 0x14d   :  { %2777 = vmatpush.msra.mxu3 %v4211_v4  ;;  %v1774_v55 = vpop.f32.mrf.mxu3  ;;  %v1697_v30 = vadd.f32 %v1696_v45, %v1641_v41  ;;  %v2952_v41 = vand.u32 4294901760, %v2951_v9 }
 0x14e   :  { %2322 = vmatmul.f32.vlgmr.msra.gmra.mxu0 %v3973_v62 }
 0x14f   :  { %2640 = vmatpush.msra.mxu0 %v4208_v5  ;;  %2357 = vmatmul.f32.vlgmr.msra.gmra.mxu1 %v3973_v62  ;;  %v1735_v29 = vadd.f32 %v1734_v46, %v1697_v30 }
 0x150   :  { %2695 = vmatpush.msra.mxu1 %v2694_v56 }
 0x151   :  { %2642 = vmatpush.msra.mxu0 %v4211_v4  ;;  %2404 = vmatmul.f32.gmra.mxu2 %v4037_v38  ;;  %v1775_v35 = vadd.f32 %v1774_v55, %v1735_v29 }
 0x152   :  { %2455 = vmatmul.f32.gmra.mxu3 %v3998_v16  ;;  %2701 = vmatpush.msra.mxu1 %v2700_v58 }
 0x153   :  { %v1649_v14 = vpop.f32.mrf.mxu0 }
 0x154   :  { %v1700_v15 = vpop.f32.mrf.mxu1  ;;  %v1739_v17 = vpop.f32.mrf.mxu2 }
 0x155   :  { %v1780_v20 = vpop.f32.mrf.mxu3  ;;  %v1701_v6 = vadd.f32 %v1700_v15, %v1649_v14 }
 0x156   :  { %2326 = vmatmul.f32.gmra.mxu0 %v3998_v16 }
 0x157   :  { %2361 = vmatmul.f32.gmra.mxu1 %v3998_v16  ;;  %v1740_v47 = vadd.f32 %v1739_v17, %v1701_v6 }
 0x159   :  { %2412 = vmatmul.f32.gmra.mxu2 %v4056_v52  ;;  %v1781_v58 = vadd.f32 %v1780_v20, %v1740_v47 }
 0x15a   :  { %2459 = vmatmul.f32.gmra.mxu3 %v4020_v28 }
 0x15b   :  { %v1657_v57 = vpop.f32.mrf.mxu0 }
 0x15c   :  { %v1704_v50 = vpop.f32.mrf.mxu1  ;;  %v1744_v18 = vpop.f32.mrf.mxu2 }
 0x15d   :  { %v1786_v23 = vpop.f32.mrf.mxu3  ;;  %v1705_v14 = vadd.f32 %v1704_v50, %v1657_v57 }
 0x15e   :  { %2330 = vmatmul.f32.gmra.mxu0 %v4020_v28 }
 0x15f   :  { %2365 = vmatmul.f32.gmra.mxu1 %v4020_v28  ;;  %v1745_v30 = vadd.f32 %v1744_v18, %v1705_v14 }
 0x161   :  { %2420 = vmatmul.f32.gmra.mxu2 %v4071_v0 }
 0x162   :  { %2463 = vmatmul.f32.gmra.mxu3 %v4042_v40 }
 0x163   :  { %v1665_v61 = vpop.f32.mrf.mxu0 }
 0x164   :  { %v1708_v26 = vpop.f32.mrf.mxu1  ;;  %v1749_v31 = vpop.f32.mrf.mxu2 }
 0x165   :  { %v1792_v32 = vpop.f32.mrf.mxu3 }
 0x166   :  { %2334 = vmatmul.f32.gmra.mxu0 %v4042_v40 }
 0x167   :  { %2369 = vmatmul.f32.gmra.mxu1 %v4042_v40 }
 0x169   :  { %2574 = vmatmul.f32.vlgmr.msrb.gmra.mxu2 %v3973_v62 }
 0x16a   :  { %2609 = vmatmul.f32.vlgmr.msrb.gmra.mxu3 %v3973_v62  ;;  %2892 = vmatpush.msrb.mxu2 %v4250_v54 }
 0x16b   :  { %2947 = vmatpush.msrb.mxu3 %v2946_v33  ;;  %v1819_v36 = vpop.f32.mrf.mxu0 }
 0x16c   :  { %v1820_v43 = vadd.f32 %v1819_v36, %v1775_v35  ;;  %2894 = vmatpush.msrb.mxu2 %v4255_v11  ;;  %v1854_v45 = vpop.f32.mrf.mxu1  ;;  %v1893_v46 = vpop.f32.mrf.mxu2 }
 0x16d   :  { %2953 = vmatpush.msrb.mxu3 %v2952_v41  ;;  %v1948_v55 = vpop.f32.mrf.mxu3 }
 0x16e   :  { %v1855_v56 = vadd.f32 %v1854_v45, %v1820_v43  ;;  %2489 = vmatmul.f32.vlgmr.msrb.gmra.mxu0 %v3985_v60 }
 0x16f   :  { %2820 = vmatpush.msrb.mxu0 %v2692_v2  ;;  %2529 = vmatmul.f32.vlgmr.msrb.gmra.mxu1 %v3996_v19 }
 0x170   :  { %3634 = vst.msk [vmem:[%s4610_s3] sm:$0xff] %vm3633_vm1, %v1855_v56  ;;  %2857 = vmatpush.msrb.mxu1 %v4208_v5  ;;  %v1787_v5 = vadd.f32 %v1786_v23, %v1745_v30 }
 0x171   :  { %2824 = vmatpush.msrb.mxu0 %v2698_v63  ;;  %2578 = vmatmul.f32.gmra.mxu2 %v3998_v16  ;;  %v1709_v63 = vadd.f32 %v1708_v26, %v1665_v61 }
 0x172   :  { %2613 = vmatmul.f32.gmra.mxu3 %v3998_v16  ;;  %2859 = vmatpush.msrb.mxu1 %v4211_v4 }
 0x173   :  { %v1823_v42 = vpop.f32.mrf.mxu0  ;;  %v1750_v18 = vadd.f32 %v1749_v31, %v1709_v63 }
 0x174   :  { %v1824_v2 = vadd.f32 %v1823_v42, %v1781_v58  ;;  %v1858_v15 = vpop.f32.mrf.mxu1  ;;  %v1901_v17 = vpop.f32.mrf.mxu2  ;;  %v1380_v42 = vadd.f32 %v4193_v59, %v4171_v8 }
 0x175   :  { %v1952_v1 = vpop.f32.mrf.mxu3  ;;  %v1793_v23 = vadd.f32 %v1792_v32, %v1750_v18  ;;  %v1949_v32 = vadd.f32 %v1948_v55, %v1893_v46 }
 0x176   :  { %v1859_v7 = vadd.f32 %v1858_v15, %v1824_v2  ;;  %2494 = vmatmul.f32.gmra.mxu0 %v4008_v24  ;;  %v1407_v30 = vadd.f32 %v4195_v27, %v1380_v42 }
 0x177   :  { %2535 = vmatmul.f32.gmra.mxu1 %v4018_v25 }
 0x178   :  { %3635 = vst.msk [vmem:[%s4610_s3 + $0x8] sm:$0xff] %vm3633_vm1, %v1859_v7  ;;  %v4354_v63 = vand.u32 4294901760, %v1407_v30 }
 0x179   :  { %2582 = vmatmul.f32.gmra.mxu2 %v4020_v28 }
 0x17a   :  { %2617 = vmatmul.f32.gmra.mxu3 %v4020_v28 }
 0x17b   :  { %v1827_v4 = vpop.f32.mrf.mxu0 }
 0x17c   :  { %v1828_v20 = vadd.f32 %v1827_v4, %v1787_v5  ;;  %v1862_v57 = vpop.f32.mrf.mxu1  ;;  %v1909_v50 = vpop.f32.mrf.mxu2 }
 0x17d   :  { %v1956_v9 = vpop.f32.mrf.mxu3 }
 0x17e   :  { %v1863_v29 = vadd.f32 %v1862_v57, %v1828_v20  ;;  %2499 = vmatmul.f32.gmra.mxu0 %v4030_v34  ;;  %v1957_v15 = vadd.f32 %v1956_v9, %v1909_v50 }
 0x17f   :  { %2541 = vmatmul.f32.gmra.mxu1 %v4040_v39 }
 0x180   :  { %3636 = vst.msk [vmem:[%s4610_s3 + $0x10] sm:$0xff] %vm3633_vm1, %v1863_v29 }
 0x181   :  { %2586 = vmatmul.f32.gmra.mxu2 %v4042_v40 }
 0x182   :  { %2621 = vmatmul.f32.gmra.mxu3 %v4042_v40 }
 0x183   :  { %v1831_v61 = vpop.f32.mrf.mxu0 }
 0x184   :  { %v1832_v26 = vadd.f32 %v1831_v61, %v1793_v23  ;;  %v1866_v33 = vpop.f32.mrf.mxu1  ;;  %v1917_v31 = vpop.f32.mrf.mxu2 }
 0x185   :  { %v1960_v6 = vpop.f32.mrf.mxu3 }
 0x186   :  { %v1867_v35 = vadd.f32 %v1866_v33, %v1832_v26  ;;  %2504 = vmatmul.f32.gmra.mxu0 %v4050_v49  ;;  %v1961_v20 = vadd.f32 %v1960_v6, %v1917_v31 }
 0x187   :  { %2547 = vmatmul.f32.gmra.mxu1 %v4059_v53 }
 0x188   :  { %3637 = vst.msk [vmem:[%s4610_s3 + $0x18] sm:$0xff] %vm3633_vm1, %v1867_v35 }
 0x189   :  { %2741 = vmatmul.f32.vlgmr.msra.gmra.mxu2 %v3985_v60 }
 0x18a   :  { %2781 = vmatmul.f32.vlgmr.msra.gmra.mxu3 %v3996_v19  ;;  %3072 = vmatpush.msra.mxu2 %v2944_v22  ;;  %v1953_v22 = vadd.f32 %v1952_v1, %v1901_v17 }
 0x18b   :  { %3109 = vmatpush.msra.mxu3 %v4250_v54  ;;  %v1986_v36 = vpop.f32.mrf.mxu0 }
 0x18c   :  { %v1987_v41 = vadd.f32 %v1986_v36, %v1949_v32  ;;  %3076 = vmatpush.msra.mxu2 %v2950_v21  ;;  %v2026_v43 = vpop.f32.mrf.mxu1  ;;  %v2071_v45 = vpop.f32.mrf.mxu2 }
 0x18d   :  { %3111 = vmatpush.msra.mxu3 %v4255_v11  ;;  %v2106_v46 = vpop.f32.mrf.mxu3 }
 0x18e   :  { %v2027_v47 = vadd.f32 %v2026_v43, %v1987_v41  ;;  %2648 = vmatmul.f32.vlgmr.msra.gmra.mxu0 %v4015_v3 }
 0x18f   :  { %2987 = vmatpush.msra.mxu0 %v4259_v48  ;;  %2703 = vmatmul.f32.vlgmr.msra.gmra.mxu1 %v3973_v62 }
 0x190   :  { %v2072_v56 = vadd.f32 %v2071_v45, %v2027_v47  ;;  %3027 = vmatpush.msra.mxu1 %v4250_v54 }
 0x191   :  { %2990 = vmatpush.msra.mxu0 %v4264_v12  ;;  %2746 = vmatmul.f32.gmra.mxu2 %v4008_v24 }
 0x192   :  { %v2107_v55 = vadd.f32 %v2106_v46, %v2072_v56  ;;  %2787 = vmatmul.f32.gmra.mxu3 %v4018_v25  ;;  %3029 = vmatpush.msra.mxu1 %v4255_v11  ;;  %v1376_v11 = vadd.f32 %v4178_v10, %v4165_v44 }
 0x193   :  { %v1991_v21 = vpop.f32.mrf.mxu0 }
 0x194   :  { %3638 = vst.msk [vmem:[%s4610_s3 + $0x20] sm:$0xff] %vm3633_vm1, %v2107_v55  ;;  %v1992_v48 = vadd.f32 %v1991_v21, %v1953_v22  ;;  %v2032_v58 = vpop.f32.mrf.mxu1  ;;  %v2075_v14 = vpop.f32.mrf.mxu2  ;;  %v1403_v59 = vadd.f32 %v4183_v13, %v1376_v11  ;;  %v4362_v13 = vsub.f32 %v1407_v30, %v4354_v63 }
 0x195   :  { %v2110_v54 = vpop.f32.mrf.mxu3 }
 0x196   :  { %v2033_v12 = vadd.f32 %v2032_v58, %v1992_v48  ;;  %2656 = vmatmul.f32.gmra.mxu0 %v4037_v38  ;;  %v4357_v27 = vand.u32 4294901760, %v1403_v59  ;;  %v3196_v33 = vand.u32 4294901760, %v4362_v13  ;;  %v4400_v58 = vand.u32 4294901760, %v4227_v37 }
 0x197   :  { %2707 = vmatmul.f32.gmra.mxu1 %v3998_v16 }
 0x198   :  { %v2076_v2 = vadd.f32 %v2075_v14, %v2033_v12  ;;  %v4369_v29 = vsub.f32 %v1403_v59, %v4357_v27  ;;  %v3197_v36 = vsub.f32 %v4362_v13, %v3196_v33  ;;  %v4405_v14 = vand.u32 4294901760, %v4213_v51 }
 0x199   :  { %2751 = vmatmul.f32.gmra.mxu2 %v4030_v34 }
 0x19a   :  { %v2111_v17 = vadd.f32 %v2110_v54, %v2076_v2  ;;  %2793 = vmatmul.f32.gmra.mxu3 %v4040_v39  ;;  %v3202_v35 = vand.u32 4294901760, %v4369_v29  ;;  %v3198_v46 = vand.u32 4294901760, %v3197_v36  ;;  %v4409_v54 = vsub.f32 %v4227_v37, %v4400_v58 }
 0x19b   :  { %v1996_v7 = vpop.f32.mrf.mxu0 }
 0x19c   :  { %3639 = vst.msk [vmem:[%s4610_s3 + $0x28] sm:$0xff] %vm3633_vm1, %v2111_v17  ;;  %v1997_v8 = vadd.f32 %v1996_v7, %v1957_v15  ;;  %v2038_v1 = vpop.f32.mrf.mxu1  ;;  %v2079_v5 = vpop.f32.mrf.mxu2  ;;  %v3203_v45 = vsub.f32 %v4369_v29, %v3202_v35  ;;  %v4414_v15 = vsub.f32 %v4213_v51, %v4405_v14  ;;  %v3448_v17 = vand.u32 4294901760, %v4409_v54 }
 0x19d   :  { %v2114_v10 = vpop.f32.mrf.mxu3 }
 0x19e   :  { %v2039_v44 = vadd.f32 %v2038_v1, %v1997_v8  ;;  %2664 = vmatmul.f32.gmra.mxu0 %v4056_v52  ;;  %v3204_v56 = vand.u32 4294901760, %v3203_v45  ;;  %v3454_v7 = vand.u32 4294901760, %v4414_v15  ;;  %v3449_v1 = vsub.f32 %v4409_v54, %v3448_v17 }
 0x19f   :  { %2711 = vmatmul.f32.gmra.mxu1 %v4020_v28 }
 0x1a0   :  { %v2080_v4 = vadd.f32 %v2079_v5, %v2039_v44  ;;  %v3455_v44 = vsub.f32 %v4414_v15, %v3454_v7 }
 0x1a1   :  { %2756 = vmatmul.f32.gmra.mxu2 %v4050_v49 }
 0x1a2   :  { %v2115_v57 = vadd.f32 %v2114_v10, %v2080_v4  ;;  %2799 = vmatmul.f32.gmra.mxu3 %v4059_v53  ;;  %v3450_v10 = vand.u32 4294901760, %v3449_v1 }
 0x1a3   :  { %v2001_v50 = vpop.f32.mrf.mxu0 }
 0x1a4   :  { %3640 = vst.msk [vmem:[%s4610_s3 + $0x30] sm:$0xff] %vm3633_vm1, %v2115_v57  ;;  %v2002_v18 = vadd.f32 %v2001_v50, %v1961_v20  ;;  %v2044_v9 = vpop.f32.mrf.mxu1  ;;  %v2083_v23 = vpop.f32.mrf.mxu2  ;;  %v3456_v50 = vand.u32 4294901760, %v3455_v44 }
 0x1a5   :  { %v2118_v26 = vpop.f32.mrf.mxu3 }
 0x1a6   :  { %v2045_v61 = vadd.f32 %v2044_v9, %v2002_v18  ;;  %2672 = vmatmul.f32.gmra.mxu0 %v4071_v0 }
 0x1a7   :  { %2715 = vmatmul.f32.gmra.mxu1 %v4042_v40 }
 0x1a8   :  { %v2084_v31 = vadd.f32 %v2083_v23, %v2045_v61 }
 0x1a9   :  { %2900 = vmatmul.f32.vlgmr.msrb.gmra.mxu2 %v4015_v3 }
 0x1aa   :  { %v2119_v6 = vadd.f32 %v2118_v26, %v2084_v31  ;;  %2955 = vmatmul.f32.vlgmr.msrb.gmra.mxu3 %v3973_v62  ;;  %3239 = vmatpush.msrb.mxu2 %v4362_v13 }
 0x1ab   :  { %3279 = vmatpush.msrb.mxu3 %v4354_v63  ;;  %v2145_v32 = vpop.f32.mrf.mxu0 }
 0x1ac   :  { %3641 = vst.msk [vmem:[%s4610_s3 + $0x38] sm:$0xff] %vm3633_vm1, %v2119_v6  ;;  %3242 = vmatpush.msrb.mxu2 %v4369_v29  ;;  %v2200_v41 = vpop.f32.mrf.mxu1  ;;  %v2238_v43 = vpop.f32.mrf.mxu2 }
 0x1ad   :  { %3281 = vmatpush.msrb.mxu3 %v4357_v27  ;;  %v2278_v47 = vpop.f32.mrf.mxu3  ;;  %v2201_v30 = vadd.f32 %v2200_v41, %v2145_v32 }
 0x1ae   :  { %2826 = vmatmul.f32.vlgmr.msrb.gmra.mxu0 %v3973_v62 }
 0x1af   :  { %3144 = vmatpush.msrb.mxu0 %v4354_v63  ;;  %2861 = vmatmul.f32.vlgmr.msrb.gmra.mxu1 %v3973_v62  ;;  %v2239_v51 = vadd.f32 %v2238_v43, %v2201_v30 }
 0x1b0   :  { %3199 = vmatpush.msrb.mxu1 %v3198_v46 }
 0x1b1   :  { %3146 = vmatpush.msrb.mxu0 %v4357_v27  ;;  %2908 = vmatmul.f32.gmra.mxu2 %v4037_v38  ;;  %v2279_v4 = vadd.f32 %v2278_v47, %v2239_v51 }
 0x1b2   :  { %2959 = vmatmul.f32.gmra.mxu3 %v3998_v16  ;;  %3205 = vmatpush.msrb.mxu1 %v3204_v56 }
 0x1b3   :  { %v2153_v22 = vpop.f32.mrf.mxu0 }
 0x1b4   :  { %v2204_v55 = vpop.f32.mrf.mxu1  ;;  %v2243_v21 = vpop.f32.mrf.mxu2 }
 0x1b5   :  { %v2284_v48 = vpop.f32.mrf.mxu3  ;;  %v2205_v20 = vadd.f32 %v2204_v55, %v2153_v22 }
 0x1b6   :  { %2830 = vmatmul.f32.gmra.mxu0 %v3998_v16 }
 0x1b7   :  { %2865 = vmatmul.f32.gmra.mxu1 %v3998_v16  ;;  %v2244_v61 = vadd.f32 %v2243_v21, %v2205_v20 }
 0x1b9   :  { %2916 = vmatmul.f32.gmra.mxu2 %v4056_v52  ;;  %v2285_v6 = vadd.f32 %v2284_v48, %v2244_v61 }
 0x1ba   :  { %2963 = vmatmul.f32.gmra.mxu3 %v4020_v28 }
 0x1bb   :  { %v2161_v12 = vpop.f32.mrf.mxu0 }
 0x1bc   :  { %v2208_v42 = vpop.f32.mrf.mxu1  ;;  %v2248_v2 = vpop.f32.mrf.mxu2 }
 0x1bd   :  { %v2290_v11 = vpop.f32.mrf.mxu3  ;;  %v2209_v32 = vadd.f32 %v2208_v42, %v2161_v12 }
 0x1be   :  { %2834 = vmatmul.f32.gmra.mxu0 %v4020_v28 }
 0x1bf   :  { %2869 = vmatmul.f32.gmra.mxu1 %v4020_v28  ;;  %v2249_v43 = vadd.f32 %v2248_v2, %v2209_v32 }
 0x1c1   :  { %2924 = vmatmul.f32.gmra.mxu2 %v4071_v0 }
 0x1c2   :  { %2967 = vmatmul.f32.gmra.mxu3 %v4042_v40 }
 0x1c3   :  { %v2169_v37 = vpop.f32.mrf.mxu0 }
 0x1c4   :  { %v2212_v8 = vpop.f32.mrf.mxu1  ;;  %v2253_v59 = vpop.f32.mrf.mxu2 }
 0x1c5   :  { %v2296_v5 = vpop.f32.mrf.mxu3 }
 0x1c6   :  { %2838 = vmatmul.f32.gmra.mxu0 %v4042_v40 }
 0x1c7   :  { %2873 = vmatmul.f32.gmra.mxu1 %v4042_v40 }
 0x1c9   :  { %3078 = vmatmul.f32.vlgmr.msra.gmra.mxu2 %v3973_v62 }
 0x1ca   :  { %3113 = vmatmul.f32.vlgmr.msra.gmra.mxu3 %v3973_v62  ;;  %3396 = vmatpush.msra.mxu2 %v4400_v58 }
 0x1cb   :  { %3451 = vmatpush.msra.mxu3 %v3450_v10  ;;  %v2323_v57 = vpop.f32.mrf.mxu0 }
 0x1cc   :  { %v2324_v18 = vadd.f32 %v2323_v57, %v2279_v4  ;;  %3398 = vmatpush.msra.mxu2 %v4405_v14  ;;  %v2358_v9 = vpop.f32.mrf.mxu1  ;;  %v2397_v23 = vpop.f32.mrf.mxu2 }
 0x1cd   :  { %3457 = vmatpush.msra.mxu3 %v3456_v50  ;;  %v2452_v31 = vpop.f32.mrf.mxu3 }
 0x1ce   :  { %v2359_v26 = vadd.f32 %v2358_v9, %v2324_v18  ;;  %2993 = vmatmul.f32.vlgmr.msra.gmra.mxu0 %v3985_v60 }
 0x1cf   :  { %3324 = vmatpush.msra.mxu0 %v3196_v33  ;;  %3033 = vmatmul.f32.vlgmr.msra.gmra.mxu1 %v3996_v19 }
 0x1d0   :  { %3642 = vst.msk [vmem:[%s4610_s3 + $0x40] sm:$0xff] %vm3633_vm1, %v2359_v26  ;;  %3361 = vmatpush.msra.mxu1 %v4354_v63  ;;  %v2291_v63 = vadd.f32 %v2290_v11, %v2249_v43 }
 0x1d1   :  { %3328 = vmatpush.msra.mxu0 %v3202_v35  ;;  %3082 = vmatmul.f32.gmra.mxu2 %v3998_v16  ;;  %v2213_v35 = vadd.f32 %v2212_v8, %v2169_v37  ;;  %v2453_v8 = vadd.f32 %v2452_v31, %v2397_v23 }
 0x1d2   :  { %3117 = vmatmul.f32.gmra.mxu3 %v3998_v16  ;;  %3363 = vmatpush.msra.mxu1 %v4357_v27 }
 0x1d3   :  { %v2327_v13 = vpop.f32.mrf.mxu0  ;;  %v2254_v22 = vadd.f32 %v2253_v59, %v2213_v35 }
 0x1d4   :  { %v2328_v33 = vadd.f32 %v2327_v13, %v2285_v6  ;;  %v2362_v36 = vpop.f32.mrf.mxu1  ;;  %v2405_v41 = vpop.f32.mrf.mxu2 }
 0x1d5   :  { %v2456_v29 = vpop.f32.mrf.mxu3  ;;  %v2297_v48 = vadd.f32 %v2296_v5, %v2254_v22 }
 0x1d6   :  { %v2363_v45 = vadd.f32 %v2362_v36, %v2328_v33  ;;  %2998 = vmatmul.f32.gmra.mxu0 %v4008_v24 }
 0x1d7   :  { %3039 = vmatmul.f32.gmra.mxu1 %v4018_v25 }
 0x1d8   :  { %3643 = vst.msk [vmem:[%s4610_s3 + $0x48] sm:$0xff] %vm3633_vm1, %v2363_v45 }
 0x1d9   :  { %3086 = vmatmul.f32.gmra.mxu2 %v4020_v28 }
 0x1da   :  { %3121 = vmatmul.f32.gmra.mxu3 %v4020_v28 }
 0x1db   :  { %v2331_v27 = vpop.f32.mrf.mxu0 }
 0x1dc   :  { %v2332_v47 = vadd.f32 %v2331_v27, %v2291_v63  ;;  %v2366_v46 = vpop.f32.mrf.mxu1  ;;  %v2413_v56 = vpop.f32.mrf.mxu2 }
 0x1dd   :  { %v2460_v21 = vpop.f32.mrf.mxu3 }
 0x1de   :  { %v2367_v55 = vadd.f32 %v2366_v46, %v2332_v47  ;;  %3003 = vmatmul.f32.gmra.mxu0 %v4030_v34  ;;  %v2461_v9 = vadd.f32 %v2460_v21, %v2413_v56 }
 0x1df   :  { %3045 = vmatmul.f32.gmra.mxu1 %v4040_v39 }
 0x1e0   :  { %3644 = vst.msk [vmem:[%s4610_s3 + $0x50] sm:$0xff] %vm3633_vm1, %v2367_v55 }
 0x1e1   :  { %3090 = vmatmul.f32.gmra.mxu2 %v4042_v40 }
 0x1e2   :  { %3125 = vmatmul.f32.gmra.mxu3 %v4042_v40 }
 0x1e3   :  { %v2335_v12 = vpop.f32.mrf.mxu0 }
 0x1e4   :  { %v2336_v42 = vadd.f32 %v2335_v12, %v2297_v48  ;;  %v2370_v2 = vpop.f32.mrf.mxu1  ;;  %v2421_v11 = vpop.f32.mrf.mxu2 }
 0x1e5   :  { %v2464_v37 = vpop.f32.mrf.mxu3 }
 0x1e6   :  { %v2371_v30 = vadd.f32 %v2370_v2, %v2336_v42  ;;  %3008 = vmatmul.f32.gmra.mxu0 %v4050_v49  ;;  %v2465_v33 = vadd.f32 %v2464_v37, %v2421_v11 }
 0x1e7   :  { %3051 = vmatmul.f32.gmra.mxu1 %v4059_v53 }
 0x1e8   :  { %3645 = vst.msk [vmem:[%s4610_s3 + $0x58] sm:$0xff] %vm3633_vm1, %v2371_v30 }
 0x1e9   :  { %3245 = vmatmul.f32.vlgmr.msrb.gmra.mxu2 %v3985_v60 }
 0x1ea   :  { %3285 = vmatmul.f32.vlgmr.msrb.gmra.mxu3 %v3996_v19  ;;  %3576 = vmatpush.msrb.mxu2 %v3448_v17  ;;  %v2457_v17 = vadd.f32 %v2456_v29, %v2405_v41 }
 0x1eb   :  { %3613 = vmatpush.msrb.mxu3 %v4400_v58  ;;  %v2490_v59 = vpop.f32.mrf.mxu0 }
 0x1ec   :  { %v2491_v1 = vadd.f32 %v2490_v59, %v2453_v8  ;;  %3580 = vmatpush.msrb.mxu2 %v3454_v7  ;;  %v2530_v51 = vpop.f32.mrf.mxu1  ;;  %v2575_v5 = vpop.f32.mrf.mxu2 }
 0x1ed   :  { %3615 = vmatpush.msrb.mxu3 %v4405_v14  ;;  %v2610_v10 = vpop.f32.mrf.mxu3 }
 0x1ee   :  { %v2531_v44 = vadd.f32 %v2530_v51, %v2491_v1  ;;  %3152 = vmatmul.f32.vlgmr.msrb.gmra.mxu0 %v4015_v3 }
 0x1ef   :  { %3491 = vmatpush.msrb.mxu0 %v4409_v54  ;;  %3207 = vmatmul.f32.vlgmr.msrb.gmra.mxu1 %v3973_v62 }
 0x1f0   :  { %v2576_v4 = vadd.f32 %v2575_v5, %v2531_v44  ;;  %3531 = vmatpush.msrb.mxu1 %v4400_v58 }
 0x1f1   :  { %3494 = vmatpush.msrb.mxu0 %v4414_v15  ;;  %3250 = vmatmul.f32.gmra.mxu2 %v4008_v24 }
 0x1f2   :  { %v2611_v20 = vadd.f32 %v2610_v10, %v2576_v4  ;;  %3291 = vmatmul.f32.gmra.mxu3 %v4018_v25  ;;  %3533 = vmatpush.msrb.mxu1 %v4405_v14 }
 0x1f3   :  { %v2495_v7 = vpop.f32.mrf.mxu0 }
 0x1f4   :  { %3646 = vst.msk [vmem:[%s4610_s3 + $0x60] sm:$0xff] %vm3633_vm1, %v2611_v20  ;;  %v2496_v54 = vadd.f32 %v2495_v7, %v2457_v17  ;;  %v2536_v57 = vpop.f32.mrf.mxu1  ;;  %v2579_v50 = vpop.f32.mrf.mxu2 }
 0x1f5   :  { %v2614_v58 = vpop.f32.mrf.mxu3 }
 0x1f6   :  { %v2537_v15 = vadd.f32 %v2536_v57, %v2496_v54  ;;  %3160 = vmatmul.f32.gmra.mxu0 %v4037_v38 }
 0x1f7   :  { %3211 = vmatmul.f32.gmra.mxu1 %v3998_v16 }
 0x1f8   :  { %v2580_v18 = vadd.f32 %v2579_v50, %v2537_v15 }
 0x1f9   :  { %3255 = vmatmul.f32.gmra.mxu2 %v4030_v34 }
 0x1fa   :  { %v2615_v23 = vadd.f32 %v2614_v58, %v2580_v18  ;;  %3297 = vmatmul.f32.gmra.mxu3 %v4040_v39 }
 0x1fb   :  { %v2500_v14 = vpop.f32.mrf.mxu0 }
 0x1fc   :  { %3647 = vst.msk [vmem:[%s4610_s3 + $0x68] sm:$0xff] %vm3633_vm1, %v2615_v23  ;;  %v2501_v61 = vadd.f32 %v2500_v14, %v2461_v9  ;;  %v2542_v26 = vpop.f32.mrf.mxu1  ;;  %v2583_v31 = vpop.f32.mrf.mxu2 }
 0x1fd   :  { %v2618_v32 = vpop.f32.mrf.mxu3 }
 0x1fe   :  { %v2543_v6 = vadd.f32 %v2542_v26, %v2501_v61  ;;  %3168 = vmatmul.f32.gmra.mxu0 %v4056_v52 }
 0x1ff   :  { %3215 = vmatmul.f32.gmra.mxu1 %v4020_v28 }
 0x200   :  { %v2584_v13 = vadd.f32 %v2583_v31, %v2543_v6 }
 0x201   :  { %3260 = vmatmul.f32.gmra.mxu2 %v4050_v49 }
 0x202   :  { %v2619_v36 = vadd.f32 %v2618_v32, %v2584_v13  ;;  %3303 = vmatmul.f32.gmra.mxu3 %v4059_v53 }
 0x203   :  { %v2505_v41 = vpop.f32.mrf.mxu0 }
 0x204   :  { %3648 = vst.msk [vmem:[%s4610_s3 + $0x70] sm:$0xff] %vm3633_vm1, %v2619_v36  ;;  %v2506_v43 = vadd.f32 %v2505_v41, %v2465_v33  ;;  %v2548_v45 = vpop.f32.mrf.mxu1  ;;  %v2587_v29 = vpop.f32.mrf.mxu2 }
 0x205   :  { %v2622_v35 = vpop.f32.mrf.mxu3 }
 0x206   :  { %v2549_v63 = vadd.f32 %v2548_v45, %v2506_v43  ;;  %3176 = vmatmul.f32.gmra.mxu0 %v4071_v0 }
 0x207   :  { %3219 = vmatmul.f32.gmra.mxu1 %v4042_v40 }
 0x208   :  { %v2588_v27 = vadd.f32 %v2587_v29, %v2549_v63 }
 0x209   :  { %3404 = vmatmul.f32.vlgmr.msra.gmra.mxu2 %v4015_v3 }
 0x20a   :  { %v2623_v47 = vadd.f32 %v2622_v35, %v2588_v27  ;;  %3459 = vmatmul.f32.vlgmr.msra.gmra.mxu3 %v3973_v62 }
 0x20b   :  { %v2649_v46 = vpop.f32.mrf.mxu0 }
 0x20c   :  { %3649 = vst.msk [vmem:[%s4610_s3 + $0x78] sm:$0xff] %vm3633_vm1, %v2623_v47  ;;  %v2704_v56 = vpop.f32.mrf.mxu1  ;;  %v2742_v22 = vpop.f32.mrf.mxu2 }
 0x20d   :  { %v2782_v55 = vpop.f32.mrf.mxu3  ;;  %v2705_v30 = vadd.f32 %v2704_v56, %v2649_v46 }
 0x20e   :  { %3330 = vmatmul.f32.vlgmr.msra.gmra.mxu0 %v3973_v62 }
 0x20f   :  { %3365 = vmatmul.f32.vlgmr.msra.gmra.mxu1 %v3973_v62  ;;  %v2743_v1 = vadd.f32 %v2742_v22, %v2705_v30 }
 0x211   :  { %3412 = vmatmul.f32.gmra.mxu2 %v4037_v38  ;;  %v2783_v51 = vadd.f32 %v2782_v55, %v2743_v1 }
 0x212   :  { %3463 = vmatmul.f32.gmra.mxu3 %v3998_v16 }
 0x213   :  { %v2657_v3 = vpop.f32.mrf.mxu0 }
 0x214   :  { %v2708_v21 = vpop.f32.mrf.mxu1  ;;  %v2747_v48 = vpop.f32.mrf.mxu2 }
 0x215   :  { %v2788_v12 = vpop.f32.mrf.mxu3  ;;  %v2709_v5 = vadd.f32 %v2708_v21, %v2657_v3 }
 0x216   :  { %3334 = vmatmul.f32.gmra.mxu0 %v3998_v16 }
 0x217   :  { %3369 = vmatmul.f32.gmra.mxu1 %v3998_v16  ;;  %v2748_v17 = vadd.f32 %v2747_v48, %v2709_v5 }
 0x219   :  { %3420 = vmatmul.f32.gmra.mxu2 %v4056_v52  ;;  %v2789_v54 = vadd.f32 %v2788_v12, %v2748_v17 }
 0x21a   :  { %3467 = vmatmul.f32.gmra.mxu3 %v4020_v28 }
 0x21b   :  { %v2665_v42 = vpop.f32.mrf.mxu0 }
 0x21c   :  { %v2712_v2 = vpop.f32.mrf.mxu1  ;;  %v2752_v11 = vpop.f32.mrf.mxu2 }
 0x21d   :  { %v2794_v38 = vpop.f32.mrf.mxu3  ;;  %v2713_v57 = vadd.f32 %v2712_v2, %v2665_v42 }
 0x21e   :  { %3338 = vmatmul.f32.gmra.mxu0 %v4020_v28 }
 0x21f   :  { %3373 = vmatmul.f32.gmra.mxu1 %v4020_v28  ;;  %v2753_v18 = vadd.f32 %v2752_v11, %v2713_v57 }
 0x221   :  { %3428 = vmatmul.f32.gmra.mxu2 %v4071_v0 }
 0x222   :  { %3471 = vmatmul.f32.gmra.mxu3 %v4042_v40 }
 0x223   :  { %v2673_v37 = vpop.f32.mrf.mxu0 }
 0x224   :  { %v2716_v8 = vpop.f32.mrf.mxu1  ;;  %v2757_v59 = vpop.f32.mrf.mxu2 }
 0x225   :  { %v2800_v52 = vpop.f32.mrf.mxu3  ;;  %v2717_v23 = vadd.f32 %v2716_v8, %v2673_v37 }
 0x226   :  { %3342 = vmatmul.f32.gmra.mxu0 %v4042_v40 }
 0x227   :  { %3377 = vmatmul.f32.gmra.mxu1 %v4042_v40  ;;  %v2758_v31 = vadd.f32 %v2757_v59, %v2717_v23 }
 0x229   :  { %3582 = vmatmul.f32.vlgmr.msrb.gmra.mxu2 %v3973_v62 }
 0x22a   :  { %3617 = vmatmul.f32.vlgmr.msrb.gmra.mxu3 %v3973_v62 }
 0x22b   :  { %v2827_v44 = vpop.f32.mrf.mxu0 }
 0x22c   :  { %v2828_v10 = vadd.f32 %v2827_v44, %v2783_v51  ;;  %v2862_v0 = vpop.f32.mrf.mxu1  ;;  %v2901_v4 = vpop.f32.mrf.mxu2 }
 0x22d   :  { %v2956_v7 = vpop.f32.mrf.mxu3 }
 0x22e   :  { %v2863_v20 = vadd.f32 %v2862_v0, %v2828_v10  ;;  %3497 = vmatmul.f32.vlgmr.msrb.gmra.mxu0 %v3985_v60 }
 0x22f   :  { %3537 = vmatmul.f32.vlgmr.msrb.gmra.mxu1 %v3996_v19  ;;  %v2795_v19 = vadd.f32 %v2794_v38, %v2753_v18 }
 0x230   :  { %3650 = vst.msk [vmem:[%s4610_s3 + $0x80] sm:$0xff] %vm3633_vm1, %v2863_v20 }
 0x231   :  { %3586 = vmatmul.f32.gmra.mxu2 %v3998_v16 }
 0x232   :  { %3621 = vmatmul.f32.gmra.mxu3 %v3998_v16 }
 0x233   :  { %v2831_v62 = vpop.f32.mrf.mxu0 }
 0x234   :  { %v2832_v50 = vadd.f32 %v2831_v62, %v2789_v54  ;;  %v2866_v15 = vpop.f32.mrf.mxu1  ;;  %v2909_v58 = vpop.f32.mrf.mxu2 }
 0x235   :  { %v2960_v9 = vpop.f32.mrf.mxu3 }
 0x236   :  { %v2867_v60 = vadd.f32 %v2866_v15, %v2832_v50  ;;  %3502 = vmatmul.f32.gmra.mxu0 %v4008_v24  ;;  %v2961_v27 = vadd.f32 %v2960_v9, %v2909_v58 }
 0x237   :  { %3543 = vmatmul.f32.gmra.mxu1 %v4018_v25  ;;  %v2801_v25 = vadd.f32 %v2800_v52, %v2758_v31 }
 0x238   :  { %3651 = vst.msk [vmem:[%s4610_s3 + $0x88] sm:$0xff] %vm3633_vm1, %v2867_v60 }
 0x239   :  { %3590 = vmatmul.f32.gmra.mxu2 %v4020_v28 }
 0x23a   :  { %3625 = vmatmul.f32.gmra.mxu3 %v4020_v28 }
 0x23b   :  { %v2835_v16 = vpop.f32.mrf.mxu0 }
 0x23c   :  { %v2836_v14 = vadd.f32 %v2835_v16, %v2795_v19  ;;  %v2870_v61 = vpop.f32.mrf.mxu1  ;;  %v2917_v26 = vpop.f32.mrf.mxu2 }
 0x23d   :  { %v2964_v6 = vpop.f32.mrf.mxu3 }
 0x23e   :  { %v2871_v24 = vadd.f32 %v2870_v61, %v2836_v14  ;;  %3507 = vmatmul.f32.gmra.mxu0 %v4030_v34  ;;  %v2965_v21 = vadd.f32 %v2964_v6, %v2917_v26 }
 0x23f   :  { %3549 = vmatmul.f32.gmra.mxu1 %v4040_v39  ;;  %v2957_v39 = vadd.f32 %v2956_v7, %v2901_v4 }
 0x240   :  { %3652 = vst.msk [vmem:[%s4610_s3 + $0x90] sm:$0xff] %vm3633_vm1, %v2871_v24 }
 0x241   :  { %3594 = vmatmul.f32.gmra.mxu2 %v4042_v40 }
 0x242   :  { %3629 = vmatmul.f32.gmra.mxu3 %v4042_v40 }
 0x243   :  { %v2839_v28 = vpop.f32.mrf.mxu0 }
 0x244   :  { %v2840_v32 = vadd.f32 %v2839_v28, %v2801_v25  ;;  %v2874_v13 = vpop.f32.mrf.mxu1  ;;  %v2925_v33 = vpop.f32.mrf.mxu2 }
 0x245   :  { %v2968_v34 = vpop.f32.mrf.mxu3 }
 0x246   :  { %v2875_v36 = vadd.f32 %v2874_v13, %v2840_v32  ;;  %3512 = vmatmul.f32.gmra.mxu0 %v4050_v49  ;;  %v2969_v8 = vadd.f32 %v2968_v34, %v2925_v33 }
 0x247   :  { %3555 = vmatmul.f32.gmra.mxu1 %v4059_v53 }
 0x248   :  { %3653 = vst.msk [vmem:[%s4610_s3 + $0x98] sm:$0xff] %vm3633_vm1, %v2875_v36 }
 0x24b   :  { %v2994_v41 = vpop.f32.mrf.mxu0 }
 0x24c   :  { %v2995_v43 = vadd.f32 %v2994_v41, %v2957_v39  ;;  %v3034_v45 = vpop.f32.mrf.mxu1  ;;  %v3079_v40 = vpop.f32.mrf.mxu2 }
 0x24d   :  { %v3114_v63 = vpop.f32.mrf.mxu3 }
 0x24e   :  { %v3035_v29 = vadd.f32 %v3034_v45, %v2995_v43 }
 0x250   :  { %v3080_v35 = vadd.f32 %v3079_v40, %v3035_v29 }
 0x252   :  { %v3115_v47 = vadd.f32 %v3114_v63, %v3080_v35 }
 0x253   :  { %v2999_v46 = vpop.f32.mrf.mxu0 }
 0x254   :  { %3654 = vst.msk [vmem:[%s4610_s3 + $0xa0] sm:$0xff] %vm3633_vm1, %v3115_v47  ;;  %v3000_v49 = vadd.f32 %v2999_v46, %v2961_v27  ;;  %v3040_v56 = vpop.f32.mrf.mxu1  ;;  %v3083_v22 = vpop.f32.mrf.mxu2 }
 0x255   :  { %v3118_v55 = vpop.f32.mrf.mxu3 }
 0x256   :  { %v3041_v53 = vadd.f32 %v3040_v56, %v3000_v49 }
 0x258   :  { %v3084_v3 = vadd.f32 %v3083_v22, %v3041_v53 }
 0x25a   :  { %v3119_v48 = vadd.f32 %v3118_v55, %v3084_v3 }
 0x25b   :  { %v3004_v12 = vpop.f32.mrf.mxu0 }
 0x25c   :  { %3655 = vst.msk [vmem:[%s4610_s3 + $0xa8] sm:$0xff] %vm3633_vm1, %v3119_v48  ;;  %v3005_v42 = vadd.f32 %v3004_v12, %v2965_v21  ;;  %v3046_v2 = vpop.f32.mrf.mxu1  ;;  %v3087_v11 = vpop.f32.mrf.mxu2 }
 0x25d   :  { %v3122_v30 = vpop.f32.mrf.mxu3 }
 0x25e   :  { %v3047_v38 = vadd.f32 %v3046_v2, %v3005_v42 }
 0x260   :  { %v3088_v37 = vadd.f32 %v3087_v11, %v3047_v38 }
 0x262   :  { %v3123_v59 = vadd.f32 %v3122_v30, %v3088_v37 }
 0x263   :  { %v3009_v1 = vpop.f32.mrf.mxu0 }
 0x264   :  { %3656 = vst.msk [vmem:[%s4610_s3 + $0xb0] sm:$0xff] %vm3633_vm1, %v3123_v59  ;;  %v3010_v52 = vadd.f32 %v3009_v1, %v2969_v8  ;;  %v3052_v51 = vpop.f32.mrf.mxu1  ;;  %v3091_v5 = vpop.f32.mrf.mxu2 }
 0x265   :  { %v3126_v10 = vpop.f32.mrf.mxu3 }
 0x266   :  { %v3053_v44 = vadd.f32 %v3052_v51, %v3010_v52 }
 0x268   :  { %v3092_v0 = vadd.f32 %v3091_v5, %v3053_v44 }
 0x26a   :  { %v3127_v4 = vadd.f32 %v3126_v10, %v3092_v0 }
 0x26b   :  { %v3153_v17 = vpop.f32.mrf.mxu0 }
 0x26c   :  { %3657 = vst.msk [vmem:[%s4610_s3 + $0xb8] sm:$0xff] %vm3633_vm1, %v3127_v4  ;;  %v3208_v20 = vpop.f32.mrf.mxu1  ;;  %v3246_v7 = vpop.f32.mrf.mxu2 }
 0x26d   :  { %v3286_v54 = vpop.f32.mrf.mxu3  ;;  %v3209_v19 = vadd.f32 %v3208_v20, %v3153_v17 }
 0x26f   :  { %v3247_v61 = vadd.f32 %v3246_v7, %v3209_v19 }
 0x271   :  { %v3287_v31 = vadd.f32 %v3286_v54, %v3247_v61 }
 0x273   :  { %v3161_v57 = vpop.f32.mrf.mxu0 }
 0x274   :  { %v3212_v62 = vpop.f32.mrf.mxu1  ;;  %v3251_v50 = vpop.f32.mrf.mxu2 }
 0x275   :  { %v3292_v15 = vpop.f32.mrf.mxu3  ;;  %v3213_v24 = vadd.f32 %v3212_v62, %v3161_v57 }
 0x277   :  { %v3252_v13 = vadd.f32 %v3251_v50, %v3213_v24 }
 0x279   :  { %v3293_v34 = vadd.f32 %v3292_v15, %v3252_v13 }
 0x27b   :  { %v3169_v58 = vpop.f32.mrf.mxu0 }
 0x27c   :  { %v3216_v18 = vpop.f32.mrf.mxu1  ;;  %v3256_v60 = vpop.f32.mrf.mxu2 }
 0x27d   :  { %v3298_v9 = vpop.f32.mrf.mxu3  ;;  %v3217_v39 = vadd.f32 %v3216_v18, %v3169_v58 }
 0x27f   :  { %v3257_v29 = vadd.f32 %v3256_v60, %v3217_v39 }
 0x281   :  { %v3299_v27 = vadd.f32 %v3298_v9, %v3257_v29 }
 0x283   :  { %v3177_v23 = vpop.f32.mrf.mxu0 }
 0x284   :  { %v3220_v16 = vpop.f32.mrf.mxu1  ;;  %v3261_v14 = vpop.f32.mrf.mxu2 }
 0x285   :  { %v3304_v26 = vpop.f32.mrf.mxu3  ;;  %v3221_v47 = vadd.f32 %v3220_v16, %v3177_v23 }
 0x287   :  { %v3262_v53 = vadd.f32 %v3261_v14, %v3221_v47 }
 0x289   :  { %v3305_v21 = vadd.f32 %v3304_v26, %v3262_v53 }
 0x28b   :  { %v3331_v6 = vpop.f32.mrf.mxu0 }
 0x28c   :  { %v3332_v25 = vadd.f32 %v3331_v6, %v3287_v31  ;;  %v3366_v28 = vpop.f32.mrf.mxu1  ;;  %v3405_v32 = vpop.f32.mrf.mxu2 }
 0x28d   :  { %v3460_v36 = vpop.f32.mrf.mxu3 }
 0x28e   :  { %v3367_v33 = vadd.f32 %v3366_v28, %v3332_v25  ;;  %v3461_v30 = vadd.f32 %v3460_v36, %v3405_v32 }
 0x290   :  { %3658 = vst.msk [vmem:[%s4610_s3 + $0xc0] sm:$0xff] %vm3633_vm1, %v3367_v33 }
 0x293   :  { %v3335_v41 = vpop.f32.mrf.mxu0 }
 0x294   :  { %v3336_v43 = vadd.f32 %v3335_v41, %v3293_v34  ;;  %v3370_v45 = vpop.f32.mrf.mxu1  ;;  %v3413_v40 = vpop.f32.mrf.mxu2 }
 0x295   :  { %v3464_v35 = vpop.f32.mrf.mxu3 }
 0x296   :  { %v3371_v63 = vadd.f32 %v3370_v45, %v3336_v43  ;;  %v3465_v44 = vadd.f32 %v3464_v35, %v3413_v40 }
 0x298   :  { %3659 = vst.msk [vmem:[%s4610_s3 + $0xc8] sm:$0xff] %vm3633_vm1, %v3371_v63 }
 0x29b   :  { %v3339_v46 = vpop.f32.mrf.mxu0 }
 0x29c   :  { %v3340_v49 = vadd.f32 %v3339_v46, %v3299_v27  ;;  %v3374_v56 = vpop.f32.mrf.mxu1  ;;  %v3421_v22 = vpop.f32.mrf.mxu2 }
 0x29d   :  { %v3468_v3 = vpop.f32.mrf.mxu3 }
 0x29e   :  { %v3375_v55 = vadd.f32 %v3374_v56, %v3340_v49  ;;  %v3469_v62 = vadd.f32 %v3468_v3, %v3421_v22 }
 0x2a0   :  { %3660 = vst.msk [vmem:[%s4610_s3 + $0xd0] sm:$0xff] %vm3633_vm1, %v3375_v55 }
 0x2a3   :  { %v3343_v48 = vpop.f32.mrf.mxu0 }
 0x2a4   :  { %v3344_v12 = vadd.f32 %v3343_v48, %v3305_v21  ;;  %v3378_v42 = vpop.f32.mrf.mxu1  ;;  %v3429_v2 = vpop.f32.mrf.mxu2 }
 0x2a5   :  { %v3472_v38 = vpop.f32.mrf.mxu3 }
 0x2a6   :  { %v3379_v11 = vadd.f32 %v3378_v42, %v3344_v12  ;;  %v3473_v16 = vadd.f32 %v3472_v38, %v3429_v2 }
 0x2a8   :  { %3661 = vst.msk [vmem:[%s4610_s3 + $0xd8] sm:$0xff] %vm3633_vm1, %v3379_v11 }
 0x2ab   :  { %v3498_v37 = vpop.f32.mrf.mxu0 }
 0x2ac   :  { %v3499_v8 = vadd.f32 %v3498_v37, %v3461_v30  ;;  %v3538_v59 = vpop.f32.mrf.mxu1  ;;  %v3583_v1 = vpop.f32.mrf.mxu2 }
 0x2ad   :  { %v3618_v51 = vpop.f32.mrf.mxu3 }
 0x2ae   :  { %v3539_v52 = vadd.f32 %v3538_v59, %v3499_v8 }
 0x2b0   :  { %v3584_v5 = vadd.f32 %v3583_v1, %v3539_v52 }
 0x2b2   :  { %v3619_v10 = vadd.f32 %v3618_v51, %v3584_v5 }
 0x2b3   :  { %v3503_v0 = vpop.f32.mrf.mxu0 }
 0x2b4   :  { %3662 = vst.msk [vmem:[%s4610_s3 + $0xe0] sm:$0xff] %vm3633_vm1, %v3619_v10  ;;  %v3504_v4 = vadd.f32 %v3503_v0, %v3465_v44  ;;  %v3544_v17 = vpop.f32.mrf.mxu1  ;;  %v3587_v20 = vpop.f32.mrf.mxu2 }
 0x2b5   :  { %v3622_v54 = vpop.f32.mrf.mxu3 }
 0x2b6   :  { %v3545_v7 = vadd.f32 %v3544_v17, %v3504_v4 }
 0x2b8   :  { %v3588_v57 = vadd.f32 %v3587_v20, %v3545_v7 }
 0x2ba   :  { %v3623_v50 = vadd.f32 %v3622_v54, %v3588_v57 }
 0x2bb   :  { %v3508_v15 = vpop.f32.mrf.mxu0 }
 0x2bc   :  { %3663 = vst.msk [vmem:[%s4610_s3 + $0xe8] sm:$0xff] %vm3633_vm1, %v3623_v50  ;;  %v3509_v58 = vadd.f32 %v3508_v15, %v3469_v62  ;;  %v3550_v18 = vpop.f32.mrf.mxu1  ;;  %v3591_v60 = vpop.f32.mrf.mxu2 }
 0x2bd   :  { %v3626_v19 = vpop.f32.mrf.mxu3 }
 0x2be   :  { %v3551_v9 = vadd.f32 %v3550_v18, %v3509_v58 }
 0x2c0   :  { %v3592_v23 = vadd.f32 %v3591_v60, %v3551_v9 }
 0x2c2   :  { %v3627_v14 = vadd.f32 %v3626_v19, %v3592_v23 }
 0x2c3   :  { %v3513_v61 = vpop.f32.mrf.mxu0 }
 0x2c4   :  { %3664 = vst.msk [vmem:[%s4610_s3 + $0xf0] sm:$0xff] %vm3633_vm1, %v3627_v14  ;;  %v3514_v26 = vadd.f32 %v3513_v61, %v3473_v16  ;;  %v3556_v31 = vpop.f32.mrf.mxu1  ;;  %v3595_v24 = vpop.f32.mrf.mxu2 }
 0x2c5   :  { %v3630_v25 = vpop.f32.mrf.mxu3 }
 0x2c6   :  { %v3557_v6 = vadd.f32 %v3556_v31, %v3514_v26 }
 0x2c8   :  { %v3596_v28 = vadd.f32 %v3595_v24, %v3557_v6 }
 0x2ca   :  { %v3631_v32 = vadd.f32 %v3630_v25, %v3596_v28 }
 0x2cc   :  { %3665 = vst.msk [vmem:[%s4610_s3 + $0xf8] sm:$0xff] %vm3633_vm1, %v3631_v32 }

// kernel: forward.3
= control target key start
LH: loop header
LB: loop body
LE: loop exit
PB: predicated region body
PF: predicated region fallthrough
CT: control target
= control target key end

     0   :  { %vm107_vm0 = vcmask 31744   ;;  %vm117_vm1 = vcmask 1043456   ;;  %s10145_s22 = smov 33   ;;  %s10146_s23 = smov 32   ;;  %vm4482_vm10 = vcmask 1041408   ;;  %vm4658_vm14 = vcmask 15360   ;;  %s15023_s0 = inlined_call_operand.vmem [shape: f32[4,2048], index: 0, kind: input, shape index: {}]   ;;  %s15024_s2 = inlined_call_operand.vmem [shape: f32[18,4], index: 2, kind: input, shape index: {}]   ;;  %s15025_s1 = inlined_call_operand.vmem [shape: f32[9,2048], index: 1, kind: input, shape index: {}]   ;;  %s15026_s3 = inlined_call_operand.vmem [shape: f32[2,1], index: 3, kind: input, shape index: {}]   ;;  %s15027_s4 = inlined_call_operand.vmem [shape: f32[2,1], index: 4, kind: input, shape index: {}]   ;;  %s15028_s5 = inlined_call_operand.vmem [shape: f32[36,2], index: 5, kind: input, shape index: {}]   ;;  %s15029_s6 = inlined_call_operand.vmem [shape: f32[4,1], index: 6, kind: input, shape index: {}]   ;;  %s15030_s7 = inlined_call_operand.vmem [shape: f32[4,1], index: 7, kind: input, shape index: {}]   ;;  %s15031_s8 = inlined_call_operand.vmem [shape: f32[4,2048], index: 8, kind: output, shape index: {}]  }
   0x1   :  { %v61_v0 = vld [vmem:[%s15023_s0] sm:$0xff]  ;;  %v70_v2 = vld [vmem:[%s15024_s2 + $0x8] sm:$0xff]  ;;  %v71_v7 = vld [vmem:[%s15024_s2 + $0x10] sm:$0x3]  ;;  %s10147_s24 = smov 31   ;;  %s10148_s25 = smov 127  }
   0x2   :  { %v69_v1 = vld [vmem:[%s15024_s2] sm:$0xff]  ;;  %80 = vst [vmem:[#allocation1] ss:$2 sm:$0xff] %v61_v0  ;;  %v112_v4 = vsel %vm107_vm0, %v70_v2, 0  ;;  %v115_v11 = vsel %vm107_vm0, %v71_v7, 0  ;;  %v62_v37 = vld [vmem:[%s15023_s0 + $0x8] sm:$0xff] }
   0x3   :  { %v109_v3 = vsel %vm107_vm0, %v69_v1, 0  ;;  %v10210_v6 = vand.u32 4294901760, %v112_v4  ;;  %v65_v12 = vld [vmem:[%s15023_s0 + $0x20] sm:$0xff]  ;;  %v10233_v18 = vand.u32 4294901760, %v115_v11  ;;  %82 = vst [vmem:[#allocation1 + $0x10] ss:$2 sm:$0xff] %v62_v37 }
   0x4   :  { %v10208_v5 = vand.u32 4294901760, %v109_v3  ;;  %v66_v51 = vld [vmem:[%s15023_s0 + $0x28] sm:$0xff]  ;;  %v63_v53 = vld [vmem:[%s15023_s0 + $0x10] sm:$0xff]  ;;  %s10149_s28 = smov 1   ;;  %s10150_s29 = smov 95  }
   0x5   :  { %v10219_v9 = vsub.f32 %v112_v4, %v10210_v6  ;;  %v10243_v26 = vsub.f32 %v115_v11, %v10233_v18  ;;  %84 = vst [vmem:[#allocation1 + $0x20] ss:$2 sm:$0xff] %v63_v53  ;;  %s10151_s30 = smov 97   ;;  %s10152_s9 = smov 96  }
   0x6   :  { %v10216_v8 = vsub.f32 %v109_v3, %v10208_v5 }
   0x7   :  { %v10231_v17 = vand.u32 4294901760, %v10219_v9  ;;  %v10249_v32 = vand.u32 4294901760, %v10243_v26 }
   0x8   :  { %v10222_v10 = vand.u32 4294901760, %v10216_v8 }
   0x9   :  { %v87_v13 = vld.sshfl [vmem:[#allocation1] sm:$0xff pattern:$0x75316420]  ;;  %v88_v15 = vld.sshfl [vmem:[#allocation1 + $0x8] sm:$0xff pattern:$0x75316420]  ;;  %v178_v25 = vsub.f32 %v10219_v9, %v10231_v17  ;;  %v186_v35 = vsub.f32 %v10243_v26, %v10249_v32 }
   0xa   :  { %v170_v14 = vsub.f32 %v10216_v8, %v10222_v10  ;;  %v118_v16 = vsel %vm117_vm1, %v87_v13, 0  ;;  %95 = vst [vmem:[#allocation1] ss:$2 sm:$0xff] %v65_v12  ;;  %v120_v19 = vsel %vm117_vm1, %v88_v15, 0  ;;  %v67_v13 = vld [vmem:[%s15023_s0 + $0x30] sm:$0xff] }
   0xb   :  { %v165_v20 = vand.u32 4294901760, %v118_v16  ;;  %v373_v22 = vand.u32 4294901760, %v120_v19  ;;  %v10246_v31 = vand.u32 4294901760, %v178_v25  ;;  %v10257_v36 = vand.u32 4294901760, %v186_v35 }
   0xc   :  { %v10236_v21 = vand.u32 4294901760, %v170_v14  ;;  %v89_v38 = vld.sshfl [vmem:[#allocation1 + $0x10] sm:$0xff pattern:$0x75316420] }
   0xd   :  { %166 = vmatpush.msra.mxu0 %v165_v20  ;;  %v208_v23 = vsub.f32 %v118_v16, %v165_v20  ;;  %276 = vmatpush.msra.mxu3 %v165_v20  ;;  %v416_v24 = vsub.f32 %v120_v19, %v373_v22  ;;  %v122_v39 = vsel %vm117_vm1, %v89_v38, 0  ;;  %v90_v45 = vld.sshfl [vmem:[#allocation1 + $0x18] sm:$0xff pattern:$0x75316420] }
   0xe   :  { %172 = vmatmul.f32.vlgmr.msra.gmra.mxu0 %v10236_v21  ;;  %280 = vmatmul.f32.vlgmr.msra.gmra.mxu3 %v10222_v10  ;;  %v581_v40 = vand.u32 4294901760, %v122_v39  ;;  %v124_v46 = vsel %vm117_vm1, %v90_v45, 0  ;;  %96 = vst [vmem:[#allocation1 + $0x10] ss:$2 sm:$0xff] %v66_v51 }
   0xf   :  { %243 = vmatpush.msra.mxu2 %v208_v23  ;;  %v209_v27 = vand.u32 4294901760, %v208_v23  ;;  %v417_v28 = vand.u32 4294901760, %v416_v24  ;;  %v789_v47 = vand.u32 4294901760, %v124_v46  ;;  %v91_v54 = vld.sshfl [vmem:[#allocation1 + $0x20] sm:$0xff pattern:$0x75316420] }
  0x10   :  { %246 = vmatmul.f32.vlgmr.msra.gmra.mxu2 %v10216_v8  ;;  %v624_v41 = vsub.f32 %v122_v39, %v581_v40  ;;  %v126_v55 = vsel %vm117_vm1, %v91_v54, 0  ;;  %v92_v62 = vld.sshfl [vmem:[#allocation1 + $0x28] sm:$0xff pattern:$0x75316420] }
  0x11   :  { %v210_v29 = vsub.f32 %v208_v23, %v209_v27  ;;  %314 = vmatpush.msrb.mxu0 %v209_v27  ;;  %374 = vmatpush.msrb.mxu2 %v373_v22  ;;  %v418_v30 = vsub.f32 %v416_v24, %v417_v28  ;;  %v832_v48 = vsub.f32 %v124_v46, %v789_v47  ;;  %v997_v56 = vand.u32 4294901760, %v126_v55 }
  0x12   :  { %v625_v42 = vand.u32 4294901760, %v624_v41  ;;  %v128_v63 = vsel %vm117_vm1, %v92_v62, 0  ;;  %97 = vst [vmem:[#allocation1 + $0x20] ss:$2 sm:$0xff] %v67_v13 }
  0x13   :  { %451 = vmatpush.msra.mxu0 %v416_v24  ;;  %522 = vmatpush.msra.mxu2 %v417_v28  ;;  %v211_v33 = vand.u32 4294901760, %v210_v29  ;;  %v419_v34 = vand.u32 4294901760, %v418_v30  ;;  %v833_v49 = vand.u32 4294901760, %v832_v48  ;;  %v1040_v57 = vsub.f32 %v126_v55, %v997_v56  ;;  %v64_v55 = vld [vmem:[%s15023_s0 + $0x18] sm:$0xff] }
  0x14   :  { %v626_v43 = vsub.f32 %v624_v41, %v625_v42  ;;  %v1205_v0 = vand.u32 4294901760, %v128_v63  ;;  %86 = vst [vmem:[#allocation1 + $0x30] ss:$2 sm:$0xff] %v64_v55 }
  0x15   :  { %212 = vmatpush.msra.mxu1 %v211_v33  ;;  %420 = vmatpush.msrb.mxu3 %v419_v34  ;;  %v834_v50 = vsub.f32 %v832_v48, %v833_v49  ;;  %v1041_v58 = vand.u32 4294901760, %v1040_v57 }
  0x16   :  { %180 = vmatmul.f32.gmra.mxu0 %v10246_v31  ;;  %214 = vmatmul.f32.vlgmr.msra.gmra.mxu1 %v10208_v5  ;;  %v627_v44 = vand.u32 4294901760, %v626_v43  ;;  %v1248_v2 = vsub.f32 %v128_v63, %v1205_v0 }
  0x17   :  { %286 = vmatmul.f32.gmra.mxu3 %v10231_v17  ;;  %344 = vmatpush.msrb.mxu1 %v165_v20  ;;  %v835_v52 = vand.u32 4294901760, %v834_v50  ;;  %v1042_v59 = vsub.f32 %v1040_v57, %v1041_v58 }
  0x18   :  { %251 = vmatmul.f32.gmra.mxu2 %v10219_v9  ;;  %552 = vmatpush.msra.mxu3 %v373_v22  ;;  %v1249_v11 = vand.u32 4294901760, %v1248_v2 }
  0x19   :  { %484 = vmatpush.msra.mxu1 %v373_v22  ;;  %v1043_v60 = vand.u32 4294901760, %v1042_v59 }
  0x1a   :  { %v1250_v12 = vsub.f32 %v1248_v2, %v1249_v11 }
  0x1c   :  { %v1251_v14 = vand.u32 4294901760, %v1250_v12 }
  0x1e   :  { %188 = vmatmul.f32.gmra.mxu0 %v10257_v36  ;;  %218 = vmatmul.f32.gmra.mxu1 %v10210_v6 }
  0x1f   :  { %292 = vmatmul.f32.gmra.mxu3 %v10249_v32 }
  0x20   :  { %256 = vmatmul.f32.gmra.mxu2 %v10243_v26 }
  0x26   :  { %222 = vmatmul.f32.gmra.mxu1 %v10233_v18  ;;  %316 = vmatmul.f32.vlgmr.msrb.gmra.mxu0 %v10208_v5 }
  0x27   :  { %422 = vmatmul.f32.vlgmr.msrb.gmra.mxu3 %v10208_v5  ;;  %582 = vmatpush.msrb.mxu0 %v581_v40 }
  0x28   :  { %380 = vmatmul.f32.vlgmr.msrb.gmra.mxu2 %v10236_v21  ;;  %692 = vmatpush.msrb.mxu3 %v581_v40 }
  0x29   :  { %659 = vmatpush.msrb.mxu2 %v624_v41 }
  0x2e   :  { %320 = vmatmul.f32.gmra.mxu0 %v10210_v6  ;;  %346 = vmatmul.f32.vlgmr.msrb.gmra.mxu1 %v10208_v5 }
  0x2f   :  { %426 = vmatmul.f32.gmra.mxu3 %v10210_v6  ;;  %628 = vmatpush.msrb.mxu1 %v627_v44 }
  0x30   :  { %388 = vmatmul.f32.gmra.mxu2 %v10246_v31 }
  0x36   :  { %324 = vmatmul.f32.gmra.mxu0 %v10233_v18  ;;  %350 = vmatmul.f32.gmra.mxu1 %v10210_v6 }
  0x37   :  { %430 = vmatmul.f32.gmra.mxu3 %v10233_v18 }
  0x38   :  { %396 = vmatmul.f32.gmra.mxu2 %v10257_v36 }
  0x3e   :  { %354 = vmatmul.f32.gmra.mxu1 %v10233_v18  ;;  %454 = vmatmul.f32.vlgmr.msra.gmra.mxu0 %v10216_v8 }
  0x3f   :  { %554 = vmatmul.f32.vlgmr.msra.gmra.mxu3 %v10208_v5  ;;  %730 = vmatpush.msra.mxu0 %v625_v42 }
  0x40   :  { %524 = vmatmul.f32.vlgmr.msra.gmra.mxu2 %v10208_v5  ;;  %836 = vmatpush.msra.mxu3 %v835_v52 }
  0x41   :  { %790 = vmatpush.msra.mxu2 %v789_v47 }
  0x46   :  { %459 = vmatmul.f32.gmra.mxu0 %v10219_v9  ;;  %488 = vmatmul.f32.vlgmr.msra.gmra.mxu1 %v10222_v10 }
  0x47   :  { %558 = vmatmul.f32.gmra.mxu3 %v10210_v6  ;;  %760 = vmatpush.msra.mxu1 %v581_v40 }
  0x48   :  { %528 = vmatmul.f32.gmra.mxu2 %v10210_v6 }
  0x4e   :  { %464 = vmatmul.f32.gmra.mxu0 %v10243_v26  ;;  %494 = vmatmul.f32.gmra.mxu1 %v10231_v17 }
  0x4f   :  { %562 = vmatmul.f32.gmra.mxu3 %v10233_v18 }
  0x50   :  { %532 = vmatmul.f32.gmra.mxu2 %v10233_v18 }
  0x56   :  { %500 = vmatmul.f32.gmra.mxu1 %v10249_v32  ;;  %588 = vmatmul.f32.vlgmr.msrb.gmra.mxu0 %v10236_v21 }
  0x57   :  { %696 = vmatmul.f32.vlgmr.msrb.gmra.mxu3 %v10222_v10  ;;  %867 = vmatpush.msrb.mxu0 %v832_v48 }
  0x58   :  { %662 = vmatmul.f32.vlgmr.msrb.gmra.mxu2 %v10216_v8  ;;  %968 = vmatpush.msrb.mxu3 %v789_v47 }
  0x59   :  { %938 = vmatpush.msrb.mxu2 %v833_v49 }
  0x5e   :  { %596 = vmatmul.f32.gmra.mxu0 %v10246_v31  ;;  %630 = vmatmul.f32.vlgmr.msrb.gmra.mxu1 %v10208_v5 }
  0x5f   :  { %702 = vmatmul.f32.gmra.mxu3 %v10231_v17  ;;  %900 = vmatpush.msrb.mxu1 %v789_v47 }
  0x60   :  { %667 = vmatmul.f32.gmra.mxu2 %v10219_v9 }
  0x66   :  { %604 = vmatmul.f32.gmra.mxu0 %v10257_v36  ;;  %634 = vmatmul.f32.gmra.mxu1 %v10210_v6 }
  0x67   :  { %708 = vmatmul.f32.gmra.mxu3 %v10249_v32 }
  0x68   :  { %672 = vmatmul.f32.gmra.mxu2 %v10243_v26 }
  0x6e   :  { %638 = vmatmul.f32.gmra.mxu1 %v10233_v18  ;;  %732 = vmatmul.f32.vlgmr.msra.gmra.mxu0 %v10208_v5 }
  0x6f   :  { %838 = vmatmul.f32.vlgmr.msra.gmra.mxu3 %v10208_v5  ;;  %998 = vmatpush.msra.mxu0 %v997_v56 }
  0x70   :  { %796 = vmatmul.f32.vlgmr.msra.gmra.mxu2 %v10236_v21  ;;  %1108 = vmatpush.msra.mxu3 %v997_v56 }
  0x71   :  { %1075 = vmatpush.msra.mxu2 %v1040_v57 }
  0x76   :  { %736 = vmatmul.f32.gmra.mxu0 %v10210_v6  ;;  %762 = vmatmul.f32.vlgmr.msra.gmra.mxu1 %v10208_v5 }
  0x77   :  { %842 = vmatmul.f32.gmra.mxu3 %v10210_v6  ;;  %1044 = vmatpush.msra.mxu1 %v1043_v60 }
  0x78   :  { %804 = vmatmul.f32.gmra.mxu2 %v10246_v31 }
  0x7e   :  { %740 = vmatmul.f32.gmra.mxu0 %v10233_v18  ;;  %766 = vmatmul.f32.gmra.mxu1 %v10210_v6 }
  0x7f   :  { %846 = vmatmul.f32.gmra.mxu3 %v10233_v18 }
  0x80   :  { %812 = vmatmul.f32.gmra.mxu2 %v10257_v36 }
  0x86   :  { %770 = vmatmul.f32.gmra.mxu1 %v10233_v18  ;;  %870 = vmatmul.f32.vlgmr.msrb.gmra.mxu0 %v10216_v8 }
  0x87   :  { %970 = vmatmul.f32.vlgmr.msrb.gmra.mxu3 %v10208_v5  ;;  %1146 = vmatpush.msrb.mxu0 %v1041_v58 }
  0x88   :  { %940 = vmatmul.f32.vlgmr.msrb.gmra.mxu2 %v10208_v5  ;;  %1252 = vmatpush.msrb.mxu3 %v1251_v14 }
  0x89   :  { %1206 = vmatpush.msrb.mxu2 %v1205_v0 }
  0x8b   :  { %v173_v61 = vpop.f32.mrf.mxu0 }
  0x8e   :  { %875 = vmatmul.f32.gmra.mxu0 %v10219_v9  ;;  %904 = vmatmul.f32.vlgmr.msrb.gmra.mxu1 %v10222_v10 }
  0x8f   :  { %974 = vmatmul.f32.gmra.mxu3 %v10210_v6  ;;  %1176 = vmatpush.msrb.mxu1 %v997_v56 }
  0x90   :  { %944 = vmatmul.f32.gmra.mxu2 %v10210_v6 }
  0x91   :  { %v281_v1 = vpop.f32.mrf.mxu3 }
  0x93   :  { %v181_v3 = vpop.f32.mrf.mxu0  ;;  %v215_v4 = vpop.f32.mrf.mxu1 }
  0x94   :  { %v247_v7 = vpop.f32.mrf.mxu2  ;;  %v216_v22 = vadd.f32 %v215_v4, %v173_v61 }
  0x96   :  { %880 = vmatmul.f32.gmra.mxu0 %v10243_v26  ;;  %910 = vmatmul.f32.gmra.mxu1 %v10231_v17  ;;  %v248_v27 = vadd.f32 %v247_v7, %v216_v22 }
  0x97   :  { %978 = vmatmul.f32.gmra.mxu3 %v10233_v18 }
  0x98   :  { %948 = vmatmul.f32.gmra.mxu2 %v10233_v18  ;;  %v282_v29 = vadd.f32 %v281_v1, %v248_v27  ;;  %v93_v1 = vld.sshfl [vmem:[#allocation1 + $0x30] sm:$0xff pattern:$0x75316420] }
  0x99   :  { %v130_v4 = vsel %vm117_vm1, %v93_v1, 0 }
  0x9a   :  { %v287_v15 = vpop.f32.mrf.mxu3  ;;  %v1413_v12 = vand.u32 4294901760, %v130_v4 }
  0x9b   :  { %v189_v16 = vpop.f32.mrf.mxu0  ;;  %v219_v19 = vpop.f32.mrf.mxu1 }
  0x9c   :  { %v252_v20 = vpop.f32.mrf.mxu2  ;;  %v220_v30 = vadd.f32 %v219_v19, %v181_v3 }
  0x9e   :  { %916 = vmatmul.f32.gmra.mxu1 %v10249_v32  ;;  %1004 = vmatmul.f32.vlgmr.msra.gmra.mxu0 %v10236_v21  ;;  %v253_v38 = vadd.f32 %v252_v20, %v220_v30 }
  0x9f   :  { %1112 = vmatmul.f32.vlgmr.msra.gmra.mxu3 %v10222_v10  ;;  %1283 = vmatpush.msra.mxu0 %v1248_v2 }
  0xa0   :  { %1078 = vmatmul.f32.vlgmr.msra.gmra.mxu2 %v10216_v8  ;;  %1384 = vmatpush.msra.mxu3 %v1205_v0  ;;  %v288_v42 = vadd.f32 %v287_v15, %v253_v38  ;;  %v1456_v15 = vsub.f32 %v130_v4, %v1413_v12 }
  0xa1   :  { %1354 = vmatpush.msra.mxu2 %v1249_v11 }
  0xa2   :  { %v293_v23 = vpop.f32.mrf.mxu3  ;;  %v1457_v20 = vand.u32 4294901760, %v1456_v15 }
  0xa3   :  { %v223_v24 = vpop.f32.mrf.mxu1  ;;  %v317_v25 = vpop.f32.mrf.mxu0 }
  0xa4   :  { %v257_v28 = vpop.f32.mrf.mxu2  ;;  %v318_v33 = vadd.f32 %v317_v25, %v282_v29  ;;  %v224_v43 = vadd.f32 %v223_v24, %v189_v16  ;;  %v1458_v27 = vsub.f32 %v1456_v15, %v1457_v20 }
  0xa6   :  { %1012 = vmatmul.f32.gmra.mxu0 %v10246_v31  ;;  %1046 = vmatmul.f32.vlgmr.msra.gmra.mxu1 %v10208_v5  ;;  %v258_v51 = vadd.f32 %v257_v28, %v224_v43 }
  0xa7   :  { %1118 = vmatmul.f32.gmra.mxu3 %v10231_v17  ;;  %1316 = vmatpush.msra.mxu1 %v1205_v0 }
  0xa8   :  { %1083 = vmatmul.f32.gmra.mxu2 %v10219_v9  ;;  %v294_v53 = vadd.f32 %v293_v23, %v258_v51 }
  0xaa   :  { %v423_v34 = vpop.f32.mrf.mxu3 }
  0xab   :  { %v321_v35 = vpop.f32.mrf.mxu0  ;;  %v347_v37 = vpop.f32.mrf.mxu1 }
  0xac   :  { %v348_v39 = vadd.f32 %v347_v37, %v318_v33  ;;  %v381_v40 = vpop.f32.mrf.mxu2  ;;  %v322_v44 = vadd.f32 %v321_v35, %v288_v42 }
  0xad   :  { %v424_v62 = vadd.f32 %v423_v34, %v381_v40  ;;  %v1459_v34 = vand.u32 4294901760, %v1458_v27 }
  0xae   :  { %1020 = vmatmul.f32.gmra.mxu0 %v10257_v36  ;;  %1050 = vmatmul.f32.gmra.mxu1 %v10210_v6  ;;  %v3593_v41 = vrot.slane %v348_v39, 2  ;;  %v3722_v50 = vrot.slane %v348_v39, 4  ;;  %v3851_v60 = vrot.slane %v348_v39, 6 }
  0xaf   :  { %3478 = vrot.lane.b32.xlu0 %v348_v39, %s10145_s22  ;;  %1124 = vmatmul.f32.gmra.mxu3 %v10249_v32 }
  0xb0   :  { %3625 = vrot.lane.b32.xlu2 %v3593_v41, %s10146_s23  ;;  %1088 = vmatmul.f32.gmra.mxu2 %v10243_v26 }
  0xb2   :  { %v427_v45 = vpop.f32.mrf.mxu3 }
  0xb3   :  { %v325_v46 = vpop.f32.mrf.mxu0  ;;  %v351_v47 = vpop.f32.mrf.mxu1 }
  0xb4   :  { %v10353_v48 = vadd.f32 %v351_v47, %v322_v44  ;;  %v389_v49 = vpop.f32.mrf.mxu2  ;;  %v326_v58 = vadd.f32 %v325_v46, %v294_v53 }
  0xb5   :  { %v428_v16 = vadd.f32 %v427_v45, %v389_v49 }
  0xb6   :  { %15302 = vst [vmem:[#allocation2_spill] sm:$0xff] %v10353_v48  ;;  %1054 = vmatmul.f32.gmra.mxu1 %v10233_v18  ;;  %1148 = vmatmul.f32.vlgmr.msrb.gmra.mxu0 %v10208_v5  ;;  %v3996_v52 = vrot.slane %v10353_v48, 2  ;;  %v4125_v13 = vrot.slane %v10353_v48, 4  ;;  %v4254_v35 = vrot.slane %v10353_v48, 6 }
  0xb7   :  { %3754 = vrot.lane.b32.xlu0 %v3722_v50, %s10147_s24  ;;  %1254 = vmatmul.f32.vlgmr.msrb.gmra.mxu3 %v10208_v5  ;;  %v94_v50 = vld.sshfl [vmem:[#allocation1 + $0x38] sm:$0xff pattern:$0x75316420] }
  0xb8   :  { %4028 = vrot.lane.b32.xlu1 %v3996_v52, %s10148_s25  ;;  %1212 = vmatmul.f32.vlgmr.msrb.gmra.mxu2 %v10236_v21  ;;  %v132_v51 = vsel %vm117_vm1, %v94_v50, 0 }
  0xb9   :  { %1414 = vmatpush.msrb.mxu0 %v1413_v12  ;;  %1491 = vmatpush.msrb.mxu2 %v1456_v15  ;;  %v1621_v52 = vand.u32 4294901760, %v132_v51 }
  0xba   :  { %v431_v54 = vpop.f32.mrf.mxu3  ;;  %1524 = vmatpush.msrb.mxu3 %v1413_v12 }
  0xbb   :  { %v355_v56 = vpop.f32.mrf.mxu1  ;;  %v455_v57 = vpop.f32.mrf.mxu0 }
  0xbc   :  { %v397_v59 = vpop.f32.mrf.mxu2  ;;  %v356_v61 = vadd.f32 %v355_v56, %v326_v58  ;;  %v456_v63 = vadd.f32 %v455_v57, %v424_v62  ;;  %v1664_v56 = vsub.f32 %v132_v51, %v1621_v52  ;;  %v68_v62 = vld [vmem:[%s15023_s0 + $0x38] sm:$0xff] }
  0xbd   :  { %v432_v38 = vadd.f32 %v431_v54, %v397_v59  ;;  %98 = vst [vmem:[#allocation1 + $0x30] ss:$2 sm:$0xff] %v68_v62 }
  0xbe   :  { %1152 = vmatmul.f32.gmra.mxu0 %v10210_v6  ;;  %1178 = vmatmul.f32.vlgmr.msrb.gmra.mxu1 %v10208_v5 }
  0xbf   :  { %3883 = vrot.lane.b32.xlu0 %v3851_v60, %s10149_s28  ;;  %1258 = vmatmul.f32.gmra.mxu3 %v10210_v6  ;;  %v1665_v60 = vand.u32 4294901760, %v1664_v56 }
  0xc0   :  { %4383 = vrot.lane.b32.xlu1 %v356_v61, %s10150_s29  ;;  %1220 = vmatmul.f32.gmra.mxu2 %v10246_v31 }
  0xc1   :  { %1460 = vmatpush.msrb.mxu1 %v1459_v34  ;;  %v1666_v61 = vsub.f32 %v1664_v56, %v1665_v60 }
  0xc2   :  { %v555_v0 = vpop.f32.mrf.mxu3 }
  0xc3   :  { %v460_v2 = vpop.f32.mrf.mxu0  ;;  %v489_v3 = vpop.f32.mrf.mxu1 }
  0xc4   :  { %v490_v7 = vadd.f32 %v489_v3, %v456_v63  ;;  %v525_v11 = vpop.f32.mrf.mxu2  ;;  %v461_v22 = vadd.f32 %v460_v2, %v428_v16  ;;  %v1667_v63 = vand.u32 4294901760, %v1666_v61 }
  0xc6   :  { %v526_v14 = vadd.f32 %v525_v11, %v490_v7  ;;  %1156 = vmatmul.f32.gmra.mxu0 %v10233_v18  ;;  %1182 = vmatmul.f32.gmra.mxu1 %v10210_v6 }
  0xc7   :  { %4157 = vrot.lane.b32.xlu0 %v4125_v13, %s10151_s30  ;;  %1262 = vmatmul.f32.gmra.mxu3 %v10233_v18 }
  0xc8   :  { %v556_v19 = vadd.f32 %v555_v0, %v526_v14  ;;  %1228 = vmatmul.f32.gmra.mxu2 %v10257_v36 }
  0xca   :  { %v3594_v23 = vrot.slane %v556_v19, 2  ;;  %v3723_v24 = vrot.slane %v556_v19, 4  ;;  %v559_v25 = vpop.f32.mrf.mxu3  ;;  %v3852_v42 = vrot.slane %v556_v19, 6 }
  0xcb   :  { %v465_v28 = vpop.f32.mrf.mxu0  ;;  %v495_v29 = vpop.f32.mrf.mxu1 }
  0xcc   :  { %v496_v30 = vadd.f32 %v495_v29, %v461_v22  ;;  %3627 = vrot.lane.b32.xlu2 %v3594_v23, %s10146_s23  ;;  %3756 = vrot.lane.b32.xlu1 %v3723_v24, %s10147_s24  ;;  %v529_v33 = vpop.f32.mrf.mxu2  ;;  %v466_v40 = vadd.f32 %v465_v28, %v432_v38 }
  0xce   :  { %v530_v37 = vadd.f32 %v529_v33, %v496_v30  ;;  %1186 = vmatmul.f32.gmra.mxu1 %v10233_v18  ;;  %1286 = vmatmul.f32.vlgmr.msra.gmra.mxu0 %v10216_v8 }
  0xcf   :  { %4286 = vrot.lane.b32.xlu0 %v4254_v35, %s10152_s9  ;;  %1386 = vmatmul.f32.vlgmr.msra.gmra.mxu3 %v10208_v5 }
  0xd0   :  { %v10385_v39 = vadd.f32 %v559_v25, %v530_v37  ;;  %1356 = vmatmul.f32.vlgmr.msra.gmra.mxu2 %v10208_v5  ;;  %1562 = vmatpush.msra.mxu0 %v1457_v20 }
  0xd1   :  { %1622 = vmatpush.msra.mxu2 %v1621_v52  ;;  %1668 = vmatpush.msra.mxu3 %v1667_v63 }
  0xd2   :  { %v3997_v41 = vrot.slane %v10385_v39, 2  ;;  %v563_v43 = vpop.f32.mrf.mxu3  ;;  %v4126_v54 = vrot.slane %v10385_v39, 4  ;;  %v4255_v0 = vrot.slane %v10385_v39, 6 }
  0xd3   :  { %v501_v44 = vpop.f32.mrf.mxu1  ;;  %v589_v45 = vpop.f32.mrf.mxu0 }
  0xd4   :  { %v502_v46 = vadd.f32 %v501_v44, %v466_v40  ;;  %4030 = vrot.lane.b32.xlu2 %v3997_v41, %s10148_s25  ;;  %3885 = vrot.lane.b32.xlu1 %v3852_v42, %s10149_s28  ;;  %v533_v47 = vpop.f32.mrf.mxu2 }
  0xd6   :  { %v534_v49 = vadd.f32 %v533_v47, %v502_v46  ;;  %1291 = vmatmul.f32.gmra.mxu0 %v10219_v9  ;;  %1320 = vmatmul.f32.vlgmr.msra.gmra.mxu1 %v10222_v10 }
  0xd7   :  { %3480 = vrot.lane.b32.xlu0 %v556_v19, %s10145_s22  ;;  %1390 = vmatmul.f32.gmra.mxu3 %v10210_v6 }
  0xd8   :  { %1360 = vmatmul.f32.gmra.mxu2 %v10210_v6  ;;  %1592 = vmatpush.msra.mxu1 %v1413_v12  ;;  %v564_v53 = vadd.f32 %v563_v43, %v534_v49 }
  0xda   :  { %v697_v55 = vpop.f32.mrf.mxu3 }
  0xdb   :  { %v597_v57 = vpop.f32.mrf.mxu0  ;;  %v631_v58 = vpop.f32.mrf.mxu1 }
  0xdc   :  { %4385 = vrot.lane.b32.xlu2 %v564_v53, %s10150_s29  ;;  %4159 = vrot.lane.b32.xlu1 %v4126_v54, %s10151_s30  ;;  %v663_v59 = vpop.f32.mrf.mxu2  ;;  %v632_v7 = vadd.f32 %v631_v58, %v589_v45  ;;  %v99_v58 = vld.sshfl [vmem:[#allocation1] sm:$0xff pattern:$0x75316420] }
  0xdd   :  { %v134_v61 = vsel %vm117_vm1, %v99_v58, 0 }
  0xde   :  { %1296 = vmatmul.f32.gmra.mxu0 %v10243_v26  ;;  %1326 = vmatmul.f32.gmra.mxu1 %v10231_v17  ;;  %v664_v14 = vadd.f32 %v663_v59, %v632_v7 }
  0xdf   :  { %1394 = vmatmul.f32.gmra.mxu3 %v10233_v18 }
  0xe0   :  { %1364 = vmatmul.f32.gmra.mxu2 %v10233_v18  ;;  %v698_v16 = vadd.f32 %v697_v55, %v664_v14 }
  0xe2   :  { %v703_v1 = vpop.f32.mrf.mxu3 }
  0xe3   :  { %v605_v2 = vpop.f32.mrf.mxu0  ;;  %v635_v3 = vpop.f32.mrf.mxu1 }
  0xe4   :  { %4288 = vrot.lane.b32.xlu1 %v4255_v0, %s10152_s9  ;;  %v668_v4 = vpop.f32.mrf.mxu2  ;;  %v636_v19 = vadd.f32 %v635_v3, %v597_v57  ;;  %v1829_v0 = vand.u32 4294901760, %v134_v61 }
  0xe6   :  { %1332 = vmatmul.f32.gmra.mxu1 %v10249_v32  ;;  %1420 = vmatmul.f32.vlgmr.msrb.gmra.mxu0 %v10236_v21  ;;  %v669_v25 = vadd.f32 %v668_v4, %v636_v19  ;;  %v1872_v3 = vsub.f32 %v134_v61, %v1829_v0 }
  0xe7   :  { %1528 = vmatmul.f32.vlgmr.msrb.gmra.mxu3 %v10222_v10  ;;  %1699 = vmatpush.msrb.mxu0 %v1664_v56 }
  0xe8   :  { %1494 = vmatmul.f32.vlgmr.msrb.gmra.mxu2 %v10216_v8  ;;  %1800 = vmatpush.msrb.mxu3 %v1621_v52  ;;  %v704_v33 = vadd.f32 %v703_v1, %v669_v25 }
  0xe9   :  { %1770 = vmatpush.msrb.mxu2 %v1665_v60 }
  0xea   :  { %v709_v11 = vpop.f32.mrf.mxu3 }
  0xeb   :  { %v639_v12 = vpop.f32.mrf.mxu1  ;;  %v733_v13 = vpop.f32.mrf.mxu0 }
  0xec   :  { %v673_v15 = vpop.f32.mrf.mxu2  ;;  %v734_v20 = vadd.f32 %v733_v13, %v698_v16  ;;  %v640_v34 = vadd.f32 %v639_v12, %v605_v2 }
  0xee   :  { %1428 = vmatmul.f32.gmra.mxu0 %v10246_v31  ;;  %1462 = vmatmul.f32.vlgmr.msrb.gmra.mxu1 %v10208_v5  ;;  %v674_v43 = vadd.f32 %v673_v15, %v640_v34 }
  0xef   :  { %1534 = vmatmul.f32.gmra.mxu3 %v10231_v17  ;;  %1732 = vmatpush.msrb.mxu1 %v1621_v52 }
  0xf0   :  { %1499 = vmatmul.f32.gmra.mxu2 %v10219_v9  ;;  %v710_v46 = vadd.f32 %v709_v11, %v674_v43  ;;  %v1873_v11 = vand.u32 4294901760, %v1872_v3 }
  0xf2   :  { %v839_v22 = vpop.f32.mrf.mxu3  ;;  %v1874_v14 = vsub.f32 %v1872_v3, %v1873_v11 }
  0xf3   :  { %v737_v23 = vpop.f32.mrf.mxu0  ;;  %v763_v24 = vpop.f32.mrf.mxu1 }
  0xf4   :  { %v764_v27 = vadd.f32 %v763_v24, %v734_v20  ;;  %v797_v28 = vpop.f32.mrf.mxu2  ;;  %v738_v35 = vadd.f32 %v737_v23, %v704_v33 }
  0xf5   :  { %v840_v55 = vadd.f32 %v839_v22, %v797_v28  ;;  %v1875_v22 = vand.u32 4294901760, %v1874_v14 }
  0xf6   :  { %1436 = vmatmul.f32.gmra.mxu0 %v10257_v36  ;;  %1466 = vmatmul.f32.gmra.mxu1 %v10210_v6  ;;  %v3853_v29 = vrot.slane %v764_v27, 6  ;;  %v3595_v30 = vrot.slane %v764_v27, 2  ;;  %v3724_v45 = vrot.slane %v764_v27, 4 }
  0xf7   :  { %3482 = vrot.lane.b32.xlu1 %v764_v27, %s10145_s22  ;;  %1540 = vmatmul.f32.gmra.mxu3 %v10249_v32 }
  0xf8   :  { %3887 = vrot.lane.b32.xlu0 %v3853_v29, %s10149_s28  ;;  %3629 = vrot.lane.b32.xlu2 %v3595_v30, %s10146_s23 }
  0xf9   :  { %1504 = vmatmul.f32.gmra.mxu2 %v10243_v26 }
  0xfa   :  { %v843_v37 = vpop.f32.mrf.mxu3 }
  0xfb   :  { %v741_v38 = vpop.f32.mrf.mxu0  ;;  %v767_v40 = vpop.f32.mrf.mxu1 }
  0xfc   :  { %v10424_v41 = vadd.f32 %v767_v40, %v738_v35  ;;  %v805_v42 = vpop.f32.mrf.mxu2  ;;  %v742_v51 = vadd.f32 %v741_v38, %v710_v46 }
  0xfd   :  { %v844_v4 = vadd.f32 %v843_v37, %v805_v42  ;;  %v100_v37 = vld.sshfl [vmem:[#allocation1 + $0x8] sm:$0xff pattern:$0x75316420] }
  0xfe   :  { %15303 = vst [vmem:[#allocation3_spill] sm:$0xff] %v10424_v41  ;;  %1470 = vmatmul.f32.gmra.mxu1 %v10233_v18  ;;  %1564 = vmatmul.f32.vlgmr.msra.gmra.mxu0 %v10208_v5  ;;  %v3998_v44 = vrot.slane %v10424_v41, 2  ;;  %v4127_v54 = vrot.slane %v10424_v41, 4  ;;  %v4256_v2 = vrot.slane %v10424_v41, 6  ;;  %v136_v38 = vsel %vm117_vm1, %v100_v37, 0 }
  0xff   :  { %1670 = vmatmul.f32.vlgmr.msra.gmra.mxu3 %v10208_v5  ;;  %1830 = vmatpush.msra.mxu0 %v1829_v0  ;;  %v2037_v42 = vand.u32 4294901760, %v136_v38 }
 0x100   :  { %4032 = vrot.lane.b32.xlu0 %v3998_v44, %s10148_s25  ;;  %3758 = vrot.lane.b32.xlu2 %v3724_v45, %s10147_s24 }
 0x101   :  { %1628 = vmatmul.f32.vlgmr.msra.gmra.mxu2 %v10236_v21  ;;  %1940 = vmatpush.msra.mxu3 %v1829_v0  ;;  %v2080_v45 = vsub.f32 %v136_v38, %v2037_v42 }
 0x102   :  { %v10433_v47 = vpop.f32.mrf.mxu3  ;;  %1907 = vmatpush.msra.mxu2 %v1872_v3 }
 0x103   :  { %v771_v49 = vpop.f32.mrf.mxu1  ;;  %v871_v50 = vpop.f32.mrf.mxu0 }
 0x104   :  { %v10435_v52 = vpop.f32.mrf.mxu2  ;;  %v772_v53 = vadd.f32 %v771_v49, %v742_v51  ;;  %v872_v56 = vadd.f32 %v871_v50, %v840_v55 }
 0x105   :  { %v848_v43 = vadd.f32 %v10433_v47, %v10435_v52 }
 0x106   :  { %1568 = vmatmul.f32.gmra.mxu0 %v10210_v6  ;;  %1594 = vmatmul.f32.vlgmr.msra.gmra.mxu1 %v10208_v5 }
 0x107   :  { %1674 = vmatmul.f32.gmra.mxu3 %v10210_v6  ;;  %1876 = vmatpush.msra.mxu1 %v1875_v22 }
 0x108   :  { %4387 = vrot.lane.b32.xlu0 %v772_v53, %s10150_s29  ;;  %4161 = vrot.lane.b32.xlu2 %v4127_v54, %s10151_s30  ;;  %v2081_v53 = vand.u32 4294901760, %v2080_v45 }
 0x109   :  { %1636 = vmatmul.f32.gmra.mxu2 %v10246_v31 }
 0x10a   :  { %v971_v57 = vpop.f32.mrf.mxu3 }
 0x10b   :  { %v876_v59 = vpop.f32.mrf.mxu0  ;;  %v905_v60 = vpop.f32.mrf.mxu1 }
 0x10c   :  { %v906_v62 = vadd.f32 %v905_v60, %v872_v56  ;;  %v941_v63 = vpop.f32.mrf.mxu2  ;;  %v877_v12 = vadd.f32 %v876_v59, %v844_v4  ;;  %v2082_v56 = vsub.f32 %v2080_v45, %v2081_v53 }
 0x10e   :  { %v942_v1 = vadd.f32 %v941_v63, %v906_v62  ;;  %1572 = vmatmul.f32.gmra.mxu0 %v10233_v18  ;;  %1598 = vmatmul.f32.gmra.mxu1 %v10210_v6  ;;  %v2083_v47 = vand.u32 4294901760, %v2082_v56 }
 0x10f   :  { %1678 = vmatmul.f32.gmra.mxu3 %v10233_v18 }
 0x110   :  { %v972_v7 = vadd.f32 %v971_v57, %v942_v1  ;;  %4290 = vrot.lane.b32.xlu2 %v4256_v2, %s10152_s9 }
 0x111   :  { %1644 = vmatmul.f32.gmra.mxu2 %v10257_v36 }
 0x112   :  { %3484 = vrot.lane.b32.xlu1 %v972_v7, %s10145_s22  ;;  %v975_v13 = vpop.f32.mrf.mxu3  ;;  %v3725_v24 = vrot.slane %v972_v7, 4  ;;  %v3596_v27 = vrot.slane %v972_v7, 2  ;;  %v3854_v40 = vrot.slane %v972_v7, 6 }
 0x113   :  { %v881_v15 = vpop.f32.mrf.mxu0  ;;  %v911_v16 = vpop.f32.mrf.mxu1 }
 0x114   :  { %v912_v19 = vadd.f32 %v911_v16, %v877_v12  ;;  %v945_v20 = vpop.f32.mrf.mxu2  ;;  %v882_v50 = vadd.f32 %v881_v15, %v848_v43 }
 0x116   :  { %v946_v23 = vadd.f32 %v945_v20, %v912_v19  ;;  %1602 = vmatmul.f32.gmra.mxu1 %v10233_v18  ;;  %1702 = vmatmul.f32.vlgmr.msrb.gmra.mxu0 %v10216_v8 }
 0x117   :  { %1802 = vmatmul.f32.vlgmr.msrb.gmra.mxu3 %v10208_v5  ;;  %1978 = vmatpush.msrb.mxu0 %v1873_v11 }
 0x118   :  { %v10455_v25 = vadd.f32 %v975_v13, %v946_v23  ;;  %3760 = vrot.lane.b32.xlu2 %v3725_v24, %s10147_s24  ;;  %2084 = vmatpush.msrb.mxu3 %v2083_v47 }
 0x119   :  { %1772 = vmatmul.f32.vlgmr.msrb.gmra.mxu2 %v10208_v5 }
 0x11a   :  { %15304 = vst [vmem:[#allocation4_spill] sm:$0xff] %v10455_v25  ;;  %3631 = vrot.lane.b32.xlu1 %v3596_v27, %s10146_s23  ;;  %v4257_v28 = vrot.slane %v10455_v25, 6  ;;  %v979_v29 = vpop.f32.mrf.mxu3  ;;  %v3999_v35 = vrot.slane %v10455_v25, 2  ;;  %2038 = vmatpush.msrb.mxu2 %v2037_v42  ;;  %v4128_v55 = vrot.slane %v10455_v25, 4 }
 0x11b   :  { %v917_v30 = vpop.f32.mrf.mxu1  ;;  %v1005_v33 = vpop.f32.mrf.mxu0 }
 0x11c   :  { %4292 = vrot.lane.b32.xlu0 %v4257_v28, %s10152_s9  ;;  %v949_v34 = vpop.f32.mrf.mxu2  ;;  %v918_v54 = vadd.f32 %v917_v30, %v882_v50 }
 0x11e   :  { %1707 = vmatmul.f32.gmra.mxu0 %v10219_v9  ;;  %1736 = vmatmul.f32.vlgmr.msrb.gmra.mxu1 %v10222_v10  ;;  %v950_v52 = vadd.f32 %v949_v34, %v918_v54  ;;  %v101_v54 = vld.sshfl [vmem:[#allocation1 + $0x10] sm:$0xff pattern:$0x75316420] }
 0x11f   :  { %1806 = vmatmul.f32.gmra.mxu3 %v10210_v6  ;;  %2008 = vmatpush.msrb.mxu1 %v1829_v0 }
 0x120   :  { %4034 = vrot.lane.b32.xlu2 %v3999_v35, %s10148_s25  ;;  %v980_v61 = vadd.f32 %v979_v29, %v950_v52 }
 0x121   :  { %1776 = vmatmul.f32.gmra.mxu2 %v10210_v6 }
 0x122   :  { %3889 = vrot.lane.b32.xlu1 %v3854_v40, %s10149_s28  ;;  %v1113_v44 = vpop.f32.mrf.mxu3 }
 0x123   :  { %v1013_v46 = vpop.f32.mrf.mxu0  ;;  %v1047_v49 = vpop.f32.mrf.mxu1 }
 0x124   :  { %v1079_v51 = vpop.f32.mrf.mxu2  ;;  %v1048_v62 = vadd.f32 %v1047_v49, %v1005_v33 }
 0x126   :  { %1712 = vmatmul.f32.gmra.mxu0 %v10243_v26  ;;  %1742 = vmatmul.f32.gmra.mxu1 %v10231_v17  ;;  %v1080_v2 = vadd.f32 %v1079_v51, %v1048_v62 }
 0x127   :  { %1810 = vmatmul.f32.gmra.mxu3 %v10233_v18 }
 0x128   :  { %4163 = vrot.lane.b32.xlu2 %v4128_v55, %s10151_s30  ;;  %v1114_v4 = vadd.f32 %v1113_v44, %v1080_v2 }
 0x129   :  { %1780 = vmatmul.f32.gmra.mxu2 %v10233_v18 }
 0x12a   :  { %v1119_v57 = vpop.f32.mrf.mxu3 }
 0x12b   :  { %v1021_v58 = vpop.f32.mrf.mxu0  ;;  %v1051_v59 = vpop.f32.mrf.mxu1 }
 0x12c   :  { %v1084_v60 = vpop.f32.mrf.mxu2  ;;  %v1052_v7 = vadd.f32 %v1051_v59, %v1013_v46 }
 0x12e   :  { %1748 = vmatmul.f32.gmra.mxu1 %v10249_v32  ;;  %1836 = vmatmul.f32.vlgmr.msra.gmra.mxu0 %v10236_v21  ;;  %v1085_v15 = vadd.f32 %v1084_v60, %v1052_v7 }
 0x12f   :  { %1944 = vmatmul.f32.vlgmr.msra.gmra.mxu3 %v10222_v10  ;;  %2115 = vmatpush.msra.mxu0 %v2080_v45 }
 0x130   :  { %4389 = vrot.lane.b32.xlu2 %v980_v61, %s10150_s29  ;;  %2216 = vmatpush.msra.mxu3 %v2037_v42  ;;  %v1120_v22 = vadd.f32 %v1119_v57, %v1085_v15 }
 0x131   :  { %1910 = vmatmul.f32.vlgmr.msra.gmra.mxu2 %v10216_v8 }
 0x132   :  { %v1125_v63 = vpop.f32.mrf.mxu3  ;;  %2186 = vmatpush.msra.mxu2 %v2081_v53 }
 0x133   :  { %v1055_v0 = vpop.f32.mrf.mxu1  ;;  %v1149_v1 = vpop.f32.mrf.mxu0 }
 0x134   :  { %v1089_v3 = vpop.f32.mrf.mxu2  ;;  %v1150_v11 = vadd.f32 %v1149_v1, %v1114_v4  ;;  %v1056_v37 = vadd.f32 %v1055_v0, %v1021_v58  ;;  %v138_v58 = vsel %vm117_vm1, %v101_v54, 0 }
 0x135   :  { %v2245_v59 = vand.u32 4294901760, %v138_v58 }
 0x136   :  { %1844 = vmatmul.f32.gmra.mxu0 %v10246_v31  ;;  %1878 = vmatmul.f32.vlgmr.msra.gmra.mxu1 %v10208_v5  ;;  %v1090_v45 = vadd.f32 %v1089_v3, %v1056_v37 }
 0x137   :  { %1950 = vmatmul.f32.gmra.mxu3 %v10231_v17  ;;  %2148 = vmatpush.msra.mxu1 %v2037_v42  ;;  %v2288_v62 = vsub.f32 %v138_v58, %v2245_v59 }
 0x138   :  { %v1126_v50 = vadd.f32 %v1125_v63, %v1090_v45 }
 0x139   :  { %1915 = vmatmul.f32.gmra.mxu2 %v10219_v9  ;;  %v2289_v1 = vand.u32 4294901760, %v2288_v62 }
 0x13a   :  { %v1255_v12 = vpop.f32.mrf.mxu3 }
 0x13b   :  { %v1153_v13 = vpop.f32.mrf.mxu0  ;;  %v1179_v14 = vpop.f32.mrf.mxu1 }
 0x13c   :  { %v1180_v16 = vadd.f32 %v1179_v14, %v1150_v11  ;;  %v1213_v19 = vpop.f32.mrf.mxu2  ;;  %v1154_v23 = vadd.f32 %v1153_v13, %v1120_v22 }
 0x13d   :  { %v1256_v49 = vadd.f32 %v1255_v12, %v1213_v19  ;;  %v2290_v12 = vsub.f32 %v2288_v62, %v2289_v1 }
 0x13e   :  { %3486 = vrot.lane.b32.xlu0 %v1180_v16, %s10145_s22  ;;  %1852 = vmatmul.f32.gmra.mxu0 %v10257_v36  ;;  %v3597_v20 = vrot.slane %v1180_v16, 2  ;;  %v3726_v33 = vrot.slane %v1180_v16, 4  ;;  %v3855_v44 = vrot.slane %v1180_v16, 6 }
 0x13f   :  { %1882 = vmatmul.f32.gmra.mxu1 %v10210_v6  ;;  %1956 = vmatmul.f32.gmra.mxu3 %v10249_v32  ;;  %v2291_v15 = vand.u32 4294901760, %v2290_v12 }
 0x140   :  { %3633 = vrot.lane.b32.xlu1 %v3597_v20, %s10146_s23 }
 0x141   :  { %1920 = vmatmul.f32.gmra.mxu2 %v10243_v26 }
 0x142   :  { %v1259_v24 = vpop.f32.mrf.mxu3 }
 0x143   :  { %v1157_v27 = vpop.f32.mrf.mxu0  ;;  %v1183_v28 = vpop.f32.mrf.mxu1 }
 0x144   :  { %v10493_v29 = vadd.f32 %v1183_v28, %v1154_v23  ;;  %v1221_v30 = vpop.f32.mrf.mxu2  ;;  %v1158_v47 = vadd.f32 %v1157_v27, %v1126_v50 }
 0x145   :  { %v1260_v63 = vadd.f32 %v1259_v24, %v1221_v30 }
 0x146   :  { %15305 = vst [vmem:[#allocation5_spill] sm:$0xff] %v10493_v29  ;;  %3762 = vrot.lane.b32.xlu0 %v3726_v33, %s10147_s24  ;;  %1980 = vmatmul.f32.vlgmr.msrb.gmra.mxu0 %v10208_v5  ;;  %v4129_v34 = vrot.slane %v10493_v29, 4  ;;  %v4000_v35 = vrot.slane %v10493_v29, 2  ;;  %v4258_v46 = vrot.slane %v10493_v29, 6 }
 0x147   :  { %1886 = vmatmul.f32.gmra.mxu1 %v10233_v18  ;;  %2086 = vmatmul.f32.vlgmr.msrb.gmra.mxu3 %v10208_v5  ;;  %v102_v33 = vld.sshfl [vmem:[#allocation1 + $0x18] sm:$0xff pattern:$0x75316420] }
 0x148   :  { %4165 = vrot.lane.b32.xlu2 %v4129_v34, %s10151_s30  ;;  %4036 = vrot.lane.b32.xlu1 %v4000_v35, %s10148_s25  ;;  %v140_v34 = vsel %vm117_vm1, %v102_v33, 0 }
 0x149   :  { %2044 = vmatmul.f32.vlgmr.msrb.gmra.mxu2 %v10236_v21  ;;  %2246 = vmatpush.msrb.mxu0 %v2245_v59  ;;  %v2453_v37 = vand.u32 4294901760, %v140_v34 }
 0x14a   :  { %v10504_v38 = vpop.f32.mrf.mxu3  ;;  %2356 = vmatpush.msrb.mxu3 %v2245_v59  ;;  %2323 = vmatpush.msrb.mxu2 %v2288_v62 }
 0x14b   :  { %v1187_v40 = vpop.f32.mrf.mxu1  ;;  %v1287_v42 = vpop.f32.mrf.mxu0 }
 0x14c   :  { %v10506_v43 = vpop.f32.mrf.mxu2  ;;  %v1288_v51 = vadd.f32 %v1287_v42, %v1256_v49  ;;  %v1188_v60 = vadd.f32 %v1187_v40, %v1158_v47  ;;  %v2496_v40 = vsub.f32 %v140_v34, %v2453_v37 }
 0x14d   :  { %v1264_v45 = vadd.f32 %v10504_v38, %v10506_v43 }
 0x14e   :  { %3891 = vrot.lane.b32.xlu0 %v3855_v44, %s10149_s28  ;;  %1984 = vmatmul.f32.gmra.mxu0 %v10210_v6  ;;  %v2497_v50 = vand.u32 4294901760, %v2496_v40 }
 0x14f   :  { %2010 = vmatmul.f32.vlgmr.msrb.gmra.mxu1 %v10208_v5  ;;  %2090 = vmatmul.f32.gmra.mxu3 %v10210_v6 }
 0x150   :  { %4294 = vrot.lane.b32.xlu1 %v4258_v46, %s10152_s9  ;;  %2292 = vmatpush.msrb.mxu1 %v2291_v15 }
 0x151   :  { %2052 = vmatmul.f32.gmra.mxu2 %v10246_v31 }
 0x152   :  { %v1387_v53 = vpop.f32.mrf.mxu3 }
 0x153   :  { %v1292_v55 = vpop.f32.mrf.mxu0  ;;  %v1321_v56 = vpop.f32.mrf.mxu1 }
 0x154   :  { %v1322_v52 = vadd.f32 %v1321_v56, %v1288_v51  ;;  %v1357_v57 = vpop.f32.mrf.mxu2  ;;  %v1293_v2 = vadd.f32 %v1292_v55, %v1260_v63 }
 0x156   :  { %v1358_v61 = vadd.f32 %v1357_v57, %v1322_v52  ;;  %1988 = vmatmul.f32.gmra.mxu0 %v10233_v18 }
 0x157   :  { %2014 = vmatmul.f32.gmra.mxu1 %v10210_v6  ;;  %2094 = vmatmul.f32.gmra.mxu3 %v10233_v18 }
 0x158   :  { %v1388_v0 = vadd.f32 %v1387_v53, %v1358_v61  ;;  %4391 = vrot.lane.b32.xlu1 %v1188_v60, %s10150_s29  ;;  %v2498_v53 = vsub.f32 %v2496_v40, %v2497_v50 }
 0x159   :  { %2060 = vmatmul.f32.gmra.mxu2 %v10257_v36 }
 0x15a   :  { %3488 = vrot.lane.b32.xlu0 %v1388_v0, %s10145_s22  ;;  %v3598_v3 = vrot.slane %v1388_v0, 2  ;;  %v1391_v4 = vpop.f32.mrf.mxu3  ;;  %v3856_v20 = vrot.slane %v1388_v0, 6  ;;  %v3727_v22 = vrot.slane %v1388_v0, 4  ;;  %v2499_v56 = vand.u32 4294901760, %v2498_v53 }
 0x15b   :  { %v1297_v7 = vpop.f32.mrf.mxu0  ;;  %v1327_v11 = vpop.f32.mrf.mxu1 }
 0x15c   :  { %v1328_v13 = vadd.f32 %v1327_v11, %v1293_v2  ;;  %3635 = vrot.lane.b32.xlu2 %v3598_v3, %s10146_s23  ;;  %v1361_v14 = vpop.f32.mrf.mxu2  ;;  %v1298_v51 = vadd.f32 %v1297_v7, %v1264_v45 }
 0x15e   :  { %v1362_v16 = vadd.f32 %v1361_v14, %v1328_v13  ;;  %2118 = vmatmul.f32.vlgmr.msra.gmra.mxu0 %v10216_v8 }
 0x15f   :  { %2018 = vmatmul.f32.gmra.mxu1 %v10233_v18  ;;  %2218 = vmatmul.f32.vlgmr.msra.gmra.mxu3 %v10208_v5 }
 0x160   :  { %v10526_v19 = vadd.f32 %v1391_v4, %v1362_v16  ;;  %2394 = vmatpush.msra.mxu0 %v2289_v1  ;;  %2500 = vmatpush.msra.mxu3 %v2499_v56 }
 0x161   :  { %2188 = vmatmul.f32.vlgmr.msra.gmra.mxu2 %v10208_v5 }
 0x162   :  { %15306 = vst [vmem:[#allocation6_spill] sm:$0xff] %v10526_v19  ;;  %3893 = vrot.lane.b32.xlu0 %v3856_v20, %s10149_s28  ;;  %v4001_v23 = vrot.slane %v10526_v19, 2  ;;  %v1395_v24 = vpop.f32.mrf.mxu3  ;;  %v4130_v35 = vrot.slane %v10526_v19, 4  ;;  %2454 = vmatpush.msra.mxu2 %v2453_v37  ;;  %v4259_v55 = vrot.slane %v10526_v19, 6 }
 0x163   :  { %v1333_v27 = vpop.f32.mrf.mxu1  ;;  %v1421_v28 = vpop.f32.mrf.mxu0 }
 0x164   :  { %3764 = vrot.lane.b32.xlu2 %v3727_v22, %s10147_s24  ;;  %4038 = vrot.lane.b32.xlu1 %v4001_v23, %s10148_s25  ;;  %v1365_v30 = vpop.f32.mrf.mxu2  ;;  %v1334_v54 = vadd.f32 %v1333_v27, %v1298_v51 }
 0x166   :  { %2123 = vmatmul.f32.gmra.mxu0 %v10219_v9  ;;  %v1366_v47 = vadd.f32 %v1365_v30, %v1334_v54 }
 0x167   :  { %2152 = vmatmul.f32.vlgmr.msra.gmra.mxu1 %v10222_v10  ;;  %2222 = vmatmul.f32.gmra.mxu3 %v10210_v6 }
 0x168   :  { %2424 = vmatpush.msra.mxu1 %v2245_v59  ;;  %v1396_v58 = vadd.f32 %v1395_v24, %v1366_v47 }
 0x169   :  { %2192 = vmatmul.f32.gmra.mxu2 %v10210_v6 }
 0x16a   :  { %4167 = vrot.lane.b32.xlu0 %v4130_v35, %s10151_s30  ;;  %v1529_v49 = vpop.f32.mrf.mxu3 }
 0x16b   :  { %v1429_v42 = vpop.f32.mrf.mxu0  ;;  %v1463_v44 = vpop.f32.mrf.mxu1 }
 0x16c   :  { %v1495_v46 = vpop.f32.mrf.mxu2  ;;  %v1464_v59 = vadd.f32 %v1463_v44, %v1421_v28 }
 0x16e   :  { %2128 = vmatmul.f32.gmra.mxu0 %v10243_v26  ;;  %v1496_v62 = vadd.f32 %v1495_v46, %v1464_v59 }
 0x16f   :  { %2158 = vmatmul.f32.gmra.mxu1 %v10231_v17  ;;  %2226 = vmatmul.f32.gmra.mxu3 %v10233_v18 }
 0x170   :  { %v1530_v1 = vadd.f32 %v1529_v49, %v1496_v62 }
 0x171   :  { %2196 = vmatmul.f32.gmra.mxu2 %v10233_v18 }
 0x172   :  { %4296 = vrot.lane.b32.xlu0 %v4259_v55, %s10152_s9  ;;  %v1535_v57 = vpop.f32.mrf.mxu3 }
 0x173   :  { %v10548_v38 = vpop.f32.mrf.mxu0  ;;  %v1467_v43 = vpop.f32.mrf.mxu1 }
 0x174   :  { %v1500_v52 = vpop.f32.mrf.mxu2  ;;  %v1468_v2 = vadd.f32 %v1467_v43, %v1429_v42 }
 0x176   :  { %2252 = vmatmul.f32.vlgmr.msrb.gmra.mxu0 %v10236_v21  ;;  %v1501_v11 = vadd.f32 %v1500_v52, %v1468_v2 }
 0x177   :  { %2164 = vmatmul.f32.gmra.mxu1 %v10249_v32  ;;  %2360 = vmatmul.f32.vlgmr.msrb.gmra.mxu3 %v10222_v10 }
 0x178   :  { %2531 = vmatpush.msrb.mxu0 %v2496_v40  ;;  %2632 = vmatpush.msrb.mxu3 %v2453_v37  ;;  %v1536_v16 = vadd.f32 %v1535_v57, %v1501_v11 }
 0x179   :  { %2326 = vmatmul.f32.vlgmr.msrb.gmra.mxu2 %v10216_v8 }
 0x17a   :  { %4393 = vrot.lane.b32.xlu0 %v1396_v58, %s10150_s29  ;;  %2602 = vmatpush.msrb.mxu2 %v2497_v50  ;;  %v10555_v0 = vpop.f32.mrf.mxu3  ;;  %v103_v50 = vld.sshfl [vmem:[#allocation1 + $0x20] sm:$0xff pattern:$0x75316420] }
 0x17b   :  { %v1471_v60 = vpop.f32.mrf.mxu1  ;;  %v1565_v61 = vpop.f32.mrf.mxu0  ;;  %v142_v54 = vsel %vm117_vm1, %v103_v50, 0 }
 0x17c   :  { %v1505_v63 = vpop.f32.mrf.mxu2  ;;  %v1566_v3 = vadd.f32 %v1565_v61, %v1530_v1  ;;  %v1472_v46 = vadd.f32 %v1471_v60, %v10548_v38  ;;  %v2661_v43 = vand.u32 4294901760, %v142_v54 }
 0x17e   :  { %2260 = vmatmul.f32.gmra.mxu0 %v10246_v31  ;;  %v1506_v52 = vadd.f32 %v1505_v63, %v1472_v46  ;;  %v2704_v59 = vsub.f32 %v142_v54, %v2661_v43 }
 0x17f   :  { %2294 = vmatmul.f32.vlgmr.msrb.gmra.mxu1 %v10208_v5  ;;  %2366 = vmatmul.f32.gmra.mxu3 %v10231_v17 }
 0x180   :  { %2564 = vmatpush.msrb.mxu1 %v2453_v37  ;;  %v2705_v61 = vand.u32 4294901760, %v2704_v59  ;;  %v1542_v62 = vadd.f32 %v10555_v0, %v1506_v52 }
 0x181   :  { %2331 = vmatmul.f32.gmra.mxu2 %v10219_v9 }
 0x182   :  { %v1671_v14 = vpop.f32.mrf.mxu3  ;;  %v2706_v2 = vsub.f32 %v2704_v59, %v2705_v61 }
 0x183   :  { %v1569_v4 = vpop.f32.mrf.mxu0  ;;  %v1595_v7 = vpop.f32.mrf.mxu1 }
 0x184   :  { %v1596_v12 = vadd.f32 %v1595_v7, %v1566_v3  ;;  %v1629_v13 = vpop.f32.mrf.mxu2  ;;  %v1570_v20 = vadd.f32 %v1569_v4, %v1536_v16 }
 0x185   :  { %v1672_v45 = vadd.f32 %v1671_v14, %v1629_v13  ;;  %v2707_v13 = vand.u32 4294901760, %v2706_v2 }
 0x186   :  { %3490 = vrot.lane.b32.xlu1 %v1596_v12, %s10145_s22  ;;  %2268 = vmatmul.f32.gmra.mxu0 %v10257_v36  ;;  %v3728_v15 = vrot.slane %v1596_v12, 4  ;;  %v3599_v28 = vrot.slane %v1596_v12, 2  ;;  %v3857_v40 = vrot.slane %v1596_v12, 6 }
 0x187   :  { %2298 = vmatmul.f32.gmra.mxu1 %v10210_v6  ;;  %2372 = vmatmul.f32.gmra.mxu3 %v10249_v32 }
 0x188   :  { %3766 = vrot.lane.b32.xlu2 %v3728_v15, %s10147_s24 }
 0x189   :  { %2336 = vmatmul.f32.gmra.mxu2 %v10243_v26 }
 0x18a   :  { %v1675_v30 = vpop.f32.mrf.mxu3 }
 0x18b   :  { %v1573_v22 = vpop.f32.mrf.mxu0  ;;  %v1599_v23 = vpop.f32.mrf.mxu1 }
 0x18c   :  { %v10567_v24 = vadd.f32 %v1599_v23, %v1570_v20  ;;  %v1637_v27 = vpop.f32.mrf.mxu2  ;;  %v1574_v7 = vadd.f32 %v1573_v22, %v1542_v62 }
 0x18d   :  { %v1676_v38 = vadd.f32 %v1675_v30, %v1637_v27 }
 0x18e   :  { %15307 = vst [vmem:[#allocation7_spill] sm:$0xff] %v10567_v24  ;;  %3637 = vrot.lane.b32.xlu1 %v3599_v28, %s10146_s23  ;;  %2396 = vmatmul.f32.vlgmr.msra.gmra.mxu0 %v10208_v5  ;;  %v4002_v33 = vrot.slane %v10567_v24, 2  ;;  %v4131_v44 = vrot.slane %v10567_v24, 4  ;;  %v4260_v58 = vrot.slane %v10567_v24, 6 }
 0x18f   :  { %2302 = vmatmul.f32.gmra.mxu1 %v10233_v18  ;;  %2502 = vmatmul.f32.vlgmr.msra.gmra.mxu3 %v10208_v5 }
 0x190   :  { %4040 = vrot.lane.b32.xlu2 %v4002_v33, %s10148_s25  ;;  %2772 = vmatpush.msra.mxu3 %v2661_v43  ;;  %v104_v33 = vld.sshfl [vmem:[#allocation1 + $0x28] sm:$0xff pattern:$0x75316420] }
 0x191   :  { %2460 = vmatmul.f32.vlgmr.msra.gmra.mxu2 %v10236_v21  ;;  %2662 = vmatpush.msra.mxu0 %v2661_v43 }
 0x192   :  { %v10578_v42 = vpop.f32.mrf.mxu3  ;;  %2739 = vmatpush.msra.mxu2 %v2704_v59 }
 0x193   :  { %v1603_v34 = vpop.f32.mrf.mxu1  ;;  %v1703_v35 = vpop.f32.mrf.mxu0 }
 0x194   :  { %v10576_v37 = vpop.f32.mrf.mxu2  ;;  %v1704_v49 = vadd.f32 %v1703_v35, %v1672_v45  ;;  %v1604_v15 = vadd.f32 %v1603_v34, %v1574_v7  ;;  %v144_v34 = vsel %vm117_vm1, %v104_v33, 0 }
 0x195   :  { %v1680_v54 = vadd.f32 %v10578_v42, %v10576_v37 }
 0x196   :  { %3895 = vrot.lane.b32.xlu1 %v3857_v40, %s10149_s28  ;;  %2400 = vmatmul.f32.gmra.mxu0 %v10210_v6  ;;  %v2869_v40 = vand.u32 4294901760, %v144_v34 }
 0x197   :  { %2426 = vmatmul.f32.vlgmr.msra.gmra.mxu1 %v10208_v5  ;;  %2506 = vmatmul.f32.gmra.mxu3 %v10210_v6 }
 0x198   :  { %4169 = vrot.lane.b32.xlu2 %v4131_v44, %s10151_s30  ;;  %2708 = vmatpush.msra.mxu1 %v2707_v13  ;;  %v2912_v45 = vsub.f32 %v144_v34, %v2869_v40 }
 0x199   :  { %2468 = vmatmul.f32.gmra.mxu2 %v10246_v31 }
 0x19a   :  { %v1803_v47 = vpop.f32.mrf.mxu3 }
 0x19b   :  { %v1708_v51 = vpop.f32.mrf.mxu0  ;;  %v1737_v53 = vpop.f32.mrf.mxu1 }
 0x19c   :  { %v1738_v55 = vadd.f32 %v1737_v53, %v1704_v49  ;;  %v1773_v56 = vpop.f32.mrf.mxu2  ;;  %v1709_v63 = vadd.f32 %v1708_v51, %v1676_v38  ;;  %v2913_v51 = vand.u32 4294901760, %v2912_v45 }
 0x19e   :  { %v1774_v57 = vadd.f32 %v1773_v56, %v1738_v55  ;;  %2404 = vmatmul.f32.gmra.mxu0 %v10233_v18  ;;  %v2914_v55 = vsub.f32 %v2912_v45, %v2913_v51 }
 0x19f   :  { %2430 = vmatmul.f32.gmra.mxu1 %v10210_v6  ;;  %2510 = vmatmul.f32.gmra.mxu3 %v10233_v18 }
 0x1a0   :  { %v1804_v60 = vadd.f32 %v1803_v47, %v1774_v57  ;;  %4298 = vrot.lane.b32.xlu2 %v4260_v58, %s10152_s9 }
 0x1a1   :  { %2476 = vmatmul.f32.gmra.mxu2 %v10257_v36 }
 0x1a2   :  { %3492 = vrot.lane.b32.xlu0 %v1804_v60, %s10145_s22  ;;  %v3600_v1 = vrot.slane %v1804_v60, 2  ;;  %v1807_v14 = vpop.f32.mrf.mxu3  ;;  %v3729_v20 = vrot.slane %v1804_v60, 4  ;;  %v3858_v35 = vrot.slane %v1804_v60, 6 }
 0x1a3   :  { %v1713_v3 = vpop.f32.mrf.mxu0  ;;  %v1743_v4 = vpop.f32.mrf.mxu1 }
 0x1a4   :  { %v1744_v11 = vadd.f32 %v1743_v4, %v1709_v63  ;;  %3639 = vrot.lane.b32.xlu1 %v3600_v1, %s10146_s23  ;;  %v1777_v12 = vpop.f32.mrf.mxu2  ;;  %v1714_v56 = vadd.f32 %v1713_v3, %v1680_v54 }
 0x1a6   :  { %v1778_v16 = vadd.f32 %v1777_v12, %v1744_v11  ;;  %2534 = vmatmul.f32.vlgmr.msrb.gmra.mxu0 %v10216_v8 }
 0x1a7   :  { %2434 = vmatmul.f32.gmra.mxu1 %v10233_v18  ;;  %2634 = vmatmul.f32.vlgmr.msrb.gmra.mxu3 %v10208_v5 }
 0x1a8   :  { %v10601_v0 = vadd.f32 %v1807_v14, %v1778_v16  ;;  %4395 = vrot.lane.b32.xlu2 %v1604_v15, %s10150_s29  ;;  %2810 = vmatpush.msrb.mxu0 %v2705_v61 }
 0x1a9   :  { %2604 = vmatmul.f32.vlgmr.msrb.gmra.mxu2 %v10208_v5 }
 0x1aa   :  { %15308 = vst [vmem:[#allocation8_spill] sm:$0xff] %v10601_v0  ;;  %3768 = vrot.lane.b32.xlu0 %v3729_v20, %s10147_s24  ;;  %v4003_v22 = vrot.slane %v10601_v0, 2  ;;  %v1811_v30 = vpop.f32.mrf.mxu3  ;;  %v4132_v44 = vrot.slane %v10601_v0, 4  ;;  %2870 = vmatpush.msrb.mxu2 %v2869_v40  ;;  %v4261_v52 = vrot.slane %v10601_v0, 6 }
 0x1ab   :  { %v1749_v23 = vpop.f32.mrf.mxu1  ;;  %v1837_v27 = vpop.f32.mrf.mxu0 }
 0x1ac   :  { %4042 = vrot.lane.b32.xlu1 %v4003_v22, %s10148_s25  ;;  %v1781_v28 = vpop.f32.mrf.mxu2  ;;  %v1750_v47 = vadd.f32 %v1749_v23, %v1714_v56 }
 0x1ae   :  { %2539 = vmatmul.f32.gmra.mxu0 %v10219_v9  ;;  %v1782_v59 = vadd.f32 %v1781_v28, %v1750_v47  ;;  %v10647_v28 = vpop.permute.xlu2 %3625 }
 0x1af   :  { %2568 = vmatmul.f32.vlgmr.msrb.gmra.mxu1 %v10222_v10  ;;  %2638 = vmatmul.f32.gmra.mxu3 %v10210_v6  ;;  %15309 = vst [vmem:[#allocation9_spill] sm:$0xff] %v10647_v28 }
 0x1b0   :  { %2840 = vmatpush.msrb.mxu1 %v2661_v43  ;;  %v2915_v43 = vand.u32 4294901760, %v2914_v55  ;;  %v1812_v60 = vadd.f32 %v1811_v30, %v1782_v59 }
 0x1b1   :  { %2608 = vmatmul.f32.gmra.mxu2 %v10210_v6 }
 0x1b2   :  { %3897 = vrot.lane.b32.xlu0 %v3858_v35, %s10149_s28  ;;  %v1945_v53 = vpop.f32.mrf.mxu3  ;;  %2916 = vmatpush.msrb.mxu3 %v2915_v43 }
 0x1b3   :  { %v1845_v46 = vpop.f32.mrf.mxu0  ;;  %v1879_v49 = vpop.f32.mrf.mxu1 }
 0x1b4   :  { %4171 = vrot.lane.b32.xlu1 %v4132_v44, %s10151_s30  ;;  %v1911_v50 = vpop.f32.mrf.mxu2  ;;  %v1880_v38 = vadd.f32 %v1879_v49, %v1837_v27 }
 0x1b6   :  { %2544 = vmatmul.f32.gmra.mxu0 %v10243_v26  ;;  %v1912_v1 = vadd.f32 %v1911_v50, %v1880_v38  ;;  %v10662_v50 = vpop.permute.xlu2 %3627 }
 0x1b7   :  { %2574 = vmatmul.f32.gmra.mxu1 %v10231_v17  ;;  %2642 = vmatmul.f32.gmra.mxu3 %v10233_v18 }
 0x1b8   :  { %v1946_v3 = vadd.f32 %v1945_v53, %v1912_v1 }
 0x1b9   :  { %2612 = vmatmul.f32.gmra.mxu2 %v10233_v18 }
 0x1ba   :  { %v1951_v42 = vpop.f32.mrf.mxu3 }
 0x1bb   :  { %v10623_v57 = vpop.f32.mrf.mxu0 }
 0x1bc   :  { %v1883_v58 = vpop.f32.mrf.mxu1  ;;  %4300 = vrot.lane.b32.xlu1 %v4261_v52, %s10152_s9  ;;  %v1916_v37 = vpop.f32.mrf.mxu2  ;;  %v105_v52 = vld.sshfl [vmem:[#allocation1 + $0x30] sm:$0xff pattern:$0x75316420] }
 0x1bd   :  { %v1884_v4 = vadd.f32 %v1883_v58, %v1845_v46  ;;  %v10659_v46 = vpop.permute.xlu1 %4028  ;;  %v146_v59 = vsel %vm117_vm1, %v105_v52, 0 }
 0x1be   :  { %2668 = vmatmul.f32.vlgmr.msra.gmra.mxu0 %v10236_v21  ;;  %15311 = vst [vmem:[#allocation11_spill] sm:$0xff] %v10659_v46 }
 0x1bf   :  { %2580 = vmatmul.f32.gmra.mxu1 %v10249_v32  ;;  %2776 = vmatmul.f32.vlgmr.msra.gmra.mxu3 %v10222_v10  ;;  %v1917_v13 = vadd.f32 %v1916_v37, %v1884_v4 }
 0x1c0   :  { %2947 = vmatpush.msra.mxu0 %v2912_v45  ;;  %3048 = vmatpush.msra.mxu3 %v2869_v40 }
 0x1c1   :  { %2742 = vmatmul.f32.vlgmr.msra.gmra.mxu2 %v10216_v8  ;;  %v1952_v22 = vadd.f32 %v1951_v42, %v1917_v13 }
 0x1c2   :  { %3018 = vmatpush.msra.mxu2 %v2913_v51  ;;  %v10633_v2 = vpop.f32.mrf.mxu3 }
 0x1c3   :  { %v1981_v61 = vpop.f32.mrf.mxu0 }
 0x1c4   :  { %v1887_v62 = vpop.f32.mrf.mxu1  ;;  %4397 = vrot.lane.b32.xlu1 %v1812_v60, %s10150_s29  ;;  %v10631_v63 = vpop.f32.mrf.mxu2  ;;  %v1982_v7 = vadd.f32 %v1981_v61, %v1946_v3  ;;  %v3077_v61 = vand.u32 4294901760, %v146_v59 }
 0x1c5   :  { %v1888_v58 = vadd.f32 %v1887_v62, %v10623_v57  ;;  %v10679_v38 = vpop.permute.xlu1 %4383 }
 0x1c6   :  { %2676 = vmatmul.f32.gmra.mxu0 %v10246_v31  ;;  %15313 = vst [vmem:[#allocation13_spill] sm:$0xff] %v10679_v38 }
 0x1c7   :  { %2710 = vmatmul.f32.vlgmr.msra.gmra.mxu1 %v10208_v5  ;;  %2782 = vmatmul.f32.gmra.mxu3 %v10231_v17 }
 0x1c8   :  { %2980 = vmatpush.msra.mxu1 %v2869_v40  ;;  %v10651_v40 = vpop.permute.xlu0 %3478 }
 0x1c9   :  { %2747 = vmatmul.f32.gmra.mxu2 %v10219_v9 }
 0x1ca   :  { %v2087_v16 = vpop.f32.mrf.mxu3 }
 0x1cb   :  { %v1985_v11 = vpop.f32.mrf.mxu0 }
 0x1cc   :  { %v2011_v12 = vpop.f32.mrf.mxu1  ;;  %v2045_v15 = vpop.f32.mrf.mxu2  ;;  %v1986_v23 = vadd.f32 %v1985_v11, %v1952_v22  ;;  %v3120_v11 = vsub.f32 %v146_v59, %v3077_v61 }
 0x1cd   :  { %v2012_v14 = vadd.f32 %v2011_v12, %v1982_v7  ;;  %v2088_v47 = vadd.f32 %v2087_v16, %v2045_v15  ;;  %v10681_v7 = vpop.permute.xlu2 %4030  ;;  %v1922_v12 = vadd.f32 %v10631_v63, %v1888_v58 }
 0x1ce   :  { %2684 = vmatmul.f32.gmra.mxu0 %v10257_v36  ;;  %v3121_v13 = vand.u32 4294901760, %v3120_v11 }
 0x1cf   :  { %2714 = vmatmul.f32.gmra.mxu1 %v10210_v6  ;;  %3494 = vrot.lane.b32.xlu0 %v2012_v14, %s10145_s22  ;;  %v3601_v20 = vrot.slane %v2012_v14, 2  ;;  %v3730_v45 = vrot.slane %v2012_v14, 4  ;;  %v3859_v56 = vrot.slane %v2012_v14, 6 }
 0x1d0   :  { %2788 = vmatmul.f32.gmra.mxu3 %v10249_v32  ;;  %v10671_v43 = vpop.permute.xlu0 %3754  ;;  %v3122_v63 = vsub.f32 %v3120_v11, %v3121_v13 }
 0x1d1   :  { %3641 = vrot.lane.b32.xlu2 %v3601_v20, %s10146_s23  ;;  %2752 = vmatmul.f32.gmra.mxu2 %v10243_v26  ;;  %15312 = vst [vmem:[#allocation12_spill] sm:$0xff] %v10671_v43  ;;  %v1958_v20 = vadd.f32 %v10633_v2, %v1922_v12 }
 0x1d2   :  { %v2091_v35 = vpop.f32.mrf.mxu3 }
 0x1d3   :  { %v10645_v27 = vpop.f32.mrf.mxu0 }
 0x1d4   :  { %v2015_v30 = vpop.f32.mrf.mxu1  ;;  %v2053_v34 = vpop.f32.mrf.mxu2 }
 0x1d5   :  { %v10649_v33 = vadd.f32 %v2015_v30, %v1986_v23  ;;  %v2092_v14 = vadd.f32 %v2091_v35, %v2053_v34  ;;  %v10697_v30 = vpop.permute.xlu1 %3756  ;;  %v3123_v34 = vand.u32 4294901760, %v3122_v63  ;;  %v1990_v35 = vadd.f32 %v10645_v27, %v1958_v20  ;;  %v10702_v2 = vpop.permute.xlu2 %4385 }
 0x1d6   :  { %2812 = vmatmul.f32.vlgmr.msrb.gmra.mxu0 %v10208_v5  ;;  %15315 = vst [vmem:[#allocation15_spill] sm:$0xff] %v10702_v2 }
 0x1d7   :  { %15310 = vst [vmem:[#allocation10_spill] sm:$0xff] %v10649_v33  ;;  %2718 = vmatmul.f32.gmra.mxu1 %v10233_v18  ;;  %v4004_v44 = vrot.slane %v10649_v33, 2  ;;  %v4133_v55 = vrot.slane %v10649_v33, 4  ;;  %v4262_v62 = vrot.slane %v10649_v33, 6  ;;  %3078 = vmatpush.msrb.mxu0 %v3077_v61 }
 0x1d8   :  { %2918 = vmatmul.f32.vlgmr.msrb.gmra.mxu3 %v10208_v5  ;;  %v10691_v16 = vpop.permute.xlu0 %3883 }
 0x1d9   :  { %4044 = vrot.lane.b32.xlu0 %v4004_v44, %s10148_s25  ;;  %3770 = vrot.lane.b32.xlu2 %v3730_v45, %s10147_s24  ;;  %15314 = vst [vmem:[#allocation14_spill] sm:$0xff] %v10691_v16 }
 0x1da   :  { %2876 = vmatmul.f32.vlgmr.msrb.gmra.mxu2 %v10236_v21  ;;  %v10666_v54 = vpop.f32.mrf.mxu3  ;;  %3188 = vmatpush.msrb.mxu3 %v3077_v61 }
 0x1db   :  { %v2119_v49 = vpop.f32.mrf.mxu0  ;;  %3155 = vmatpush.msrb.mxu2 %v3120_v11 }
 0x1dc   :  { %v2019_v51 = vpop.f32.mrf.mxu1  ;;  %v10664_v53 = vpop.f32.mrf.mxu2  ;;  %v2120_v37 = vadd.f32 %v2119_v49, %v2088_v47 }
 0x1dd   :  { %v10720_v11 = vpop.permute.xlu2 %3629 }
 0x1de   :  { %2816 = vmatmul.f32.gmra.mxu0 %v10210_v6  ;;  %15318 = vst [vmem:[#allocation18_spill] sm:$0xff] %v10720_v11 }
 0x1df   :  { %2842 = vmatmul.f32.vlgmr.msrb.gmra.mxu1 %v10208_v5 }
 0x1e0   :  { %2922 = vmatmul.f32.gmra.mxu3 %v10210_v6  ;;  %3124 = vmatpush.msrb.mxu1 %v3123_v34 }
 0x1e1   :  { %4173 = vrot.lane.b32.xlu0 %v4133_v55, %s10151_s30  ;;  %3899 = vrot.lane.b32.xlu2 %v3859_v56, %s10149_s28  ;;  %v2020_v56 = vadd.f32 %v2019_v51, %v1990_v35 }
 0x1e2   :  { %2884 = vmatmul.f32.gmra.mxu2 %v10246_v31  ;;  %v2219_v4 = vpop.f32.mrf.mxu3 }
 0x1e3   :  { %v2124_v42 = vpop.f32.mrf.mxu0 }
 0x1e4   :  { %v2153_v60 = vpop.f32.mrf.mxu1  ;;  %v2189_v3 = vpop.f32.mrf.mxu2  ;;  %v2125_v22 = vadd.f32 %v2124_v42, %v2092_v14 }
 0x1e5   :  { %v2154_v1 = vadd.f32 %v2153_v60, %v2120_v37  ;;  %v10712_v37 = vpop.permute.xlu0 %4157 }
 0x1e6   :  { %2820 = vmatmul.f32.gmra.mxu0 %v10233_v18  ;;  %15317 = vst [vmem:[#allocation17_spill] sm:$0xff] %v10712_v37 }
 0x1e7   :  { %v2190_v57 = vadd.f32 %v2189_v3, %v2154_v1  ;;  %2846 = vmatmul.f32.gmra.mxu1 %v10210_v6  ;;  %v106_v1 = vld.sshfl [vmem:[#allocation1 + $0x38] sm:$0xff pattern:$0x75316420]  ;;  %v10716_v3 = vpop.permute.xlu1 %3885 }
 0x1e8   :  { %2926 = vmatmul.f32.gmra.mxu3 %v10233_v18 }
 0x1e9   :  { %v10688_v15 = vadd.f32 %v2219_v4, %v2190_v57  ;;  %4302 = vrot.lane.b32.xlu0 %v4262_v62, %s10152_s9  ;;  %v148_v4 = vsel %vm117_vm1, %v106_v1, 0 }
 0x1ea   :  { %2892 = vmatmul.f32.gmra.mxu2 %v10257_v36  ;;  %v2223_v55 = vpop.f32.mrf.mxu3  ;;  %v3285_v12 = vand.u32 4294901760, %v148_v4 }
 0x1eb   :  { %3496 = vrot.lane.b32.xlu1 %v10688_v15, %s10145_s22  ;;  %v2129_v23 = vpop.f32.mrf.mxu0  ;;  %v3602_v27 = vrot.slane %v10688_v15, 2  ;;  %v3731_v57 = vrot.slane %v10688_v15, 4 }
 0x1ec   :  { %v2159_v44 = vpop.f32.mrf.mxu1  ;;  %v2193_v49 = vpop.f32.mrf.mxu2  ;;  %v3328_v62 = vsub.f32 %v148_v4, %v3285_v12 }
 0x1ed   :  { %v2160_v45 = vadd.f32 %v2159_v44, %v2125_v22  ;;  %v2096_v22 = vadd.f32 %v10666_v54, %v10664_v53  ;;  %v10731_v35 = vpop.permute.xlu0 %4286  ;;  %v3860_v53 = vrot.slane %v10688_v15, 6  ;;  %v10738_v54 = vpop.permute.xlu2 %3758 }
 0x1ee   :  { %2950 = vmatmul.f32.vlgmr.msra.gmra.mxu0 %v10216_v8  ;;  %v3329_v20 = vand.u32 4294901760, %v3328_v62  ;;  %15319 = vst [vmem:[#allocation19_spill] sm:$0xff] %v10731_v35 }
 0x1ef   :  { %v2194_v47 = vadd.f32 %v2193_v49, %v2160_v45  ;;  %2850 = vmatmul.f32.gmra.mxu1 %v10233_v18  ;;  %3226 = vmatpush.msra.mxu0 %v3121_v13  ;;  %v2130_v45 = vadd.f32 %v2129_v23, %v2096_v22  ;;  %15321 = vst [vmem:[#allocation21_spill] sm:$0xff] %v10738_v54 }
 0x1f0   :  { %3050 = vmatmul.f32.vlgmr.msra.gmra.mxu3 %v10208_v5  ;;  %v3330_v34 = vsub.f32 %v3328_v62, %v3329_v20 }
 0x1f1   :  { %v10705_v52 = vadd.f32 %v2223_v55, %v2194_v47  ;;  %4399 = vrot.lane.b32.xlu0 %v2020_v56, %s10150_s29  ;;  %v10735_v55 = vpop.permute.xlu1 %4159 }
 0x1f2   :  { %3020 = vmatmul.f32.vlgmr.msra.gmra.mxu2 %v10208_v5  ;;  %v2227_v60 = vpop.f32.mrf.mxu3  ;;  %v3331_v49 = vand.u32 4294901760, %v3330_v34  ;;  %15320 = vst [vmem:[#allocation20_spill] sm:$0xff] %v10735_v55 }
 0x1f3   :  { %15316 = vst [vmem:[#allocation16_spill] sm:$0xff] %v10705_v52  ;;  %3643 = vrot.lane.b32.xlu1 %v3602_v27, %s10146_s23  ;;  %v2253_v58 = vpop.f32.mrf.mxu0  ;;  %v4005_v51 = vrot.slane %v10705_v52, 2  ;;  %v4134_v14 = vrot.slane %v10705_v52, 4  ;;  %3286 = vmatpush.msra.mxu2 %v3285_v12  ;;  %v4263_v23 = vrot.slane %v10705_v52, 6 }
 0x1f4   :  { %v2165_v42 = vpop.f32.mrf.mxu1  ;;  %v2197_v59 = vpop.f32.mrf.mxu2  ;;  %3332 = vmatpush.msra.mxu3 %v3331_v49 }
 0x1f5   :  { %4046 = vrot.lane.b32.xlu2 %v4005_v51, %s10148_s25  ;;  %v2166_v56 = vadd.f32 %v2165_v42, %v2130_v45  ;;  %v10749_v15 = vpop.permute.xlu0 %3480  ;;  %v10755_v22 = vpop.permute.xlu2 %4161 }
 0x1f6   :  { %2955 = vmatmul.f32.gmra.mxu0 %v10219_v9  ;;  %15323 = vst [vmem:[#allocation23_spill] sm:$0xff] %v10755_v22 }
 0x1f7   :  { %2984 = vmatmul.f32.vlgmr.msra.gmra.mxu1 %v10222_v10  ;;  %v2198_v51 = vadd.f32 %v2197_v59, %v2166_v56 }
 0x1f8   :  { %3054 = vmatmul.f32.gmra.mxu3 %v10210_v6  ;;  %3256 = vmatpush.msra.mxu1 %v3077_v61 }
 0x1f9   :  { %v2228_v42 = vadd.f32 %v2227_v60, %v2198_v51 }
 0x1fa   :  { %3024 = vmatmul.f32.gmra.mxu2 %v10210_v6  ;;  %v2361_v61 = vpop.f32.mrf.mxu3 }
 0x1fb   :  { %3772 = vrot.lane.b32.xlu1 %v3731_v57, %s10147_s24  ;;  %v2261_v13 = vpop.f32.mrf.mxu0 }
 0x1fc   :  { %v2295_v63 = vpop.f32.mrf.mxu1  ;;  %v2327_v44 = vpop.f32.mrf.mxu2 }
 0x1fd   :  { %4175 = vrot.lane.b32.xlu2 %v4134_v14, %s10151_s30  ;;  %v2296_v57 = vadd.f32 %v2295_v63, %v2253_v58  ;;  %v10752_v14 = vpop.permute.xlu1 %4288  ;;  %v10760_v58 = vpop.permute.xlu0 %3887 }
 0x1fe   :  { %2960 = vmatmul.f32.gmra.mxu0 %v10243_v26  ;;  %15322 = vst [vmem:[#allocation22_spill] sm:$0xff] %v10752_v14  ;;  %v10765_v48 = vpop.permute.xlu2 %4290 }
 0x1ff   :  { %2990 = vmatmul.f32.gmra.mxu1 %v10231_v17  ;;  %v2328_v45 = vadd.f32 %v2327_v44, %v2296_v57  ;;  %15324 = vst [vmem:[#allocation24_spill] sm:$0xff] %v10760_v58 }
 0x200   :  { %3058 = vmatmul.f32.gmra.mxu3 %v10233_v18  ;;  %15325 = vst [vmem:[#allocation25_spill] sm:$0xff] %v10765_v48 }
 0x201   :  { %v2362_v60 = vadd.f32 %v2361_v61, %v2328_v45 }
 0x202   :  { %3028 = vmatmul.f32.gmra.mxu2 %v10233_v18  ;;  %v2367_v4 = vpop.f32.mrf.mxu3 }
 0x203   :  { %3901 = vrot.lane.b32.xlu1 %v3860_v53, %s10149_s28  ;;  %v10742_v47 = vpop.f32.mrf.mxu0 }
 0x204   :  { %v2299_v27 = vpop.f32.mrf.mxu1  ;;  %v2332_v1 = vpop.f32.mrf.mxu2 }
 0x205   :  { %4304 = vrot.lane.b32.xlu2 %v4263_v23, %s10152_s9  ;;  %v2300_v63 = vadd.f32 %v2299_v27, %v2261_v13  ;;  %v10763_v53 = vpop.permute.xlu1 %3482  ;;  %v10772_v13 = vpop.permute.xlu0 %4032 }
 0x206   :  { %3084 = vmatmul.f32.vlgmr.msrb.gmra.mxu0 %v10236_v21 }
 0x207   :  { %2996 = vmatmul.f32.gmra.mxu1 %v10249_v32  ;;  %3363 = vmatpush.msrb.mxu0 %v3328_v62  ;;  %v2333_v23 = vadd.f32 %v2332_v1, %v2300_v63 }
 0x208   :  { %3192 = vmatmul.f32.vlgmr.msrb.gmra.mxu3 %v10222_v10 }
 0x209   :  { %3464 = vmatpush.msrb.mxu3 %v3285_v12 }
 0x20a   :  { %3158 = vmatmul.f32.vlgmr.msrb.gmra.mxu2 %v10216_v8  ;;  %v2373_v49 = vpop.f32.mrf.mxu3 }
 0x20b   :  { %4401 = vrot.lane.b32.xlu1 %v2228_v42, %s10150_s29  ;;  %v2397_v59 = vpop.f32.mrf.mxu0  ;;  %3434 = vmatpush.msrb.mxu2 %v3329_v20 }
 0x20c   :  { %v2303_v34 = vpop.f32.mrf.mxu1  ;;  %v2337_v62 = vpop.f32.mrf.mxu2  ;;  %v2398_v20 = vadd.f32 %v2397_v59, %v2362_v60 }
 0x20d   :  { %v10774_v1 = vpop.permute.xlu1 %3484  ;;  %v10795_v33 = vpop.permute.xlu0 %4387 }
 0x20e   :  { %3092 = vmatmul.f32.gmra.mxu0 %v10246_v31  ;;  %15326 = vst [vmem:[#allocation26_spill] sm:$0xff] %v10774_v1 }
 0x20f   :  { %3126 = vmatmul.f32.vlgmr.msrb.gmra.mxu1 %v10208_v5  ;;  %15330 = vst [vmem:[#allocation30_spill] sm:$0xff] %v10795_v33 }
 0x210   :  { %3198 = vmatmul.f32.gmra.mxu3 %v10231_v17  ;;  %3396 = vmatpush.msrb.mxu1 %v3285_v12  ;;  %v2368_v12 = vadd.f32 %v2367_v4, %v2333_v23 }
 0x212   :  { %3163 = vmatmul.f32.gmra.mxu2 %v10219_v9  ;;  %v2503_v57 = vpop.f32.mrf.mxu3 }
 0x213   :  { %v2401_v56 = vpop.f32.mrf.mxu0 }
 0x214   :  { %v2427_v44 = vpop.f32.mrf.mxu1  ;;  %v2461_v42 = vpop.f32.mrf.mxu2  ;;  %v2402_v61 = vadd.f32 %v2401_v56, %v2368_v12  ;;  %v2304_v56 = vadd.f32 %v2303_v34, %v10742_v47 }
 0x215   :  { %v2428_v51 = vadd.f32 %v2427_v44, %v2398_v20  ;;  %v10782_v44 = vpop.permute.xlu2 %3760  ;;  %v2504_v47 = vadd.f32 %v2503_v57, %v2461_v42  ;;  %v10806_v25 = vpop.permute.xlu0 %4292 }
 0x216   :  { %3100 = vmatmul.f32.gmra.mxu0 %v10257_v36  ;;  %15328 = vst [vmem:[#allocation28_spill] sm:$0xff] %v10782_v44  ;;  %v2338_v0 = vadd.f32 %v2337_v62, %v2304_v56 }
 0x217   :  { %3130 = vmatmul.f32.gmra.mxu1 %v10210_v6  ;;  %3498 = vrot.lane.b32.xlu0 %v2428_v51, %s10145_s22  ;;  %v3603_v20 = vrot.slane %v2428_v51, 2  ;;  %v3732_v52 = vrot.slane %v2428_v51, 4  ;;  %15332 = vst [vmem:[#allocation32_spill] sm:$0xff] %v10806_v25 }
 0x218   :  { %3204 = vmatmul.f32.gmra.mxu3 %v10249_v32 }
 0x21a   :  { %3168 = vmatmul.f32.gmra.mxu2 %v10243_v26  ;;  %v2507_v63 = vpop.f32.mrf.mxu3 }
 0x21b   :  { %v2405_v27 = vpop.f32.mrf.mxu0 }
 0x21c   :  { %v2431_v59 = vpop.f32.mrf.mxu1  ;;  %v2469_v60 = vpop.f32.mrf.mxu2 }
 0x21d   :  { %v10776_v45 = vadd.f32 %v2431_v59, %v2402_v61  ;;  %v10802_v34 = vpop.permute.xlu2 %4034 }
 0x21e   :  { %3228 = vmatmul.f32.vlgmr.msra.gmra.mxu0 %v10208_v5  ;;  %15331 = vst [vmem:[#allocation31_spill] sm:$0xff] %v10802_v34 }
 0x21f   :  { %15327 = vst [vmem:[#allocation27_spill] sm:$0xff] %v10776_v45  ;;  %3134 = vmatmul.f32.gmra.mxu1 %v10233_v18  ;;  %3645 = vrot.lane.b32.xlu0 %v3603_v20, %s10146_s23  ;;  %v4006_v4 = vrot.slane %v10776_v45, 2  ;;  %v10792_v20 = vpop.permute.xlu1 %3631 }
 0x220   :  { %3334 = vmatmul.f32.vlgmr.msra.gmra.mxu3 %v10208_v5  ;;  %15329 = vst [vmem:[#allocation29_spill] sm:$0xff] %v10792_v20 }
 0x221   :  { %4048 = vrot.lane.b32.xlu1 %v4006_v4, %s10148_s25  ;;  %v2374_v4 = vadd.f32 %v2373_v49, %v2338_v0  ;;  %v2508_v0 = vadd.f32 %v2507_v63, %v2469_v60  ;;  %v10822_v60 = vpop.permute.xlu0 %3486 }
 0x222   :  { %3292 = vmatmul.f32.vlgmr.msra.gmra.mxu2 %v10236_v21  ;;  %v10790_v59 = vpop.f32.mrf.mxu3  ;;  %v4135_v21 = vrot.slane %v10776_v45, 4  ;;  %15335 = vst [vmem:[#allocation35_spill] sm:$0xff] %v10822_v60 }
 0x223   :  { %v2535_v23 = vpop.f32.mrf.mxu0  ;;  %v2406_v62 = vadd.f32 %v2405_v27, %v2374_v4 }
 0x224   :  { %v2435_v12 = vpop.f32.mrf.mxu1  ;;  %v10788_v61 = vpop.f32.mrf.mxu2  ;;  %v2536_v24 = vadd.f32 %v2535_v23, %v2504_v47 }
 0x225   :  { %v2436_v42 = vadd.f32 %v2435_v12, %v2406_v62 }
 0x226   :  { %3232 = vmatmul.f32.gmra.mxu0 %v10210_v6 }
 0x227   :  { %3258 = vmatmul.f32.vlgmr.msra.gmra.mxu1 %v10208_v5  ;;  %3774 = vrot.lane.b32.xlu0 %v3732_v52, %s10147_s24  ;;  %v3861_v52 = vrot.slane %v2428_v51, 6 }
 0x228   :  { %3338 = vmatmul.f32.gmra.mxu3 %v10210_v6 }
 0x229   :  { %4177 = vrot.lane.b32.xlu1 %v4135_v21, %s10151_s30  ;;  %v4264_v21 = vrot.slane %v10776_v45, 6 }
 0x22a   :  { %3300 = vmatmul.f32.gmra.mxu2 %v10246_v31  ;;  %v2635_v44 = vpop.f32.mrf.mxu3  ;;  %v10810_v31 = vpop.permute.xlu1 %3889 }
 0x22b   :  { %v2540_v19 = vpop.f32.mrf.mxu0  ;;  %15333 = vst [vmem:[#allocation33_spill] sm:$0xff] %v10810_v31 }
 0x22c   :  { %v2569_v29 = vpop.f32.mrf.mxu1  ;;  %v2605_v35 = vpop.f32.mrf.mxu2 }
 0x22d   :  { %v2570_v56 = vadd.f32 %v2569_v29, %v2536_v24  ;;  %v2541_v29 = vadd.f32 %v2540_v19, %v2508_v0 }
 0x22e   :  { %3236 = vmatmul.f32.gmra.mxu0 %v10233_v18 }
 0x22f   :  { %v2606_v57 = vadd.f32 %v2605_v35, %v2570_v56  ;;  %3262 = vmatmul.f32.gmra.mxu1 %v10210_v6  ;;  %3903 = vrot.lane.b32.xlu0 %v3861_v52, %s10149_s28  ;;  %v10818_v35 = vpop.permute.xlu2 %4163 }
 0x230   :  { %3342 = vmatmul.f32.gmra.mxu3 %v10233_v18  ;;  %15334 = vst [vmem:[#allocation34_spill] sm:$0xff] %v10818_v35 }
 0x231   :  { %v2636_v49 = vadd.f32 %v2635_v44, %v2606_v57  ;;  %4403 = vrot.lane.b32.xlu1 %v2436_v42, %s10150_s29 }
 0x232   :  { %3308 = vmatmul.f32.gmra.mxu2 %v10257_v36  ;;  %v2639_v12 = vpop.f32.mrf.mxu3  ;;  %v10826_v36 = vpop.permute.xlu1 %3633 }
 0x233   :  { %3500 = vrot.lane.b32.xlu2 %v2636_v49, %s10145_s22  ;;  %v10816_v24 = vpop.f32.mrf.mxu0  ;;  %15336 = vst [vmem:[#allocation36_spill] sm:$0xff] %v10826_v36  ;;  %v3604_v44 = vrot.slane %v2636_v49, 2  ;;  %v3733_v42 = vrot.slane %v2636_v49, 4 }
 0x234   :  { %v2575_v51 = vpop.f32.mrf.mxu1  ;;  %v2609_v23 = vpop.f32.mrf.mxu2 }
 0x235   :  { %v2576_v27 = vadd.f32 %v2575_v51, %v2541_v29 }
 0x236   :  { %3366 = vmatmul.f32.vlgmr.msrb.gmra.mxu0 %v10216_v8 }
 0x237   :  { %v2610_v63 = vadd.f32 %v2609_v23, %v2576_v27  ;;  %3266 = vmatmul.f32.gmra.mxu1 %v10233_v18  ;;  %4306 = vrot.lane.b32.xlu0 %v4264_v21, %s10152_s9  ;;  %v10841_v52 = vpop.permute.xlu2 %4389  ;;  %v3862_v23 = vrot.slane %v2636_v49, 6 }
 0x238   :  { %3466 = vmatmul.f32.vlgmr.msrb.gmra.mxu3 %v10208_v5  ;;  %15338 = vst [vmem:[#allocation38_spill] sm:$0xff] %v10841_v52 }
 0x239   :  { %v10829_v19 = vadd.f32 %v2639_v12, %v2610_v63 }
 0x23a   :  { %3436 = vmatmul.f32.vlgmr.msrb.gmra.mxu2 %v10208_v5  ;;  %v10837_v62 = vpop.f32.mrf.mxu3  ;;  %v10846_v5 = vpop.permute.xlu0 %3762 }
 0x23b   :  { %15337 = vst [vmem:[#allocation37_spill] sm:$0xff] %v10829_v19  ;;  %3647 = vrot.lane.b32.xlu2 %v3604_v44, %s10146_s23  ;;  %v2669_v47 = vpop.f32.mrf.mxu0  ;;  %v4007_v56 = vrot.slane %v10829_v19, 2  ;;  %v10848_v57 = vpop.permute.xlu1 %4036  ;;  %v4265_v27 = vrot.slane %v10829_v19, 6  ;;  %v4136_v49 = vrot.slane %v10829_v19, 4 }
 0x23c   :  { %v10833_v8 = vpop.f32.mrf.mxu1  ;;  %v10835_v4 = vpop.f32.mrf.mxu2  ;;  %15339 = vst [vmem:[#allocation39_spill] sm:$0xff] %v10846_v5 }
 0x23d   :  { %15340 = vst [vmem:[#allocation40_spill] sm:$0xff] %v10848_v57 }
 0x23e   :  { %3371 = vmatmul.f32.gmra.mxu0 %v10219_v9 }
 0x23f   :  { %3400 = vmatmul.f32.vlgmr.msrb.gmra.mxu1 %v10222_v10  ;;  %4050 = vrot.lane.b32.xlu0 %v4007_v56, %s10148_s25  ;;  %v10854_v10 = vpop.permute.xlu2 %4165 }
 0x240   :  { %3470 = vmatmul.f32.gmra.mxu3 %v10210_v6  ;;  %15341 = vst [vmem:[#allocation41_spill] sm:$0xff] %v10854_v10 }
 0x242   :  { %3440 = vmatmul.f32.gmra.mxu2 %v10210_v6  ;;  %v2777_v51 = vpop.f32.mrf.mxu3  ;;  %v10860_v6 = vpop.permute.xlu0 %3891 }
 0x243   :  { %3776 = vrot.lane.b32.xlu2 %v3733_v42, %s10147_s24  ;;  %v2677_v0 = vpop.f32.mrf.mxu0  ;;  %15342 = vst [vmem:[#allocation42_spill] sm:$0xff] %v10860_v6  ;;  %v10865_v21 = vpop.permute.xlu1 %4294 }
 0x244   :  { %v2711_v29 = vpop.f32.mrf.mxu1  ;;  %v2743_v9 = vpop.f32.mrf.mxu2  ;;  %15343 = vst [vmem:[#allocation43_spill] sm:$0xff] %v10865_v21 }
 0x246   :  { %3376 = vmatmul.f32.gmra.mxu0 %v10243_v26 }
 0x247   :  { %3406 = vmatmul.f32.gmra.mxu1 %v10231_v17  ;;  %4308 = vrot.lane.b32.xlu0 %v4265_v27, %s10152_s9  ;;  %v10867_v56 = vpop.permute.xlu2 %3635  ;;  %v2712_v17 = vadd.f32 %v2711_v29, %v2669_v47 }
 0x248   :  { %3474 = vmatmul.f32.gmra.mxu3 %v10233_v18  ;;  %15344 = vst [vmem:[#allocation44_spill] sm:$0xff] %v10867_v56 }
 0x24a   :  { %3444 = vmatmul.f32.gmra.mxu2 %v10233_v18  ;;  %v2783_v44 = vpop.f32.mrf.mxu3  ;;  %v10872_v42 = vpop.permute.xlu0 %3488 }
 0x24b   :  { %3905 = vrot.lane.b32.xlu2 %v3862_v23, %s10149_s28  ;;  %v10863_v12 = vpop.f32.mrf.mxu0  ;;  %15345 = vst [vmem:[#allocation45_spill] sm:$0xff] %v10872_v42  ;;  %v2744_v23 = vadd.f32 %v2743_v9, %v2712_v17  ;;  %v10880_v21 = vpop.permute.xlu1 %4391 }
 0x24c   :  { %v2715_v26 = vpop.f32.mrf.mxu1  ;;  %v2748_v63 = vpop.f32.mrf.mxu2  ;;  %15346 = vst [vmem:[#allocation46_spill] sm:$0xff] %v10880_v21 }
 0x24d   :  { %v2716_v47 = vadd.f32 %v2715_v26, %v2677_v0 }
 0x24f   :  { %3412 = vmatmul.f32.gmra.mxu1 %v10249_v32  ;;  %v10882_v56 = vpop.permute.xlu2 %3764  ;;  %v2778_v32 = vadd.f32 %v2777_v51, %v2744_v23 }
 0x250   :  { %15347 = vst [vmem:[#allocation47_spill] sm:$0xff] %v10882_v56 }
 0x252   :  { %v10884_v42 = vpop.permute.xlu0 %3893 }
 0x253   :  { %4179 = vrot.lane.b32.xlu2 %v4136_v49, %s10151_s30  ;;  %v2813_v18 = vpop.f32.mrf.mxu0  ;;  %v10878_v6 = vpop.f32.mrf.mxu3  ;;  %v2749_v49 = vadd.f32 %v2748_v63, %v2716_v47  ;;  %15348 = vst [vmem:[#allocation48_spill] sm:$0xff] %v10884_v42 }
 0x254   :  { %v10874_v27 = vpop.f32.mrf.mxu1  ;;  %v10876_v45 = vpop.f32.mrf.mxu2  ;;  %v2814_v29 = vadd.f32 %v2813_v18, %v2778_v32 }
 0x255   :  { %v10886_v9 = vpop.permute.xlu1 %4038  ;;  %v2784_v21 = vadd.f32 %v2783_v44, %v2749_v49 }
 0x256   :  { %15349 = vst [vmem:[#allocation49_spill] sm:$0xff] %v10886_v9 }
 0x257   :  { %v10889_v57 = vpop.permute.xlu2 %3766 }
 0x258   :  { %15350 = vst [vmem:[#allocation50_spill] sm:$0xff] %v10889_v57 }
 0x25b   :  { %v2817_v19 = vpop.f32.mrf.mxu0  ;;  %v2919_v52 = vpop.f32.mrf.mxu3 }
 0x25c   :  { %v2843_v10 = vpop.f32.mrf.mxu1  ;;  %v2818_v0 = vadd.f32 %v2817_v19, %v2784_v21 }
 0x25d   :  { %v2844_v5 = vadd.f32 %v2843_v10, %v2814_v29  ;;  %v2877_v36 = vpop.f32.mrf.mxu2  ;;  %v10896_v32 = vpop.permute.xlu1 %3490 }
 0x25e   :  { %15352 = vst [vmem:[#allocation52_spill] sm:$0xff] %v10896_v32  ;;  %v10900_v29 = vpop.permute.xlu0 %4167 }
 0x25f   :  { %3502 = vrot.lane.b32.xlu1 %v2844_v5, %s10145_s22  ;;  %v3863_v17 = vrot.slane %v2844_v5, 6  ;;  %v3605_v18 = vrot.slane %v2844_v5, 2  ;;  %15353 = vst [vmem:[#allocation53_spill] sm:$0xff] %v10900_v29  ;;  %v10903_v44 = vpop.permute.xlu2 %4040 }
 0x260   :  { %15354 = vst [vmem:[#allocation54_spill] sm:$0xff] %v10903_v44 }
 0x261   :  { %3907 = vrot.lane.b32.xlu0 %v3863_v17, %s10149_s28  ;;  %v3734_v17 = vrot.slane %v2844_v5, 4 }
 0x263   :  { %v10892_v51 = vpop.f32.mrf.mxu0  ;;  %v2923_v23 = vpop.f32.mrf.mxu3 }
 0x264   :  { %v2847_v26 = vpop.f32.mrf.mxu1 }
 0x265   :  { %v10894_v63 = vadd.f32 %v2847_v26, %v2818_v0  ;;  %v2885_v10 = vpop.f32.mrf.mxu2  ;;  %v10912_v26 = vpop.permute.xlu1 %3637 }
 0x266   :  { %15355 = vst [vmem:[#allocation55_spill] sm:$0xff] %v10912_v26  ;;  %v10914_v57 = vpop.permute.xlu0 %4296  ;;  %v2924_v31 = vadd.f32 %v2923_v23, %v2885_v10 }
 0x267   :  { %15351 = vst [vmem:[#allocation51_spill] sm:$0xff] %v10894_v63  ;;  %3649 = vrot.lane.b32.xlu1 %v3605_v18, %s10146_s23  ;;  %v4137_v47 = vrot.slane %v10894_v63, 4  ;;  %v2920_v18 = vadd.f32 %v2919_v52, %v2877_v36  ;;  %v10916_v56 = vpop.permute.xlu2 %4169  ;;  %v4008_v9 = vrot.slane %v10894_v63, 2 }
 0x268   :  { %15356 = vst [vmem:[#allocation56_spill] sm:$0xff] %v10914_v57 }
 0x269   :  { %4181 = vrot.lane.b32.xlu2 %v4137_v47, %s10151_s30  ;;  %15357 = vst [vmem:[#allocation57_spill] sm:$0xff] %v10916_v56 }
 0x26b   :  { %v2951_v19 = vpop.f32.mrf.mxu0  ;;  %v10909_v0 = vpop.f32.mrf.mxu3 }
 0x26c   :  { %v10905_v21 = vpop.f32.mrf.mxu1  ;;  %v2952_v32 = vadd.f32 %v2951_v19, %v2920_v18 }
 0x26d   :  { %v10907_v49 = vpop.f32.mrf.mxu2  ;;  %v10920_v25 = vpop.permute.xlu1 %3895 }
 0x26e   :  { %15358 = vst [vmem:[#allocation58_spill] sm:$0xff] %v10920_v25  ;;  %v10925_v18 = vpop.permute.xlu0 %4393 }
 0x26f   :  { %3778 = vrot.lane.b32.xlu1 %v3734_v17, %s10147_s24  ;;  %15359 = vst [vmem:[#allocation59_spill] sm:$0xff] %v10925_v18 }
 0x273   :  { %v2956_v42 = vpop.f32.mrf.mxu0  ;;  %v3051_v60 = vpop.f32.mrf.mxu3 }
 0x274   :  { %v2985_v47 = vpop.f32.mrf.mxu1  ;;  %v2957_v36 = vadd.f32 %v2956_v42, %v2924_v31 }
 0x275   :  { %v2986_v44 = vadd.f32 %v2985_v47, %v2952_v32  ;;  %v3021_v29 = vpop.f32.mrf.mxu2  ;;  %v10932_v31 = vpop.permute.xlu1 %3639 }
 0x276   :  { %15362 = vst [vmem:[#allocation62_spill] sm:$0xff] %v10932_v31 }
 0x277   :  { %v3022_v5 = vadd.f32 %v3021_v29, %v2986_v44  ;;  %4052 = vrot.lane.b32.xlu1 %v4008_v9, %s10148_s25  ;;  %v10928_v44 = vpop.permute.xlu2 %4298 }
 0x278   :  { %15360 = vst [vmem:[#allocation60_spill] sm:$0xff] %v10928_v44 }
 0x279   :  { %v3052_v17 = vadd.f32 %v3051_v60, %v3022_v5  ;;  %v10936_v5 = vpop.permute.xlu0 %3492 }
 0x27a   :  { %15363 = vst [vmem:[#allocation63_spill] sm:$0xff] %v10936_v5 }
 0x27b   :  { %3504 = vrot.lane.b32.xlu0 %v3052_v17, %s10145_s22  ;;  %v10923_v52 = vpop.f32.mrf.mxu0  ;;  %v3735_v19 = vrot.slane %v3052_v17, 4  ;;  %v3055_v29 = vpop.f32.mrf.mxu3  ;;  %v3606_v10 = vrot.slane %v3052_v17, 2 }
 0x27c   :  { %v2991_v32 = vpop.f32.mrf.mxu1 }
 0x27d   :  { %v2992_v47 = vadd.f32 %v2991_v32, %v2957_v36  ;;  %3780 = vrot.lane.b32.xlu2 %v3735_v19, %s10147_s24  ;;  %v3025_v56 = vpop.f32.mrf.mxu2 }
 0x27f   :  { %v3026_v9 = vadd.f32 %v3025_v56, %v2992_v47  ;;  %v10945_v56 = vpop.permute.xlu2 %4395  ;;  %v3864_v47 = vrot.slane %v3052_v17, 6 }
 0x280   :  { %15364 = vst [vmem:[#allocation64_spill] sm:$0xff] %v10945_v56 }
 0x281   :  { %v10930_v60 = vadd.f32 %v3055_v29, %v3026_v9  ;;  %v10950_v44 = vpop.permute.xlu0 %3768 }
 0x282   :  { %15366 = vst [vmem:[#allocation66_spill] sm:$0xff] %v10950_v44 }
 0x283   :  { %15361 = vst [vmem:[#allocation61_spill] sm:$0xff] %v10930_v60  ;;  %3651 = vrot.lane.b32.xlu0 %v3606_v10, %s10146_s23  ;;  %v3085_v42 = vpop.f32.mrf.mxu0  ;;  %v4009_v23 = vrot.slane %v10930_v60, 2  ;;  %v10943_v32 = vpop.f32.mrf.mxu3 }
 0x284   :  { %v10938_v36 = vpop.f32.mrf.mxu1  ;;  %v10948_v10 = vpop.permute.xlu1 %4042 }
 0x285   :  { %4054 = vrot.lane.b32.xlu1 %v4009_v23, %s10148_s25  ;;  %v10941_v19 = vpop.f32.mrf.mxu2  ;;  %15365 = vst [vmem:[#allocation65_spill] sm:$0xff] %v10948_v10 }
 0x287   :  { %v10952_v5 = vpop.permute.xlu2 %3641 }
 0x288   :  { %15367 = vst [vmem:[#allocation67_spill] sm:$0xff] %v10952_v5 }
 0x289   :  { %v10958_v17 = vpop.permute.xlu0 %3897 }
 0x28a   :  { %15369 = vst [vmem:[#allocation69_spill] sm:$0xff] %v10958_v17 }
 0x28b   :  { %3909 = vrot.lane.b32.xlu0 %v3864_v47, %s10149_s28  ;;  %v3093_v29 = vpop.f32.mrf.mxu0  ;;  %v3193_v31 = vpop.f32.mrf.mxu3 }
 0x28c   :  { %v3127_v9 = vpop.f32.mrf.mxu1  ;;  %v10956_v35 = vpop.permute.xlu1 %4171 }
 0x28d   :  { %v3159_v25 = vpop.f32.mrf.mxu2  ;;  %15368 = vst [vmem:[#allocation68_spill] sm:$0xff] %v10956_v35  ;;  %v3128_v47 = vadd.f32 %v3127_v9, %v3085_v42 }
 0x28f   :  { %v10960_v56 = vpop.permute.xlu2 %3770  ;;  %v3160_v20 = vadd.f32 %v3159_v25, %v3128_v47 }
 0x290   :  { %15370 = vst [vmem:[#allocation70_spill] sm:$0xff] %v10960_v56 }
 0x291   :  { %v10968_v5 = vpop.permute.xlu0 %3494  ;;  %v3194_v48 = vadd.f32 %v3193_v31, %v3160_v20 }
 0x292   :  { %15372 = vst [vmem:[#allocation72_spill] sm:$0xff] %v10968_v5 }
 0x293   :  { %v10954_v23 = vpop.f32.mrf.mxu0  ;;  %v3199_v57 = vpop.f32.mrf.mxu3 }
 0x294   :  { %v3131_v26 = vpop.f32.mrf.mxu1  ;;  %v10970_v14 = vpop.permute.xlu1 %4300 }
 0x295   :  { %v3164_v18 = vpop.f32.mrf.mxu2  ;;  %15373 = vst [vmem:[#allocation73_spill] sm:$0xff] %v10970_v14  ;;  %v3132_v55 = vadd.f32 %v3131_v26, %v3093_v29 }
 0x297   :  { %v10972_v17 = vpop.permute.xlu2 %3899  ;;  %v3165_v11 = vadd.f32 %v3164_v18, %v3132_v55  ;;  %v2512_v55 = vadd.f32 %v10790_v59, %v10788_v61 }
 0x298   :  { %15374 = vst [vmem:[#allocation74_spill] sm:$0xff] %v10972_v17 }
 0x299   :  { %v10975_v47 = vpop.permute.xlu0 %4044 }
 0x29a   :  { %15375 = vst [vmem:[#allocation75_spill] sm:$0xff] %v10975_v47 }
 0x29b   :  { %v3229_v34 = vpop.f32.mrf.mxu0  ;;  %v10966_v33 = vpop.f32.mrf.mxu3 }
 0x29c   :  { %v10962_v10 = vpop.f32.mrf.mxu1  ;;  %15371 = vst [vmem:[#allocation71_spill] sm:$0xff] %v10966_v33  ;;  %v3230_v58 = vadd.f32 %v3229_v34, %v3194_v48  ;;  %v10978_v22 = vpop.permute.xlu1 %4397 }
 0x29d   :  { %v10964_v44 = vpop.f32.mrf.mxu2  ;;  %15376 = vst [vmem:[#allocation76_spill] sm:$0xff] %v10978_v22 }
 0x29f   :  { %v10980_v14 = vpop.permute.xlu2 %4046 }
 0x2a0   :  { %15377 = vst [vmem:[#allocation77_spill] sm:$0xff] %v10980_v14 }
 0x2a3   :  { %v3233_v35 = vpop.f32.mrf.mxu0  ;;  %v3335_v56 = vpop.f32.mrf.mxu3 }
 0x2a4   :  { %v3259_v1 = vpop.f32.mrf.mxu1 }
 0x2a5   :  { %v3260_v42 = vadd.f32 %v3259_v1, %v3230_v58  ;;  %v3293_v9 = vpop.f32.mrf.mxu2  ;;  %v10985_v58 = vpop.permute.xlu0 %4173 }
 0x2a6   :  { %15379 = vst [vmem:[#allocation79_spill] sm:$0xff] %v10985_v58  ;;  %v10987_v1 = vpop.permute.xlu1 %3496 }
 0x2a7   :  { %3506 = vrot.lane.b32.xlu2 %v3260_v42, %s10145_s22  ;;  %v3607_v25 = vrot.slane %v3260_v42, 2  ;;  %v3736_v20 = vrot.slane %v3260_v42, 4  ;;  %15380 = vst [vmem:[#allocation80_spill] sm:$0xff] %v10987_v1  ;;  %v10995_v37 = vpop.permute.xlu2 %4175 }
 0x2a8   :  { %15382 = vst [vmem:[#allocation82_spill] sm:$0xff] %v10995_v37  ;;  %v3200_v37 = vadd.f32 %v3199_v57, %v3165_v11  ;;  %v2546_v11 = vadd.f32 %v10816_v24, %v2512_v55 }
 0x2a9   :  { %3653 = vrot.lane.b32.xlu1 %v3607_v25, %s10146_s23  ;;  %v3865_v25 = vrot.slane %v3260_v42, 6 }
 0x2aa   :  { %v3234_v26 = vadd.f32 %v3233_v35, %v3200_v37  ;;  %v4138_v37 = vrot.slane %v10930_v60, 4  ;;  %v3510_v35 = vlaneseq }
 0x2ab   :  { %v10982_v34 = vpop.f32.mrf.mxu0  ;;  %v3339_v31 = vpop.f32.mrf.mxu3 }
 0x2ac   :  { %v3263_v5 = vpop.f32.mrf.mxu1  ;;  %15378 = vst [vmem:[#allocation78_spill] sm:$0xff] %v10982_v34  ;;  %v3336_v34 = vadd.f32 %v3335_v56, %v3293_v9  ;;  %v11032_v24 = vand.u32 127, %v3510_v35 }
 0x2ad   :  { %v3301_v48 = vpop.f32.mrf.mxu2 }
 0x2ae   :  { %v11000_v54 = vpop.permute.xlu1 %3643  ;;  %vm3512_vm2 = vcmp.lt.s32.totalorder %v11032_v24, 33  ;;  %vm3657_vm3 = vcmp.lt.s32.totalorder %v11032_v24, 32  ;;  %vm3786_vm4 = vcmp.lt.s32.totalorder %v11032_v24, 31  ;;  %vm4060_vm5 = vcmp.lt.s32.totalorder %v11032_v24, 127 }
 0x2af   :  { %3782 = vrot.lane.b32.xlu2 %v3736_v20, %s10147_s24  ;;  %v10998_v20 = vpop.permute.xlu0 %4302  ;;  %v11002_v38 = vpop.permute.xlu2 %4304  ;;  %vm3915_vm6 = vcmp.lt.s32.totalorder %v11032_v24, 1  ;;  %vm4415_vm7 = vcmp.lt.s32.totalorder %v11032_v24, 95  ;;  %vm4189_vm8 = vcmp.lt.s32.totalorder %v11032_v24, 97  ;;  %vm4318_vm9 = vcmp.lt.s32.totalorder %v11032_v24, 96 }
 0x2b3   :  { %v10993_v22 = vpop.f32.mrf.mxu3  ;;  %v3367_v14 = vpop.f32.mrf.mxu0 }
 0x2b4   :  { %v10989_v17 = vpop.f32.mrf.mxu1  ;;  %v3368_v33 = vadd.f32 %v3367_v14, %v3336_v34  ;;  %v2720_v14 = vadd.f32 %v10874_v27, %v10863_v12  ;;  %v2582_v12 = vadd.f32 %v10833_v8, %v2546_v11  ;;  %v3340_v34 = vadd.f32 %v3339_v31, %v3301_v48 }
 0x2b5   :  { %15381 = vst [vmem:[#allocation81_spill] sm:$0xff] %v10989_v17  ;;  %v10991_v47 = vpop.f32.mrf.mxu2 }
 0x2b6   :  { %v11013_v18 = vpop.permute.xlu1 %3772  ;;  %v2754_v57 = vadd.f32 %v10876_v45, %v2720_v14  ;;  %v2614_v8 = vadd.f32 %v10835_v4, %v2582_v12 }
 0x2b7   :  { %3911 = vrot.lane.b32.xlu2 %v3865_v25, %s10149_s28  ;;  %v11019_v29 = vpop.permute.xlu2 %3500 }
 0x2b8   :  { %v2790_v59 = vadd.f32 %v10878_v6, %v2754_v57  ;;  %v11075_v57 = vld [vmem:[%s15025_s1] sm:$0xff] }
 0x2b9   :  { %15385 = vst [vmem:[#allocation85_spill] sm:$0xff] %v11075_v57 }
 0x2bb   :  { %v3467_v41 = vpop.f32.mrf.mxu3  ;;  %v3372_v9 = vpop.f32.mrf.mxu0 }
 0x2bc   :  { %v3401_v58 = vpop.f32.mrf.mxu1 }
 0x2bd   :  { %v3402_v1 = vadd.f32 %v3401_v58, %v3368_v33  ;;  %v3437_v17 = vpop.f32.mrf.mxu2  ;;  %v11009_v33 = vpop.permute.xlu0 %4399  ;;  %v11045_v58 = vld [vmem:[%s15025_s1 + $0x8] sm:$0xff] }
 0x2be   :  { %15384 = vst [vmem:[#allocation84_spill] sm:$0xff] %v11045_v58 }
 0x2bf   :  { %v3438_v42 = vadd.f32 %v3437_v17, %v3402_v1  ;;  %v2822_v17 = vadd.f32 %v10892_v51, %v2790_v59  ;;  %v15109_v51 = vperm.slane %v11045_v58, 0  ;;  %v11049_v1 = vpop.permute.xlu2 %3647 }
 0x2c1   :  { %v3468_v2 = vadd.f32 %v3467_v41, %v3438_v42  ;;  %v11015_v41 = vadd.f32 %v3263_v5, %v3234_v26  ;;  %v2928_v5 = vadd.f32 %v10909_v0, %v10907_v49  ;;  %v2852_v6 = vadd.f32 %v10905_v21, %v2822_v17  ;;  %v11039_v49 = vpop.permute.xlu1 %3901 }
 0x2c2   :  { %v3373_v42 = vadd.f32 %v3372_v9, %v3340_v34  ;;  %v4266_v21 = vrot.slane %v10894_v63, 6  ;;  %v3344_v17 = vadd.f32 %v10993_v22, %v10991_v47  ;;  %v15104_v9 = vperm.slane %v11075_v57, 5 }
 0x2c3   :  { %3508 = vrot.lane.b32.xlu1 %v3468_v2, %s10145_s22  ;;  %v3737_v25 = vrot.slane %v3468_v2, 4  ;;  %v3608_v56 = vrot.slane %v3468_v2, 2  ;;  %15383 = vst [vmem:[#allocation83_spill] sm:$0xff] %v11015_v41  ;;  %v3866_v27 = vrot.slane %v3468_v2, 6  ;;  %v4010_v61 = vrot.slane %v11015_v41, 2  ;;  %v3471_v11 = vpop.f32.mrf.mxu3  ;;  %v3377_v59 = vpop.f32.mrf.mxu0 }
 0x2c4   :  { %v2962_v2 = vadd.f32 %v10923_v52, %v2928_v5  ;;  %v3407_v4 = vpop.f32.mrf.mxu1  ;;  %v2644_v52 = vadd.f32 %v10837_v62, %v2614_v8  ;;  %v4139_v12 = vrot.slane %v11015_v41, 4  ;;  %v11094_v5 = vld [vmem:[%s15025_s1 + $0x10] sm:$0xff]  ;;  %v3136_v22 = vadd.f32 %v10962_v10, %v10954_v23 }
 0x2c5   :  { %3784 = vrot.lane.b32.xlu2 %v3737_v25, %s10147_s24  ;;  %3655 = vrot.lane.b32.xlu0 %v3608_v56, %s10146_s23  ;;  %v11030_v45 = vpop.permute.xlu0 %3498  ;;  %v3408_v31 = vadd.f32 %v3407_v4, %v3373_v42  ;;  %v3441_v62 = vpop.f32.mrf.mxu2  ;;  %v15108_v56 = vperm.slane %v11045_v58, 1  ;;  %15386 = vst [vmem:[#allocation86_spill] sm:$0xff] %v11094_v5  ;;  %v3526_v4 = vsel %vm3512_vm2, %v10749_v15, %v10763_v53  ;;  %v15105_v10 = vperm.slane %v11045_v58, 5 }
 0x2c6   :  { %v2998_v0 = vadd.f32 %v10938_v36, %v2962_v2  ;;  %v3527_v36 = vsel %vm3512_vm2, %v10651_v40, %v10749_v15  ;;  %v3378_v47 = vadd.f32 %v3377_v59, %v3344_v17  ;;  %v3930_v15 = vsel %vm3915_vm6, %v10691_v16, %v10716_v3  ;;  %v15391_v17 = vld [vmem:[#allocation18_spill] sm:$0xff] }
 0x2c7   :  { %v3546_v25 = vmul.f32 %v15109_v51, %v3527_v36  ;;  %v3442_v55 = vadd.f32 %v3441_v62, %v3408_v31  ;;  %v11096_v8 = vpop.permute.xlu2 %3776  ;;  %v4074_v31 = vsel %vm4060_vm5, %v10681_v7, %v10772_v13 }
 0x2c8   :  { %v3030_v48 = vadd.f32 %v10941_v19, %v2998_v0  ;;  %v3672_v19 = vsel %vm3657_vm3, %v10647_v28, %v10662_v50 }
 0x2c9   :  { %v11078_v35 = vpop.permute.xlu1 %4401  ;;  %v11100_v2 = vadd.f32 %v3471_v11, %v3442_v55  ;;  %v3170_v55 = vadd.f32 %v10964_v44, %v3136_v22  ;;  %v15110_v44 = vperm.slane %v11094_v5, 1  ;;  %v15112_v22 = vperm.slane %v11094_v5, 2 }
 0x2ca   :  { %v3060_v26 = vadd.f32 %v10943_v32, %v3030_v48  ;;  %v3691_v32 = vmul.f32 %v15108_v56, %v3672_v19 }
 0x2cb   :  { %4183 = vrot.lane.b32.xlu1 %v4138_v37, %s10151_s30  ;;  %v3562_v37 = vadd.f32 %v3546_v25, %v10385_v39  ;;  %v3801_v39 = vsel %vm3786_vm4, %v10671_v43, %v10697_v30  ;;  %15387 = vst [vmem:[#allocation87_spill] sm:$0xff] %v11100_v2  ;;  %v4011_v36 = vrot.slane %v11100_v2, 2  ;;  %v4140_v11 = vrot.slane %v11100_v2, 4  ;;  %v15497_v43 = vld [vmem:[#allocation68_spill] sm:$0xff] }
 0x2cc   :  { %v3413_v0 = vpop.f32.mrf.mxu1 }
 0x2cd   :  { %3913 = vrot.lane.b32.xlu2 %v3866_v27, %s10149_s28  ;;  %4056 = vrot.lane.b32.xlu0 %v4010_v61, %s10148_s25  ;;  %v11064_v14 = vpop.permute.xlu0 %3645  ;;  %v4267_v27 = vrot.slane %v10930_v60, 6  ;;  %v15107_v61 = vperm.slane %v11045_v58, 2  ;;  %v3707_v34 = vadd.f32 %v3691_v32, %v3562_v37  ;;  %v3414_v23 = vadd.f32 %v3413_v0, %v3378_v47  ;;  %v3445_v25 = vpop.f32.mrf.mxu2 }
 0x2ce   :  { %v4268_v37 = vrot.slane %v11015_v41, 6  ;;  %v3671_v0 = vsel %vm3657_vm3, %v10662_v50, %v15391_v17  ;;  %v15113_v47 = vperm.slane %v11045_v58, 6  ;;  %v15436_v41 = vld [vmem:[#allocation39_spill] sm:$0xff] }
 0x2cf   :  { %v3820_v42 = vmul.f32 %v15107_v61, %v3801_v39  ;;  %v15407_v61 = vld [vmem:[#allocation31_spill] sm:$0xff] }
 0x2d0   :  { %v4073_v39 = vsel %vm4060_vm5, %v10772_v13, %v15407_v61  ;;  %v15411_v13 = vperm.slane %v11045_v58, 7 }
 0x2d1   :  { %v3836_v19 = vadd.f32 %v3820_v42, %v3707_v34  ;;  %v4094_v34 = vmul.f32 %v15105_v10, %v4074_v31  ;;  %v15396_v10 = vld [vmem:[#allocation17_spill] sm:$0xff] }
 0x2d3   :  { %4407 = vrot.lane.b32.xlu1 %v2852_v6, %s10150_s29  ;;  %v15111_v6 = vperm.slane %v11094_v5, 0 }
 0x2d5   :  { %4310 = vrot.lane.b32.xlu2 %v4266_v21, %s10152_s9  ;;  %4405 = vrot.lane.b32.xlu0 %v2644_v52, %s10150_s29  ;;  %v4075_v52 = vsel %vm4060_vm5, %v10659_v46, %v10681_v7  ;;  %v15106_v21 = vperm.slane %v11045_v58, 3  ;;  %v3547_v48 = vmul.f32 %v15111_v6, %v3526_v4  ;;  %v11134_v62 = vpop.permute.xlu0 %3774  ;;  %v15390_v7 = vld [vmem:[#allocation13_spill] sm:$0xff]  ;;  %v3446_v4 = vadd.f32 %v3445_v25, %v3414_v23  ;;  %v15394_v25 = vld [vmem:[#allocation71_spill] sm:$0xff]  ;;  %v15400_v23 = vld [vmem:[#allocation26_spill] sm:$0xff] }
 0x2d7   :  { %v3949_v59 = vmul.f32 %v15106_v21, %v3930_v15  ;;  %v3475_v15 = vpop.f32.mrf.mxu3 }
 0x2d8   :  { %v3476_v51 = vadd.f32 %v3475_v15, %v3446_v4  ;;  %v10110_v4 = vld [vmem:[%s15025_s1 + $0x88] ss:$0 sm:$0xff] }
 0x2d9   :  { %v3965_v31 = vadd.f32 %v3949_v59, %v3836_v19  ;;  %v11188_v19 = vld [vmem:[%s15025_s1 + $0x18] sm:$0xff] }
 0x2da   :  { %v15116_v59 = vperm.slane %v11188_v19, 0  ;;  %v15424_v58 = vperm.slane %v11188_v19, 2 }
 0x2db   :  { %4409 = vrot.lane.b32.xlu1 %v3060_v26, %s10150_s29  ;;  %v11136_v26 = vpop.permute.xlu1 %4048 }
 0x2dd   :  { %4185 = vrot.lane.b32.xlu2 %v4139_v12, %s10151_s30  ;;  %4312 = vrot.lane.b32.xlu0 %v4267_v27, %s10152_s9  ;;  %v11144_v12 = vmul.f32 %v15104_v9, %v4075_v52  ;;  %v15389_v27 = vld [vmem:[#allocation15_spill] sm:$0xff]  ;;  %v15395_v9 = vld [vmem:[#allocation20_spill] sm:$0xff] }
 0x2de   :  { %v4430_v32 = vsel %vm4415_vm7, %v15390_v7, %v15389_v27  ;;  %v15392_v52 = vld [vmem:[#allocation3_spill] sm:$0xff]  ;;  %v4204_v21 = vsel %vm4189_vm8, %v15396_v10, %v15395_v9  ;;  %15398 = vst [vmem:[#allocation15_spill] sm:$0xff] %v11188_v19 }
 0x2df   :  { %15388 = vst [vmem:[#allocation88_spill] sm:$0xff] %v11144_v12  ;;  %v3563_v42 = vadd.f32 %v3547_v48, %v15392_v52  ;;  %v3692_v48 = vmul.f32 %v15110_v44, %v3671_v0  ;;  %v15397_v52 = vld [vmem:[#allocation23_spill] sm:$0xff]  ;;  %v10109_v0 = vld [vmem:[%s15025_s1 + $0x80] ss:$0 sm:$0xff] }
 0x2e1   :  { %v3708_v44 = vadd.f32 %v3692_v48, %v3563_v42  ;;  %v4269_v42 = vrot.slane %v11100_v2, 6  ;;  %v15403_v48 = vld [vmem:[#allocation25_spill] sm:$0xff] }
 0x2e3   :  { %4058 = vrot.lane.b32.xlu1 %v4011_v36, %s10148_s25  ;;  %v15393_v36 = vld [vmem:[#allocation21_spill] sm:$0xff]  ;;  %v11236_v10 = vpop.permute.xlu1 %4177 }
 0x2e4   :  { %v3800_v50 = vsel %vm3786_vm4, %v10697_v30, %v15393_v36  ;;  %v4203_v30 = vsel %vm4189_vm8, %v15395_v9, %v15397_v52 }
 0x2e5   :  { %4187 = vrot.lane.b32.xlu2 %v4140_v11, %s10151_s30  ;;  %4314 = vrot.lane.b32.xlu0 %v4268_v37, %s10152_s9  ;;  %v3206_v11 = vadd.f32 %v15394_v25, %v3170_v55  ;;  %v11172_v37 = vpop.permute.xlu2 %3905  ;;  %v4110_v55 = vadd.f32 %v4094_v34, %v3965_v31  ;;  %v15399_v25 = vld [vmem:[#allocation78_spill] sm:$0xff]  ;;  %v3821_v9 = vmul.f32 %v15112_v22, %v3800_v50  ;;  %v15402_v50 = vld [vmem:[#allocation24_spill] sm:$0xff] }
 0x2e6   :  { %v3525_v34 = vsel %vm3512_vm2, %v10763_v53, %v15400_v23  ;;  %v4223_v31 = vmul.f32 %v15113_v47, %v4203_v30  ;;  %v3929_v53 = vsel %vm3915_vm6, %v10716_v3, %v15402_v50  ;;  %v15404_v22 = vld [vmem:[#allocation22_spill] sm:$0xff] }
 0x2e7   :  { %v3238_v56 = vadd.f32 %v15399_v25, %v3206_v11  ;;  %v15401_v11 = vld [vmem:[#allocation81_spill] sm:$0xff]  ;;  %v4332_v30 = vsel %vm4318_vm9, %v15404_v22, %v15403_v48  ;;  %v15405_v47 = vld [vmem:[#allocation30_spill] sm:$0xff]  ;;  %v3548_v7 = vmul.f32 %v15116_v59, %v3525_v34 }
 0x2e8   :  { %v4429_v6 = vsel %vm4415_vm7, %v15389_v27, %v15405_v47  ;;  %v4239_v3 = vadd.f32 %v4223_v31, %v4110_v55  ;;  %v11240_v27 = vmul.f32 %v10109_v0, %v4430_v32  ;;  %v3837_v55 = vadd.f32 %v3821_v9, %v3708_v44  ;;  %v15412_v34 = vld [vmem:[#allocation34_spill] sm:$0xff] }
 0x2e9   :  { %v3268_v25 = vadd.f32 %v15401_v11, %v3238_v56  ;;  %v15406_v56 = vld [vmem:[#allocation29_spill] sm:$0xff]  ;;  %v11227_v11 = vpop.permute.xlu0 %3903  ;;  %v15117_v31 = vperm.slane %v11094_v5, 6  ;;  %v4352_v46 = vmul.f32 %v15411_v13, %v4332_v30  ;;  %v4449_v2 = vmul.f32 %v10110_v4, %v4429_v6  ;;  %v15418_v13 = vld [vmem:[#allocation32_spill] sm:$0xff] }
 0x2ea   :  { %15408 = vst [vmem:[#allocation18_spill] sm:$0xff] %v11240_v27  ;;  %v15414_v0 = vperm.slane %v11094_v5, 3  ;;  %v15415_v44 = vperm.slane %v11094_v5, 5  ;;  %v11264_v6 = vld [vmem:[%s15025_s1 + $0x20] sm:$0xff] }
 0x2eb   :  { %4413 = vrot.lane.b32.xlu1 %v3476_v51, %s10150_s29  ;;  %v3670_v51 = vsel %vm3657_vm3, %v15391_v17, %v15406_v56  ;;  %v15409_v17 = vperm.slane %v11075_v57, 6  ;;  %15416 = vst [vmem:[#allocation21_spill] sm:$0xff] %v11264_v6  ;;  %v4368_v4 = vadd.f32 %v4352_v46, %v4239_v3  ;;  %v15420_v3 = vld [vmem:[#allocation33_spill] sm:$0xff] }
 0x2ec   :  { %v3950_v59 = vmul.f32 %v15414_v0, %v3929_v53  ;;  %v4095_v9 = vmul.f32 %v15415_v44, %v4073_v39  ;;  %v4331_v53 = vsel %vm4318_vm9, %v15403_v48, %v15418_v13  ;;  %v15419_v0 = vld [vmem:[#allocation28_spill] sm:$0xff]  ;;  %v15421_v48 = vld [vmem:[#allocation19_spill] sm:$0xff] }
 0x2ed   :  { %4316 = vrot.lane.b32.xlu2 %v4269_v42, %s10152_s9  ;;  %4411 = vrot.lane.b32.xlu0 %v3268_v25, %s10150_s29  ;;  %v11244_v15 = vmul.f32 %v15409_v17, %v4204_v21  ;;  %v4202_v42 = vsel %vm4189_vm8, %v15397_v52, %v15412_v34  ;;  %v15413_v25 = vperm.slane %v11188_v19, 1  ;;  %v15120_v17 = vperm.slane %v11094_v5, 7  ;;  %v15417_v52 = vld [vmem:[#allocation4_spill] sm:$0xff]  ;;  %v15431_v5 = vld [vmem:[#allocation45_spill] sm:$0xff] }
 0x2ee   :  { %v3564_v30 = vadd.f32 %v3548_v7, %v15417_v52  ;;  %v3966_v39 = vadd.f32 %v3950_v59, %v3837_v55  ;;  %v3799_v44 = vsel %vm3786_vm4, %v15393_v36, %v15419_v0  ;;  %v4224_v46 = vmul.f32 %v15117_v31, %v4202_v42  ;;  %v15423_v42 = vld [vmem:[#allocation35_spill] sm:$0xff] }
 0x2ef   :  { %15410 = vst [vmem:[#allocation3_spill] sm:$0xff] %v11244_v15  ;;  %v3693_v32 = vmul.f32 %v15413_v25, %v3670_v51  ;;  %v11272_v25 = vpop.permute.xlu2 %4179  ;;  %v3928_v7 = vsel %vm3915_vm6, %v15402_v50, %v15420_v3  ;;  %v4333_v52 = vsel %vm4318_vm9, %v15421_v48, %v15404_v22  ;;  %v11288_v51 = vadd.f32 %v4449_v2, %v4368_v4  ;;  %v10111_v2 = vld [vmem:[%s15025_s1 + $0x90] ss:$0 sm:$0xff]  ;;  %v15427_v4 = vld [vmem:[#allocation40_spill] sm:$0xff]  ;;  %v15450_v15 = vld [vmem:[#allocation49_spill] sm:$0xff] }
 0x2f0   :  { %v15123_v55 = vperm.slane %v11264_v6, 0  ;;  %v4111_v21 = vadd.f32 %v4095_v9, %v3966_v39  ;;  %v4353_v36 = vmul.f32 %v15120_v17, %v4331_v53  ;;  %v3524_v31 = vsel %vm3512_vm2, %v15400_v23, %v15423_v42  ;;  %v11308_v9 = vld [vmem:[%s15025_s1 + $0x28] sm:$0xff] }
 0x2f1   :  { %15422 = vst [vmem:[#allocation71_spill] sm:$0xff] %v11288_v51  ;;  %v3709_v59 = vadd.f32 %v3693_v32, %v3564_v30  ;;  %v3822_v27 = vmul.f32 %v15424_v58, %v3799_v44  ;;  %v15425_v22 = vperm.slane %v11188_v19, 3  ;;  %v4072_v23 = vsel %vm4060_vm5, %v15407_v61, %v15427_v4  ;;  %v15430_v39 = vld [vmem:[#allocation38_spill] sm:$0xff] }
 0x2f2   :  { %15426 = vst [vmem:[#allocation20_spill] sm:$0xff] %v11308_v9  ;;  %v15428_v58 = vperm.slane %v11075_v57, 7  ;;  %v4240_v53 = vadd.f32 %v4224_v46, %v4111_v21  ;;  %v4428_v44 = vsel %vm4415_vm7, %v15405_v47, %v15430_v39  ;;  %v3549_v50 = vmul.f32 %v15123_v55, %v3524_v31  ;;  %v11332_v46 = vpop.permute.xlu1 %4403 }
 0x2f3   :  { %v3951_v32 = vmul.f32 %v15425_v22, %v3928_v7  ;;  %v11323_v22 = vpop.permute.xlu0 %4306  ;;  %v3838_v17 = vadd.f32 %v3822_v27, %v3709_v59  ;;  %v3523_v21 = vsel %vm3512_vm2, %v15423_v42, %v15431_v5  ;;  %v11336_v47 = vsel %vm4482_vm10, %v11288_v51, 0.0  ;;  %v15441_v42 = vld [vmem:[#allocation43_spill] sm:$0xff] }
 0x2f4   :  { %v11316_v30 = vmul.f32 %v15428_v58, %v4333_v52  ;;  %15432 = vst [vmem:[#allocation78_spill] sm:$0xff] %v11336_v47  ;;  %v4369_v52 = vadd.f32 %v4353_v36, %v4240_v53  ;;  %v15433_v58 = vld [vmem:[#allocation36_spill] sm:$0xff]  ;;  %v15434_v31 = vperm.slane %v11188_v19, 5  ;;  %v4450_v55 = vmul.f32 %v10111_v2, %v4428_v44  ;;  %v15438_v2 = vld [vmem:[#allocation41_spill] sm:$0xff] }
 0x2f5   :  { %v3669_v27 = vsel %vm3657_vm3, %v15406_v56, %v15433_v58  ;;  %v3967_v61 = vadd.f32 %v3951_v32, %v3838_v17  ;;  %v3798_v36 = vsel %vm3786_vm4, %v15419_v0, %v15436_v41  ;;  %v15437_v51 = vperm.slane %v11308_v9, 0  ;;  %v15439_v32 = vld [vmem:[#allocation5_spill] sm:$0xff] }
 0x2f6   :  { %15429 = vst [vmem:[#allocation23_spill] sm:$0xff] %v11316_v30  ;;  %v4096_v59 = vmul.f32 %v15434_v31, %v4072_v23  ;;  %v4201_v17 = vsel %vm4189_vm8, %v15412_v34, %v15438_v2  ;;  %v3565_v44 = vadd.f32 %v3549_v50, %v15439_v32  ;;  %v15440_v31 = vperm.slane %v11264_v6, 1  ;;  %v10112_v50 = vld [vmem:[%s15025_s1 + $0x98] ss:$0 sm:$0xff]  ;;  %v15449_v30 = vld [vmem:[#allocation6_spill] sm:$0xff] }
 0x2f7   :  { %v11346_v48 = vpop.permute.xlu2 %4181  ;;  %v3550_v23 = vmul.f32 %v15437_v51, %v3523_v21  ;;  %v4330_v0 = vsel %vm4318_vm9, %v15418_v13, %v15441_v42  ;;  %v11367_v53 = vadd.f32 %v4450_v55, %v4369_v52  ;;  %v15443_v21 = vld [vmem:[#allocation42_spill] sm:$0xff]  ;;  %v15445_v13 = vperm.slane %v11264_v6, 2 }
 0x2f8   :  { %15435 = vst [vmem:[#allocation26_spill] sm:$0xff] %v11346_v48  ;;  %v3694_v7 = vmul.f32 %v15440_v31, %v3669_v27  ;;  %v4112_v51 = vadd.f32 %v4096_v59, %v3967_v61  ;;  %v3927_v34 = vsel %vm3915_vm6, %v15420_v3, %v15443_v21  ;;  %v15444_v27 = vld [vmem:[#allocation44_spill] sm:$0xff]  ;;  %v15446_v52 = vld [vmem:[#allocation46_spill] sm:$0xff]  ;;  %v15447_v3 = vperm.slane %v11188_v19, 6 }
 0x2f9   :  { %15442 = vst [vmem:[#allocation81_spill] sm:$0xff] %v11367_v53  ;;  %v3668_v32 = vsel %vm3657_vm3, %v15433_v58, %v15444_v27  ;;  %v3823_v55 = vmul.f32 %v15445_v13, %v3798_v36  ;;  %v4427_v61 = vsel %vm4415_vm7, %v15430_v39, %v15446_v52  ;;  %v15448_v56 = vperm.slane %v11188_v19, 7 }
 0x2fa   :  { %v4225_v31 = vmul.f32 %v15447_v3, %v4201_v17  ;;  %v3566_v60 = vadd.f32 %v3550_v23, %v15449_v30  ;;  %v4071_v58 = vsel %vm4060_vm5, %v15427_v4, %v15450_v15  ;;  %v3710_v36 = vadd.f32 %v3694_v7, %v3565_v44  ;;  %v11401_v63 = vpop.permute.xlu1 %3502  ;;  %v15454_v23 = vld [vmem:[#allocation53_spill] sm:$0xff]  ;;  %v15455_v3 = vld [vmem:[#allocation47_spill] sm:$0xff] }
 0x2fb   :  { %v4354_v47 = vmul.f32 %v15448_v56, %v4330_v0  ;;  %v15451_v39 = vperm.slane %v11264_v6, 3  ;;  %v15128_v59 = vperm.slane %v11264_v6, 6  ;;  %15452 = vst [vmem:[#allocation24_spill] sm:$0xff] %v11401_v63  ;;  %v15453_v17 = vperm.slane %v11308_v9, 1  ;;  %v11409_v7 = vpop.permute.xlu0 %4050  ;;  %v15500_v63 = vld [vmem:[#allocation67_spill] sm:$0xff] }
 0x2fc   :  { %v4241_v0 = vadd.f32 %v4225_v31, %v4112_v51  ;;  %v4451_v30 = vmul.f32 %v10112_v50, %v4427_v61  ;;  %v4200_v4 = vsel %vm4189_vm8, %v15438_v2, %v15454_v23  ;;  %v3839_v44 = vadd.f32 %v3823_v55, %v3710_v36  ;;  %v11421_v51 = vld [vmem:[%s15025_s1 + $0x30] sm:$0xff]  ;;  %v15459_v55 = vld [vmem:[#allocation48_spill] sm:$0xff] }
 0x2fd   :  { %v3952_v12 = vmul.f32 %v15451_v39, %v3927_v34  ;;  %v3695_v56 = vmul.f32 %v15453_v17, %v3668_v32  ;;  %v3797_v34 = vsel %vm3786_vm4, %v15436_v41, %v15455_v3  ;;  %v15132_v39 = vperm.slane %v11308_v9, 3  ;;  %15457 = vst [vmem:[#allocation25_spill] sm:$0xff] %v11421_v51  ;;  %v15461_v17 = vld [vmem:[#allocation56_spill] sm:$0xff]  ;;  %v10113_v41 = vld [vmem:[%s15025_s1 + $0xa0] ss:$0 sm:$0xff] }
 0x2fe   :  { %v15456_v13 = vperm.slane %v11264_v6, 5  ;;  %v4370_v2 = vadd.f32 %v4354_v47, %v4241_v0  ;;  %v3926_v31 = vsel %vm3915_vm6, %v15443_v21, %v15459_v55  ;;  %v11432_v36 = vsel %vm4482_vm10, %v11367_v53, 0.0 }
 0x2ff   :  { %v11423_v50 = vpop.permute.xlu2 %3780  ;;  %v3711_v61 = vadd.f32 %v3695_v56, %v3566_v60  ;;  %15460 = vst [vmem:[#allocation30_spill] sm:$0xff] %v11432_v36  ;;  %v4329_v60 = vsel %vm4318_vm9, %v15441_v42, %v15461_v17  ;;  %v15462_v47 = vperm.slane %v11308_v9, 2  ;;  %v3953_v42 = vmul.f32 %v15132_v39, %v3926_v31 }
 0x300   :  { %v4097_v32 = vmul.f32 %v15456_v13, %v4071_v58  ;;  %15458 = vst [vmem:[#allocation22_spill] sm:$0xff] %v11423_v50  ;;  %v3968_v58 = vadd.f32 %v3952_v12, %v3839_v44  ;;  %v4226_v13 = vmul.f32 %v15128_v59, %v4200_v4  ;;  %v11442_v0 = vadd.f32 %v4451_v30, %v4370_v2  ;;  %v11452_v4 = vld [vmem:[%s15025_s1 + $0x38] sm:$0xff] }
 0x301   :  { %v3824_v56 = vmul.f32 %v15462_v47, %v3797_v34  ;;  %15464 = vst [vmem:[#allocation31_spill] sm:$0xff] %v11452_v4  ;;  %v15465_v34 = vld [vmem:[#allocation59_spill] sm:$0xff]  ;;  %v15466_v2 = vld [vmem:[#allocation52_spill] sm:$0xff]  ;;  %v15467_v21 = vperm.slane %v11264_v6, 7  ;;  %v15479_v53 = vperm.slane %v11308_v9, 5 }
 0x302   :  { %15463 = vst [vmem:[#allocation29_spill] sm:$0xff] %v11442_v0  ;;  %v4113_v44 = vadd.f32 %v4097_v32, %v3968_v58  ;;  %v4426_v30 = vsel %vm4415_vm7, %v15446_v52, %v15465_v34  ;;  %v3522_v47 = vsel %vm3512_vm2, %v15431_v5, %v15466_v2  ;;  %v15468_v32 = vld [vmem:[#allocation50_spill] sm:$0xff]  ;;  %v15469_v52 = vld [vmem:[#allocation55_spill] sm:$0xff]  ;;  %v11489_v19 = vsel %vm4482_vm10, %v11442_v0, 0.0  ;;  %v11493_v6 = vpop.permute.xlu1 %3649  ;;  %v15484_v50 = vld [vmem:[#allocation72_spill] sm:$0xff] }
 0x303   :  { %v3840_v59 = vadd.f32 %v3824_v56, %v3711_v61  ;;  %v4355_v12 = vmul.f32 %v15467_v21, %v4329_v60  ;;  %v3796_v58 = vsel %vm3786_vm4, %v15455_v3, %v15468_v32  ;;  %v3667_v39 = vsel %vm3657_vm3, %v15444_v27, %v15469_v52  ;;  %v15470_v61 = vld [vmem:[#allocation54_spill] sm:$0xff]  ;;  %15473 = vst [vmem:[#allocation34_spill] sm:$0xff] %v11489_v19 }
 0x304   :  { %v4242_v31 = vadd.f32 %v4226_v13, %v4113_v44  ;;  %v4070_v60 = vsel %vm4060_vm5, %v15450_v15, %v15470_v61  ;;  %v4452_v56 = vmul.f32 %v10113_v41, %v4426_v30  ;;  %v15471_v13 = vperm.slane %v11421_v51, 0  ;;  %v15472_v44 = vld [vmem:[#allocation63_spill] sm:$0xff]  ;;  %15474 = vst [vmem:[#allocation4_spill] sm:$0xff] %v11493_v6  ;;  %v15491_v6 = vld [vmem:[#allocation65_spill] sm:$0xff] }
 0x305   :  { %v3521_v3 = vsel %vm3512_vm2, %v15466_v2, %v15472_v44  ;;  %v3969_v27 = vadd.f32 %v3953_v42, %v3840_v59  ;;  %v15476_v41 = vperm.slane %v11421_v51, 2  ;;  %v11505_v59 = vld [vmem:[%s15025_s1 + $0x40] sm:$0xff]  ;;  %v11507_v42 = vpop.permute.xlu0 %4308  ;;  %v4098_v5 = vmul.f32 %v15479_v53, %v4070_v60 }
 0x306   :  { %v3551_v21 = vmul.f32 %v15471_v13, %v3522_v47  ;;  %v4371_v47 = vadd.f32 %v4355_v12, %v4242_v31  ;;  %v15477_v13 = vperm.slane %v11421_v51, 1  ;;  %15478 = vst [vmem:[#allocation28_spill] sm:$0xff] %v11505_v59  ;;  %v15480_v0 = vperm.slane %v11452_v4, 0  ;;  %v15485_v60 = vld [vmem:[#allocation57_spill] sm:$0xff]  ;;  %v15488_v31 = vld [vmem:[#allocation66_spill] sm:$0xff] }
 0x307   :  { %v11495_v15 = vpop.permute.xlu2 %3506  ;;  %v3825_v30 = vmul.f32 %v15476_v41, %v3796_v58  ;;  %v15482_v58 = vld [vmem:[#allocation7_spill] sm:$0xff]  ;;  %v3520_v53 = vsel %vm3512_vm2, %v15472_v44, %v15484_v50  ;;  %v3795_v44 = vsel %vm3786_vm4, %v15468_v32, %v15488_v31  ;;  %v15495_v12 = vld [vmem:[#allocation69_spill] sm:$0xff] }
 0x308   :  { %15475 = vst [vmem:[#allocation32_spill] sm:$0xff] %v11495_v15  ;;  %v3696_v2 = vmul.f32 %v15477_v13, %v3667_v39  ;;  %v3552_v19 = vmul.f32 %v15480_v0, %v3521_v3  ;;  %v11515_v39 = vadd.f32 %v4452_v56, %v4371_v47  ;;  %v3567_v41 = vadd.f32 %v3551_v21, %v15482_v58  ;;  %v15483_v13 = vld [vmem:[#allocation62_spill] sm:$0xff]  ;;  %v15486_v3 = vld [vmem:[#allocation60_spill] sm:$0xff] }
 0x309   :  { %v3666_v36 = vsel %vm3657_vm3, %v15469_v52, %v15483_v13  ;;  %v4199_v0 = vsel %vm4189_vm8, %v15454_v23, %v15485_v60  ;;  %v4328_v56 = vsel %vm4318_vm9, %v15461_v17, %v15486_v3  ;;  %v15487_v21 = vld [vmem:[#allocation58_spill] sm:$0xff]  ;;  %v15489_v15 = vld [vmem:[#allocation8_spill] sm:$0xff]  ;;  %v15490_v17 = vperm.slane %v11452_v4, 1 }
 0x30a   :  { %15481 = vst [vmem:[#allocation33_spill] sm:$0xff] %v11515_v39  ;;  %v3925_v52 = vsel %vm3915_vm6, %v15459_v55, %v15487_v21  ;;  %v3712_v58 = vadd.f32 %v3696_v2, %v3567_v41  ;;  %v3568_v48 = vadd.f32 %v3552_v19, %v15489_v15  ;;  %v4069_v55 = vsel %vm4060_vm5, %v15470_v61, %v15491_v6 }
 0x30b   :  { %v3697_v16 = vmul.f32 %v15490_v17, %v3666_v36  ;;  %v15492_v2 = vperm.slane %v11505_v59, 0  ;;  %v15493_v47 = vperm.slane %v11308_v9, 6  ;;  %v15494_v23 = vperm.slane %v11421_v51, 3 }
 0x30c   :  { %v3924_v19 = vsel %vm3915_vm6, %v15487_v21, %v15495_v12  ;;  %v4114_v15 = vadd.f32 %v4098_v5, %v3969_v27  ;;  %v15496_v17 = vperm.slane %v11452_v4, 2  ;;  %v3665_v5 = vsel %vm3657_vm3, %v15483_v13, %v15500_v63 }
 0x30d   :  { %v3553_v41 = vmul.f32 %v15492_v2, %v3520_v53  ;;  %v4227_v32 = vmul.f32 %v15493_v47, %v4199_v0  ;;  %v3954_v28 = vmul.f32 %v15494_v23, %v3925_v52  ;;  %v4198_v53 = vsel %vm4189_vm8, %v15485_v60, %v15497_v43  ;;  %v11578_v27 = vpop.permute.xlu0 %3907  ;;  %v10114_v60 = vld [vmem:[%s15025_s1 + $0xa8] ss:$0 sm:$0xff]  ;;  %v15506_v0 = vld [vmem:[#allocation64_spill] sm:$0xff] }
 0x30e   :  { %v3826_v61 = vmul.f32 %v15496_v17, %v3795_v44  ;;  %v15498_v52 = vperm.slane %v11308_v9, 7  ;;  %v3841_v23 = vadd.f32 %v3825_v30, %v3712_v58  ;;  %v15499_v2 = vperm.slane %v11421_v51, 5  ;;  %15501 = vst [vmem:[#allocation35_spill] sm:$0xff] %v11578_v27 }
 0x30f   :  { %v11582_v44 = vsel %vm4482_vm10, %v11515_v39, 0.0  ;;  %v15503_v30 = vperm.slane %v11452_v4, 3  ;;  %v4243_v13 = vadd.f32 %v4227_v32, %v4114_v15  ;;  %v4425_v36 = vsel %vm4415_vm7, %v15465_v34, %v15506_v0  ;;  %v15509_v32 = vld [vmem:[#allocation73_spill] sm:$0xff]  ;;  %v15510_v34 = vld [vmem:[#allocation70_spill] sm:$0xff] }
 0x310   :  { %v4356_v47 = vmul.f32 %v15498_v52, %v4328_v56  ;;  %v4099_v21 = vmul.f32 %v15499_v2, %v4069_v55  ;;  %15502 = vst [vmem:[#allocation40_spill] sm:$0xff] %v11582_v44  ;;  %v3713_v56 = vadd.f32 %v3697_v16, %v3568_v48  ;;  %v15504_v55 = vld [vmem:[#allocation10_spill] sm:$0xff]  ;;  %v11590_v52 = vpop.permute.xlu1 %3778  ;;  %v11592_v2 = vpop.permute.xlu2 %3782  ;;  %v3970_v9 = vadd.f32 %v3954_v28, %v3841_v23 }
 0x311   :  { %v3955_v58 = vmul.f32 %v15503_v30, %v3924_v19  ;;  %v3569_v17 = vadd.f32 %v3553_v41, %v15504_v55  ;;  %15505 = vst [vmem:[#allocation38_spill] sm:$0xff] %v11592_v2  ;;  %v15507_v39 = vperm.slane %v11421_v51, 6  ;;  %v15508_v48 = vperm.slane %v11505_v59, 1 }
 0x312   :  { %v3842_v16 = vadd.f32 %v3826_v61, %v3713_v56  ;;  %v15148_v41 = vperm.slane %v11421_v51, 7  ;;  %v15149_v30 = vperm.slane %v11505_v59, 2  ;;  %v4372_v55 = vadd.f32 %v4356_v47, %v4243_v13  ;;  %v15515_v13 = vld [vmem:[#allocation77_spill] sm:$0xff] }
 0x313   :  { %v4228_v44 = vmul.f32 %v15507_v39, %v4198_v53  ;;  %v3698_v19 = vmul.f32 %v15508_v48, %v3665_v5  ;;  %v4115_v2 = vadd.f32 %v4099_v21, %v3970_v9  ;;  %v4327_v15 = vsel %vm4318_vm9, %v15486_v3, %v15509_v32  ;;  %v10115_v53 = vld [vmem:[%s15025_s1 + $0xb0] ss:$0 sm:$0xff]  ;;  %v11619_v9 = vld [vmem:[%s15025_s1 + $0x48] sm:$0xff]  ;;  %v15512_v21 = vld [vmem:[#allocation76_spill] sm:$0xff] }
 0x314   :  { %v3794_v28 = vsel %vm3786_vm4, %v15488_v31, %v15510_v34  ;;  %v4453_v39 = vmul.f32 %v10114_v60, %v4425_v36  ;;  %v3971_v61 = vadd.f32 %v3955_v58, %v3842_v16  ;;  %v15151_v23 = vperm.slane %v11505_v59, 3  ;;  %15511 = vst [vmem:[#allocation45_spill] sm:$0xff] %v11619_v9  ;;  %v15513_v58 = vld [vmem:[#allocation75_spill] sm:$0xff]  ;;  %v15518_v48 = vld [vmem:[#allocation82_spill] sm:$0xff] }
 0x315   :  { %v3714_v47 = vadd.f32 %v3698_v19, %v3569_v17  ;;  %v4244_v3 = vadd.f32 %v4228_v44, %v4115_v2  ;;  %v4424_v31 = vsel %vm4415_vm7, %v15506_v0, %v15512_v21  ;;  %v15150_v36 = vperm.slane %v11452_v4, 5  ;;  %v15514_v2 = vld [vmem:[#allocation74_spill] sm:$0xff]  ;;  %v15517_v5 = vld [vmem:[#allocation79_spill] sm:$0xff] }
 0x316   :  { %v4357_v60 = vmul.f32 %v15148_v41, %v4327_v15  ;;  %v3827_v56 = vmul.f32 %v15149_v30, %v3794_v28  ;;  %v4068_v44 = vsel %vm4060_vm5, %v15491_v6, %v15513_v58  ;;  %v3923_v0 = vsel %vm3915_vm6, %v15495_v12, %v15514_v2  ;;  %v11646_v15 = vpop.permute.xlu0 %3504  ;;  %v15516_v30 = vld [vmem:[#allocation80_spill] sm:$0xff] }
 0x317   :  { %v4067_v16 = vsel %vm4060_vm5, %v15513_v58, %v15515_v13  ;;  %v15154_v19 = vperm.slane %v11619_v9, 0  ;;  %v4454_v28 = vmul.f32 %v10115_v53, %v4424_v31  ;;  %v3519_v12 = vsel %vm3512_vm2, %v15484_v50, %v15516_v30 }
 0x318   :  { %v3843_v6 = vadd.f32 %v3827_v56, %v3714_v47  ;;  %v4100_v17 = vmul.f32 %v15150_v36, %v4068_v44  ;;  %v4197_v58 = vsel %vm4189_vm8, %v15497_v43, %v15517_v5  ;;  %v4196_v53 = vsel %vm4189_vm8, %v15517_v5, %v15518_v48  ;;  %v11673_v36 = vpop.permute.xlu1 %4052  ;;  %v11675_v41 = vpop.permute.xlu2 %3911 }
 0x319   :  { %v3956_v31 = vmul.f32 %v15151_v23, %v3923_v0  ;;  %v15519_v50 = vperm.slane %v11505_v59, 5  ;;  %v3664_v43 = vsel %vm3657_vm3, %v15500_v63, %v11000_v54  ;;  %15520 = vst [vmem:[#allocation36_spill] sm:$0xff] %v11675_v41  ;;  %v4326_v5 = vsel %vm4318_vm9, %v15509_v32, %v10998_v20 }
 0x31a   :  { %v3554_v0 = vmul.f32 %v15154_v19, %v3519_v12  ;;  %v15521_v23 = vperm.slane %v11452_v4, 6  ;;  %v15522_v47 = vperm.slane %v11505_v59, 6  ;;  %v3793_v32 = vsel %vm3786_vm4, %v15510_v34, %v11013_v18 }
 0x31b   :  { %v4101_v56 = vmul.f32 %v15519_v50, %v4067_v16  ;;  %v4325_v16 = vsel %vm4318_vm9, %v10998_v20, %v11002_v38  ;;  %v3972_v63 = vadd.f32 %v3956_v31, %v3843_v6  ;;  %v4373_v12 = vadd.f32 %v4357_v60, %v4244_v3 }
 0x31c   :  { %v4229_v44 = vmul.f32 %v15521_v23, %v4197_v58  ;;  %v4230_v51 = vmul.f32 %v15522_v47, %v4196_v53  ;;  %v4116_v19 = vadd.f32 %v4100_v17, %v3971_v61  ;;  %v15523_v41 = vperm.slane %v11619_v9, 1  ;;  %v15526_v61 = vld [vmem:[#allocation16_spill] sm:$0xff]  ;;  %v11715_v17 = vld [vmem:[%s15025_s1 + $0x50] sm:$0xff] }
 0x31d   :  { %v15169_v20 = vperm.slane %v11619_v9, 3  ;;  %v4117_v50 = vadd.f32 %v4101_v56, %v3972_v63  ;;  %v15524_v6 = vperm.slane %v11452_v4, 7  ;;  %v15525_v23 = vperm.slane %v11505_v59, 7  ;;  %15528 = vst [vmem:[#allocation39_spill] sm:$0xff] %v11715_v17 }
 0x31e   :  { %v3699_v27 = vmul.f32 %v15523_v41, %v3664_v43  ;;  %v3922_v53 = vsel %vm3915_vm6, %v15514_v2, %v11039_v49  ;;  %v11707_v34 = vadd.f32 %v4453_v39, %v4372_v55  ;;  %v3570_v3 = vadd.f32 %v3554_v0, %v15526_v61  ;;  %v10116_v55 = vld [vmem:[%s15025_s1 + $0xb8] ss:$0 sm:$0xff] }
 0x31f   :  { %v4358_v31 = vmul.f32 %v15524_v6, %v4326_v5  ;;  %v4359_v58 = vmul.f32 %v15525_v23, %v4325_v16  ;;  %v15527_v41 = vperm.slane %v11619_v9, 2  ;;  %v15167_v47 = vperm.slane %v11619_v9, 5 }
 0x320   :  { %v11718_v56 = vadd.f32 %v4454_v28, %v4373_v12  ;;  %v4245_v43 = vadd.f32 %v4229_v44, %v4116_v19  ;;  %v4246_v5 = vadd.f32 %v4230_v51, %v4117_v50  ;;  %v4066_v39 = vsel %vm4060_vm5, %v15515_v13, %v11136_v26  ;;  %v11736_v51 = vld [vmem:[%s15025_s1 + $0x58] sm:$0xff]  ;;  %v11739_v44 = vpop.permute.xlu0 %3651  ;;  %v11748_v63 = vpop.permute.xlu2 %3784 }
 0x321   :  { %v3828_v60 = vmul.f32 %v15527_v41, %v3793_v32  ;;  %v4423_v2 = vsel %vm4415_vm7, %v15512_v21, %v11009_v33  ;;  %v3715_v0 = vadd.f32 %v3699_v27, %v3570_v3  ;;  %v3957_v28 = vmul.f32 %v15169_v20, %v3922_v53  ;;  %15529 = vst [vmem:[#allocation41_spill] sm:$0xff] %v11736_v51  ;;  %v11746_v21 = vpop.permute.xlu1 %4054 }
 0x322   :  { %v15164_v19 = vperm.slane %v11619_v9, 6  ;;  %v4374_v16 = vadd.f32 %v4358_v31, %v4245_v43  ;;  %v4375_v13 = vadd.f32 %v4359_v58, %v4246_v5  ;;  %v15172_v50 = vperm.slane %v11715_v17, 0 }
 0x323   :  { %v4195_v27 = vsel %vm4189_vm8, %v15518_v48, %v11236_v10  ;;  %v3844_v32 = vadd.f32 %v3828_v60, %v3715_v0  ;;  %v3518_v12 = vsel %vm3512_vm2, %v15516_v30, %v11030_v45  ;;  %v4102_v6 = vmul.f32 %v15167_v47, %v4066_v39  ;;  %v10117_v48 = vld [vmem:[%s15025_s1 + $0xc0] ss:$0 sm:$0xff] }
 0x324   :  { %v15163_v31 = vperm.slane %v11619_v9, 7  ;;  %v4455_v23 = vmul.f32 %v10116_v55, %v4423_v2  ;;  %v15158_v58 = vperm.slane %v11736_v51, 0  ;;  %v15171_v53 = vperm.slane %v11715_v17, 1 }
 0x325   :  { %v4324_v61 = vsel %vm4318_vm9, %v11002_v38, %v11323_v22  ;;  %v3973_v30 = vadd.f32 %v3957_v28, %v3844_v32  ;;  %v4422_v3 = vsel %vm4415_vm7, %v11009_v33, %v11078_v35  ;;  %v3517_v41 = vsel %vm3512_vm2, %v11030_v45, %v11019_v29 }
 0x326   :  { %v4231_v60 = vmul.f32 %v15164_v19, %v4195_v27  ;;  %v3555_v43 = vmul.f32 %v15172_v50, %v3518_v12  ;;  %v3663_v38 = vsel %vm3657_vm3, %v11000_v54, %v11064_v14  ;;  %v15157_v5 = vperm.slane %v11736_v51, 1  ;;  %v15536_v19 = vld [vmem:[#allocation4_spill] sm:$0xff]  ;;  %v15540_v50 = vld [vmem:[#allocation26_spill] sm:$0xff] }
 0x327   :  { %v15170_v33 = vperm.slane %v11715_v17, 2  ;;  %v4118_v55 = vadd.f32 %v4102_v6, %v3973_v30  ;;  %v3662_v45 = vsel %vm3657_vm3, %v11064_v14, %v11049_v1  ;;  %v15159_v39 = vperm.slane %v11736_v51, 2  ;;  %v10118_v6 = vld [vmem:[%s15025_s1 + $0xc8] ss:$0 sm:$0xff] }
 0x328   :  { %v4360_v2 = vmul.f32 %v15163_v31, %v4324_v61  ;;  %v4456_v0 = vmul.f32 %v10117_v48, %v4422_v3  ;;  %v3556_v28 = vmul.f32 %v15158_v58, %v3517_v41  ;;  %v3792_v54 = vsel %vm3786_vm4, %v11013_v18, %v11134_v62  ;;  %v15530_v61 = vld [vmem:[#allocation27_spill] sm:$0xff]  ;;  %v11839_v58 = vpop.permute.xlu2 %3913 }
 0x329   :  { %v15168_v27 = vperm.slane %v11715_v17, 3  ;;  %v3700_v32 = vmul.f32 %v15171_v53, %v3663_v38  ;;  %v4247_v14 = vadd.f32 %v4231_v60, %v4118_v55  ;;  %v3791_v12 = vsel %vm3786_vm4, %v11134_v62, %v11096_v8  ;;  %v11819_v41 = vpop.permute.xlu1 %3653 }
 0x32a   :  { %v15162_v48 = vperm.slane %v11736_v51, 3  ;;  %v3571_v30 = vadd.f32 %v3555_v43, %v15530_v61  ;;  %v3701_v18 = vmul.f32 %v15157_v5, %v3662_v45  ;;  %v3921_v3 = vsel %vm3915_vm6, %v11039_v49, %v11227_v11  ;;  %v15531_v49 = vld [vmem:[#allocation37_spill] sm:$0xff]  ;;  %v11837_v5 = vpop.permute.xlu0 %3909 }
 0x32b   :  { %v4421_v62 = vsel %vm4415_vm7, %v11078_v35, %v11332_v46  ;;  %v3829_v60 = vmul.f32 %v15170_v33, %v3792_v54  ;;  %v3920_v43 = vsel %vm3915_vm6, %v11227_v11, %v11172_v37  ;;  %v4376_v38 = vadd.f32 %v4360_v2, %v4247_v14  ;;  %v15539_v33 = vld [vmem:[#allocation14_spill] sm:$0xff] }
 0x32c   :  { %v15161_v55 = vperm.slane %v11715_v17, 5  ;;  %v11828_v45 = vadd.f32 %v4455_v23, %v4374_v16  ;;  %v3572_v61 = vadd.f32 %v3556_v28, %v15531_v49  ;;  %v3830_v35 = vmul.f32 %v15159_v39, %v3791_v12 }
 0x32d   :  { %v4065_v54 = vsel %vm4060_vm5, %v11136_v26, %v11409_v7  ;;  %v11841_v11 = vadd.f32 %v4456_v0, %v4375_v13  ;;  %v3716_v2 = vadd.f32 %v3700_v32, %v3571_v30  ;;  %v3958_v16 = vmul.f32 %v15168_v27, %v3921_v3 }
 0x32e   :  { %v4457_v23 = vmul.f32 %v10118_v6, %v4421_v62  ;;  %v11847_v28 = vsel %vm4482_vm10, %v11707_v34, 0.0  ;;  %v3717_v14 = vadd.f32 %v3701_v18, %v3572_v61  ;;  %v3959_v12 = vmul.f32 %v15162_v48, %v3920_v43  ;;  %v11871_v18 = vld [vmem:[%s15025_s1 + $0x60] sm:$0xff] }
 0x32f   :  { %v15160_v26 = vperm.slane %v11715_v17, 6  ;;  %v3845_v49 = vadd.f32 %v3829_v60, %v3716_v2  ;;  %v4194_v13 = vsel %vm4189_vm8, %v11236_v10, %v11272_v25  ;;  %v4103_v0 = vmul.f32 %v15161_v55, %v4065_v54  ;;  %15532 = vst [vmem:[#allocation5_spill] sm:$0xff] %v11871_v18 }
 0x330   :  { %v11852_v39 = vadd.f32 %v4457_v23, %v4376_v38  ;;  %v11862_v32 = vsel %vm4482_vm10, %v11718_v56, 0.0  ;;  %v11866_v6 = vsel %vm4482_vm10, %v11828_v45, 0.0  ;;  %v3846_v30 = vadd.f32 %v3830_v35, %v3717_v14 }
 0x331   :  { %v15165_v3 = vperm.slane %v11075_v57, 0  ;;  %v11876_v10 = vsel %vm4482_vm10, %v11841_v11, 0.0  ;;  %v3974_v62 = vadd.f32 %v3958_v16, %v3845_v49  ;;  %v15166_v60 = vperm.slane %v11715_v17, 7  ;;  %v15533_v49 = vld [vmem:[#allocation24_spill] sm:$0xff] }
 0x332   :  { %v15179_v43 = vperm.slane %v11736_v51, 6  ;;  %v11880_v38 = vadd.f32 %v3959_v12, %v3846_v30  ;;  %v4232_v61 = vmul.f32 %v15160_v26, %v4194_v13  ;;  %v4323_v35 = vsel %vm4318_vm9, %v11323_v22, %v11507_v42 }
 0x333   :  { %v15174_v2 = vperm.slane %v11075_v57, 1  ;;  %v11893_v16 = vsel %vm4482_vm10, %v11852_v39, 0.0  ;;  %v4119_v23 = vadd.f32 %v4103_v0, %v3974_v62  ;;  %v15178_v14 = vperm.slane %v11871_v18, 0 }
 0x334   :  { %v3516_v22 = vsel %vm3512_vm2, %v11019_v29, %v15533_v49  ;;  %v15173_v30 = vperm.slane %v11075_v57, 2  ;;  %v4361_v62 = vmul.f32 %v15166_v60, %v4323_v35  ;;  %v15175_v55 = vperm.slane %v11871_v18, 1  ;;  %v15535_v29 = vld [vmem:[#allocation9_spill] sm:$0xff]  ;;  %v11928_v35 = vld [vmem:[%s15025_s1 + $0x68] sm:$0xff]  ;;  %v11931_v60 = vpop.permute.xlu2 %4310 }
 0x335   :  { %v11888_v54 = vpop.permute.xlu1 %3508  ;;  %15537 = vst [vmem:[#allocation43_spill] sm:$0xff] %v11928_v35  ;;  %v3557_v20 = vmul.f32 %v15178_v14, %v3516_v22  ;;  %v3931_v53 = vsel %vm3915_vm6, %v11839_v58, %v15539_v33  ;;  %v4193_v13 = vsel %vm4189_vm8, %v11272_v25, %v15540_v50  ;;  %v15185_v33 = vperm.slane %v11928_v35, 2  ;;  %v11962_v25 = vld [vmem:[%s15025_s1 + $0x70] sm:$0xff] }
 0x336   :  { %v3528_v12 = vsel %vm3512_vm2, %v11888_v54, %v10651_v40  ;;  %v15534_v40 = vld [vmem:[#allocation12_spill] sm:$0xff]  ;;  %15541 = vst [vmem:[#allocation42_spill] sm:$0xff] %v11962_v25  ;;  %v15547_v14 = vperm.slane %v11871_v18, 3 }
 0x337   :  { %v3545_v26 = vmul.f32 %v15165_v3, %v3528_v12  ;;  %v11908_v0 = vpop.permute.xlu0 %3655  ;;  %v3802_v48 = vsel %vm3786_vm4, %v11748_v63, %v15534_v40  ;;  %v3661_v12 = vsel %vm3657_vm3, %v11049_v1, %v15536_v19  ;;  %v15176_v3 = vperm.slane %v11075_v57, 3  ;;  %v15538_v40 = vld [vmem:[#allocation2_spill] sm:$0xff] }
 0x338   :  { %v3673_v31 = vsel %vm3657_vm3, %v11908_v0, %v15535_v29  ;;  %v4248_v29 = vadd.f32 %v4232_v61, %v4119_v23  ;;  %v15177_v1 = vperm.slane %v11871_v18, 2  ;;  %v3702_v22 = vmul.f32 %v15175_v55, %v3661_v12  ;;  %v15543_v55 = vld [vmem:[#allocation35_spill] sm:$0xff] }
 0x339   :  { %v3561_v47 = vadd.f32 %v3545_v26, %v15538_v40  ;;  %v3690_v27 = vmul.f32 %v15174_v2, %v3673_v31  ;;  %v3790_v31 = vsel %vm3786_vm4, %v11096_v8, %v11590_v52  ;;  %v3819_v26 = vmul.f32 %v15173_v30, %v3802_v48 }
 0x33a   :  { %v11953_v23 = vadd.f32 %v4361_v62, %v4248_v29  ;;  %v15180_v40 = vperm.slane %v11736_v51, 5  ;;  %v4064_v8 = vsel %vm4060_vm5, %v11409_v7, %v11673_v36  ;;  %v4233_v12 = vmul.f32 %v15179_v43, %v4193_v13  ;;  %v15542_v29 = vld [vmem:[#allocation51_spill] sm:$0xff] }
 0x33b   :  { %v3706_v61 = vadd.f32 %v3690_v27, %v3561_v47  ;;  %v15183_v47 = vperm.slane %v11928_v35, 0  ;;  %v3948_v27 = vmul.f32 %v15176_v3, %v3931_v53  ;;  %v3573_v30 = vadd.f32 %v3557_v20, %v15542_v29  ;;  %v15544_v29 = vld [vmem:[#allocation32_spill] sm:$0xff] }
 0x33c   :  { %v3831_v2 = vmul.f32 %v15177_v1, %v3790_v31  ;;  %v3515_v7 = vsel %vm3512_vm2, %v15533_v49, %v11646_v15  ;;  %v3919_v53 = vsel %vm3915_vm6, %v11172_v37, %v15543_v55  ;;  %v4104_v31 = vmul.f32 %v15180_v40, %v4064_v8  ;;  %v15545_v1 = vld [vmem:[#allocation22_spill] sm:$0xff]  ;;  %v15546_v8 = vld [vmem:[#allocation88_spill] sm:$0xff] }
 0x33d   :  { %v3835_v48 = vadd.f32 %v3819_v26, %v3706_v61  ;;  %v11971_v62 = vpop.permute.xlu1 %4183  ;;  %v15181_v26 = vperm.slane %v11928_v35, 1  ;;  %v15182_v61 = vperm.slane %v11962_v25, 0  ;;  %v3718_v20 = vadd.f32 %v3702_v22, %v3573_v30 }
 0x33e   :  { %v3660_v49 = vsel %vm3657_vm3, %v15536_v19, %v11739_v44  ;;  %v3514_v37 = vsel %vm3512_vm2, %v11646_v15, %v15544_v29  ;;  %v3558_v30 = vmul.f32 %v15183_v47, %v3515_v7  ;;  %v15184_v22 = vperm.slane %v11962_v25, 1 }
 0x33f   :  { %v3964_v13 = vadd.f32 %v3948_v27, %v3835_v48  ;;  %v11988_v3 = vpop.permute.xlu0 %4056  ;;  %v3789_v27 = vsel %vm3786_vm4, %v11590_v52, %v15545_v1  ;;  %v3960_v19 = vmul.f32 %v15547_v14, %v3919_v53  ;;  %v3847_v43 = vadd.f32 %v3831_v2, %v3718_v20  ;;  %v12026_v2 = vld [vmem:[%s15025_s1 + $0x78] sm:$0xff]  ;;  %v12028_v14 = vpop.permute.xlu2 %4185  ;;  %v15549_v53 = vld [vmem:[#allocation3_spill] sm:$0xff] }
 0x340   :  { %v3659_v15 = vsel %vm3657_vm3, %v11739_v44, %v11819_v41  ;;  %v3703_v52 = vmul.f32 %v15181_v26, %v3660_v49  ;;  %v4063_v7 = vsel %vm4060_vm5, %v11673_v36, %v11746_v21  ;;  %15548 = vst [vmem:[#allocation44_spill] sm:$0xff] %v12026_v2  ;;  %v3832_v20 = vmul.f32 %v15185_v33, %v3789_v27  ;;  %v15550_v26 = vld [vmem:[#allocation61_spill] sm:$0xff] }
 0x341   :  { %v4109_v48 = vadd.f32 %v15546_v8, %v3964_v13  ;;  %v3559_v13 = vmul.f32 %v15182_v61, %v3514_v37  ;;  %v4120_v49 = vadd.f32 %v4104_v31, %v11880_v38  ;;  %v15186_v8 = vperm.slane %v11928_v35, 3 }
 0x342   :  { %v15203_v36 = vperm.slane %v12026_v2, 0  ;;  %v3574_v37 = vadd.f32 %v3558_v30, %v15550_v26  ;;  %v3704_v61 = vmul.f32 %v15184_v22, %v3659_v15  ;;  %v3513_v47 = vsel %vm3512_vm2, %v15544_v29, %v11888_v54  ;;  %v15553_v22 = vld [vmem:[#allocation83_spill] sm:$0xff]  ;;  %v15554_v29 = vld [vmem:[#allocation18_spill] sm:$0xff] }
 0x343   :  { %v4238_v44 = vadd.f32 %v15549_v53, %v4109_v48  ;;  %v15551_v48 = vld [vmem:[#allocation23_spill] sm:$0xff]  ;;  %v3976_v27 = vadd.f32 %v3960_v19, %v3847_v43  ;;  %v15552_v38 = vperm.slane %v11871_v18, 5  ;;  %v3918_v26 = vsel %vm3915_vm6, %v15543_v55, %v11837_v5  ;;  %v15555_v43 = vld [vmem:[#allocation38_spill] sm:$0xff] }
 0x344   :  { %v15187_v30 = vperm.slane %v11962_v25, 2  ;;  %v3719_v15 = vadd.f32 %v3703_v52, %v3574_v37  ;;  %v3575_v33 = vadd.f32 %v3559_v13, %v15553_v22  ;;  %v15188_v54 = vperm.slane %v11962_v25, 3 }
 0x345   :  { %v4367_v53 = vadd.f32 %v15551_v48, %v4238_v44  ;;  %v12044_v40 = vpop.permute.xlu1 %4407  ;;  %v4105_v31 = vmul.f32 %v15552_v38, %v4063_v7  ;;  %v3788_v19 = vsel %vm3786_vm4, %v15545_v1, %v15555_v43  ;;  %v4249_v7 = vadd.f32 %v4233_v12, %v4120_v49  ;;  %v15556_v1 = vld [vmem:[#allocation36_spill] sm:$0xff]  ;;  %v15557_v49 = vld [vmem:[#allocation78_spill] sm:$0xff] }
 0x346   :  { %v3560_v55 = vmul.f32 %v15203_v36, %v3513_v47  ;;  %v15202_v38 = vperm.slane %v12026_v2, 1  ;;  %v3961_v22 = vmul.f32 %v15186_v8, %v3918_v26  ;;  %v3720_v52 = vadd.f32 %v3704_v61, %v3575_v33 }
 0x347   :  { %v12056_v44 = vadd.f32 %v15554_v29, %v4367_v53  ;;  %v4406_v48 = vpop.permute.xlu0 %4405  ;;  %v3658_v13 = vsel %vm3657_vm3, %v11819_v41, %v11908_v0  ;;  %v12073_v53 = vadd.f32 %v4105_v31, %v3976_v27  ;;  %v3917_v47 = vsel %vm3915_vm6, %v11837_v5, %v15556_v1  ;;  %v15558_v27 = vld [vmem:[#allocation87_spill] sm:$0xff] }
 0x348   :  { %v15189_v12 = vperm.slane %v11736_v51, 7  ;;  %v3848_v33 = vadd.f32 %v3832_v20, %v3719_v15  ;;  %v3833_v61 = vmul.f32 %v15187_v30, %v3788_v19  ;;  %v15190_v41 = vperm.slane %v12026_v2, 2  ;;  %v15559_v15 = vld [vmem:[#allocation30_spill] sm:$0xff] }
 0x349   :  { %v4483_v37 = vsel %vm4482_vm10, %v12056_v44, 0.0  ;;  %v4322_v0 = vsel %vm4318_vm9, %v11507_v42, %v11931_v60  ;;  %v3787_v5 = vsel %vm3786_vm4, %v15555_v43, %v11748_v63  ;;  %v3576_v31 = vadd.f32 %v3560_v55, %v15558_v27  ;;  %v4188_v42 = vpop.permute.xlu2 %4187  ;;  %v15561_v27 = vld [vmem:[#allocation40_spill] sm:$0xff] }
 0x34a   :  { %v4485_v26 = vadd.f32 %v15557_v49, %v4483_v37  ;;  %v3705_v20 = vmul.f32 %v15202_v38, %v3658_v13  ;;  %v3977_v19 = vadd.f32 %v3961_v22, %v3848_v33  ;;  %v3962_v37 = vmul.f32 %v15188_v54, %v3917_v47  ;;  %v15560_v22 = vld [vmem:[#allocation34_spill] sm:$0xff] }
 0x34b   :  { %v3849_v49 = vadd.f32 %v3833_v61, %v3720_v52  ;;  %v15191_v8 = vperm.slane %v12026_v2, 3  ;;  %v3916_v63 = vsel %vm3915_vm6, %v15556_v1, %v11839_v58  ;;  %v4362_v43 = vmul.f32 %v15189_v12, %v4322_v0  ;;  %v10119_v58 = vld [vmem:[%s15025_s1 + $0xd0] ss:$0 sm:$0xff] }
 0x34c   :  { %v4487_v29 = vadd.f32 %v15559_v15, %v4485_v26  ;;  %v15204_v55 = vperm.slane %v11871_v18, 6  ;;  %v3834_v52 = vmul.f32 %v15190_v41, %v3787_v5  ;;  %v15200_v47 = vperm.slane %v11928_v35, 6 }
 0x34d   :  { %v12099_v30 = vpop.permute.xlu1 %4409  ;;  %v15197_v26 = vperm.slane %v11962_v25, 6  ;;  %v15196_v33 = vperm.slane %v12026_v2, 6  ;;  %v3721_v61 = vadd.f32 %v3705_v20, %v3576_v31  ;;  %v15192_v0 = vperm.slane %v11928_v35, 5 }
 0x34e   :  { %v4489_v13 = vadd.f32 %v15560_v22, %v4487_v29  ;;  %v4420_v5 = vsel %vm4415_vm7, %v11332_v46, %v4406_v48  ;;  %v3963_v29 = vmul.f32 %v15191_v8, %v3916_v63  ;;  %v15193_v22 = vperm.slane %v12026_v2, 7  ;;  %v10120_v46 = vld [vmem:[%s15025_s1 + $0xd8] ss:$0 sm:$0xff] }
 0x34f   :  { %v4313_v1 = vpop.permute.xlu0 %4312  ;;  %v15201_v54 = vperm.slane %v11871_v18, 7  ;;  %v3978_v12 = vadd.f32 %v3962_v37, %v3849_v49  ;;  %v4378_v41 = vadd.f32 %v4362_v43, %v4249_v7  ;;  %v4192_v31 = vsel %vm4189_vm8, %v15540_v50, %v11971_v62 }
 0x350   :  { %v4491_v15 = vadd.f32 %v15561_v27, %v4489_v13  ;;  %v4062_v20 = vsel %vm4060_vm5, %v11746_v21, %v11988_v3  ;;  %v4419_v7 = vsel %vm4415_vm7, %v4406_v48, %v12044_v40  ;;  %v4458_v37 = vmul.f32 %v10119_v58, %v4420_v5  ;;  %v15562_v5 = vld [vmem:[#allocation11_spill] sm:$0xff] }
 0x351   :  { %v15199_v49 = vperm.slane %v11962_v25, 5  ;;  %v15198_v50 = vperm.slane %v12026_v2, 5  ;;  %v3850_v43 = vadd.f32 %v3834_v52, %v3721_v61  ;;  %v4321_v21 = vsel %vm4318_vm9, %v11931_v60, %v4313_v1 }
 0x352   :  { %v4493_v63 = vadd.f32 %v11847_v28, %v4491_v15  ;;  %v15195_v27 = vperm.slane %v11928_v35, 7  ;;  %v4234_v28 = vmul.f32 %v15204_v55, %v4192_v31  ;;  %v4190_v48 = vsel %vm4189_vm8, %v12028_v14, %v4188_v42 }
 0x353   :  { %v4106_v58 = vmul.f32 %v15192_v0, %v4062_v20  ;;  %v15194_v52 = vperm.slane %v11962_v25, 7  ;;  %v4459_v61 = vmul.f32 %v10120_v46, %v4419_v7  ;;  %v12164_v8 = vadd.f32 %v4458_v37, %v11953_v23  ;;  %v15563_v7 = vld [vmem:[#allocation17_spill] sm:$0xff] }
 0x354   :  { %v4495_v13 = vadd.f32 %v11862_v32, %v4493_v63  ;;  %v4317_v63 = vpop.permute.xlu2 %4316  ;;  %v4363_v20 = vmul.f32 %v15201_v54, %v4321_v21  ;;  %v4205_v23 = vsel %vm4189_vm8, %v4188_v42, %v15563_v7  ;;  %v4250_v21 = vadd.f32 %v4234_v28, %v12073_v53 }
 0x355   :  { %v4059_v15 = vpop.permute.xlu1 %4058  ;;  %v4418_v53 = vsel %vm4415_vm7, %v12044_v40, %v12099_v30  ;;  %v4237_v40 = vmul.f32 %v15196_v33, %v4205_v23 }
 0x356   :  { %v4497_v32 = vadd.f32 %v11866_v6, %v4495_v13  ;;  %v4061_v60 = vsel %vm4060_vm5, %v11988_v3, %v4059_v15  ;;  %v4076_v31 = vsel %vm4060_vm5, %v4059_v15, %v15562_v5  ;;  %v4191_v3 = vsel %vm4189_vm8, %v11971_v62, %v12028_v14 }
 0x357   :  { %v4107_v0 = vmul.f32 %v15199_v49, %v4061_v60  ;;  %v4108_v6 = vmul.f32 %v15198_v50, %v4076_v31  ;;  %v4315_v46 = vpop.permute.xlu0 %4314  ;;  %v3979_v13 = vadd.f32 %v3963_v29, %v3850_v43  ;;  %v4236_v15 = vmul.f32 %v15197_v26, %v4190_v48  ;;  %v10121_v60 = vld [vmem:[%s15025_s1 + $0xe0] ss:$0 sm:$0xff]  ;;  %v15564_v31 = vld [vmem:[#allocation19_spill] sm:$0xff] }
 0x358   :  { %v4499_v37 = vadd.f32 %v11876_v10, %v4497_v32  ;;  %v4320_v62 = vsel %vm4318_vm9, %v4313_v1, %v4315_v46  ;;  %v4122_v14 = vadd.f32 %v4106_v58, %v3977_v19  ;;  %v4334_v42 = vsel %vm4318_vm9, %v4317_v63, %v15564_v31  ;;  %v10122_v58 = vld [vmem:[%s15025_s1 + $0xf8] ss:$0 sm:$0xff] }
 0x359   :  { %v4123_v5 = vadd.f32 %v4107_v0, %v3978_v12  ;;  %v12196_v29 = vadd.f32 %v4459_v61, %v4378_v41  ;;  %v4502_v12 = vsel %vm4482_vm10, %v12164_v8, 0.0  ;;  %v4379_v0 = vadd.f32 %v4363_v20, %v4250_v21  ;;  %v10123_v61 = vld [vmem:[%s15025_s1 + $0xe8] ss:$0 sm:$0xff] }
 0x35a   :  { %v4501_v10 = vadd.f32 %v11893_v16, %v4499_v37  ;;  %v4124_v43 = vadd.f32 %v4108_v6, %v3979_v13  ;;  %v4235_v19 = vmul.f32 %v15200_v47, %v4191_v3  ;;  %v4319_v28 = vsel %vm4318_vm9, %v4315_v46, %v4317_v63  ;;  %v10124_v63 = vld [vmem:[%s15025_s1 + $0xf0] ss:$0 sm:$0xff]  ;;  %v15565_v46 = vld [vmem:[#allocation13_spill] sm:$0xff] }
 0x35b   :  { %v4364_v16 = vmul.f32 %v15195_v27, %v4320_v62  ;;  %v4460_v41 = vmul.f32 %v10121_v60, %v4418_v53  ;;  %v4252_v48 = vadd.f32 %v4236_v15, %v4123_v5  ;;  %v4366_v20 = vmul.f32 %v15193_v22, %v4334_v42 }
 0x35c   :  { %v4503_v1 = vadd.f32 %v4502_v12, %v4501_v10  ;;  %v4251_v6 = vadd.f32 %v4235_v19, %v4122_v14  ;;  %v4504_v7 = vsel %vm4482_vm10, %v12196_v29, 0.0  ;;  %v4365_v37 = vmul.f32 %v15194_v52, %v4319_v28 }
 0x35d   :  { %v4414_v32 = vpop.permute.xlu1 %4413  ;;  %v12224_v23 = vadd.f32 %v4460_v41, %v4379_v0  ;;  %v4253_v21 = vadd.f32 %v4237_v40, %v4124_v43 }
 0x35e   :  { %v4431_v3 = vsel %vm4415_vm7, %v4414_v32, %v15565_v46  ;;  %v4505_v15 = vadd.f32 %v4504_v7, %v4503_v1  ;;  %v4380_v60 = vadd.f32 %v4364_v16, %v4251_v6  ;;  %v4381_v14 = vadd.f32 %v4365_v37, %v4252_v48  ;;  %v15567_v6 = vld [vmem:[#allocation81_spill] sm:$0xff] }
 0x35f   :  { %v4412_v13 = vpop.permute.xlu0 %4411  ;;  %v4463_v31 = vmul.f32 %v10122_v58, %v4431_v3  ;;  %v4382_v0 = vadd.f32 %v4366_v20, %v4253_v21  ;;  %v4506_v19 = vsel %vm4482_vm10, %v12224_v23, 0.0  ;;  %v15568_v3 = vld [vmem:[#allocation29_spill] sm:$0xff] }
 0x360   :  { %v4416_v5 = vsel %vm4415_vm7, %v4412_v13, %v4414_v32  ;;  %v4417_v62 = vsel %vm4415_vm7, %v12099_v30, %v4412_v13  ;;  %v4507_v43 = vadd.f32 %v4506_v19, %v4505_v15  ;;  %v15569_v21 = vld [vmem:[#allocation33_spill] sm:$0xff] }
 0x361   :  { %v4461_v42 = vmul.f32 %v10123_v61, %v4417_v62  ;;  %v4462_v10 = vmul.f32 %v10124_v63, %v4416_v5  ;;  %v4479_v1 = vadd.f32 %v4463_v31, %v4382_v0  ;;  %v15566_v63 = vld [vmem:[#allocation71_spill] sm:$0xff] }
 0x363   :  { %v4477_v53 = vadd.f32 %v4461_v42, %v4380_v60  ;;  %v4478_v12 = vadd.f32 %v4462_v10, %v4381_v14  ;;  %v4512_v30 = vsel %vm4482_vm10, %v4479_v1, 0.0 }
 0x365   :  { %v4508_v28 = vsel %vm4482_vm10, %v4477_v53, 0.0  ;;  %v4510_v40 = vsel %vm4482_vm10, %v4478_v12, 0.0 }
 0x366   :  { %v4509_v16 = vadd.f32 %v4508_v28, %v4507_v43 }
 0x368   :  { %v4511_v41 = vadd.f32 %v4510_v40, %v4509_v16 }
 0x36a   :  { %v4513_v48 = vadd.f32 %v4512_v30, %v4511_v41 }
 0x36c   :  { %4514 = vadd.xlane.f32.xlu2 %v4513_v48 }
 0x3df   :  { %v4515_v58 = vpop.xlane.xlu2 %4514 }
 0x3e0   :  { %v4516_v32 = vmul.f32 0.00048828125, %v4515_v58 }
 0x3e2   :  { %v12239_v61 = vsub.f32 %v12056_v44, %v4516_v32  ;;  %v12242_v20 = vsub.f32 %v15566_v63, %v4516_v32  ;;  %v12245_v46 = vsub.f32 %v15567_v6, %v4516_v32  ;;  %v12248_v7 = vsub.f32 %v15568_v3, %v4516_v32 }
 0x3e3   :  { %v12255_v15 = vsub.f32 %v15569_v21, %v4516_v32  ;;  %v12260_v60 = vsub.f32 %v11707_v34, %v4516_v32  ;;  %v12267_v42 = vsub.f32 %v11718_v56, %v4516_v32  ;;  %v12273_v34 = vsub.f32 %v11828_v45, %v4516_v32 }
 0x3e4   :  { %v4533_v37 = vmul.f32 %v12239_v61, %v12239_v61  ;;  %v4534_v13 = vmul.f32 %v12242_v20, %v12242_v20  ;;  %v4535_v44 = vmul.f32 %v12245_v46, %v12245_v46  ;;  %v4536_v5 = vmul.f32 %v12248_v7, %v12248_v7 }
 0x3e5   :  { %v4537_v10 = vmul.f32 %v12255_v15, %v12255_v15  ;;  %v4538_v43 = vmul.f32 %v12260_v60, %v12260_v60  ;;  %v12279_v40 = vsub.f32 %v11841_v11, %v4516_v32  ;;  %v4539_v56 = vmul.f32 %v12267_v42, %v12267_v42 }
 0x3e6   :  { %v4549_v62 = vsel %vm4482_vm10, %v4533_v37, 0.0  ;;  %v4550_v14 = vsel %vm4482_vm10, %v4534_v13, 0.0  ;;  %v4552_v0 = vsel %vm4482_vm10, %v4535_v44, 0.0  ;;  %v4554_v28 = vsel %vm4482_vm10, %v4536_v5, 0.0 }
 0x3e7   :  { %v4551_v31 = vadd.f32 %v4550_v14, %v4549_v62  ;;  %v4556_v41 = vsel %vm4482_vm10, %v4537_v10, 0.0  ;;  %v12285_v48 = vsub.f32 %v11852_v39, %v4516_v32  ;;  %v4540_v45 = vmul.f32 %v12273_v34, %v12273_v34 }
 0x3e8   :  { %v4558_v58 = vsel %vm4482_vm10, %v4538_v43, 0.0  ;;  %v12291_v6 = vsub.f32 %v12164_v8, %v4516_v32  ;;  %v4541_v11 = vmul.f32 %v12279_v40, %v12279_v40  ;;  %v4560_v3 = vsel %vm4482_vm10, %v4539_v56, 0.0 }
 0x3e9   :  { %v4553_v19 = vadd.f32 %v4552_v0, %v4551_v31  ;;  %v12297_v13 = vsub.f32 %v12196_v29, %v4516_v32  ;;  %v4542_v39 = vmul.f32 %v12285_v48, %v12285_v48  ;;  %v4562_v21 = vsel %vm4482_vm10, %v4540_v45, 0.0 }
 0x3ea   :  { %15570 = vst [vmem:[#allocation46_spill] sm:$0xff] %v12291_v6  ;;  %v12303_v5 = vsub.f32 %v12224_v23, %v4516_v32  ;;  %v4543_v8 = vmul.f32 %v12291_v6, %v12291_v6  ;;  %v4564_v62 = vsel %vm4482_vm10, %v4541_v11, 0.0  ;;  %v12308_v31 = vsub.f32 %v4477_v53, %v4516_v32 }
 0x3eb   :  { %v4555_v16 = vadd.f32 %v4554_v28, %v4553_v19  ;;  %15571 = vst [vmem:[#allocation6_spill] sm:$0xff] %v12297_v13  ;;  %v4544_v29 = vmul.f32 %v12297_v13, %v12297_v13  ;;  %v4566_v10 = vsel %vm4482_vm10, %v4542_v39, 0.0  ;;  %v12313_v19 = vsub.f32 %v4478_v12, %v4516_v32 }
 0x3ec   :  { %15572 = vst [vmem:[#allocation49_spill] sm:$0xff] %v12303_v5  ;;  %v4545_v23 = vmul.f32 %v12303_v5, %v12303_v5  ;;  %v4568_v43 = vsel %vm4482_vm10, %v4543_v8, 0.0  ;;  %v4546_v53 = vmul.f32 %v12308_v31, %v12308_v31  ;;  %v10153_v39 = vmov 0  }
 0x3ed   :  { %v4557_v30 = vadd.f32 %v4556_v41, %v4555_v16  ;;  %15573 = vst [vmem:[#allocation53_spill] sm:$0xff] %v12308_v31  ;;  %v12318_v16 = vsub.f32 %v4479_v1, %v4516_v32  ;;  %v4570_v56 = vsel %vm4482_vm10, %v4544_v29, 0.0  ;;  %10107 = vset.pattern.permute.xlu1 %v10153_v39  ;;  %10108 = vset.pattern.permute.xlu0 %v10153_v39  ;;  %v4655_v39 = vld [vmem:[%s15028_s5 + $0x10] sm:$0xff] }
 0x3ee   :  { %15574 = vst [vmem:[#allocation47_spill] sm:$0xff] %v12313_v19  ;;  %v4572_v12 = vsel %vm4482_vm10, %v4545_v23, 0.0  ;;  %v4480_v23 = vld [vmem:[%s15026_s3] sm:$0x3] }
 0x3ef   :  { %v4559_v63 = vadd.f32 %v4558_v58, %v4557_v30  ;;  %15575 = vst [vmem:[#allocation48_spill] sm:$0xff] %v12318_v16  ;;  %v4547_v30 = vmul.f32 %v12313_v19, %v12313_v19  ;;  %v4548_v58 = vmul.f32 %v12318_v16, %v12318_v16 }
 0x3f1   :  { %v4561_v37 = vadd.f32 %v4560_v3, %v4559_v63  ;;  %v4574_v63 = vsel %vm4482_vm10, %v4546_v53, 0.0  ;;  %v4576_v1 = vsel %vm4482_vm10, %v4547_v30, 0.0  ;;  %v4578_v3 = vsel %vm4482_vm10, %v4548_v58, 0.0 }
 0x3f3   :  { %v4563_v44 = vadd.f32 %v4562_v21, %v4561_v37 }
 0x3f5   :  { %v4565_v14 = vadd.f32 %v4564_v62, %v4563_v44 }
 0x3f7   :  { %v4567_v0 = vadd.f32 %v4566_v10, %v4565_v14 }
 0x3f9   :  { %v4569_v28 = vadd.f32 %v4568_v43, %v4567_v0 }
 0x3fb   :  { %v4571_v41 = vadd.f32 %v4570_v56, %v4569_v28  ;;  %v4481_v56 = vld [vmem:[%s15027_s4] sm:$0x3] }
 0x3fd   :  { %v4573_v45 = vadd.f32 %v4572_v12, %v4571_v41  ;;  %v4653_v41 = vld [vmem:[%s15028_s5] sm:$0xff] }
 0x3fe   :  { %v4660_v30 = vsel %vm4658_vm14, %v4653_v41, 0  ;;  %v4656_v41 = vld [vmem:[%s15028_s5 + $0x18] sm:$0xff] }
 0x3ff   :  { %v4575_v11 = vadd.f32 %v4574_v63, %v4573_v45  ;;  %v12341_v12 = vand.u32 4294901760, %v4660_v30  ;;  %v4654_v45 = vld [vmem:[%s15028_s5 + $0x8] sm:$0xff] }
 0x401   :  { %v4577_v32 = vadd.f32 %v4576_v1, %v4575_v11  ;;  %v12349_v63 = vsub.f32 %v4660_v30, %v12341_v12  ;;  %v4663_v11 = vsel %vm4658_vm14, %v4654_v45, 0 }
 0x403   :  { %v4579_v37 = vadd.f32 %v4578_v3, %v4577_v32  ;;  %v12353_v1 = vand.u32 4294901760, %v12349_v63  ;;  %v12355_v32 = vand.u32 4294901760, %v4663_v11 }
 0x405   :  { %4580 = vadd.xlane.f32.xlu0 %v4579_v37 }
 0x478   :  { %v4581_v21 = vpop.xlane.xlu0 %4580 }
 0x479   :  { %v4582_v44 = vmul.f32 0.00048828125, %v4581_v21 }
 0x47b   :  { %v4583_v8 = vadd.f32 1e-05, %v4582_v44  ;;  %v4742_v44 = vsub.f32 %v12349_v63, %v12353_v1 }
 0x47d   :  { %10125 = vrsqrt.f32 %v4583_v8  ;;  %vm4590_vm12 = vweird.f32 %v4583_v8 }
 0x483   :  { %v10126_v62 = vpop.eup %10125 }
 0x484   :  { %v4585_v14 = vmul.f32 %v10126_v62, %v4583_v8  ;;  %vm4591_vm11 = vweird.f32 %v10126_v62 }
 0x485   :  { %vm4592_vm13 = vmor %vm4590_vm12, %vm4591_vm11 }
 0x486   :  { %v4586_v29 = vmul.f32 %v10126_v62, %v4585_v14  ;;  %v12371_v14 = vsub.f32 %v4663_v11, %v12355_v32 }
 0x488   :  { %v4587_v10 = vmul.f32 0.5, %v4586_v29 }
 0x48a   :  { %v4588_v0 = vsub.f32 1.5, %v4587_v10  ;;  %v12374_v10 = vand.u32 4294901760, %v4742_v44  ;;  %v4669_v44 = vsel %vm4658_vm14, %v4656_v41, 0  ;;  %v4657_v41 = vld [vmem:[%s15028_s5 + $0x20] sm:$0xf] }
 0x48c   :  { %v4589_v43 = vmul.f32 %v10126_v62, %v4588_v0  ;;  %15578 = vst [vmem:[#allocation52_spill] sm:$0xff] %v12374_v10 }
 0x48e   :  { %v4593_v28 = vsel %vm4592_vm13, %v10126_v62, %v4589_v43  ;;  %v12379_v43 = vand.u32 4294901760, %v12371_v14 }
 0x48f   :  { %v4594_v53 = vmul.f32 %v4593_v28, %v4480_v23 }
 0x490   :  { %v4750_v11 = vsub.f32 %v12371_v14, %v12379_v43 }
 0x491   :  { %4597 = vperm.xlu1 %10107, %v4594_v53  }
 0x499   :  { %4618 = vperm.xlu1 %10107, %v4481_v56  }
 0x503   :  { %v12346_v58 = vpop.permute.xlu1 %4597 }
 0x504   :  { %15576 = vst [vmem:[#allocation56_spill] sm:$0xff] %v12346_v58  ;;  %v4600_v3 = vmul.f32 %v12346_v58, %v12239_v61  ;;  %v4601_v37 = vmul.f32 %v12346_v58, %v12242_v20  ;;  %v4666_v61 = vsel %vm4658_vm14, %v4655_v39, 0 }
 0x505   :  { %v12381_v28 = vand.u32 4294901760, %v4666_v61 }
 0x50b   :  { %v12364_v21 = vpop.permute.xlu1 %4618 }
 0x50c   :  { %15577 = vst [vmem:[#allocation59_spill] sm:$0xff] %v12364_v21  ;;  %v4621_v8 = vadd.f32 %v12364_v21, %v4600_v3  ;;  %v4622_v62 = vadd.f32 %v12364_v21, %v4601_v37  ;;  %v12391_v3 = vsub.f32 %v4666_v61, %v12381_v28  ;;  %v12400_v61 = vand.u32 4294901760, %v4669_v44 }
 0x50e   :  { %v4637_v29 = vmax.f32 %v4621_v8, 0.0  ;;  %v4638_v20 = vmax.f32 %v4622_v62, 0.0 }
 0x510   :  { %v4675_v0 = vsel %vm4482_vm10, %v4637_v29, 0  ;;  %v4678_v23 = vsel %vm4482_vm10, %v4638_v20, 0  ;;  %v12395_v29 = vand.u32 4294901760, %v4750_v11  ;;  %v12398_v20 = vand.u32 4294901760, %v12391_v3 }
 0x511   :  { %v4737_v53 = vand.u32 4294901760, %v4675_v0  ;;  %v5007_v56 = vand.u32 4294901760, %v4678_v23  ;;  %v4672_v11 = vsel %vm4658_vm14, %v4657_v41, 0 }
 0x512   :  { %15579 = vst [vmem:[#allocation50_spill] sm:$0xff] %v12395_v29 }
 0x513   :  { %4738 = vmatpush.msra.mxu0 %v4737_v53  ;;  %4882 = vmatpush.msra.mxu3 %v4737_v53  ;;  %v4796_v30 = vsub.f32 %v4675_v0, %v4737_v53  ;;  %v5066_v45 = vsub.f32 %v4678_v23, %v5007_v56  ;;  %15580 = vst [vmem:[#allocation55_spill] sm:$0xff] %v12398_v20 }
 0x514   :  { %4744 = vmatmul.f32.vlgmr.msra.gmra.mxu0 %v12374_v10  ;;  %4886 = vmatmul.f32.vlgmr.msra.gmra.mxu3 %v12353_v1 }
 0x515   :  { %4839 = vmatpush.msra.mxu2 %v4796_v30  ;;  %v4797_v37 = vand.u32 4294901760, %v4796_v30  ;;  %v5067_v39 = vand.u32 4294901760, %v5066_v45 }
 0x516   :  { %4842 = vmatmul.f32.vlgmr.msra.gmra.mxu2 %v12349_v63 }
 0x517   :  { %5008 = vmatpush.msrb.mxu2 %v5007_v56  ;;  %4932 = vmatpush.msrb.mxu0 %v4797_v37  ;;  %v4798_v8 = vsub.f32 %v4796_v30, %v4797_v37  ;;  %v5068_v62 = vsub.f32 %v5066_v45, %v5067_v39  ;;  %v4758_v30 = vsub.f32 %v12391_v3, %v12398_v20 }
 0x519   :  { %5202 = vmatpush.msra.mxu2 %v5067_v39  ;;  %5109 = vmatpush.msra.mxu0 %v5066_v45  ;;  %v4799_v0 = vand.u32 4294901760, %v4798_v8  ;;  %v5069_v23 = vand.u32 4294901760, %v5068_v62  ;;  %v12410_v45 = vsub.f32 %v4669_v44, %v12400_v61  ;;  %v12415_v37 = vand.u32 4294901760, %v4758_v30 }
 0x51a   :  { %v12420_v8 = vand.u32 4294901760, %v4672_v11 }
 0x51b   :  { %4800 = vmatpush.msra.mxu1 %v4799_v0  ;;  %5070 = vmatpush.msrb.mxu3 %v5069_v23  ;;  %15581 = vst [vmem:[#allocation54_spill] sm:$0xff] %v12410_v45  ;;  %v12418_v39 = vand.u32 4294901760, %v12410_v45 }
 0x51c   :  { %4752 = vmatmul.f32.gmra.mxu0 %v12395_v29  ;;  %4802 = vmatmul.f32.vlgmr.msra.gmra.mxu1 %v12341_v12  ;;  %v12427_v44 = vsub.f32 %v4672_v11, %v12420_v8 }
 0x51d   :  { %4892 = vmatmul.f32.gmra.mxu3 %v12379_v43  ;;  %4970 = vmatpush.msrb.mxu1 %v4737_v53  ;;  %15582 = vst [vmem:[#allocation63_spill] sm:$0xff] %v12418_v39  ;;  %v4766_v53 = vsub.f32 %v12410_v45, %v12418_v39 }
 0x51e   :  { %5240 = vmatpush.msra.mxu3 %v5007_v56  ;;  %4847 = vmatmul.f32.gmra.mxu2 %v12371_v14  ;;  %15583 = vst [vmem:[#allocation7_spill] sm:$0xff] %v12427_v44  ;;  %v12436_v0 = vand.u32 4294901760, %v12427_v44 }
 0x51f   :  { %5152 = vmatpush.msra.mxu1 %v5007_v56  ;;  %v4602_v56 = vmul.f32 %v12346_v58, %v12245_v46  ;;  %v12433_v62 = vand.u32 4294901760, %v4766_v53 }
 0x520   :  { %15584 = vst [vmem:[#allocation62_spill] sm:$0xff] %v12436_v0  ;;  %v4774_v41 = vsub.f32 %v12427_v44, %v12436_v0 }
 0x521   :  { %v4623_v23 = vadd.f32 %v12364_v21, %v4602_v56 }
 0x522   :  { %v12445_v46 = vand.u32 4294901760, %v4774_v41 }
 0x523   :  { %v4639_v30 = vmax.f32 %v4623_v23, 0.0 }
 0x524   :  { %4760 = vmatmul.f32.gmra.mxu0 %v12415_v37  ;;  %4806 = vmatmul.f32.gmra.mxu1 %v12355_v32 }
 0x525   :  { %4898 = vmatmul.f32.gmra.mxu3 %v12398_v20  ;;  %v4681_v11 = vsel %vm4482_vm10, %v4639_v30, 0  ;;  %v4603_v30 = vmul.f32 %v12346_v58, %v12248_v7 }
 0x526   :  { %4852 = vmatmul.f32.gmra.mxu2 %v12391_v3  ;;  %v5277_v53 = vand.u32 4294901760, %v4681_v11 }
 0x528   :  { %v5336_v56 = vsub.f32 %v4681_v11, %v5277_v53  ;;  %v4624_v11 = vadd.f32 %v12364_v21, %v4603_v30 }
 0x52a   :  { %v5337_v22 = vand.u32 4294901760, %v5336_v56 }
 0x52c   :  { %4768 = vmatmul.f32.gmra.mxu0 %v12433_v62  ;;  %4810 = vmatmul.f32.gmra.mxu1 %v12381_v28  ;;  %v5338_v23 = vsub.f32 %v5336_v56, %v5337_v22 }
 0x52d   :  { %4904 = vmatmul.f32.gmra.mxu3 %v12418_v39 }
 0x52e   :  { %4857 = vmatmul.f32.gmra.mxu2 %v12410_v45  ;;  %v5339_v41 = vand.u32 4294901760, %v5338_v23 }
 0x534   :  { %4776 = vmatmul.f32.gmra.mxu0 %v12445_v46  ;;  %4814 = vmatmul.f32.gmra.mxu1 %v12400_v61 }
 0x535   :  { %4910 = vmatmul.f32.gmra.mxu3 %v12436_v0 }
 0x536   :  { %4862 = vmatmul.f32.gmra.mxu2 %v12427_v44 }
 0x53c   :  { %4818 = vmatmul.f32.gmra.mxu1 %v12420_v8  ;;  %4934 = vmatmul.f32.vlgmr.msrb.gmra.mxu0 %v12341_v12 }
 0x53d   :  { %5072 = vmatmul.f32.vlgmr.msrb.gmra.mxu3 %v12341_v12  ;;  %5278 = vmatpush.msrb.mxu0 %v5277_v53 }
 0x53e   :  { %5422 = vmatpush.msrb.mxu3 %v5277_v53  ;;  %5014 = vmatmul.f32.vlgmr.msrb.gmra.mxu2 %v12374_v10 }
 0x53f   :  { %5379 = vmatpush.msrb.mxu2 %v5336_v56  ;;  %v4640_v56 = vmax.f32 %v4624_v11, 0.0 }
 0x541   :  { %v4684_v23 = vsel %vm4482_vm10, %v4640_v56, 0 }
 0x544   :  { %4938 = vmatmul.f32.gmra.mxu0 %v12355_v32  ;;  %4972 = vmatmul.f32.vlgmr.msrb.gmra.mxu1 %v12341_v12 }
 0x545   :  { %5076 = vmatmul.f32.gmra.mxu3 %v12355_v32  ;;  %5340 = vmatpush.msrb.mxu1 %v5339_v41  ;;  %v5547_v41 = vand.u32 4294901760, %v4684_v23 }
 0x546   :  { %5022 = vmatmul.f32.gmra.mxu2 %v12395_v29 }
 0x547   :  { %v5606_v7 = vsub.f32 %v4684_v23, %v5547_v41 }
 0x549   :  { %v5607_v30 = vand.u32 4294901760, %v5606_v7 }
 0x54b   :  { %v5608_v11 = vsub.f32 %v5606_v7, %v5607_v30 }
 0x54c   :  { %4942 = vmatmul.f32.gmra.mxu0 %v12381_v28  ;;  %4976 = vmatmul.f32.gmra.mxu1 %v12355_v32 }
 0x54d   :  { %5080 = vmatmul.f32.gmra.mxu3 %v12381_v28  ;;  %v5609_v56 = vand.u32 4294901760, %v5608_v11 }
 0x54e   :  { %5030 = vmatmul.f32.gmra.mxu2 %v12415_v37 }
 0x554   :  { %4946 = vmatmul.f32.gmra.mxu0 %v12400_v61  ;;  %4980 = vmatmul.f32.gmra.mxu1 %v12381_v28 }
 0x555   :  { %5084 = vmatmul.f32.gmra.mxu3 %v12400_v61 }
 0x556   :  { %5038 = vmatmul.f32.gmra.mxu2 %v12433_v62 }
 0x55c   :  { %4950 = vmatmul.f32.gmra.mxu0 %v12420_v8  ;;  %4984 = vmatmul.f32.gmra.mxu1 %v12400_v61 }
 0x55d   :  { %5088 = vmatmul.f32.gmra.mxu3 %v12420_v8 }
 0x55e   :  { %5046 = vmatmul.f32.gmra.mxu2 %v12445_v46 }
 0x564   :  { %4988 = vmatmul.f32.gmra.mxu1 %v12420_v8  ;;  %5112 = vmatmul.f32.vlgmr.msra.gmra.mxu0 %v12349_v63 }
 0x565   :  { %5242 = vmatmul.f32.vlgmr.msra.gmra.mxu3 %v12341_v12  ;;  %5472 = vmatpush.msra.mxu0 %v5337_v22 }
 0x566   :  { %5610 = vmatpush.msra.mxu3 %v5609_v56  ;;  %5204 = vmatmul.f32.vlgmr.msra.gmra.mxu2 %v12341_v12 }
 0x567   :  { %5548 = vmatpush.msra.mxu2 %v5547_v41 }
 0x56c   :  { %5117 = vmatmul.f32.gmra.mxu0 %v12371_v14  ;;  %5156 = vmatmul.f32.vlgmr.msra.gmra.mxu1 %v12353_v1 }
 0x56d   :  { %5246 = vmatmul.f32.gmra.mxu3 %v12355_v32  ;;  %5510 = vmatpush.msra.mxu1 %v5277_v53 }
 0x56e   :  { %5208 = vmatmul.f32.gmra.mxu2 %v12355_v32 }
 0x574   :  { %5122 = vmatmul.f32.gmra.mxu0 %v12391_v3  ;;  %5162 = vmatmul.f32.gmra.mxu1 %v12379_v43 }
 0x575   :  { %5250 = vmatmul.f32.gmra.mxu3 %v12381_v28 }
 0x576   :  { %5212 = vmatmul.f32.gmra.mxu2 %v12381_v28 }
 0x57c   :  { %5127 = vmatmul.f32.gmra.mxu0 %v12410_v45  ;;  %5168 = vmatmul.f32.gmra.mxu1 %v12398_v20 }
 0x57d   :  { %5254 = vmatmul.f32.gmra.mxu3 %v12400_v61 }
 0x57e   :  { %5216 = vmatmul.f32.gmra.mxu2 %v12400_v61 }
 0x584   :  { %5132 = vmatmul.f32.gmra.mxu0 %v12427_v44  ;;  %5174 = vmatmul.f32.gmra.mxu1 %v12418_v39 }
 0x585   :  { %5258 = vmatmul.f32.gmra.mxu3 %v12420_v8 }
 0x586   :  { %5220 = vmatmul.f32.gmra.mxu2 %v12420_v8 }
 0x58c   :  { %5180 = vmatmul.f32.gmra.mxu1 %v12436_v0  ;;  %5284 = vmatmul.f32.vlgmr.msrb.gmra.mxu0 %v12374_v10 }
 0x58d   :  { %5426 = vmatmul.f32.vlgmr.msrb.gmra.mxu3 %v12353_v1  ;;  %5649 = vmatpush.msrb.mxu0 %v5606_v7  ;;  %v4604_v7 = vmul.f32 %v12346_v58, %v12255_v15 }
 0x58e   :  { %5780 = vmatpush.msrb.mxu3 %v5547_v41  ;;  %5382 = vmatmul.f32.vlgmr.msrb.gmra.mxu2 %v12349_v63 }
 0x58f   :  { %5742 = vmatpush.msrb.mxu2 %v5607_v30 }
 0x591   :  { %v4745_v22 = vpop.f32.mrf.mxu0 }
 0x594   :  { %5292 = vmatmul.f32.gmra.mxu0 %v12395_v29  ;;  %5342 = vmatmul.f32.vlgmr.msrb.gmra.mxu1 %v12341_v12 }
 0x595   :  { %5432 = vmatmul.f32.gmra.mxu3 %v12379_v43  ;;  %5692 = vmatpush.msrb.mxu1 %v5547_v41  ;;  %v4625_v41 = vadd.f32 %v12364_v21, %v4604_v7 }
 0x596   :  { %5387 = vmatmul.f32.gmra.mxu2 %v12371_v14 }
 0x597   :  { %v4887_v53 = vpop.f32.mrf.mxu3  ;;  %v4641_v26 = vmax.f32 %v4625_v41, 0.0 }
 0x599   :  { %v4753_v23 = vpop.f32.mrf.mxu0  ;;  %v4803_v11 = vpop.f32.mrf.mxu1  ;;  %v4687_v15 = vsel %vm4482_vm10, %v4641_v26, 0 }
 0x59a   :  { %v4843_v56 = vpop.f32.mrf.mxu2  ;;  %v12520_v54 = vand.u32 4294901760, %v4687_v15  ;;  %v4804_v2 = vadd.f32 %v4803_v11, %v4745_v22 }
 0x59c   :  { %5300 = vmatmul.f32.gmra.mxu0 %v12415_v37  ;;  %5346 = vmatmul.f32.gmra.mxu1 %v12355_v32  ;;  %v12527_v41 = vsub.f32 %v4687_v15, %v12520_v54  ;;  %v4844_v51 = vadd.f32 %v4843_v56, %v4804_v2 }
 0x59d   :  { %5438 = vmatmul.f32.gmra.mxu3 %v12398_v20 }
 0x59e   :  { %5392 = vmatmul.f32.gmra.mxu2 %v12391_v3  ;;  %v15221_v25 = vand.u32 4294901760, %v12527_v41  ;;  %v4888_v22 = vadd.f32 %v4887_v53, %v4844_v51 }
 0x5a0   :  { %v4893_v30 = vpop.f32.mrf.mxu3  ;;  %v5878_v15 = vsub.f32 %v12527_v41, %v15221_v25  ;;  %v4605_v25 = vmul.f32 %v12346_v58, %v12260_v60 }
 0x5a1   :  { %v4761_v52 = vpop.f32.mrf.mxu0  ;;  %v4807_v27 = vpop.f32.mrf.mxu1 }
 0x5a2   :  { %v4848_v33 = vpop.f32.mrf.mxu2  ;;  %v5879_v9 = vand.u32 4294901760, %v5878_v15  ;;  %v4808_v11 = vadd.f32 %v4807_v27, %v4753_v23  ;;  %v4626_v15 = vadd.f32 %v12364_v21, %v4605_v25 }
 0x5a4   :  { %5308 = vmatmul.f32.gmra.mxu0 %v12433_v62  ;;  %5350 = vmatmul.f32.gmra.mxu1 %v12381_v28  ;;  %v4849_v19 = vadd.f32 %v4848_v33, %v4808_v11 }
 0x5a5   :  { %5444 = vmatmul.f32.gmra.mxu3 %v12418_v39 }
 0x5a6   :  { %5397 = vmatmul.f32.gmra.mxu2 %v12410_v45  ;;  %v4894_v51 = vadd.f32 %v4893_v30, %v4849_v19 }
 0x5a8   :  { %v12515_v50 = vpop.f32.mrf.mxu3 }
 0x5a9   :  { %v12518_v49 = vpop.f32.mrf.mxu0  ;;  %v4811_v47 = vpop.f32.mrf.mxu1 }
 0x5aa   :  { %v4853_v7 = vpop.f32.mrf.mxu2 }
 0x5ac   :  { %5316 = vmatmul.f32.gmra.mxu0 %v12445_v46  ;;  %5354 = vmatmul.f32.gmra.mxu1 %v12400_v61 }
 0x5ad   :  { %5450 = vmatmul.f32.gmra.mxu3 %v12436_v0 }
 0x5ae   :  { %5402 = vmatmul.f32.gmra.mxu2 %v12427_v44 }
 0x5b0   :  { %v12529_v38 = vpop.f32.mrf.mxu3 }
 0x5b1   :  { %v12531_v26 = vpop.f32.mrf.mxu0  ;;  %v4815_v36 = vpop.f32.mrf.mxu1 }
 0x5b2   :  { %v12533_v55 = vpop.f32.mrf.mxu2  ;;  %v4816_v19 = vadd.f32 %v4815_v36, %v12518_v49 }
 0x5b4   :  { %5358 = vmatmul.f32.gmra.mxu1 %v12420_v8  ;;  %5474 = vmatmul.f32.vlgmr.msra.gmra.mxu0 %v12341_v12 }
 0x5b5   :  { %5612 = vmatmul.f32.vlgmr.msra.gmra.mxu3 %v12341_v12  ;;  %5818 = vmatpush.msra.mxu0 %v12520_v54 }
 0x5b6   :  { %5962 = vmatpush.msra.mxu3 %v12520_v54  ;;  %5554 = vmatmul.f32.vlgmr.msra.gmra.mxu2 %v12374_v10 }
 0x5b7   :  { %5919 = vmatpush.msra.mxu2 %v12527_v41 }
 0x5b8   :  { %v12546_v35 = vpop.f32.mrf.mxu3 }
 0x5b9   :  { %v12548_v57 = vpop.f32.mrf.mxu1  ;;  %v4935_v18 = vpop.f32.mrf.mxu0 }
 0x5ba   :  { %v12550_v17 = vpop.f32.mrf.mxu2  ;;  %v4936_v16 = vadd.f32 %v4935_v18, %v4888_v22  ;;  %v4812_v18 = vadd.f32 %v4811_v47, %v4761_v52 }
 0x5bc   :  { %5478 = vmatmul.f32.gmra.mxu0 %v12355_v32  ;;  %5512 = vmatmul.f32.vlgmr.msra.gmra.mxu1 %v12341_v12  ;;  %v4854_v53 = vadd.f32 %v4853_v7, %v4812_v18 }
 0x5bd   :  { %5616 = vmatmul.f32.gmra.mxu3 %v12355_v32  ;;  %5880 = vmatpush.msra.mxu1 %v5879_v9  ;;  %v4642_v9 = vmax.f32 %v4626_v15, 0.0 }
 0x5be   :  { %5562 = vmatmul.f32.gmra.mxu2 %v12395_v29  ;;  %v4900_v52 = vadd.f32 %v12515_v50, %v4854_v53 }
 0x5c0   :  { %v12558_v59 = vpop.f32.mrf.mxu3 }
 0x5c1   :  { %v4939_v2 = vpop.f32.mrf.mxu0  ;;  %v4973_v56 = vpop.f32.mrf.mxu1 }
 0x5c2   :  { %v4974_v4 = vadd.f32 %v4973_v56, %v4936_v16  ;;  %v12561_v31 = vpop.f32.mrf.mxu2  ;;  %v4940_v27 = vadd.f32 %v4939_v2, %v4894_v51  ;;  %v4690_v16 = vsel %vm4482_vm10, %v4642_v9, 0  ;;  %v4859_v9 = vadd.f32 %v12533_v55, %v4816_v19 }
 0x5c3   :  { %v12575_v47 = vand.u32 4294901760, %v4690_v16 }
 0x5c4   :  { %5482 = vmatmul.f32.gmra.mxu0 %v12381_v28  ;;  %5516 = vmatmul.f32.gmra.mxu1 %v12355_v32  ;;  %v9138_v11 = vrot.slane %v4974_v4, 4  ;;  %v4906_v18 = vadd.f32 %v12529_v38, %v4859_v9 }
 0x5c5   :  { %5620 = vmatmul.f32.gmra.mxu3 %v12381_v28  ;;  %9042 = vrot.lane.b32.xlu1 %v4974_v4, %s10145_s22  ;;  %v12587_v7 = vsub.f32 %v4690_v16, %v12575_v47 }
 0x5c6   :  { %5570 = vmatmul.f32.gmra.mxu2 %v12415_v37 }
 0x5c7   :  { %v6147_v49 = vand.u32 4294901760, %v12587_v7 }
 0x5c8   :  { %v12568_v60 = vpop.f32.mrf.mxu3 }
 0x5c9   :  { %v4943_v25 = vpop.f32.mrf.mxu0  ;;  %v4977_v33 = vpop.f32.mrf.mxu1 }
 0x5ca   :  { %v4978_v23 = vadd.f32 %v4977_v33, %v4940_v27  ;;  %v12571_v22 = vpop.f32.mrf.mxu2  ;;  %v4944_v4 = vadd.f32 %v4943_v25, %v4900_v52  ;;  %v4820_v27 = vadd.f32 %v12548_v57, %v12531_v26  ;;  %v6148_v25 = vsub.f32 %v12587_v7, %v6147_v49 }
 0x5cb   :  { %v15586_v26 = vand.u32 4294901760, %v12527_v41 }
 0x5cc   :  { %v9346_v56 = vrot.slane %v4978_v23, 4  ;;  %5486 = vmatmul.f32.gmra.mxu0 %v12400_v61  ;;  %5520 = vmatmul.f32.gmra.mxu1 %v12381_v28  ;;  %v6149_v57 = vand.u32 4294901760, %v6148_v25 }
 0x5cd   :  { %5624 = vmatmul.f32.gmra.mxu3 %v12400_v61  ;;  %9250 = vrot.lane.b32.xlu2 %v4978_v23, %s10147_s24  ;;  %v4864_v23 = vadd.f32 %v12550_v17, %v4820_v27 }
 0x5ce   :  { %9170 = vrot.lane.b32.xlu1 %v9138_v11, %s10146_s23  ;;  %9378 = vrot.lane.b32.xlu0 %v9346_v56, %s10149_s28 }
 0x5cf   :  { %5578 = vmatmul.f32.gmra.mxu2 %v12433_v62  ;;  %v4912_v56 = vadd.f32 %v12546_v35, %v4864_v23  ;;  %v5074_v35 = vadd.f32 %v12558_v59, %v12561_v31  ;;  %v5078_v59 = vadd.f32 %v12568_v60, %v12571_v22 }
 0x5d0   :  { %v12584_v30 = vpop.f32.mrf.mxu3 }
 0x5d1   :  { %v4947_v2 = vpop.f32.mrf.mxu0  ;;  %v4981_v15 = vpop.f32.mrf.mxu1 }
 0x5d2   :  { %v12590_v51 = vadd.f32 %v4981_v15, %v4944_v4  ;;  %v12592_v50 = vpop.f32.mrf.mxu2  ;;  %v4948_v55 = vadd.f32 %v4947_v2, %v4906_v18 }
 0x5d3   :  { %v5082_v60 = vadd.f32 %v12584_v30, %v12592_v50 }
 0x5d4   :  { %15585 = vst [vmem:[#allocation72_spill] sm:$0xff] %v12590_v51  ;;  %v9474_v36 = vrot.slane %v12590_v51, 4  ;;  %5490 = vmatmul.f32.gmra.mxu0 %v12420_v8  ;;  %5524 = vmatmul.f32.gmra.mxu1 %v12400_v61 }
 0x5d5   :  { %5628 = vmatmul.f32.gmra.mxu3 %v12420_v8 }
 0x5d6   :  { %9506 = vrot.lane.b32.xlu1 %v9474_v36, %s10148_s25 }
 0x5d7   :  { %5586 = vmatmul.f32.gmra.mxu2 %v12445_v46 }
 0x5d8   :  { %v12607_v33 = vpop.f32.mrf.mxu3 }
 0x5d9   :  { %v4951_v16 = vpop.f32.mrf.mxu0  ;;  %v4985_v53 = vpop.f32.mrf.mxu1 }
 0x5da   :  { %v4986_v11 = vadd.f32 %v4985_v53, %v4948_v55  ;;  %v12610_v38 = vpop.f32.mrf.mxu2  ;;  %v4952_v17 = vadd.f32 %v4951_v16, %v4912_v56 }
 0x5db   :  { %v5086_v30 = vadd.f32 %v12607_v33, %v12610_v38 }
 0x5dc   :  { %5528 = vmatmul.f32.gmra.mxu1 %v12420_v8  ;;  %5652 = vmatmul.f32.vlgmr.msrb.gmra.mxu0 %v12349_v63  ;;  %v9682_v9 = vrot.slane %v4986_v11, 4 }
 0x5dd   :  { %5782 = vmatmul.f32.vlgmr.msrb.gmra.mxu3 %v12341_v12  ;;  %6012 = vmatpush.msrb.mxu0 %v15586_v26 }
 0x5de   :  { %6150 = vmatpush.msrb.mxu3 %v6149_v57  ;;  %9586 = vrot.lane.b32.xlu0 %v4986_v11, %s10151_s30 }
 0x5df   :  { %5744 = vmatmul.f32.vlgmr.msrb.gmra.mxu2 %v12341_v12 }
 0x5e0   :  { %6088 = vmatpush.msrb.mxu2 %v12575_v47  ;;  %v12621_v52 = vpop.f32.mrf.mxu3 }
 0x5e1   :  { %v4989_v19 = vpop.f32.mrf.mxu1  ;;  %v5113_v4 = vpop.f32.mrf.mxu0 }
 0x5e2   :  { %v4990_v2 = vadd.f32 %v4989_v19, %v4952_v17  ;;  %v12623_v15 = vpop.f32.mrf.mxu2  ;;  %v5114_v41 = vadd.f32 %v5113_v4, %v5074_v35 }
 0x5e3   :  { %v5090_v33 = vadd.f32 %v12621_v52, %v12623_v15 }
 0x5e4   :  { %5657 = vmatmul.f32.gmra.mxu0 %v12371_v14  ;;  %5696 = vmatmul.f32.vlgmr.msrb.gmra.mxu1 %v12353_v1 }
 0x5e5   :  { %5786 = vmatmul.f32.gmra.mxu3 %v12355_v32  ;;  %6050 = vmatpush.msrb.mxu1 %v12520_v54 }
 0x5e6   :  { %9714 = vrot.lane.b32.xlu0 %v9682_v9, %s10152_s9  ;;  %9794 = vrot.lane.b32.xlu1 %v4990_v2, %s10150_s29 }
 0x5e7   :  { %5748 = vmatmul.f32.gmra.mxu2 %v12355_v32 }
 0x5e8   :  { %v5243_v36 = vpop.f32.mrf.mxu3 }
 0x5e9   :  { %v5118_v18 = vpop.f32.mrf.mxu0  ;;  %v5157_v27 = vpop.f32.mrf.mxu1 }
 0x5ea   :  { %v5158_v55 = vadd.f32 %v5157_v27, %v5114_v41  ;;  %v5205_v25 = vpop.f32.mrf.mxu2  ;;  %v5119_v31 = vadd.f32 %v5118_v18, %v5078_v59 }
 0x5ec   :  { %v5206_v16 = vadd.f32 %v5205_v25, %v5158_v55  ;;  %5662 = vmatmul.f32.gmra.mxu0 %v12391_v3  ;;  %5702 = vmatmul.f32.gmra.mxu1 %v12379_v43 }
 0x5ed   :  { %5790 = vmatmul.f32.gmra.mxu3 %v12381_v28 }
 0x5ee   :  { %v5244_v54 = vadd.f32 %v5243_v36, %v5206_v16 }
 0x5ef   :  { %5752 = vmatmul.f32.gmra.mxu2 %v12381_v28 }
 0x5f0   :  { %v9139_v53 = vrot.slane %v5244_v54, 4  ;;  %9044 = vrot.lane.b32.xlu1 %v5244_v54, %s10145_s22  ;;  %v5247_v23 = vpop.f32.mrf.mxu3 }
 0x5f1   :  { %v5123_v11 = vpop.f32.mrf.mxu0  ;;  %v5163_v57 = vpop.f32.mrf.mxu1 }
 0x5f2   :  { %v5164_v26 = vadd.f32 %v5163_v57, %v5119_v31  ;;  %9172 = vrot.lane.b32.xlu2 %v9139_v53, %s10146_s23  ;;  %v5209_v56 = vpop.f32.mrf.mxu2  ;;  %v5124_v19 = vadd.f32 %v5123_v11, %v5082_v60 }
 0x5f4   :  { %v5210_v17 = vadd.f32 %v5209_v56, %v5164_v26  ;;  %5667 = vmatmul.f32.gmra.mxu0 %v12410_v45  ;;  %5708 = vmatmul.f32.gmra.mxu1 %v12398_v20 }
 0x5f5   :  { %5794 = vmatmul.f32.gmra.mxu3 %v12400_v61 }
 0x5f6   :  { %v5248_v22 = vadd.f32 %v5247_v23, %v5210_v17 }
 0x5f7   :  { %5756 = vmatmul.f32.gmra.mxu2 %v12400_v61 }
 0x5f8   :  { %v9347_v4 = vrot.slane %v5248_v22, 4  ;;  %9252 = vrot.lane.b32.xlu0 %v5248_v22, %s10147_s24  ;;  %v5251_v2 = vpop.f32.mrf.mxu3 }
 0x5f9   :  { %v5128_v9 = vpop.f32.mrf.mxu0  ;;  %v5169_v35 = vpop.f32.mrf.mxu1 }
 0x5fa   :  { %v5170_v41 = vadd.f32 %v5169_v35, %v5124_v19  ;;  %9380 = vrot.lane.b32.xlu1 %v9347_v4, %s10149_s28  ;;  %v5213_v36 = vpop.f32.mrf.mxu2  ;;  %v5129_v27 = vadd.f32 %v5128_v9, %v5086_v30 }
 0x5fc   :  { %v5214_v18 = vadd.f32 %v5213_v36, %v5170_v41  ;;  %5672 = vmatmul.f32.gmra.mxu0 %v12427_v44  ;;  %5714 = vmatmul.f32.gmra.mxu1 %v12418_v39 }
 0x5fd   :  { %5798 = vmatmul.f32.gmra.mxu3 %v12420_v8 }
 0x5fe   :  { %v12655_v50 = vadd.f32 %v5251_v2, %v5214_v18 }
 0x5ff   :  { %5760 = vmatmul.f32.gmra.mxu2 %v12420_v8 }
 0x600   :  { %v9475_v55 = vrot.slane %v12655_v50, 4  ;;  %v5255_v25 = vpop.f32.mrf.mxu3 }
 0x601   :  { %v5133_v16 = vpop.f32.mrf.mxu0  ;;  %v5175_v59 = vpop.f32.mrf.mxu1 }
 0x602   :  { %v5176_v54 = vadd.f32 %v5175_v59, %v5129_v27  ;;  %9508 = vrot.lane.b32.xlu2 %v9475_v55, %s10148_s25  ;;  %v5217_v31 = vpop.f32.mrf.mxu2  ;;  %v5134_v23 = vadd.f32 %v5133_v16, %v5090_v33 }
 0x604   :  { %v5218_v53 = vadd.f32 %v5217_v31, %v5176_v54  ;;  %5720 = vmatmul.f32.gmra.mxu1 %v12436_v0  ;;  %5824 = vmatmul.f32.vlgmr.msra.gmra.mxu0 %v12374_v10 }
 0x605   :  { %5966 = vmatmul.f32.vlgmr.msra.gmra.mxu3 %v12353_v1  ;;  %6189 = vmatpush.msra.mxu0 %v12587_v7 }
 0x606   :  { %6320 = vmatpush.msra.mxu3 %v12575_v47  ;;  %v5256_v38 = vadd.f32 %v5255_v25, %v5218_v53 }
 0x607   :  { %5922 = vmatmul.f32.vlgmr.msra.gmra.mxu2 %v12349_v63 }
 0x608   :  { %6282 = vmatpush.msra.mxu2 %v6147_v49  ;;  %9588 = vrot.lane.b32.xlu1 %v5256_v38, %s10151_s30  ;;  %v5259_v11 = vpop.f32.mrf.mxu3  ;;  %v9683_v52 = vrot.slane %v5256_v38, 4 }
 0x609   :  { %v5181_v57 = vpop.f32.mrf.mxu1  ;;  %v5285_v26 = vpop.f32.mrf.mxu0 }
 0x60a   :  { %v5182_v56 = vadd.f32 %v5181_v57, %v5134_v23  ;;  %v5221_v17 = vpop.f32.mrf.mxu2 }
 0x60c   :  { %v5222_v60 = vadd.f32 %v5221_v17, %v5182_v56  ;;  %5832 = vmatmul.f32.gmra.mxu0 %v12395_v29  ;;  %5882 = vmatmul.f32.vlgmr.msra.gmra.mxu1 %v12341_v12 }
 0x60d   :  { %5972 = vmatmul.f32.gmra.mxu3 %v12379_v43  ;;  %6232 = vmatpush.msra.mxu1 %v12575_v47  ;;  %v4606_v47 = vmul.f32 %v12346_v58, %v12267_v42 }
 0x60e   :  { %v5260_v15 = vadd.f32 %v5259_v11, %v5222_v60 }
 0x60f   :  { %5927 = vmatmul.f32.gmra.mxu2 %v12371_v14  ;;  %v4627_v2 = vadd.f32 %v12364_v21, %v4606_v47 }
 0x610   :  { %9796 = vrot.lane.b32.xlu2 %v5260_v15, %s10150_s29  ;;  %9716 = vrot.lane.b32.xlu1 %v9683_v52, %s10152_s9  ;;  %v5427_v7 = vpop.f32.mrf.mxu3 }
 0x611   :  { %v5293_v49 = vpop.f32.mrf.mxu0  ;;  %v5343_v22 = vpop.f32.mrf.mxu1  ;;  %v4643_v36 = vmax.f32 %v4627_v2, 0.0 }
 0x612   :  { %v5383_v19 = vpop.f32.mrf.mxu2  ;;  %v5344_v38 = vadd.f32 %v5343_v22, %v5285_v26  ;;  %v4607_v22 = vmul.f32 %v12346_v58, %v12273_v34 }
 0x613   :  { %v4693_v42 = vsel %vm4482_vm10, %v4643_v36, 0 }
 0x614   :  { %5840 = vmatmul.f32.gmra.mxu0 %v12415_v37  ;;  %5886 = vmatmul.f32.gmra.mxu1 %v12355_v32  ;;  %v12696_v25 = vand.u32 4294901760, %v4693_v42  ;;  %v5384_v17 = vadd.f32 %v5383_v19, %v5344_v38 }
 0x615   :  { %5978 = vmatmul.f32.gmra.mxu3 %v12398_v20 }
 0x616   :  { %v12703_v16 = vsub.f32 %v4693_v42, %v12696_v25  ;;  %v5428_v26 = vadd.f32 %v5427_v7, %v5384_v17  ;;  %v4628_v42 = vadd.f32 %v12364_v21, %v4607_v22 }
 0x617   :  { %5932 = vmatmul.f32.gmra.mxu2 %v12391_v3 }
 0x618   :  { %v12684_v4 = vpop.f32.mrf.mxu3  ;;  %v15229_v33 = vand.u32 4294901760, %v12703_v16  ;;  %v4644_v34 = vmax.f32 %v4628_v42, 0.0 }
 0x619   :  { %v5301_v9 = vpop.f32.mrf.mxu0  ;;  %v5347_v35 = vpop.f32.mrf.mxu1 }
 0x61a   :  { %v5388_v41 = vpop.f32.mrf.mxu2  ;;  %v6418_v23 = vsub.f32 %v12703_v16, %v15229_v33  ;;  %v5348_v15 = vadd.f32 %v5347_v35, %v5293_v49  ;;  %v4696_v17 = vsel %vm4482_vm10, %v4644_v34, 0 }
 0x61c   :  { %5848 = vmatmul.f32.gmra.mxu0 %v12433_v62  ;;  %5890 = vmatmul.f32.gmra.mxu1 %v12381_v28  ;;  %v6419_v52 = vand.u32 4294901760, %v6418_v23  ;;  %v5389_v38 = vadd.f32 %v5388_v41, %v5348_v15 }
 0x61d   :  { %5984 = vmatmul.f32.gmra.mxu3 %v12418_v39 }
 0x61e   :  { %v5434_v7 = vadd.f32 %v12684_v4, %v5389_v38  ;;  %v12753_v4 = vand.u32 4294901760, %v4696_v17 }
 0x61f   :  { %5937 = vmatmul.f32.gmra.mxu2 %v12410_v45 }
 0x620   :  { %v12691_v18 = vpop.f32.mrf.mxu3 }
 0x621   :  { %v12694_v30 = vpop.f32.mrf.mxu0  ;;  %v5351_v27 = vpop.f32.mrf.mxu1 }
 0x622   :  { %v5393_v55 = vpop.f32.mrf.mxu2  ;;  %v5352_v49 = vadd.f32 %v5351_v27, %v5301_v9 }
 0x624   :  { %5856 = vmatmul.f32.gmra.mxu0 %v12445_v46  ;;  %5894 = vmatmul.f32.gmra.mxu1 %v12400_v61 }
 0x625   :  { %5990 = vmatmul.f32.gmra.mxu3 %v12436_v0 }
 0x627   :  { %5942 = vmatmul.f32.gmra.mxu2 %v12427_v44 }
 0x628   :  { %v12705_v59 = vpop.f32.mrf.mxu3 }
 0x629   :  { %v12707_v54 = vpop.f32.mrf.mxu0  ;;  %v5355_v31 = vpop.f32.mrf.mxu1 }
 0x62a   :  { %v12709_v53 = vpop.f32.mrf.mxu2  ;;  %v5356_v9 = vadd.f32 %v5355_v31, %v12694_v30 }
 0x62c   :  { %5898 = vmatmul.f32.gmra.mxu1 %v12420_v8  ;;  %6014 = vmatmul.f32.vlgmr.msrb.gmra.mxu0 %v12341_v12  ;;  %v5399_v42 = vadd.f32 %v12709_v53, %v5356_v9 }
 0x62d   :  { %6152 = vmatmul.f32.vlgmr.msrb.gmra.mxu3 %v12341_v12  ;;  %6358 = vmatpush.msrb.mxu0 %v12696_v25 }
 0x62e   :  { %6502 = vmatpush.msrb.mxu3 %v12696_v25  ;;  %v5446_v31 = vadd.f32 %v12705_v59, %v5399_v42 }
 0x62f   :  { %6094 = vmatmul.f32.vlgmr.msrb.gmra.mxu2 %v12374_v10 }
 0x630   :  { %6459 = vmatpush.msrb.mxu2 %v12703_v16  ;;  %v12722_v11 = vpop.f32.mrf.mxu3 }
 0x631   :  { %v12724_v57 = vpop.f32.mrf.mxu1  ;;  %v5475_v56 = vpop.f32.mrf.mxu0 }
 0x632   :  { %v12726_v60 = vpop.f32.mrf.mxu2  ;;  %v5476_v47 = vadd.f32 %v5475_v56, %v5428_v26  ;;  %v5360_v53 = vadd.f32 %v12724_v57, %v12707_v54  ;;  %v15587_v57 = vand.u32 4294901760, %v12703_v16 }
 0x634   :  { %6018 = vmatmul.f32.gmra.mxu0 %v12355_v32  ;;  %6052 = vmatmul.f32.vlgmr.msrb.gmra.mxu1 %v12341_v12 }
 0x635   :  { %6156 = vmatmul.f32.gmra.mxu3 %v12355_v32  ;;  %6420 = vmatpush.msrb.mxu1 %v6419_v52  ;;  %v5394_v52 = vadd.f32 %v5393_v55, %v5352_v49  ;;  %v12762_v55 = vsub.f32 %v4696_v17, %v12753_v4 }
 0x637   :  { %6102 = vmatmul.f32.gmra.mxu2 %v12395_v29  ;;  %v6687_v30 = vand.u32 4294901760, %v12762_v55 }
 0x638   :  { %v12734_v2 = vpop.f32.mrf.mxu3 }
 0x639   :  { %v5479_v19 = vpop.f32.mrf.mxu0  ;;  %v5513_v36 = vpop.f32.mrf.mxu1  ;;  %v6688_v49 = vsub.f32 %v12762_v55, %v6687_v30 }
 0x63a   :  { %v5514_v23 = vadd.f32 %v5513_v36, %v5476_v47  ;;  %v12737_v33 = vpop.f32.mrf.mxu2  ;;  %v5480_v35 = vadd.f32 %v5479_v19, %v5434_v7 }
 0x63b   :  { %v6689_v54 = vand.u32 4294901760, %v6688_v49  ;;  %v5614_v16 = vadd.f32 %v12734_v2, %v12737_v33 }
 0x63c   :  { %v9140_v51 = vrot.slane %v5514_v23, 4  ;;  %6022 = vmatmul.f32.gmra.mxu0 %v12381_v28  ;;  %6056 = vmatmul.f32.gmra.mxu1 %v12355_v32 }
 0x63d   :  { %6160 = vmatmul.f32.gmra.mxu3 %v12381_v28  ;;  %9046 = vrot.lane.b32.xlu1 %v5514_v23, %s10145_s22 }
 0x63e   :  { %9174 = vrot.lane.b32.xlu0 %v9140_v51, %s10146_s23  ;;  %v5440_v51 = vadd.f32 %v12691_v18, %v5394_v52 }
 0x63f   :  { %6110 = vmatmul.f32.gmra.mxu2 %v12415_v37 }
 0x640   :  { %v12749_v22 = vpop.f32.mrf.mxu3 }
 0x641   :  { %v5483_v41 = vpop.f32.mrf.mxu0  ;;  %v5517_v56 = vpop.f32.mrf.mxu1 }
 0x642   :  { %v5518_v26 = vadd.f32 %v5517_v56, %v5480_v35  ;;  %v12747_v15 = vpop.f32.mrf.mxu2  ;;  %v5484_v27 = vadd.f32 %v5483_v41, %v5440_v51  ;;  %v5404_v56 = vadd.f32 %v12726_v60, %v5360_v53 }
 0x644   :  { %v9348_v47 = vrot.slane %v5518_v26, 4  ;;  %6026 = vmatmul.f32.gmra.mxu0 %v12400_v61  ;;  %6060 = vmatmul.f32.gmra.mxu1 %v12381_v28 }
 0x645   :  { %6164 = vmatmul.f32.gmra.mxu3 %v12400_v61  ;;  %9254 = vrot.lane.b32.xlu1 %v5518_v26, %s10147_s24  ;;  %v5452_v26 = vadd.f32 %v12722_v11, %v5404_v56 }
 0x646   :  { %9382 = vrot.lane.b32.xlu0 %v9348_v47, %s10149_s28 }
 0x647   :  { %6118 = vmatmul.f32.gmra.mxu2 %v12433_v62 }
 0x648   :  { %v12769_v34 = vpop.f32.mrf.mxu3 }
 0x649   :  { %v5487_v19 = vpop.f32.mrf.mxu0  ;;  %v5521_v36 = vpop.f32.mrf.mxu1 }
 0x64a   :  { %v12765_v38 = vadd.f32 %v5521_v36, %v5484_v27  ;;  %v12767_v23 = vpop.f32.mrf.mxu2  ;;  %v5488_v7 = vadd.f32 %v5487_v19, %v5446_v31 }
 0x64c   :  { %v9476_v18 = vrot.slane %v12765_v38, 4  ;;  %6030 = vmatmul.f32.gmra.mxu0 %v12420_v8  ;;  %6064 = vmatmul.f32.gmra.mxu1 %v12400_v61 }
 0x64d   :  { %6168 = vmatmul.f32.gmra.mxu3 %v12420_v8 }
 0x64e   :  { %9510 = vrot.lane.b32.xlu0 %v9476_v18, %s10148_s25 }
 0x64f   :  { %6126 = vmatmul.f32.gmra.mxu2 %v12445_v46 }
 0x650   :  { %v12787_v59 = vpop.f32.mrf.mxu3 }
 0x651   :  { %v5491_v35 = vpop.f32.mrf.mxu0  ;;  %v5525_v41 = vpop.f32.mrf.mxu1 }
 0x652   :  { %v5526_v17 = vadd.f32 %v5525_v41, %v5488_v7  ;;  %v12785_v52 = vpop.f32.mrf.mxu2  ;;  %v5492_v60 = vadd.f32 %v5491_v35, %v5452_v26 }
 0x654   :  { %6068 = vmatmul.f32.gmra.mxu1 %v12420_v8  ;;  %6192 = vmatmul.f32.vlgmr.msra.gmra.mxu0 %v12349_v63  ;;  %v9684_v36 = vrot.slane %v5526_v17, 4 }
 0x655   :  { %6322 = vmatmul.f32.vlgmr.msra.gmra.mxu3 %v12341_v12  ;;  %6552 = vmatpush.msra.mxu0 %v15587_v57 }
 0x656   :  { %6690 = vmatpush.msra.mxu3 %v6689_v54  ;;  %9590 = vrot.lane.b32.xlu2 %v5526_v17, %s10151_s30  ;;  %v12818_v17 = vpop.permute.xlu1 %9042 }
 0x657   :  { %6284 = vmatmul.f32.vlgmr.msra.gmra.mxu2 %v12341_v12  ;;  %15588 = vst [vmem:[#allocation57_spill] sm:$0xff] %v12818_v17 }
 0x658   :  { %6628 = vmatpush.msra.mxu2 %v12753_v4  ;;  %v12800_v19 = vpop.f32.mrf.mxu3 }
 0x659   :  { %v5529_v47 = vpop.f32.mrf.mxu1  ;;  %v5653_v51 = vpop.f32.mrf.mxu0 }
 0x65a   :  { %v5530_v9 = vadd.f32 %v5529_v47, %v5492_v60  ;;  %v12798_v27 = vpop.f32.mrf.mxu2  ;;  %v5654_v11 = vadd.f32 %v5653_v51, %v5614_v16 }
 0x65c   :  { %6197 = vmatmul.f32.gmra.mxu0 %v12371_v14  ;;  %6236 = vmatmul.f32.vlgmr.msra.gmra.mxu1 %v12353_v1 }
 0x65d   :  { %6326 = vmatmul.f32.gmra.mxu3 %v12355_v32  ;;  %6590 = vmatpush.msra.mxu1 %v12696_v25  ;;  %v5618_v25 = vadd.f32 %v12749_v22, %v12747_v15  ;;  %v5622_v15 = vadd.f32 %v12769_v34, %v12767_v23  ;;  %v5626_v34 = vadd.f32 %v12787_v59, %v12785_v52 }
 0x65e   :  { %9718 = vrot.lane.b32.xlu2 %v9684_v36, %s10152_s9  ;;  %9798 = vrot.lane.b32.xlu0 %v5530_v9, %s10150_s29  ;;  %v12831_v23 = vpop.permute.xlu1 %9170  ;;  %v5630_v59 = vadd.f32 %v12800_v19, %v12798_v27 }
 0x65f   :  { %6288 = vmatmul.f32.gmra.mxu2 %v12355_v32  ;;  %15589 = vst [vmem:[#allocation60_spill] sm:$0xff] %v12831_v23 }
 0x660   :  { %v5783_v7 = vpop.f32.mrf.mxu3 }
 0x661   :  { %v5658_v42 = vpop.f32.mrf.mxu0  ;;  %v5697_v18 = vpop.f32.mrf.mxu1 }
 0x662   :  { %v5698_v31 = vadd.f32 %v5697_v18, %v5654_v11  ;;  %v5745_v53 = vpop.f32.mrf.mxu2  ;;  %v5659_v2 = vadd.f32 %v5658_v42, %v5618_v25 }
 0x664   :  { %v5746_v49 = vadd.f32 %v5745_v53, %v5698_v31  ;;  %6202 = vmatmul.f32.gmra.mxu0 %v12391_v3  ;;  %6242 = vmatmul.f32.gmra.mxu1 %v12379_v43 }
 0x665   :  { %6330 = vmatmul.f32.gmra.mxu3 %v12381_v28 }
 0x666   :  { %v5784_v33 = vadd.f32 %v5783_v7, %v5746_v49  ;;  %v12843_v52 = vpop.permute.xlu1 %9506 }
 0x667   :  { %6292 = vmatmul.f32.gmra.mxu2 %v12381_v28  ;;  %15591 = vst [vmem:[#allocation66_spill] sm:$0xff] %v12843_v52 }
 0x668   :  { %v9141_v35 = vrot.slane %v5784_v33, 4  ;;  %9048 = vrot.lane.b32.xlu2 %v5784_v33, %s10145_s22  ;;  %v5787_v26 = vpop.f32.mrf.mxu3 }
 0x669   :  { %v5663_v41 = vpop.f32.mrf.mxu0  ;;  %v5703_v56 = vpop.f32.mrf.mxu1 }
 0x66a   :  { %v5704_v54 = vadd.f32 %v5703_v56, %v5659_v2  ;;  %9176 = vrot.lane.b32.xlu1 %v9141_v35, %s10146_s23  ;;  %v5749_v57 = vpop.f32.mrf.mxu2  ;;  %v5664_v47 = vadd.f32 %v5663_v41, %v5622_v15 }
 0x66c   :  { %v5750_v60 = vadd.f32 %v5749_v57, %v5704_v54  ;;  %6207 = vmatmul.f32.gmra.mxu0 %v12410_v45  ;;  %6248 = vmatmul.f32.gmra.mxu1 %v12398_v20 }
 0x66d   :  { %6334 = vmatmul.f32.gmra.mxu3 %v12400_v61 }
 0x66e   :  { %v5788_v22 = vadd.f32 %v5787_v26, %v5750_v60 }
 0x66f   :  { %6296 = vmatmul.f32.gmra.mxu2 %v12400_v61 }
 0x670   :  { %v9349_v51 = vrot.slane %v5788_v22, 4  ;;  %9256 = vrot.lane.b32.xlu2 %v5788_v22, %s10147_s24  ;;  %v5791_v42 = vpop.f32.mrf.mxu3 }
 0x671   :  { %v5668_v9 = vpop.f32.mrf.mxu0  ;;  %v5709_v36 = vpop.f32.mrf.mxu1 }
 0x672   :  { %v5710_v16 = vadd.f32 %v5709_v36, %v5664_v47  ;;  %9384 = vrot.lane.b32.xlu1 %v9349_v51, %s10149_s28  ;;  %v5753_v11 = vpop.f32.mrf.mxu2  ;;  %v5669_v53 = vadd.f32 %v5668_v9, %v5626_v34  ;;  %v12859_v47 = vpop.permute.xlu1 %9794 }
 0x673   :  { %15592 = vst [vmem:[#allocation8_spill] sm:$0xff] %v12859_v47 }
 0x674   :  { %v5754_v18 = vadd.f32 %v5753_v11, %v5710_v16  ;;  %6212 = vmatmul.f32.gmra.mxu0 %v12427_v44  ;;  %6254 = vmatmul.f32.gmra.mxu1 %v12418_v39  ;;  %v4608_v11 = vmul.f32 %v12346_v58, %v12279_v40 }
 0x675   :  { %6338 = vmatmul.f32.gmra.mxu3 %v12420_v8 }
 0x676   :  { %v12836_v31 = vadd.f32 %v5791_v42, %v5754_v18  ;;  %v12879_v42 = vpop.permute.xlu2 %9250  ;;  %v4629_v18 = vadd.f32 %v12364_v21, %v4608_v11 }
 0x677   :  { %6300 = vmatmul.f32.gmra.mxu2 %v12420_v8  ;;  %15594 = vst [vmem:[#allocation69_spill] sm:$0xff] %v12879_v42 }
 0x678   :  { %15590 = vst [vmem:[#allocation58_spill] sm:$0xff] %v12836_v31  ;;  %v9477_v7 = vrot.slane %v12836_v31, 4  ;;  %v5795_v35 = vpop.f32.mrf.mxu3 }
 0x679   :  { %v5673_v49 = vpop.f32.mrf.mxu0  ;;  %v5715_v25 = vpop.f32.mrf.mxu1 }
 0x67a   :  { %v5716_v33 = vadd.f32 %v5715_v25, %v5669_v53  ;;  %9512 = vrot.lane.b32.xlu2 %v9477_v7, %s10148_s25  ;;  %v5757_v2 = vpop.f32.mrf.mxu2  ;;  %v5674_v54 = vadd.f32 %v5673_v49, %v5630_v59  ;;  %v12871_v16 = vpop.permute.xlu1 %9044  ;;  %v4645_v25 = vmax.f32 %v4629_v18, 0.0 }
 0x67c   :  { %v5758_v41 = vadd.f32 %v5757_v2, %v5716_v33  ;;  %6260 = vmatmul.f32.gmra.mxu1 %v12436_v0  ;;  %6364 = vmatmul.f32.vlgmr.msrb.gmra.mxu0 %v12374_v10 }
 0x67d   :  { %6506 = vmatmul.f32.vlgmr.msrb.gmra.mxu3 %v12353_v1  ;;  %6729 = vmatpush.msrb.mxu0 %v12762_v55 }
 0x67e   :  { %6860 = vmatpush.msrb.mxu3 %v12753_v4  ;;  %v5796_v56 = vadd.f32 %v5795_v35, %v5758_v41  ;;  %v12896_v2 = vpop.permute.xlu2 %9172  ;;  %v4699_v35 = vsel %vm4482_vm10, %v4645_v25, 0 }
 0x67f   :  { %6462 = vmatmul.f32.vlgmr.msrb.gmra.mxu2 %v12349_v63 }
 0x680   :  { %v9685_v57 = vrot.slane %v5796_v56, 4  ;;  %6822 = vmatpush.msrb.mxu2 %v6687_v30  ;;  %v5799_v27 = vpop.f32.mrf.mxu3 }
 0x681   :  { %v5721_v26 = vpop.f32.mrf.mxu1  ;;  %v12853_v60 = vpop.f32.mrf.mxu0 }
 0x682   :  { %v5722_v15 = vadd.f32 %v5721_v26, %v5674_v54  ;;  %9592 = vrot.lane.b32.xlu2 %v5796_v56, %s10151_s30  ;;  %9720 = vrot.lane.b32.xlu0 %v9685_v57, %s10152_s9  ;;  %v5761_v22 = vpop.f32.mrf.mxu2  ;;  %v12890_v33 = vpop.permute.xlu1 %9380  ;;  %v12907_v57 = vand.u32 4294901760, %v4699_v35 }
 0x684   :  { %v5762_v19 = vadd.f32 %v5761_v22, %v5722_v15  ;;  %6372 = vmatmul.f32.gmra.mxu0 %v12395_v29  ;;  %6422 = vmatmul.f32.vlgmr.msrb.gmra.mxu1 %v12341_v12  ;;  %v12916_v15 = vsub.f32 %v4699_v35, %v12907_v57 }
 0x685   :  { %6512 = vmatmul.f32.gmra.mxu3 %v12379_v43  ;;  %6772 = vmatpush.msrb.mxu1 %v12753_v4  ;;  %v12874_v4 = vpop.permute.xlu0 %9378 }
 0x686   :  { %v5800_v55 = vadd.f32 %v5799_v27, %v5762_v19  ;;  %15593 = vst [vmem:[#allocation65_spill] sm:$0xff] %v12874_v4  ;;  %v12920_v27 = vpop.permute.xlu2 %9508  ;;  %v15240_v25 = vand.u32 4294901760, %v12916_v15 }
 0x687   :  { %6467 = vmatmul.f32.gmra.mxu2 %v12371_v14  ;;  %15598 = vst [vmem:[#allocation64_spill] sm:$0xff] %v12920_v27 }
 0x688   :  { %v12867_v36 = vpop.f32.mrf.mxu3  ;;  %v6958_v47 = vsub.f32 %v12916_v15, %v15240_v25 }
 0x689   :  { %v12864_v30 = vpop.f32.mrf.mxu0  ;;  %v5883_v51 = vpop.f32.mrf.mxu1 }
 0x68a   :  { %9800 = vrot.lane.b32.xlu2 %v5800_v55, %s10150_s29  ;;  %v5923_v9 = vpop.f32.mrf.mxu2  ;;  %v12911_v26 = vpop.permute.xlu1 %9588  ;;  %v5884_v35 = vadd.f32 %v5883_v51, %v12853_v60  ;;  %v6959_v51 = vand.u32 4294901760, %v6958_v47 }
 0x68b   :  { %15596 = vst [vmem:[#allocation67_spill] sm:$0xff] %v12911_v26 }
 0x68c   :  { %6380 = vmatmul.f32.gmra.mxu0 %v12415_v37  ;;  %6426 = vmatmul.f32.gmra.mxu1 %v12355_v32  ;;  %v5924_v6 = vadd.f32 %v5923_v9, %v5884_v35 }
 0x68d   :  { %6518 = vmatmul.f32.gmra.mxu3 %v12398_v20  ;;  %v12893_v40 = vpop.permute.xlu0 %9586 }
 0x68e   :  { %15595 = vst [vmem:[#allocation68_spill] sm:$0xff] %v12893_v40  ;;  %v12943_v40 = vpop.permute.xlu2 %9796  ;;  %v5968_v25 = vadd.f32 %v12867_v36, %v5924_v6 }
 0x68f   :  { %6472 = vmatmul.f32.gmra.mxu2 %v12391_v3  ;;  %15600 = vst [vmem:[#allocation70_spill] sm:$0xff] %v12943_v40 }
 0x690   :  { %v12886_v49 = vpop.f32.mrf.mxu3 }
 0x691   :  { %v12882_v34 = vpop.f32.mrf.mxu0  ;;  %v5887_v53 = vpop.f32.mrf.mxu1 }
 0x692   :  { %v12884_v7 = vpop.f32.mrf.mxu2 }
 0x694   :  { %6388 = vmatmul.f32.gmra.mxu0 %v12433_v62  ;;  %6430 = vmatmul.f32.gmra.mxu1 %v12381_v28 }
 0x695   :  { %6524 = vmatmul.f32.gmra.mxu3 %v12418_v39  ;;  %v12918_v22 = vpop.permute.xlu0 %9714  ;;  %v4609_v39 = vmul.f32 %v12346_v58, %v12285_v48  ;;  %v9088_v48 = vsel %vm3512_vm2, %v12818_v17, %v12871_v16 }
 0x696   :  { %15597 = vst [vmem:[#allocation10_spill] sm:$0xff] %v12918_v22  ;;  %v12937_v22 = vpop.permute.xlu1 %9716 }
 0x697   :  { %6477 = vmatmul.f32.gmra.mxu2 %v12410_v45  ;;  %15599 = vst [vmem:[#allocation73_spill] sm:$0xff] %v12937_v22  ;;  %v4630_v6 = vadd.f32 %v12364_v21, %v4609_v39 }
 0x698   :  { %v12905_v54 = vpop.f32.mrf.mxu3 }
 0x699   :  { %v12899_v41 = vpop.f32.mrf.mxu0  ;;  %v12901_v59 = vpop.f32.mrf.mxu1 }
 0x69a   :  { %v12903_v56 = vpop.f32.mrf.mxu2 }
 0x69c   :  { %6396 = vmatmul.f32.gmra.mxu0 %v12445_v46  ;;  %6434 = vmatmul.f32.gmra.mxu1 %v12400_v61 }
 0x69d   :  { %6530 = vmatmul.f32.gmra.mxu3 %v12436_v0  ;;  %v9253_v52 = vpop.permute.xlu0 %9252 }
 0x69f   :  { %6482 = vmatmul.f32.gmra.mxu2 %v12427_v44 }
 0x6a0   :  { %v12928_v18 = vpop.f32.mrf.mxu3 }
 0x6a1   :  { %v12922_v19 = vpop.f32.mrf.mxu0  ;;  %v12924_v55 = vpop.f32.mrf.mxu1 }
 0x6a2   :  { %v12926_v11 = vpop.f32.mrf.mxu2 }
 0x6a4   :  { %6438 = vmatmul.f32.gmra.mxu1 %v12420_v8  ;;  %6554 = vmatmul.f32.vlgmr.msra.gmra.mxu0 %v12341_v12 }
 0x6a5   :  { %6692 = vmatmul.f32.vlgmr.msra.gmra.mxu3 %v12341_v12  ;;  %6898 = vmatpush.msra.mxu0 %v12907_v57 }
 0x6a6   :  { %7042 = vmatpush.msra.mxu3 %v12907_v57 }
 0x6a7   :  { %6634 = vmatmul.f32.vlgmr.msra.gmra.mxu2 %v12374_v10  ;;  %v5888_v10 = vadd.f32 %v5887_v53, %v12864_v30  ;;  %v15603_v30 = vld [vmem:[#allocation86_spill] sm:$0xff] }
 0x6a8   :  { %6999 = vmatpush.msra.mxu2 %v12916_v15  ;;  %v12950_v0 = vpop.f32.mrf.mxu3  ;;  %v15604_v36 = vperm.slane %v15603_v30, 0 }
 0x6a9   :  { %v12946_v5 = vpop.f32.mrf.mxu1  ;;  %v6015_v13 = vpop.f32.mrf.mxu0  ;;  %v5929_v58 = vadd.f32 %v12884_v7, %v5888_v10  ;;  %v5892_v7 = vadd.f32 %v12901_v59, %v12882_v34 }
 0x6aa   :  { %v12948_v60 = vpop.f32.mrf.mxu2  ;;  %v6016_v47 = vadd.f32 %v6015_v13, %v5968_v25 }
 0x6ac   :  { %6558 = vmatmul.f32.gmra.mxu0 %v12355_v32  ;;  %6592 = vmatmul.f32.vlgmr.msra.gmra.mxu1 %v12341_v12 }
 0x6ad   :  { %6696 = vmatmul.f32.gmra.mxu3 %v12355_v32  ;;  %6960 = vmatpush.msra.mxu1 %v6959_v51 }
 0x6af   :  { %6642 = vmatmul.f32.gmra.mxu2 %v12395_v29  ;;  %v12960_v9 = vpop.permute.xlu1 %9046 }
 0x6b0   :  { %v12962_v35 = vpop.permute.xlu2 %9590  ;;  %v9087_v44 = vsel %vm3512_vm2, %v12871_v16, %v12960_v9  ;;  %v12968_v51 = vpop.permute.xlu0 %9174  ;;  %v15605_v16 = vperm.slane %v15603_v30, 1 }
 0x6b1   :  { %15601 = vst [vmem:[#allocation76_spill] sm:$0xff] %v12962_v35  ;;  %v12979_v13 = vsel %vm4189_vm8, %v12911_v26, %v12962_v35  ;;  %v9092_v53 = vmul.f32 %v9087_v44, %v15604_v36  ;;  %v9215_v25 = vsel %vm3657_vm3, %v12896_v2, %v12968_v51  ;;  %v6019_v39 = vpop.f32.mrf.mxu0  ;;  %v6053_v21 = vpop.f32.mrf.mxu1  ;;  %v15606_v44 = vld [vmem:[#allocation84_spill] sm:$0xff] }
 0x6b2   :  { %15602 = vst [vmem:[#allocation75_spill] sm:$0xff] %v12968_v51  ;;  %v9220_v17 = vmul.f32 %v9215_v25, %v15605_v16  ;;  %v6054_v29 = vadd.f32 %v6053_v21, %v6016_v47  ;;  %v12991_v26 = vpop.f32.mrf.mxu2  ;;  %v12993_v45 = vpop.f32.mrf.mxu3  ;;  %v15607_v36 = vperm.slane %v15606_v44, 0  ;;  %v4646_v51 = vmax.f32 %v4630_v6, 0.0 }
 0x6b3   :  { %v9108_v20 = vadd.f32 %v9092_v53, %v12765_v38  ;;  %v9216_v21 = vsel %vm3657_vm3, %v12831_v23, %v12896_v2  ;;  %v5974_v38 = vadd.f32 %v12886_v49, %v5929_v58  ;;  %v15608_v2 = vperm.slane %v15606_v44, 1 }
 0x6b4   :  { %v9091_v31 = vmul.f32 %v9088_v48, %v15607_v36  ;;  %v9142_v35 = vrot.slane %v6054_v29, 4  ;;  %6562 = vmatmul.f32.gmra.mxu0 %v12381_v28  ;;  %6596 = vmatmul.f32.gmra.mxu1 %v12355_v32  ;;  %v4702_v49 = vsel %vm4482_vm10, %v4646_v51, 0  ;;  %v15610_v51 = vperm.slane %v15606_v44, 2 }
 0x6b5   :  { %v9236_v10 = vadd.f32 %v9220_v17, %v9108_v20  ;;  %6700 = vmatmul.f32.gmra.mxu3 %v12381_v28  ;;  %9050 = vrot.lane.b32.xlu1 %v6054_v29, %s10145_s22  ;;  %v9296_v20 = vsel %vm3786_vm4, %v12879_v42, %v9253_v52  ;;  %v6020_v47 = vadd.f32 %v6019_v39, %v5974_v38  ;;  %v15611_v16 = vperm.slane %v15603_v30, 3  ;;  %v15641_v42 = vld [vmem:[#allocation6_spill] sm:$0xff] }
 0x6b6   :  { %9178 = vrot.lane.b32.xlu2 %v9142_v35, %s10146_s23  ;;  %v9107_v29 = vadd.f32 %v9091_v31, %v12655_v50  ;;  %v9219_v59 = vmul.f32 %v9216_v21, %v15608_v2  ;;  %v15609_v50 = vperm.slane %v15603_v30, 2  ;;  %v9299_v25 = vmul.f32 %v9296_v20, %v15610_v51 }
 0x6b7   :  { %6650 = vmatmul.f32.gmra.mxu2 %v12415_v37  ;;  %v13013_v17 = vpop.permute.xlu1 %9254  ;;  %v5934_v39 = vadd.f32 %v12903_v56, %v5892_v7  ;;  %v9424_v38 = vsel %vm3915_vm6, %v12874_v4, %v12890_v33  ;;  %v13051_v56 = vand.u32 4294901760, %v4702_v49 }
 0x6b8   :  { %v13016_v6 = vpop.permute.xlu2 %9718  ;;  %v9295_v58 = vsel %vm3786_vm4, %v9253_v52, %v13013_v17  ;;  %v13021_v34 = vpop.permute.xlu0 %9382 }
 0x6b9   :  { %v9759_v35 = vsel %vm4318_vm9, %v12937_v22, %v13016_v6  ;;  %v9300_v31 = vmul.f32 %v9295_v58, %v15609_v50  ;;  %v9423_v52 = vsel %vm3915_vm6, %v12890_v33, %v13021_v34  ;;  %v6023_v48 = vpop.f32.mrf.mxu0  ;;  %v6057_v53 = vpop.f32.mrf.mxu1  ;;  %v9235_v22 = vadd.f32 %v9219_v59, %v9107_v29 }
 0x6ba   :  { %v9428_v36 = vmul.f32 %v9423_v52, %v15611_v16  ;;  %v6058_v21 = vadd.f32 %v6057_v53, %v6020_v47  ;;  %v13045_v2 = vpop.f32.mrf.mxu2  ;;  %v13047_v50 = vpop.f32.mrf.mxu3  ;;  %v15612_v33 = vperm.slane %v15606_v44, 3  ;;  %v5980_v47 = vadd.f32 %v12905_v54, %v5934_v39 }
 0x6bb   :  { %v9316_v58 = vadd.f32 %v9300_v31, %v9236_v10  ;;  %v9315_v20 = vadd.f32 %v9299_v25, %v9235_v22  ;;  %v5896_v29 = vadd.f32 %v12924_v55, %v12899_v41  ;;  %v13066_v52 = vsub.f32 %v4702_v49, %v13051_v56 }
 0x6bc   :  { %6566 = vmatmul.f32.gmra.mxu0 %v12400_v61  ;;  %6600 = vmatmul.f32.gmra.mxu1 %v12381_v28  ;;  %v9427_v10 = vmul.f32 %v9424_v38, %v15612_v33  ;;  %v6024_v59 = vadd.f32 %v6023_v48, %v5980_v47  ;;  %v15613_v41 = vperm.slane %v15606_v44, 5  ;;  %v9350_v16 = vrot.slane %v6058_v21, 4 }
 0x6bd   :  { %v13053_v7 = vadd.f32 %v9428_v36, %v9316_v58  ;;  %6704 = vmatmul.f32.gmra.mxu3 %v12400_v61  ;;  %9258 = vrot.lane.b32.xlu0 %v6058_v21, %s10147_s24  ;;  %v5939_v54 = vadd.f32 %v12926_v11, %v5896_v29  ;;  %v15614_v38 = vperm.slane %v15606_v44, 6  ;;  %v15263_v11 = vand.u32 4294901760, %v13066_v52 }
 0x6be   :  { %v9443_v25 = vadd.f32 %v9427_v10, %v9315_v20  ;;  %v15615_v10 = vperm.slane %v15606_v44, 7 }
 0x6bf   :  { %6658 = vmatmul.f32.gmra.mxu2 %v12433_v62  ;;  %v9635_v58 = vmul.f32 %v12979_v13, %v15614_v38  ;;  %v5986_v21 = vadd.f32 %v12928_v18, %v5939_v54 }
 0x6c0   :  { %v13063_v31 = vpop.permute.xlu0 %9510  ;;  %v9763_v47 = vmul.f32 %v9759_v35, %v15615_v10 }
 0x6c1   :  { %v9551_v22 = vsel %vm4060_vm5, %v12920_v27, %v13063_v31  ;;  %v6027_v53 = vpop.f32.mrf.mxu0  ;;  %v6061_v51 = vpop.f32.mrf.mxu1 }
 0x6c2   :  { %v9555_v55 = vmul.f32 %v9551_v22, %v15613_v41  ;;  %v13075_v39 = vadd.f32 %v6061_v51, %v6024_v59  ;;  %v13077_v48 = vpop.permute.xlu2 %9048  ;;  %v13079_v49 = vpop.f32.mrf.mxu2  ;;  %v6028_v13 = vadd.f32 %v6027_v53, %v5986_v21  ;;  %v7228_v59 = vsub.f32 %v13066_v52, %v15263_v11  ;;  %v15627_v11 = vld [vmem:[#allocation54_spill] sm:$0xff] }
 0x6c3   :  { %v13081_v36 = vpop.f32.mrf.mxu3  ;;  %v5900_v51 = vadd.f32 %v12946_v5, %v12922_v19  ;;  %v15616_v5 = vand.u32 4294901760, %v12916_v15 }
 0x6c4   :  { %v9571_v33 = vadd.f32 %v9555_v55, %v9443_v25  ;;  %v9478_v20 = vrot.slane %v13075_v39, 4  ;;  %6570 = vmatmul.f32.gmra.mxu0 %v12420_v8  ;;  %6604 = vmatmul.f32.gmra.mxu1 %v12400_v61  ;;  %v7229_v53 = vand.u32 4294901760, %v7228_v59 }
 0x6c5   :  { %6708 = vmatmul.f32.gmra.mxu3 %v12420_v8  ;;  %9386 = vrot.lane.b32.xlu0 %v9350_v16, %s10149_s28  ;;  %v5944_v16 = vadd.f32 %v12948_v60, %v5900_v51  ;;  %v15618_v51 = vperm.slane %v15603_v30, 5 }
 0x6c6   :  { %v9651_v29 = vadd.f32 %v9635_v58, %v9571_v33  ;;  %9514 = vrot.lane.b32.xlu1 %v9478_v20, %s10148_s25  ;;  %v10129_v33 = vld [vmem:[%s15025_s1 + $0x88] ss:$0 sm:$0xff] }
 0x6c7   :  { %6666 = vmatmul.f32.gmra.mxu2 %v12445_v46  ;;  %v5992_v38 = vadd.f32 %v12950_v0, %v5944_v16 }
 0x6c8   :  { %v9779_v22 = vadd.f32 %v9763_v47, %v9651_v29 }
 0x6c9   :  { %v6031_v25 = vpop.f32.mrf.mxu0  ;;  %v6065_v41 = vpop.f32.mrf.mxu1 }
 0x6ca   :  { %v6066_v18 = vadd.f32 %v6065_v41, %v6028_v13  ;;  %v13102_v54 = vpop.f32.mrf.mxu2  ;;  %v13106_v55 = vpop.permute.xlu2 %9256  ;;  %v6032_v21 = vadd.f32 %v6031_v25, %v5992_v38  ;;  %v9086_v41 = vsel %vm3512_vm2, %v12960_v9, %v13077_v48 }
 0x6cb   :  { %v13104_v44 = vpop.f32.mrf.mxu3 }
 0x6cc   :  { %v9686_v35 = vrot.slane %v6066_v18, 4  ;;  %6608 = vmatmul.f32.gmra.mxu1 %v12420_v8  ;;  %6732 = vmatmul.f32.vlgmr.msrb.gmra.mxu0 %v12349_v63 }
 0x6cd   :  { %6862 = vmatmul.f32.vlgmr.msrb.gmra.mxu3 %v12341_v12  ;;  %7092 = vmatpush.msrb.mxu0 %v15616_v5 }
 0x6ce   :  { %7230 = vmatpush.msrb.mxu3 %v7229_v53  ;;  %9594 = vrot.lane.b32.xlu2 %v6066_v18, %s10151_s30  ;;  %v15619_v53 = vld [vmem:[#allocation15_spill] sm:$0xff] }
 0x6cf   :  { %6824 = vmatmul.f32.vlgmr.msrb.gmra.mxu2 %v12341_v12  ;;  %9722 = vrot.lane.b32.xlu1 %v9686_v35, %s10152_s9  ;;  %v15620_v16 = vperm.slane %v15619_v53, 0 }
 0x6d0   :  { %7168 = vmatpush.msrb.mxu2 %v13051_v56  ;;  %v13118_v19 = vpop.permute.xlu0 %9798 }
 0x6d1   :  { %v9839_v60 = vsel %vm4415_vm7, %v12943_v40, %v13118_v19  ;;  %v6069_v15 = vpop.f32.mrf.mxu1  ;;  %v6193_v58 = vpop.f32.mrf.mxu0 }
 0x6d2   :  { %v9843_v20 = vmul.f32 %v10129_v33, %v9839_v60  ;;  %v13128_v10 = vpop.f32.mrf.mxu2  ;;  %v6070_v13 = vadd.f32 %v6069_v15, %v6032_v21  ;;  %v15621_v33 = vld [vmem:[#allocation76_spill] sm:$0xff]  ;;  %v15622_v21 = vld [vmem:[#allocation75_spill] sm:$0xff] }
 0x6d3   :  { %v13130_v47 = vpop.f32.mrf.mxu3 }
 0x6d4   :  { %v13132_v29 = vadd.f32 %v9843_v20, %v9779_v22  ;;  %6737 = vmatmul.f32.gmra.mxu0 %v12371_v14  ;;  %6776 = vmatmul.f32.vlgmr.msrb.gmra.mxu1 %v12353_v1  ;;  %v13136_v0 = vpop.permute.xlu2 %9512  ;;  %v6154_v22 = vadd.f32 %v12993_v45, %v12991_v26  ;;  %v9093_v45 = vmul.f32 %v9086_v41, %v15620_v16  ;;  %v15626_v41 = vperm.slane %v15619_v53, 2 }
 0x6d5   :  { %6866 = vmatmul.f32.gmra.mxu3 %v12355_v32  ;;  %7130 = vmatpush.msrb.mxu1 %v12907_v57  ;;  %v9550_v59 = vsel %vm4060_vm5, %v13063_v31, %v13136_v0 }
 0x6d6   :  { %15617 = vst [vmem:[#allocation74_spill] sm:$0xff] %v13132_v29  ;;  %v9556_v25 = vmul.f32 %v9550_v59, %v15618_v51  ;;  %v6194_v57 = vadd.f32 %v6193_v58, %v6154_v22  ;;  %v9294_v58 = vsel %vm3786_vm4, %v13013_v17, %v13106_v55  ;;  %v15623_v59 = vld [vmem:[#allocation58_spill] sm:$0xff]  ;;  %v15625_v51 = vperm.slane %v15619_v53, 1 }
 0x6d7   :  { %6828 = vmatmul.f32.gmra.mxu2 %v12355_v32  ;;  %9802 = vrot.lane.b32.xlu1 %v6070_v13, %s10150_s29  ;;  %v9109_v22 = vadd.f32 %v9093_v45, %v15623_v59 }
 0x6d8   :  { %v9572_v18 = vadd.f32 %v9556_v25, %v13053_v7  ;;  %v6158_v7 = vadd.f32 %v13047_v50, %v13045_v2  ;;  %v15624_v2 = vperm.slane %v15603_v30, 6 }
 0x6d9   :  { %v6198_v35 = vpop.f32.mrf.mxu0  ;;  %v6237_v31 = vpop.f32.mrf.mxu1 }
 0x6da   :  { %v6238_v26 = vadd.f32 %v6237_v31, %v6194_v57  ;;  %v6285_v5 = vpop.f32.mrf.mxu2  ;;  %v9301_v57 = vmul.f32 %v9294_v58, %v15626_v41  ;;  %v6199_v31 = vadd.f32 %v6198_v35, %v6158_v7  ;;  %v6162_v35 = vadd.f32 %v13081_v36, %v13079_v49  ;;  %v15630_v36 = vld [vmem:[#allocation7_spill] sm:$0xff] }
 0x6db   :  { %v6323_v38 = vpop.f32.mrf.mxu3  ;;  %v15629_v58 = vperm.slane %v15619_v53, 3 }
 0x6dc   :  { %v6286_v60 = vadd.f32 %v6285_v5, %v6238_v26  ;;  %6742 = vmatmul.f32.gmra.mxu0 %v12391_v3  ;;  %6782 = vmatmul.f32.gmra.mxu1 %v12379_v43  ;;  %v13159_v9 = vpop.permute.xlu2 %9592  ;;  %v13161_v15 = vpop.permute.xlu1 %9176 }
 0x6dd   :  { %6870 = vmatmul.f32.gmra.mxu3 %v12381_v28  ;;  %v9630_v20 = vsel %vm4189_vm8, %v15621_v33, %v13159_v9  ;;  %v9214_v13 = vsel %vm3657_vm3, %v15622_v21, %v13161_v15 }
 0x6de   :  { %v9636_v50 = vmul.f32 %v9630_v20, %v15624_v2  ;;  %v9221_v17 = vmul.f32 %v9214_v13, %v15625_v51  ;;  %v6324_v25 = vadd.f32 %v6323_v38, %v6286_v60  ;;  %v15628_v38 = vld [vmem:[#allocation55_spill] sm:$0xff] }
 0x6df   :  { %6832 = vmatmul.f32.gmra.mxu2 %v12381_v28 }
 0x6e0   :  { %v9652_v16 = vadd.f32 %v9636_v50, %v9572_v18  ;;  %v9237_v26 = vadd.f32 %v9221_v17, %v9109_v22  ;;  %9052 = vrot.lane.b32.xlu0 %v6324_v25, %s10145_s22  ;;  %v9143_v7 = vrot.slane %v6324_v25, 4  ;;  %v15631_v25 = vld [vmem:[#allocation63_spill] sm:$0xff] }
 0x6e1   :  { %v6203_v5 = vpop.f32.mrf.mxu0  ;;  %v6243_v33 = vpop.f32.mrf.mxu1 }
 0x6e2   :  { %v6244_v45 = vadd.f32 %v6243_v33, %v6199_v31  ;;  %v9317_v21 = vadd.f32 %v9301_v57, %v9237_v26  ;;  %v6289_v59 = vpop.f32.mrf.mxu2  ;;  %v6204_v50 = vadd.f32 %v6203_v5, %v6162_v35  ;;  %v6166_v26 = vadd.f32 %v13104_v44, %v13102_v54  ;;  %v15632_v44 = vld [vmem:[#allocation62_spill] sm:$0xff] }
 0x6e3   :  { %v6327_v20 = vpop.f32.mrf.mxu3 }
 0x6e4   :  { %v6290_v2 = vadd.f32 %v6289_v59, %v6244_v45  ;;  %6747 = vmatmul.f32.gmra.mxu0 %v15627_v11  ;;  %6788 = vmatmul.f32.gmra.mxu1 %v15628_v38  ;;  %v13189_v60 = vpop.permute.xlu1 %9384 }
 0x6e5   :  { %6874 = vmatmul.f32.gmra.mxu3 %v12400_v61  ;;  %v9422_v18 = vsel %vm3915_vm6, %v13021_v34, %v13189_v60 }
 0x6e6   :  { %v9429_v13 = vmul.f32 %v9422_v18, %v15629_v58  ;;  %v6328_v22 = vadd.f32 %v6327_v20, %v6290_v2  ;;  %v13215_v2 = vpop.permute.xlu2 %9800  ;;  %v15633_v58 = vld [vmem:[#allocation52_spill] sm:$0xff] }
 0x6e7   :  { %6836 = vmatmul.f32.gmra.mxu2 %v12400_v61 }
 0x6e8   :  { %v13201_v51 = vadd.f32 %v9429_v13, %v9317_v21  ;;  %9180 = vrot.lane.b32.xlu0 %v9143_v7, %s10146_s23  ;;  %9260 = vrot.lane.b32.xlu1 %v6328_v22, %s10147_s24  ;;  %v9351_v5 = vrot.slane %v6328_v22, 4  ;;  %v9838_v22 = vsel %vm4415_vm7, %v13118_v19, %v13215_v2  ;;  %v10130_v19 = vld [vmem:[%s15025_s1 + $0x90] ss:$0 sm:$0xff] }
 0x6e9   :  { %v6208_v17 = vpop.f32.mrf.mxu0  ;;  %v6249_v41 = vpop.f32.mrf.mxu1 }
 0x6ea   :  { %v6250_v34 = vadd.f32 %v6249_v41, %v6204_v50  ;;  %v6293_v57 = vpop.f32.mrf.mxu2  ;;  %v6209_v45 = vadd.f32 %v6208_v17, %v6166_v26  ;;  %v15634_v17 = vperm.slane %v15603_v30, 7  ;;  %v6170_v30 = vadd.f32 %v13130_v47, %v13128_v10 }
 0x6eb   :  { %v6331_v31 = vpop.f32.mrf.mxu3 }
 0x6ec   :  { %v6294_v49 = vadd.f32 %v6293_v57, %v6250_v34  ;;  %6752 = vmatmul.f32.gmra.mxu0 %v15630_v36  ;;  %6794 = vmatmul.f32.gmra.mxu1 %v15631_v25  ;;  %v9844_v57 = vmul.f32 %v10130_v19, %v9838_v22  ;;  %v15638_v22 = vld [vmem:[#allocation46_spill] sm:$0xff] }
 0x6ed   :  { %6878 = vmatmul.f32.gmra.mxu3 %v12420_v8 }
 0x6ee   :  { %v13210_v33 = vadd.f32 %v6331_v31, %v6294_v49  ;;  %v15635_v49 = vand.u32 4294901760, %v13066_v52 }
 0x6ef   :  { %6840 = vmatmul.f32.gmra.mxu2 %v12420_v8 }
 0x6f0   :  { %v9479_v21 = vrot.slane %v13210_v33, 4  ;;  %9388 = vrot.lane.b32.xlu0 %v9351_v5, %s10149_s28 }
 0x6f1   :  { %v6213_v59 = vpop.f32.mrf.mxu0  ;;  %v6255_v20 = vpop.f32.mrf.mxu1 }
 0x6f2   :  { %v6256_v18 = vadd.f32 %v6255_v20, %v6209_v45  ;;  %9516 = vrot.lane.b32.xlu1 %v9479_v21, %s10148_s25  ;;  %v6297_v35 = vpop.f32.mrf.mxu2  ;;  %v6214_v20 = vadd.f32 %v6213_v59, %v6170_v30 }
 0x6f3   :  { %v6335_v7 = vpop.f32.mrf.mxu3 }
 0x6f4   :  { %v6298_v54 = vadd.f32 %v6297_v35, %v6256_v18  ;;  %6800 = vmatmul.f32.gmra.mxu1 %v15632_v44  ;;  %6904 = vmatmul.f32.vlgmr.msra.gmra.mxu0 %v15633_v58  ;;  %v13220_v13 = vpop.permute.xlu0 %9720  ;;  %v15637_v18 = vld [vmem:[#allocation50_spill] sm:$0xff] }
 0x6f5   :  { %7046 = vmatmul.f32.vlgmr.msra.gmra.mxu3 %v12353_v1  ;;  %7269 = vmatpush.msra.mxu0 %v13066_v52  ;;  %v9758_v50 = vsel %vm4318_vm9, %v13016_v6, %v13220_v13 }
 0x6f6   :  { %7400 = vmatpush.msra.mxu3 %v13051_v56  ;;  %v9764_v41 = vmul.f32 %v9758_v50, %v15634_v17  ;;  %v6336_v34 = vadd.f32 %v6335_v7, %v6298_v54  ;;  %v15640_v17 = vld [vmem:[#allocation59_spill] sm:$0xff] }
 0x6f7   :  { %7002 = vmatmul.f32.vlgmr.msra.gmra.mxu2 %v12349_v63 }
 0x6f8   :  { %v9780_v31 = vadd.f32 %v9764_v41, %v9652_v16  ;;  %7362 = vmatpush.msra.mxu2 %v15635_v49  ;;  %9596 = vrot.lane.b32.xlu0 %v6336_v34, %s10151_s30  ;;  %v9687_v52 = vrot.slane %v6336_v34, 4 }
 0x6f9   :  { %v6261_v6 = vpop.f32.mrf.mxu1  ;;  %v6365_v26 = vpop.f32.mrf.mxu0 }
 0x6fa   :  { %v13244_v5 = vadd.f32 %v9844_v57, %v9780_v31  ;;  %v6301_v45 = vpop.f32.mrf.mxu2  ;;  %v6262_v16 = vadd.f32 %v6261_v6, %v6214_v20 }
 0x6fb   :  { %v6339_v21 = vpop.f32.mrf.mxu3 }
 0x6fc   :  { %15636 = vst [vmem:[#allocation77_spill] sm:$0xff] %v13244_v5  ;;  %6912 = vmatmul.f32.gmra.mxu0 %v15637_v18  ;;  %6962 = vmatmul.f32.vlgmr.msra.gmra.mxu1 %v12341_v12  ;;  %v6302_v35 = vadd.f32 %v6301_v45, %v6262_v16 }
 0x6fd   :  { %7052 = vmatmul.f32.gmra.mxu3 %v12379_v43  ;;  %7312 = vmatpush.msra.mxu1 %v13051_v56  ;;  %v15639_v56 = vld [vmem:[#allocation56_spill] sm:$0xff] }
 0x6fe   :  { %v6340_v59 = vadd.f32 %v6339_v21, %v6302_v35  ;;  %v4610_v50 = vmul.f32 %v15639_v56, %v15638_v22 }
 0x6ff   :  { %7007 = vmatmul.f32.gmra.mxu2 %v12371_v14 }
 0x700   :  { %9724 = vrot.lane.b32.xlu0 %v9687_v52, %s10152_s9  ;;  %v4631_v41 = vadd.f32 %v15640_v17, %v4610_v50 }
 0x701   :  { %v6373_v10 = vpop.f32.mrf.mxu0  ;;  %v6423_v47 = vpop.f32.mrf.mxu1 }
 0x702   :  { %v6463_v7 = vpop.f32.mrf.mxu2  ;;  %v4647_v49 = vmax.f32 %v4631_v41, 0.0 }
 0x703   :  { %v6507_v54 = vpop.f32.mrf.mxu3 }
 0x704   :  { %6920 = vmatmul.f32.gmra.mxu0 %v12415_v37  ;;  %6966 = vmatmul.f32.gmra.mxu1 %v12355_v32  ;;  %v4705_v6 = vsel %vm4482_vm10, %v4647_v49, 0  ;;  %v6424_v49 = vadd.f32 %v6423_v47, %v6365_v26 }
 0x705   :  { %7058 = vmatmul.f32.gmra.mxu3 %v15628_v38  ;;  %v13275_v52 = vand.u32 4294901760, %v4705_v6 }
 0x706   :  { %v6464_v40 = vadd.f32 %v6463_v7, %v6424_v49 }
 0x707   :  { %7012 = vmatmul.f32.gmra.mxu2 %v12391_v3  ;;  %v13282_v16 = vsub.f32 %v4705_v6, %v13275_v52 }
 0x708   :  { %9804 = vrot.lane.b32.xlu0 %v6340_v59, %s10150_s29  ;;  %v6508_v47 = vadd.f32 %v6507_v54, %v6464_v40 }
 0x709   :  { %v13260_v34 = vpop.f32.mrf.mxu0  ;;  %v6427_v19 = vpop.f32.mrf.mxu1  ;;  %v15270_v41 = vand.u32 4294901760, %v13282_v16 }
 0x70a   :  { %v6468_v57 = vpop.f32.mrf.mxu2 }
 0x70b   :  { %v13262_v31 = vpop.f32.mrf.mxu3  ;;  %v7498_v6 = vsub.f32 %v13282_v16, %v15270_v41  ;;  %v6428_v41 = vadd.f32 %v6427_v19, %v6373_v10  ;;  %v15642_v10 = vld [vmem:[#allocation21_spill] sm:$0xff] }
 0x70c   :  { %6928 = vmatmul.f32.gmra.mxu0 %v12433_v62  ;;  %6970 = vmatmul.f32.gmra.mxu1 %v12381_v28  ;;  %v15643_v54 = vperm.slane %v15642_v10, 0 }
 0x70d   :  { %7064 = vmatmul.f32.gmra.mxu3 %v15631_v25  ;;  %v7499_v27 = vand.u32 4294901760, %v7498_v6  ;;  %v15644_v25 = vperm.slane %v15642_v10, 1 }
 0x70f   :  { %7017 = vmatmul.f32.gmra.mxu2 %v15627_v11 }
 0x710   :  { %v13311_v26 = vpop.permute.xlu2 %9178 }
 0x711   :  { %v13269_v30 = vpop.f32.mrf.mxu0  ;;  %v6431_v45 = vpop.f32.mrf.mxu1  ;;  %v9213_v49 = vsel %vm3657_vm3, %v13161_v15, %v13311_v26 }
 0x712   :  { %v13271_v21 = vpop.f32.mrf.mxu2 }
 0x713   :  { %v13273_v20 = vpop.f32.mrf.mxu3 }
 0x714   :  { %6936 = vmatmul.f32.gmra.mxu0 %v12445_v46  ;;  %6974 = vmatmul.f32.gmra.mxu1 %v12400_v61 }
 0x715   :  { %7070 = vmatmul.f32.gmra.mxu3 %v15632_v44 }
 0x717   :  { %7022 = vmatmul.f32.gmra.mxu2 %v15630_v36  ;;  %v9222_v36 = vmul.f32 %v9213_v49, %v15644_v25  ;;  %v6432_v25 = vadd.f32 %v6431_v45, %v13260_v34 }
 0x719   :  { %v13284_v35 = vpop.f32.mrf.mxu0  ;;  %v13286_v59 = vpop.f32.mrf.mxu1 }
 0x71a   :  { %v13288_v22 = vpop.f32.mrf.mxu2 }
 0x71b   :  { %v13290_v50 = vpop.f32.mrf.mxu3 }
 0x71c   :  { %6978 = vmatmul.f32.gmra.mxu1 %v12420_v8  ;;  %7094 = vmatmul.f32.vlgmr.msrb.gmra.mxu0 %v12341_v12 }
 0x71d   :  { %7232 = vmatmul.f32.vlgmr.msrb.gmra.mxu3 %v12341_v12  ;;  %7438 = vmatpush.msrb.mxu0 %v13275_v52 }
 0x71e   :  { %7582 = vmatpush.msrb.mxu3 %v13275_v52 }
 0x71f   :  { %7174 = vmatmul.f32.vlgmr.msrb.gmra.mxu2 %v15633_v58  ;;  %v4611_v58 = vmul.f32 %v15639_v56, %v15641_v42 }
 0x720   :  { %7539 = vmatpush.msrb.mxu2 %v13282_v16 }
 0x721   :  { %v13303_v5 = vpop.f32.mrf.mxu1  ;;  %v6555_v29 = vpop.f32.mrf.mxu0  ;;  %v4632_v40 = vadd.f32 %v15640_v17, %v4611_v58 }
 0x722   :  { %v13305_v4 = vpop.f32.mrf.mxu2  ;;  %v6556_v6 = vadd.f32 %v6555_v29, %v6508_v47 }
 0x723   :  { %v13307_v23 = vpop.f32.mrf.mxu3 }
 0x724   :  { %7098 = vmatmul.f32.gmra.mxu0 %v12355_v32  ;;  %7132 = vmatmul.f32.vlgmr.msrb.gmra.mxu1 %v12341_v12 }
 0x725   :  { %7236 = vmatmul.f32.gmra.mxu3 %v12355_v32  ;;  %7500 = vmatpush.msrb.mxu1 %v7499_v27 }
 0x727   :  { %7182 = vmatmul.f32.gmra.mxu2 %v15637_v18  ;;  %v13317_v7 = vpop.permute.xlu1 %9050  ;;  %v6469_v18 = vadd.f32 %v6468_v57, %v6428_v41 }
 0x728   :  { %v9085_v27 = vsel %vm3512_vm2, %v13077_v48, %v13317_v7  ;;  %v4648_v48 = vmax.f32 %v4632_v40, 0.0 }
 0x729   :  { %v9094_v42 = vmul.f32 %v9085_v27, %v15643_v54  ;;  %v6559_v19 = vpop.f32.mrf.mxu0  ;;  %v6593_v56 = vpop.f32.mrf.mxu1 }
 0x72a   :  { %v6594_v44 = vadd.f32 %v6593_v56, %v6556_v6  ;;  %v13333_v29 = vpop.f32.mrf.mxu2  ;;  %v6514_v56 = vadd.f32 %v13262_v31, %v6469_v18  ;;  %v4708_v49 = vsel %vm4482_vm10, %v4648_v48, 0  ;;  %v15645_v6 = vperm.slane %v15642_v10, 2 }
 0x72b   :  { %v9110_v15 = vadd.f32 %v9094_v42, %v13075_v39  ;;  %v13335_v47 = vpop.f32.mrf.mxu3  ;;  %v6474_v18 = vadd.f32 %v13271_v21, %v6432_v25  ;;  %v13358_v42 = vand.u32 4294901760, %v4708_v49 }
 0x72c   :  { %7102 = vmatmul.f32.gmra.mxu0 %v12381_v28  ;;  %7136 = vmatmul.f32.gmra.mxu1 %v12355_v32  ;;  %v6560_v57 = vadd.f32 %v6559_v19, %v6514_v56  ;;  %v9144_v19 = vrot.slane %v6594_v44, 4 }
 0x72d   :  { %7240 = vmatmul.f32.gmra.mxu3 %v12381_v28  ;;  %9054 = vrot.lane.b32.xlu1 %v6594_v44, %s10145_s22  ;;  %v9238_v58 = vadd.f32 %v9222_v36, %v9110_v15  ;;  %v13370_v15 = vsub.f32 %v4708_v49, %v13358_v42  ;;  %v6436_v44 = vadd.f32 %v13286_v59, %v13269_v30  ;;  %v15647_v30 = vperm.slane %v15619_v53, 5 }
 0x72f   :  { %7190 = vmatmul.f32.gmra.mxu2 %v12415_v37  ;;  %v13344_v39 = vpop.permute.xlu0 %9258 }
 0x730   :  { %v9293_v41 = vsel %vm3786_vm4, %v13106_v55, %v13344_v39  ;;  %v6520_v55 = vadd.f32 %v13273_v20, %v6474_v18  ;;  %v15646_v20 = vperm.slane %v15642_v10, 3  ;;  %v7767_v18 = vand.u32 4294901760, %v13370_v15 }
 0x731   :  { %v9302_v27 = vmul.f32 %v9293_v41, %v15645_v6  ;;  %v6563_v36 = vpop.f32.mrf.mxu0  ;;  %v6597_v40 = vpop.f32.mrf.mxu1 }
 0x732   :  { %v6598_v34 = vadd.f32 %v6597_v40, %v6560_v57  ;;  %v13354_v45 = vpop.f32.mrf.mxu2  ;;  %v6564_v48 = vadd.f32 %v6563_v36, %v6520_v55  ;;  %v13386_v6 = vpop.permute.xlu2 %9594 }
 0x733   :  { %v9318_v31 = vadd.f32 %v9302_v27, %v9238_v58  ;;  %v13356_v54 = vpop.f32.mrf.mxu3 }
 0x734   :  { %7106 = vmatmul.f32.gmra.mxu0 %v12400_v61  ;;  %7140 = vmatmul.f32.gmra.mxu1 %v12381_v28 }
 0x735   :  { %7244 = vmatmul.f32.gmra.mxu3 %v12400_v61  ;;  %9262 = vrot.lane.b32.xlu2 %v6598_v34, %s10147_s24 }
 0x736   :  { %9182 = vrot.lane.b32.xlu1 %v9144_v19, %s10146_s23  ;;  %v6479_v19 = vadd.f32 %v13288_v22, %v6436_v44  ;;  %v7768_v22 = vsub.f32 %v13370_v15, %v7767_v18 }
 0x737   :  { %7198 = vmatmul.f32.gmra.mxu2 %v12433_v62  ;;  %v13367_v21 = vpop.permute.xlu0 %9386 }
 0x738   :  { %v9421_v58 = vsel %vm3915_vm6, %v13189_v60, %v13367_v21  ;;  %v13378_v56 = vpop.permute.xlu1 %9514 }
 0x739   :  { %v9430_v25 = vmul.f32 %v9421_v58, %v15646_v20  ;;  %v9549_v57 = vsel %vm4060_vm5, %v13136_v0, %v13378_v56  ;;  %v6567_v41 = vpop.f32.mrf.mxu0  ;;  %v6601_v49 = vpop.f32.mrf.mxu1  ;;  %v9352_v0 = vrot.slane %v6598_v34, 4  ;;  %v15648_v34 = vperm.slane %v15619_v53, 6 }
 0x73a   :  { %v9557_v59 = vmul.f32 %v9549_v57, %v15647_v30  ;;  %v13390_v27 = vadd.f32 %v6601_v49, %v6564_v48  ;;  %v13394_v36 = vpop.f32.mrf.mxu2 }
 0x73b   :  { %v13392_v60 = vadd.f32 %v9430_v25, %v9318_v31  ;;  %v13396_v40 = vpop.f32.mrf.mxu3  ;;  %v9629_v31 = vsel %vm4189_vm8, %v13159_v9, %v13386_v6 }
 0x73c   :  { %v9573_v55 = vadd.f32 %v9557_v59, %v13201_v51  ;;  %v9480_v58 = vrot.slane %v13390_v27, 4  ;;  %7110 = vmatmul.f32.gmra.mxu0 %v12420_v8  ;;  %7144 = vmatmul.f32.gmra.mxu1 %v12400_v61  ;;  %v6526_v51 = vadd.f32 %v13290_v50, %v6479_v19  ;;  %v9637_v44 = vmul.f32 %v9629_v31, %v15648_v34 }
 0x73d   :  { %7248 = vmatmul.f32.gmra.mxu3 %v12420_v8  ;;  %v15649_v50 = vperm.slane %v15619_v53, 7  ;;  %v6440_v53 = vadd.f32 %v13303_v5, %v13284_v35 }
 0x73e   :  { %9390 = vrot.lane.b32.xlu1 %v9352_v0, %s10149_s28  ;;  %9518 = vrot.lane.b32.xlu2 %v9480_v58, %s10148_s25  ;;  %v6568_v25 = vadd.f32 %v6567_v41, %v6526_v51  ;;  %v9653_v49 = vadd.f32 %v9637_v44, %v9573_v55  ;;  %v7769_v41 = vand.u32 4294901760, %v7768_v22  ;;  %v10131_v22 = vld [vmem:[%s15025_s1 + $0x98] ss:$0 sm:$0xff] }
 0x73f   :  { %7206 = vmatmul.f32.gmra.mxu2 %v12445_v46  ;;  %v6484_v5 = vadd.f32 %v13305_v4, %v6440_v53 }
 0x741   :  { %v13418_v48 = vpop.permute.xlu1 %9722  ;;  %v6571_v20 = vpop.f32.mrf.mxu0  ;;  %v6532_v4 = vadd.f32 %v13307_v23, %v6484_v5 }
 0x742   :  { %v9757_v9 = vsel %vm4318_vm9, %v13220_v13, %v13418_v48  ;;  %v6605_v57 = vpop.f32.mrf.mxu1  ;;  %v13426_v59 = vpop.f32.mrf.mxu2  ;;  %v15650_v13 = vand.u32 4294901760, %v13282_v16 }
 0x743   :  { %v9765_v30 = vmul.f32 %v9757_v9, %v15649_v50  ;;  %v13428_v19 = vpop.f32.mrf.mxu3  ;;  %v6606_v0 = vadd.f32 %v6605_v57, %v6568_v25  ;;  %v6572_v50 = vadd.f32 %v6571_v20, %v6532_v4  ;;  %v15652_v20 = vld [vmem:[#allocation20_spill] sm:$0xff] }
 0x744   :  { %7148 = vmatmul.f32.gmra.mxu1 %v12420_v8  ;;  %7272 = vmatmul.f32.vlgmr.msra.gmra.mxu0 %v12349_v63 }
 0x745   :  { %v9781_v58 = vadd.f32 %v9765_v30, %v9653_v49  ;;  %7402 = vmatmul.f32.vlgmr.msra.gmra.mxu3 %v12341_v12  ;;  %7632 = vmatpush.msra.mxu0 %v15650_v13  ;;  %v9688_v35 = vrot.slane %v6606_v0, 4 }
 0x746   :  { %7770 = vmatpush.msra.mxu3 %v7769_v41  ;;  %9598 = vrot.lane.b32.xlu2 %v6606_v0, %s10151_s30 }
 0x747   :  { %7364 = vmatmul.f32.vlgmr.msra.gmra.mxu2 %v12341_v12 }
 0x748   :  { %7708 = vmatpush.msra.mxu2 %v13358_v42 }
 0x749   :  { %v13440_v55 = vpop.permute.xlu1 %9802  ;;  %v6733_v31 = vpop.f32.mrf.mxu0 }
 0x74a   :  { %v9837_v51 = vsel %vm4415_vm7, %v13215_v2, %v13440_v55  ;;  %v6609_v16 = vpop.f32.mrf.mxu1  ;;  %v13449_v44 = vpop.f32.mrf.mxu2  ;;  %v6694_v2 = vadd.f32 %v13335_v47, %v13333_v29  ;;  %v6698_v29 = vadd.f32 %v13356_v54, %v13354_v45 }
 0x74b   :  { %v9845_v34 = vmul.f32 %v10131_v22, %v9837_v51  ;;  %v13451_v25 = vpop.f32.mrf.mxu3  ;;  %v6610_v53 = vadd.f32 %v6609_v16, %v6572_v50 }
 0x74c   :  { %7277 = vmatmul.f32.gmra.mxu0 %v12371_v14  ;;  %7316 = vmatmul.f32.vlgmr.msra.gmra.mxu1 %v12353_v1  ;;  %v6734_v57 = vadd.f32 %v6733_v31, %v6694_v2  ;;  %v15653_v31 = vperm.slane %v15652_v20, 0 }
 0x74d   :  { %v13456_v9 = vadd.f32 %v9845_v34, %v9781_v58  ;;  %7406 = vmatmul.f32.gmra.mxu3 %v12355_v32  ;;  %7670 = vmatpush.msra.mxu1 %v13275_v52 }
 0x74e   :  { %9726 = vrot.lane.b32.xlu2 %v9688_v35, %s10152_s9 }
 0x74f   :  { %15651 = vst [vmem:[#allocation80_spill] sm:$0xff] %v13456_v9  ;;  %7368 = vmatmul.f32.gmra.mxu2 %v12355_v32 }
 0x751   :  { %v6738_v49 = vpop.f32.mrf.mxu0 }
 0x752   :  { %v6777_v30 = vpop.f32.mrf.mxu1  ;;  %v13465_v0 = vpop.permute.xlu0 %9052  ;;  %v6739_v16 = vadd.f32 %v6738_v49, %v6698_v29 }
 0x753   :  { %v6778_v41 = vadd.f32 %v6777_v30, %v6734_v57  ;;  %v6825_v58 = vpop.f32.mrf.mxu2  ;;  %v6863_v13 = vpop.f32.mrf.mxu3  ;;  %v9084_v52 = vsel %vm3512_vm2, %v13317_v7, %v13465_v0  ;;  %v15654_v57 = vperm.slane %v15652_v20, 1 }
 0x754   :  { %7282 = vmatmul.f32.gmra.mxu0 %v12391_v3  ;;  %7322 = vmatmul.f32.gmra.mxu1 %v12379_v43  ;;  %v9095_v51 = vmul.f32 %v9084_v52, %v15653_v31 }
 0x755   :  { %v6826_v23 = vadd.f32 %v6825_v58, %v6778_v41  ;;  %7410 = vmatmul.f32.gmra.mxu3 %v12381_v28 }
 0x756   :  { %9806 = vrot.lane.b32.xlu2 %v6610_v53, %s10150_s29  ;;  %v9111_v2 = vadd.f32 %v9095_v51, %v13210_v33  ;;  %v15655_v33 = vperm.slane %v15652_v20, 2 }
 0x757   :  { %v6864_v47 = vadd.f32 %v6863_v13, %v6826_v23  ;;  %7372 = vmatmul.f32.gmra.mxu2 %v12381_v28  ;;  %v6702_v13 = vadd.f32 %v13396_v40, %v13394_v36  ;;  %v15656_v36 = vperm.slane %v15652_v20, 3 }
 0x759   :  { %9056 = vrot.lane.b32.xlu1 %v6864_v47, %s10145_s22  ;;  %v6743_v22 = vpop.f32.mrf.mxu0  ;;  %v9145_v4 = vrot.slane %v6864_v47, 4 }
 0x75a   :  { %v6783_v34 = vpop.f32.mrf.mxu1  ;;  %v13481_v7 = vpop.permute.xlu0 %9180  ;;  %v6744_v52 = vadd.f32 %v6743_v22, %v6702_v13 }
 0x75b   :  { %v6784_v5 = vadd.f32 %v6783_v34, %v6739_v16  ;;  %v9212_v35 = vsel %vm3657_vm3, %v13311_v26, %v13481_v7  ;;  %v13487_v45 = vpop.permute.xlu1 %9260  ;;  %v6829_v54 = vpop.f32.mrf.mxu2  ;;  %v15657_v34 = vld [vmem:[#allocation7_spill] sm:$0xff] }
 0x75c   :  { %v9223_v49 = vmul.f32 %v9212_v35, %v15654_v57  ;;  %v9292_v50 = vsel %vm3786_vm4, %v13344_v39, %v13487_v45  ;;  %7287 = vmatmul.f32.gmra.mxu0 %v15627_v11  ;;  %7328 = vmatmul.f32.gmra.mxu1 %v15628_v38  ;;  %v6867_v30 = vpop.f32.mrf.mxu3 }
 0x75d   :  { %v6830_v26 = vadd.f32 %v6829_v54, %v6784_v5  ;;  %7414 = vmatmul.f32.gmra.mxu3 %v12400_v61  ;;  %v9303_v58 = vmul.f32 %v9292_v50, %v15655_v33  ;;  %v15658_v5 = vld [vmem:[#allocation63_spill] sm:$0xff] }
 0x75e   :  { %v9239_v41 = vadd.f32 %v9223_v49, %v9111_v2  ;;  %9184 = vrot.lane.b32.xlu2 %v9145_v4, %s10146_s23  ;;  %v15659_v4 = vperm.slane %v15642_v10, 5  ;;  %v6706_v49 = vadd.f32 %v13428_v19, %v13426_v59 }
 0x75f   :  { %v6868_v53 = vadd.f32 %v6867_v30, %v6830_v26  ;;  %7376 = vmatmul.f32.gmra.mxu2 %v12400_v61 }
 0x760   :  { %v9319_v39 = vadd.f32 %v9303_v58, %v9239_v41 }
 0x761   :  { %9264 = vrot.lane.b32.xlu0 %v6868_v53, %s10147_s24  ;;  %v6748_v23 = vpop.f32.mrf.mxu0  ;;  %v9353_v50 = vrot.slane %v6868_v53, 4 }
 0x762   :  { %v6789_v29 = vpop.f32.mrf.mxu1  ;;  %v13506_v47 = vpop.permute.xlu0 %9388  ;;  %v6749_v41 = vadd.f32 %v6748_v23, %v6706_v49  ;;  %v15662_v23 = vld [vmem:[#allocation52_spill] sm:$0xff] }
 0x763   :  { %v6790_v31 = vadd.f32 %v6789_v29, %v6744_v52  ;;  %v9420_v51 = vsel %vm3915_vm6, %v13367_v21, %v13506_v47  ;;  %v6833_v16 = vpop.f32.mrf.mxu2  ;;  %v15661_v52 = vld [vmem:[#allocation62_spill] sm:$0xff] }
 0x764   :  { %v9431_v40 = vmul.f32 %v9420_v51, %v15656_v36  ;;  %7292 = vmatmul.f32.gmra.mxu0 %v15657_v34  ;;  %7334 = vmatmul.f32.gmra.mxu1 %v15658_v5  ;;  %v13516_v22 = vpop.permute.xlu1 %9516  ;;  %v6871_v35 = vpop.f32.mrf.mxu3 }
 0x765   :  { %v6834_v54 = vadd.f32 %v6833_v16, %v6790_v31  ;;  %7418 = vmatmul.f32.gmra.mxu3 %v12420_v8  ;;  %v9548_v2 = vsel %vm4060_vm5, %v13378_v56, %v13516_v22 }
 0x766   :  { %v13523_v21 = vadd.f32 %v9431_v40, %v9319_v39  ;;  %v9558_v57 = vmul.f32 %v9548_v2, %v15659_v4  ;;  %v15663_v2 = vperm.slane %v15642_v10, 7 }
 0x767   :  { %v13529_v30 = vadd.f32 %v6871_v35, %v6834_v54  ;;  %7380 = vmatmul.f32.gmra.mxu2 %v12420_v8 }
 0x768   :  { %v9574_v26 = vadd.f32 %v9558_v57, %v13392_v60  ;;  %v15660_v60 = vperm.slane %v15642_v10, 6  ;;  %v15664_v57 = vld [vmem:[#allocation50_spill] sm:$0xff] }
 0x769   :  { %v9481_v33 = vrot.slane %v13529_v30, 4  ;;  %9392 = vrot.lane.b32.xlu0 %v9353_v50, %s10149_s28  ;;  %v6753_v56 = vpop.f32.mrf.mxu0 }
 0x76a   :  { %v6795_v58 = vpop.f32.mrf.mxu1  ;;  %v13535_v13 = vpop.permute.xlu0 %9596 }
 0x76b   :  { %v6796_v39 = vadd.f32 %v6795_v58, %v6749_v41  ;;  %v9628_v59 = vsel %vm4189_vm8, %v13386_v6, %v13535_v13  ;;  %9520 = vrot.lane.b32.xlu1 %v9481_v33, %s10148_s25  ;;  %v6837_v19 = vpop.f32.mrf.mxu2 }
 0x76c   :  { %v9638_v53 = vmul.f32 %v9628_v59, %v15660_v60  ;;  %7340 = vmatmul.f32.gmra.mxu1 %v15661_v52  ;;  %7444 = vmatmul.f32.vlgmr.msrb.gmra.mxu0 %v15662_v23  ;;  %v6875_v29 = vpop.f32.mrf.mxu3 }
 0x76d   :  { %v6838_v31 = vadd.f32 %v6837_v19, %v6796_v39  ;;  %7586 = vmatmul.f32.vlgmr.msrb.gmra.mxu3 %v12353_v1  ;;  %7809 = vmatpush.msrb.mxu0 %v13370_v15  ;;  %v15667_v19 = vld [vmem:[#allocation49_spill] sm:$0xff] }
 0x76e   :  { %v9654_v51 = vadd.f32 %v9638_v53, %v9574_v26  ;;  %7940 = vmatpush.msrb.mxu3 %v13358_v42 }
 0x76f   :  { %7542 = vmatmul.f32.vlgmr.msrb.gmra.mxu2 %v12349_v63  ;;  %v6876_v6 = vadd.f32 %v6875_v29, %v6838_v31 }
 0x770   :  { %7902 = vmatpush.msrb.mxu2 %v7767_v18  ;;  %v6710_v18 = vadd.f32 %v13451_v25, %v13449_v44 }
 0x771   :  { %v13552_v16 = vpop.f32.mrf.mxu0  ;;  %v9689_v50 = vrot.slane %v6876_v6, 4 }
 0x772   :  { %v6801_v36 = vpop.f32.mrf.mxu1  ;;  %v13554_v40 = vpop.permute.xlu0 %9724 }
 0x773   :  { %v9756_v35 = vsel %vm4318_vm9, %v13418_v48, %v13554_v40  ;;  %9600 = vrot.lane.b32.xlu1 %v6876_v6, %s10151_s30  ;;  %v6841_v54 = vpop.f32.mrf.mxu2  ;;  %v6754_v48 = vadd.f32 %v6753_v56, %v6710_v18 }
 0x774   :  { %v9766_v4 = vmul.f32 %v9756_v35, %v15663_v2  ;;  %7452 = vmatmul.f32.gmra.mxu0 %v15664_v57  ;;  %7502 = vmatmul.f32.vlgmr.msrb.gmra.mxu1 %v12341_v12  ;;  %v6879_v15 = vpop.f32.mrf.mxu3 }
 0x775   :  { %7592 = vmatmul.f32.gmra.mxu3 %v12379_v43  ;;  %7852 = vmatpush.msrb.mxu1 %v13358_v42  ;;  %v6802_v26 = vadd.f32 %v6801_v36, %v6754_v48  ;;  %v10132_v42 = vld [vmem:[%s15025_s1 + $0xa0] ss:$0 sm:$0xff] }
 0x776   :  { %v9782_v49 = vadd.f32 %v9766_v4, %v9654_v51 }
 0x777   :  { %7547 = vmatmul.f32.gmra.mxu2 %v12371_v14  ;;  %v6842_v39 = vadd.f32 %v6841_v54, %v6802_v26 }
 0x779   :  { %v13570_v10 = vpop.f32.mrf.mxu0  ;;  %v6880_v29 = vadd.f32 %v6879_v15, %v6842_v39 }
 0x77a   :  { %v6963_v41 = vpop.f32.mrf.mxu1  ;;  %v13572_v33 = vpop.permute.xlu0 %9804 }
 0x77b   :  { %15665 = vst [vmem:[#allocation79_spill] sm:$0xff] %v13572_v33  ;;  %v9836_v44 = vsel %vm4415_vm7, %v13440_v55, %v13572_v33  ;;  %9728 = vrot.lane.b32.xlu1 %v9689_v50, %s10152_s9  ;;  %v7003_v25 = vpop.f32.mrf.mxu2  ;;  %v15668_v55 = vld [vmem:[#allocation56_spill] sm:$0xff] }
 0x77c   :  { %v9846_v56 = vmul.f32 %v10132_v42, %v9836_v44  ;;  %7460 = vmatmul.f32.gmra.mxu0 %v12415_v37  ;;  %7506 = vmatmul.f32.gmra.mxu1 %v12355_v32  ;;  %v7047_v58 = vpop.f32.mrf.mxu3  ;;  %v4612_v60 = vmul.f32 %v15668_v55, %v15667_v19  ;;  %v6964_v19 = vadd.f32 %v6963_v41, %v13552_v16 }
 0x77d   :  { %7598 = vmatmul.f32.gmra.mxu3 %v15628_v38 }
 0x77e   :  { %v13585_v59 = vadd.f32 %v9846_v56, %v9782_v49  ;;  %v4633_v53 = vadd.f32 %v15640_v17, %v4612_v60  ;;  %v7004_v41 = vadd.f32 %v7003_v25, %v6964_v19 }
 0x77f   :  { %7552 = vmatmul.f32.gmra.mxu2 %v12391_v3 }
 0x780   :  { %15666 = vst [vmem:[#allocation82_spill] sm:$0xff] %v13585_v59  ;;  %v4649_v35 = vmax.f32 %v4633_v53, 0.0 }
 0x781   :  { %v13591_v31 = vpop.f32.mrf.mxu0 }
 0x782   :  { %v6967_v51 = vpop.f32.mrf.mxu1  ;;  %v4711_v54 = vsel %vm4482_vm10, %v4649_v35, 0 }
 0x783   :  { %9808 = vrot.lane.b32.xlu1 %v6880_v29, %s10150_s29  ;;  %v7008_v6 = vpop.f32.mrf.mxu2  ;;  %v13607_v18 = vand.u32 4294901760, %v4711_v54  ;;  %v6968_v25 = vadd.f32 %v6967_v51, %v13570_v10 }
 0x784   :  { %7468 = vmatmul.f32.gmra.mxu0 %v12433_v62  ;;  %7510 = vmatmul.f32.gmra.mxu1 %v12381_v28  ;;  %v13596_v36 = vpop.f32.mrf.mxu3 }
 0x785   :  { %7604 = vmatmul.f32.gmra.mxu3 %v15658_v5  ;;  %v13616_v48 = vsub.f32 %v4711_v54, %v13607_v18  ;;  %v15670_v54 = vperm.slane %v15652_v20, 5  ;;  %v7009_v10 = vadd.f32 %v7008_v6, %v6968_v25  ;;  %v15674_v6 = vld [vmem:[#allocation25_spill] sm:$0xff] }
 0x786   :  { %v15675_v25 = vperm.slane %v15674_v6, 0 }
 0x787   :  { %7557 = vmatmul.f32.gmra.mxu2 %v15627_v11  ;;  %v15281_v56 = vand.u32 4294901760, %v13616_v48 }
 0x789   :  { %v13601_v2 = vpop.f32.mrf.mxu0  ;;  %v8038_v60 = vsub.f32 %v13616_v48, %v15281_v56 }
 0x78a   :  { %v13603_v4 = vpop.f32.mrf.mxu1 }
 0x78b   :  { %v13605_v15 = vpop.f32.mrf.mxu2  ;;  %v8039_v33 = vand.u32 4294901760, %v8038_v60 }
 0x78c   :  { %7476 = vmatmul.f32.gmra.mxu0 %v12445_v46  ;;  %7514 = vmatmul.f32.gmra.mxu1 %v12400_v61  ;;  %v13611_v49 = vpop.f32.mrf.mxu3 }
 0x78d   :  { %7610 = vmatmul.f32.gmra.mxu3 %v15661_v52 }
 0x78f   :  { %7562 = vmatmul.f32.gmra.mxu2 %v15657_v34  ;;  %v13618_v50 = vpop.permute.xlu2 %9262 }
 0x791   :  { %v13620_v26 = vpop.f32.mrf.mxu0 }
 0x792   :  { %v13622_v44 = vpop.f32.mrf.mxu1 }
 0x793   :  { %v13624_v42 = vpop.f32.mrf.mxu2 }
 0x794   :  { %7518 = vmatmul.f32.gmra.mxu1 %v12420_v8  ;;  %7634 = vmatmul.f32.vlgmr.msra.gmra.mxu0 %v12341_v12  ;;  %v13629_v39 = vpop.f32.mrf.mxu3 }
 0x795   :  { %7772 = vmatmul.f32.vlgmr.msra.gmra.mxu3 %v12341_v12  ;;  %7978 = vmatpush.msra.mxu0 %v13607_v18 }
 0x796   :  { %8122 = vmatpush.msra.mxu3 %v13607_v18 }
 0x797   :  { %7714 = vmatmul.f32.vlgmr.msra.gmra.mxu2 %v15662_v23 }
 0x798   :  { %8079 = vmatpush.msra.mxu2 %v13616_v48  ;;  %v13640_v53 = vpop.permute.xlu2 %9518 }
 0x799   :  { %15669 = vst [vmem:[#allocation16_spill] sm:$0xff] %v13640_v53  ;;  %v9547_v29 = vsel %vm4060_vm5, %v13516_v22, %v13640_v53  ;;  %v7095_v35 = vpop.f32.mrf.mxu0  ;;  %v15671_v22 = vld [vmem:[#allocation53_spill] sm:$0xff] }
 0x79a   :  { %v9559_v59 = vmul.f32 %v9547_v29, %v15670_v54  ;;  %v13648_v16 = vpop.f32.mrf.mxu1  ;;  %v4613_v29 = vmul.f32 %v15668_v55, %v15671_v22  ;;  %v7048_v54 = vadd.f32 %v7047_v58, %v7004_v41  ;;  %v15673_v22 = vperm.slane %v15652_v20, 6 }
 0x79b   :  { %v13650_v9 = vpop.f32.mrf.mxu2 }
 0x79c   :  { %v9575_v56 = vadd.f32 %v9559_v59, %v13523_v21  ;;  %7638 = vmatmul.f32.gmra.mxu0 %v12355_v32  ;;  %7672 = vmatmul.f32.vlgmr.msra.gmra.mxu1 %v12341_v12  ;;  %v13655_v23 = vpop.f32.mrf.mxu3  ;;  %v4634_v59 = vadd.f32 %v15640_v17, %v4613_v29  ;;  %v7096_v60 = vadd.f32 %v7095_v35, %v7048_v54 }
 0x79d   :  { %7776 = vmatmul.f32.gmra.mxu3 %v12355_v32  ;;  %8040 = vmatpush.msra.mxu1 %v8039_v33 }
 0x79e   :  { %v4650_v29 = vmax.f32 %v4634_v59, 0.0 }
 0x79f   :  { %7722 = vmatmul.f32.gmra.mxu2 %v15664_v57  ;;  %v13662_v19 = vpop.permute.xlu1 %9054 }
 0x7a0   :  { %v13664_v21 = vpop.permute.xlu2 %9598  ;;  %v9083_v51 = vsel %vm3512_vm2, %v13465_v0, %v13662_v19  ;;  %v7054_v0 = vadd.f32 %v13596_v36, %v7009_v10  ;;  %v15677_v10 = vperm.slane %v15674_v6, 1 }
 0x7a1   :  { %15672 = vst [vmem:[#allocation27_spill] sm:$0xff] %v13664_v21  ;;  %v9627_v33 = vsel %vm4189_vm8, %v13535_v13, %v13664_v21  ;;  %v7099_v53 = vpop.f32.mrf.mxu0 }
 0x7a2   :  { %v9639_v58 = vmul.f32 %v9627_v33, %v15673_v22  ;;  %v7133_v41 = vpop.f32.mrf.mxu1  ;;  %v9096_v33 = vmul.f32 %v9083_v51, %v15675_v25  ;;  %v4714_v22 = vsel %vm4482_vm10, %v4650_v29, 0  ;;  %v15678_v29 = vperm.slane %v15652_v20, 7 }
 0x7a3   :  { %v7134_v55 = vadd.f32 %v7133_v41, %v7096_v60  ;;  %v13677_v57 = vpop.f32.mrf.mxu2  ;;  %v13725_v20 = vand.u32 4294901760, %v4714_v22 }
 0x7a4   :  { %v9655_v35 = vadd.f32 %v9639_v58, %v9575_v56  ;;  %7642 = vmatmul.f32.gmra.mxu0 %v12381_v28  ;;  %7676 = vmatmul.f32.gmra.mxu1 %v12355_v32  ;;  %v13681_v13 = vpop.f32.mrf.mxu3  ;;  %v6972_v56 = vadd.f32 %v13603_v4, %v13591_v31  ;;  %v7100_v58 = vadd.f32 %v7099_v53, %v7054_v0 }
 0x7a5   :  { %v9146_v54 = vrot.slane %v7134_v55, 4  ;;  %7780 = vmatmul.f32.gmra.mxu3 %v12381_v28  ;;  %9058 = vrot.lane.b32.xlu2 %v7134_v55, %s10145_s22  ;;  %v9291_v55 = vsel %vm3786_vm4, %v13487_v45, %v13618_v50  ;;  %v9112_v41 = vadd.f32 %v9096_v33, %v13390_v27 }
 0x7a7   :  { %7730 = vmatmul.f32.gmra.mxu2 %v12415_v37  ;;  %9186 = vrot.lane.b32.xlu0 %v9146_v54, %s10146_s23  ;;  %v7014_v54 = vadd.f32 %v13605_v15, %v6972_v56 }
 0x7a8   :  { %v13692_v60 = vpop.permute.xlu1 %9182  ;;  %v13694_v59 = vpop.permute.xlu2 %9726 }
 0x7a9   :  { %15676 = vst [vmem:[#allocation37_spill] sm:$0xff] %v13694_v59  ;;  %v9211_v31 = vsel %vm3657_vm3, %v13481_v7, %v13692_v60  ;;  %v9755_v36 = vsel %vm4318_vm9, %v13554_v40, %v13694_v59  ;;  %v7103_v4 = vpop.f32.mrf.mxu0  ;;  %v15679_v7 = vperm.slane %v15674_v6, 2  ;;  %v7060_v56 = vadd.f32 %v13611_v49, %v7014_v54 }
 0x7aa   :  { %v9224_v51 = vmul.f32 %v9211_v31, %v15677_v10  ;;  %v9767_v45 = vmul.f32 %v9755_v36, %v15678_v29  ;;  %v7137_v53 = vpop.f32.mrf.mxu1  ;;  %v15681_v49 = vperm.slane %v15674_v6, 3 }
 0x7ab   :  { %v7138_v25 = vadd.f32 %v7137_v53, %v7100_v58  ;;  %v13715_v0 = vpop.f32.mrf.mxu2  ;;  %v9304_v21 = vmul.f32 %v9291_v55, %v15679_v7  ;;  %v13735_v55 = vsub.f32 %v4714_v22, %v13725_v20  ;;  %v6976_v58 = vadd.f32 %v13622_v44, %v13601_v2 }
 0x7ac   :  { %v9240_v17 = vadd.f32 %v9224_v51, %v9112_v41  ;;  %v13719_v40 = vadd.f32 %v9767_v45, %v9655_v35  ;;  %7646 = vmatmul.f32.gmra.mxu0 %v12400_v61  ;;  %7680 = vmatmul.f32.gmra.mxu1 %v12381_v28  ;;  %v13723_v27 = vpop.f32.mrf.mxu3  ;;  %v7104_v31 = vadd.f32 %v7103_v4, %v7060_v56  ;;  %v15683_v56 = vand.u32 4294901760, %v13616_v48 }
 0x7ad   :  { %v9354_v33 = vrot.slane %v7138_v25, 4  ;;  %7784 = vmatmul.f32.gmra.mxu3 %v12400_v61  ;;  %9266 = vrot.lane.b32.xlu1 %v7138_v25, %s10147_s24  ;;  %v8307_v44 = vand.u32 4294901760, %v13735_v55 }
 0x7ae   :  { %15680 = vst [vmem:[#allocation24_spill] sm:$0xff] %v13719_v40  ;;  %v9320_v15 = vadd.f32 %v9304_v21, %v9240_v17 }
 0x7af   :  { %7738 = vmatmul.f32.gmra.mxu2 %v12433_v62  ;;  %9394 = vrot.lane.b32.xlu2 %v9354_v33, %s10149_s28  ;;  %v8308_v29 = vsub.f32 %v13735_v55, %v8307_v44 }
 0x7b0   :  { %v13732_v35 = vpop.permute.xlu1 %9390 }
 0x7b1   :  { %v9419_v17 = vsel %vm3915_vm6, %v13506_v47, %v13732_v35  ;;  %v7107_v21 = vpop.f32.mrf.mxu0  ;;  %v7019_v47 = vadd.f32 %v13624_v42, %v6976_v58  ;;  %v8309_v42 = vand.u32 4294901760, %v8308_v29  ;;  %v6980_v58 = vadd.f32 %v13648_v16, %v13620_v26 }
 0x7b2   :  { %v9432_v36 = vmul.f32 %v9419_v17, %v15681_v49  ;;  %v7141_v41 = vpop.f32.mrf.mxu1  ;;  %v7234_v26 = vadd.f32 %v13681_v13, %v13677_v57 }
 0x7b3   :  { %v13745_v10 = vadd.f32 %v7141_v41, %v7104_v31  ;;  %v13747_v51 = vpop.f32.mrf.mxu2  ;;  %v7066_v45 = vadd.f32 %v13629_v39, %v7019_v47  ;;  %v13774_v39 = vpop.permute.xlu2 %9806  ;;  %v7024_v49 = vadd.f32 %v13650_v9, %v6980_v58 }
 0x7b4   :  { %v13749_v22 = vadd.f32 %v9432_v36, %v9320_v15  ;;  %7650 = vmatmul.f32.gmra.mxu0 %v12420_v8  ;;  %7684 = vmatmul.f32.gmra.mxu1 %v12400_v61  ;;  %v13753_v2 = vpop.f32.mrf.mxu3  ;;  %15684 = vst [vmem:[#allocation9_spill] sm:$0xff] %v13774_v39 }
 0x7b5   :  { %v9482_v4 = vrot.slane %v13745_v10, 4  ;;  %7788 = vmatmul.f32.gmra.mxu3 %v12420_v8  ;;  %v7108_v25 = vadd.f32 %v7107_v21, %v7066_v45  ;;  %v7072_v16 = vadd.f32 %v13655_v23, %v7024_v49 }
 0x7b6   :  { %15682 = vst [vmem:[#allocation12_spill] sm:$0xff] %v13749_v22 }
 0x7b7   :  { %7746 = vmatmul.f32.gmra.mxu2 %v12445_v46  ;;  %9522 = vrot.lane.b32.xlu0 %v9482_v4, %s10148_s25 }
 0x7b9   :  { %v7111_v53 = vpop.f32.mrf.mxu0 }
 0x7ba   :  { %v7145_v54 = vpop.f32.mrf.mxu1  ;;  %v7112_v9 = vadd.f32 %v7111_v53, %v7072_v16  ;;  %v15685_v53 = vld [vmem:[#allocation31_spill] sm:$0xff] }
 0x7bb   :  { %v13765_v7 = vpop.f32.mrf.mxu2  ;;  %v7146_v15 = vadd.f32 %v7145_v54, %v7108_v25  ;;  %v13795_v41 = vpop.permute.xlu2 %9184  ;;  %v15687_v58 = vperm.slane %v15685_v53, 1 }
 0x7bc   :  { %7688 = vmatmul.f32.gmra.mxu1 %v12420_v8  ;;  %7812 = vmatmul.f32.vlgmr.msrb.gmra.mxu0 %v12349_v63  ;;  %v13769_v33 = vpop.f32.mrf.mxu3  ;;  %v9210_v57 = vsel %vm3657_vm3, %v13692_v60, %v13795_v41  ;;  %v7238_v60 = vadd.f32 %v13723_v27, %v13715_v0 }
 0x7bd   :  { %7942 = vmatmul.f32.vlgmr.msrb.gmra.mxu3 %v12341_v12  ;;  %8172 = vmatpush.msrb.mxu0 %v15683_v56  ;;  %v9690_v36 = vrot.slane %v7146_v15, 4 }
 0x7be   :  { %8310 = vmatpush.msrb.mxu3 %v8309_v42  ;;  %v15686_v42 = vperm.slane %v15685_v53, 0 }
 0x7bf   :  { %7904 = vmatmul.f32.vlgmr.msrb.gmra.mxu2 %v12341_v12  ;;  %9602 = vrot.lane.b32.xlu0 %v7146_v15, %s10151_s30 }
 0x7c0   :  { %8248 = vmatpush.msrb.mxu2 %v13725_v20 }
 0x7c1   :  { %v7273_v31 = vpop.f32.mrf.mxu0 }
 0x7c2   :  { %v7149_v17 = vpop.f32.mrf.mxu1  ;;  %v7274_v47 = vadd.f32 %v7273_v31, %v7234_v26  ;;  %v9225_v31 = vmul.f32 %v9210_v57, %v15687_v58 }
 0x7c3   :  { %v13781_v21 = vpop.f32.mrf.mxu2  ;;  %v7150_v13 = vadd.f32 %v7149_v17, %v7112_v9 }
 0x7c4   :  { %7817 = vmatmul.f32.gmra.mxu0 %v12371_v14  ;;  %7856 = vmatmul.f32.vlgmr.msrb.gmra.mxu1 %v12353_v1  ;;  %v13785_v48 = vpop.f32.mrf.mxu3 }
 0x7c5   :  { %7946 = vmatmul.f32.gmra.mxu3 %v12355_v32  ;;  %8210 = vmatpush.msrb.mxu1 %v13607_v18 }
 0x7c7   :  { %7908 = vmatmul.f32.gmra.mxu2 %v12355_v32  ;;  %9730 = vrot.lane.b32.xlu0 %v9690_v36, %s10152_s9 }
 0x7c9   :  { %v7278_v4 = vpop.f32.mrf.mxu0 }
 0x7ca   :  { %v7317_v29 = vpop.f32.mrf.mxu1  ;;  %v7279_v17 = vadd.f32 %v7278_v4, %v7238_v60 }
 0x7cb   :  { %v7318_v45 = vadd.f32 %v7317_v29, %v7274_v47  ;;  %v13797_v54 = vpop.permute.xlu1 %9056  ;;  %v7365_v25 = vpop.f32.mrf.mxu2 }
 0x7cc   :  { %v9082_v23 = vsel %vm3512_vm2, %v13662_v19, %v13797_v54  ;;  %7822 = vmatmul.f32.gmra.mxu0 %v12391_v3  ;;  %7862 = vmatmul.f32.gmra.mxu1 %v12379_v43  ;;  %v7403_v18 = vpop.f32.mrf.mxu3 }
 0x7cd   :  { %v9097_v15 = vmul.f32 %v9082_v23, %v15686_v42  ;;  %v7366_v56 = vadd.f32 %v7365_v25, %v7318_v45  ;;  %7950 = vmatmul.f32.gmra.mxu3 %v12381_v28  ;;  %v7242_v45 = vadd.f32 %v13753_v2, %v13747_v51  ;;  %v15688_v23 = vperm.slane %v15685_v53, 2 }
 0x7cf   :  { %v9113_v19 = vadd.f32 %v9097_v15, %v13529_v30  ;;  %v7404_v49 = vadd.f32 %v7403_v18, %v7366_v56  ;;  %7912 = vmatmul.f32.gmra.mxu2 %v12381_v28  ;;  %9810 = vrot.lane.b32.xlu0 %v7150_v13, %s10150_s29 }
 0x7d1   :  { %v9147_v36 = vrot.slane %v7404_v49, 4  ;;  %v7283_v26 = vpop.f32.mrf.mxu0  ;;  %v9241_v16 = vadd.f32 %v9225_v31, %v9113_v19  ;;  %v15689_v31 = vperm.slane %v15685_v53, 3 }
 0x7d2   :  { %v7323_v47 = vpop.f32.mrf.mxu1  ;;  %v7284_v57 = vadd.f32 %v7283_v26, %v7242_v45 }
 0x7d3   :  { %v7324_v29 = vadd.f32 %v7323_v47, %v7279_v17  ;;  %v13819_v9 = vpop.permute.xlu0 %9264  ;;  %9188 = vrot.lane.b32.xlu1 %v9147_v36, %s10146_s23  ;;  %v7369_v0 = vpop.f32.mrf.mxu2  ;;  %v7246_v17 = vadd.f32 %v13769_v33, %v13765_v7 }
 0x7d4   :  { %7827 = vmatmul.f32.gmra.mxu0 %v15627_v11  ;;  %7868 = vmatmul.f32.gmra.mxu1 %v15628_v38  ;;  %v7407_v30 = vpop.f32.mrf.mxu3  ;;  %v9290_v4 = vsel %vm3786_vm4, %v13618_v50, %v13819_v9 }
 0x7d5   :  { %v7370_v27 = vadd.f32 %v7369_v0, %v7324_v29  ;;  %7954 = vmatmul.f32.gmra.mxu3 %v12400_v61  ;;  %v9305_v18 = vmul.f32 %v9290_v4, %v15688_v23  ;;  %v15692_v23 = vld [vmem:[#allocation50_spill] sm:$0xff] }
 0x7d7   :  { %v7408_v25 = vadd.f32 %v7407_v30, %v7370_v27  ;;  %7916 = vmatmul.f32.gmra.mxu2 %v12400_v61  ;;  %9060 = vrot.lane.b32.xlu0 %v7404_v49, %s10145_s22  ;;  %v9321_v58 = vadd.f32 %v9305_v18, %v9241_v16  ;;  %v15691_v27 = vld [vmem:[#allocation52_spill] sm:$0xff] }
 0x7d9   :  { %v9355_v13 = vrot.slane %v7408_v25, 4  ;;  %9268 = vrot.lane.b32.xlu2 %v7408_v25, %s10147_s24  ;;  %v7288_v42 = vpop.f32.mrf.mxu0 }
 0x7da   :  { %v7329_v15 = vpop.f32.mrf.mxu1 }
 0x7db   :  { %v7330_v56 = vadd.f32 %v7329_v15, %v7284_v57  ;;  %v13836_v60 = vpop.permute.xlu0 %9392  ;;  %9396 = vrot.lane.b32.xlu1 %v9355_v13, %s10149_s28  ;;  %v7373_v50 = vpop.f32.mrf.mxu2  ;;  %v7250_v13 = vadd.f32 %v13785_v48, %v13781_v21 }
 0x7dc   :  { %v9418_v51 = vsel %vm3915_vm6, %v13732_v35, %v13836_v60  ;;  %7832 = vmatmul.f32.gmra.mxu0 %v15657_v34  ;;  %7874 = vmatmul.f32.gmra.mxu1 %v15658_v5  ;;  %v7411_v2 = vpop.f32.mrf.mxu3  ;;  %v7289_v35 = vadd.f32 %v7288_v42, %v7246_v17 }
 0x7dd   :  { %v9433_v19 = vmul.f32 %v9418_v51, %v15689_v31  ;;  %v7374_v49 = vadd.f32 %v7373_v50, %v7330_v56  ;;  %7958 = vmatmul.f32.gmra.mxu3 %v12420_v8  ;;  %v15694_v51 = vld [vmem:[#allocation56_spill] sm:$0xff] }
 0x7df   :  { %v13850_v36 = vadd.f32 %v9433_v19, %v9321_v58  ;;  %v13852_v26 = vadd.f32 %v7411_v2, %v7374_v49  ;;  %7920 = vmatmul.f32.gmra.mxu2 %v12420_v8  ;;  %v15695_v58 = vld [vmem:[#allocation59_spill] sm:$0xff]  ;;  %v13883_v19 = vpop.permute.xlu1 %9520 }
 0x7e1   :  { %15690 = vst [vmem:[#allocation4_spill] sm:$0xff] %v13852_v26  ;;  %v9483_v47 = vrot.slane %v13852_v26, 4  ;;  %v7293_v29 = vpop.f32.mrf.mxu0 }
 0x7e2   :  { %v7335_v16 = vpop.f32.mrf.mxu1 }
 0x7e3   :  { %v7336_v0 = vadd.f32 %v7335_v16, %v7289_v35  ;;  %9524 = vrot.lane.b32.xlu2 %v9483_v47, %s10148_s25  ;;  %v7377_v30 = vpop.f32.mrf.mxu2 }
 0x7e4   :  { %7880 = vmatmul.f32.gmra.mxu1 %v15661_v52  ;;  %7984 = vmatmul.f32.vlgmr.msra.gmra.mxu0 %v15691_v27  ;;  %v7415_v7 = vpop.f32.mrf.mxu3 }
 0x7e5   :  { %v7378_v33 = vadd.f32 %v7377_v30, %v7336_v0  ;;  %8126 = vmatmul.f32.vlgmr.msra.gmra.mxu3 %v12353_v1  ;;  %8349 = vmatpush.msra.mxu0 %v13735_v55  ;;  %v7294_v55 = vadd.f32 %v7293_v29, %v7250_v13 }
 0x7e6   :  { %8480 = vmatpush.msra.mxu3 %v13725_v20 }
 0x7e7   :  { %8082 = vmatmul.f32.vlgmr.msra.gmra.mxu2 %v12349_v63  ;;  %v7416_v4 = vadd.f32 %v7415_v7, %v7378_v33  ;;  %v13899_v33 = vpop.permute.xlu1 %9600 }
 0x7e8   :  { %8442 = vmatpush.msra.mxu2 %v8307_v44 }
 0x7e9   :  { %v7445_v45 = vpop.f32.mrf.mxu0  ;;  %v9691_v44 = vrot.slane %v7416_v4, 4 }
 0x7ea   :  { %v7341_v25 = vpop.f32.mrf.mxu1 }
 0x7eb   :  { %9604 = vrot.lane.b32.xlu2 %v7416_v4, %s10151_s30  ;;  %v7381_v57 = vpop.f32.mrf.mxu2  ;;  %v7342_v42 = vadd.f32 %v7341_v25, %v7294_v55 }
 0x7ec   :  { %7992 = vmatmul.f32.gmra.mxu0 %v15692_v23  ;;  %8042 = vmatmul.f32.vlgmr.msra.gmra.mxu1 %v12341_v12  ;;  %v7419_v18 = vpop.f32.mrf.mxu3 }
 0x7ed   :  { %8132 = vmatmul.f32.gmra.mxu3 %v12379_v43  ;;  %8392 = vmatpush.msra.mxu1 %v13725_v20  ;;  %v7382_v48 = vadd.f32 %v7381_v57, %v7342_v42  ;;  %v15693_v20 = vld [vmem:[#allocation47_spill] sm:$0xff] }
 0x7ee   :  { %v4614_v2 = vmul.f32 %v15694_v51, %v15693_v20 }
 0x7ef   :  { %8087 = vmatmul.f32.gmra.mxu2 %v12371_v14  ;;  %v7420_v49 = vadd.f32 %v7419_v18, %v7382_v48  ;;  %v13925_v20 = vpop.permute.xlu1 %9728 }
 0x7f0   :  { %v4635_v31 = vadd.f32 %v15695_v58, %v4614_v2  ;;  %15696 = vst [vmem:[#allocation2_spill] sm:$0xff] %v13925_v20 }
 0x7f1   :  { %v13873_v15 = vpop.f32.mrf.mxu0 }
 0x7f2   :  { %v7503_v56 = vpop.f32.mrf.mxu1  ;;  %v4651_v16 = vmax.f32 %v4635_v31, 0.0 }
 0x7f3   :  { %9732 = vrot.lane.b32.xlu2 %v9691_v44, %s10152_s9  ;;  %v7543_v50 = vpop.f32.mrf.mxu2  ;;  %v7504_v2 = vadd.f32 %v7503_v56, %v7445_v45 }
 0x7f4   :  { %8000 = vmatmul.f32.gmra.mxu0 %v12415_v37  ;;  %8046 = vmatmul.f32.gmra.mxu1 %v12355_v32  ;;  %v7587_v21 = vpop.f32.mrf.mxu3  ;;  %v4717_v0 = vsel %vm4482_vm10, %v4651_v16, 0 }
 0x7f5   :  { %8138 = vmatmul.f32.gmra.mxu3 %v15628_v38  ;;  %v13903_v25 = vand.u32 4294901760, %v4717_v0  ;;  %v7544_v40 = vadd.f32 %v7543_v50, %v7504_v2 }
 0x7f7   :  { %8092 = vmatmul.f32.gmra.mxu2 %v12391_v3  ;;  %v13912_v18 = vsub.f32 %v4717_v0, %v13903_v25  ;;  %v7588_v50 = vadd.f32 %v7587_v21, %v7544_v40 }
 0x7f9   :  { %v13885_v17 = vpop.f32.mrf.mxu0  ;;  %v15289_v42 = vand.u32 4294901760, %v13912_v18 }
 0x7fa   :  { %v7507_v35 = vpop.f32.mrf.mxu1 }
 0x7fb   :  { %9812 = vrot.lane.b32.xlu2 %v7420_v49, %s10150_s29  ;;  %v7548_v47 = vpop.f32.mrf.mxu2  ;;  %v8578_v31 = vsub.f32 %v13912_v18, %v15289_v42  ;;  %v13950_v42 = vpop.permute.xlu1 %9808  ;;  %v7508_v2 = vadd.f32 %v7507_v35, %v13873_v15 }
 0x7fc   :  { %8008 = vmatmul.f32.gmra.mxu0 %v12433_v62  ;;  %8050 = vmatmul.f32.gmra.mxu1 %v12381_v28  ;;  %v13890_v29 = vpop.f32.mrf.mxu3  ;;  %15697 = vst [vmem:[#allocation14_spill] sm:$0xff] %v13950_v42 }
 0x7fd   :  { %8144 = vmatmul.f32.gmra.mxu3 %v15658_v5  ;;  %v8579_v39 = vand.u32 4294901760, %v8578_v31  ;;  %v15698_v31 = vld [vmem:[#allocation28_spill] sm:$0xff]  ;;  %v7549_v15 = vadd.f32 %v7548_v47, %v7508_v2 }
 0x7fe   :  { %v15699_v59 = vperm.slane %v15698_v31, 0  ;;  %v15701_v21 = vperm.slane %v15698_v31, 1  ;;  %v15702_v2 = vperm.slane %v15698_v31, 2 }
 0x7ff   :  { %8097 = vmatmul.f32.gmra.mxu2 %v15627_v11  ;;  %v13935_v49 = vpop.permute.xlu2 %9058 }
 0x800   :  { %v9081_v45 = vsel %vm3512_vm2, %v13797_v54, %v13935_v49  ;;  %v15700_v54 = vld [vmem:[#allocation48_spill] sm:$0xff] }
 0x801   :  { %v13895_v30 = vpop.f32.mrf.mxu0  ;;  %v9098_v6 = vmul.f32 %v9081_v45, %v15699_v59 }
 0x802   :  { %v13897_v7 = vpop.f32.mrf.mxu1 }
 0x803   :  { %v13901_v4 = vpop.f32.mrf.mxu2  ;;  %v9114_v59 = vadd.f32 %v9098_v6, %v13745_v10  ;;  %v7594_v10 = vadd.f32 %v13890_v29, %v7549_v15  ;;  %v15703_v15 = vperm.slane %v15698_v31, 3 }
 0x804   :  { %8016 = vmatmul.f32.gmra.mxu0 %v12445_v46  ;;  %8054 = vmatmul.f32.gmra.mxu1 %v12400_v61  ;;  %v13907_v57 = vpop.f32.mrf.mxu3 }
 0x805   :  { %8150 = vmatmul.f32.gmra.mxu3 %v15661_v52 }
 0x807   :  { %8102 = vmatmul.f32.gmra.mxu2 %v15657_v34 }
 0x809   :  { %v13914_v13 = vpop.f32.mrf.mxu0 }
 0x80a   :  { %v13916_v55 = vpop.f32.mrf.mxu1 }
 0x80b   :  { %v13918_v44 = vpop.f32.mrf.mxu2 }
 0x80c   :  { %8058 = vmatmul.f32.gmra.mxu1 %v12420_v8  ;;  %8174 = vmatmul.f32.vlgmr.msrb.gmra.mxu0 %v12341_v12  ;;  %v13923_v48 = vpop.f32.mrf.mxu3 }
 0x80d   :  { %8312 = vmatmul.f32.vlgmr.msrb.gmra.mxu3 %v12341_v12  ;;  %8518 = vmatpush.msrb.mxu0 %v13903_v25 }
 0x80e   :  { %8662 = vmatpush.msrb.mxu3 %v13903_v25 }
 0x80f   :  { %8254 = vmatmul.f32.vlgmr.msrb.gmra.mxu2 %v15691_v27  ;;  %v4615_v27 = vmul.f32 %v15694_v51, %v15700_v54 }
 0x810   :  { %8619 = vmatpush.msrb.mxu2 %v13912_v18 }
 0x811   :  { %v7635_v16 = vpop.f32.mrf.mxu0  ;;  %v4636_v26 = vadd.f32 %v15695_v58, %v4615_v27  ;;  %v13974_v58 = vpop.permute.xlu2 %9394 }
 0x812   :  { %v13937_v0 = vpop.f32.mrf.mxu1  ;;  %v7636_v52 = vadd.f32 %v7635_v16, %v7588_v50  ;;  %v9417_v50 = vsel %vm3915_vm6, %v13836_v60, %v13974_v58 }
 0x813   :  { %v13939_v22 = vpop.f32.mrf.mxu2  ;;  %v4652_v6 = vmax.f32 %v4636_v26, 0.0 }
 0x814   :  { %8178 = vmatmul.f32.gmra.mxu0 %v12355_v32  ;;  %8212 = vmatmul.f32.vlgmr.msrb.gmra.mxu1 %v12341_v12  ;;  %v13947_v56 = vpop.f32.mrf.mxu3 }
 0x815   :  { %8316 = vmatmul.f32.gmra.mxu3 %v12355_v32  ;;  %8580 = vmatpush.msrb.mxu1 %v8579_v39  ;;  %v4720_v54 = vsel %vm4482_vm10, %v4652_v6, 0 }
 0x817   :  { %8262 = vmatmul.f32.gmra.mxu2 %v15692_v23 }
 0x819   :  { %v13958_v5 = vpop.permute.xlu0 %9186  ;;  %v7639_v34 = vpop.f32.mrf.mxu0 }
 0x81a   :  { %v9209_v40 = vsel %vm3657_vm3, %v13795_v41, %v13958_v5  ;;  %v7673_v39 = vpop.f32.mrf.mxu1  ;;  %v7640_v29 = vadd.f32 %v7639_v34, %v7594_v10 }
 0x81b   :  { %v9226_v35 = vmul.f32 %v9209_v40, %v15701_v21  ;;  %v7674_v45 = vadd.f32 %v7673_v39, %v7636_v52  ;;  %v13968_v51 = vpop.f32.mrf.mxu2  ;;  %v7512_v52 = vadd.f32 %v13897_v7, %v13885_v17 }
 0x81c   :  { %8182 = vmatmul.f32.gmra.mxu0 %v12381_v28  ;;  %8216 = vmatmul.f32.gmra.mxu1 %v12355_v32  ;;  %v13972_v27 = vpop.f32.mrf.mxu3 }
 0x81d   :  { %v9242_v16 = vadd.f32 %v9226_v35, %v9114_v59  ;;  %v9148_v41 = vrot.slane %v7674_v45, 4  ;;  %8320 = vmatmul.f32.gmra.mxu3 %v12381_v28  ;;  %9062 = vrot.lane.b32.xlu1 %v7674_v45, %s10145_s22  ;;  %v7554_v39 = vadd.f32 %v13901_v4, %v7512_v52  ;;  %v9434_v59 = vmul.f32 %v9417_v50, %v15703_v15 }
 0x81f   :  { %8270 = vmatmul.f32.gmra.mxu2 %v12415_v37  ;;  %9190 = vrot.lane.b32.xlu2 %v9148_v41, %s10146_s23  ;;  %v13983_v47 = vpop.permute.xlu1 %9266  ;;  %v7600_v45 = vadd.f32 %v13907_v57, %v7554_v39  ;;  %v7516_v41 = vadd.f32 %v13916_v55, %v13895_v30 }
 0x820   :  { %v9289_v26 = vsel %vm3786_vm4, %v13819_v9, %v13983_v47  ;;  %v14005_v9 = vand.u32 4294901760, %v4720_v54 }
 0x821   :  { %v9306_v17 = vmul.f32 %v9289_v26, %v15702_v2  ;;  %v7643_v7 = vpop.f32.mrf.mxu0  ;;  %v15704_v2 = vperm.slane %v15685_v53, 5 }
 0x822   :  { %v7677_v40 = vpop.f32.mrf.mxu1  ;;  %v7644_v6 = vadd.f32 %v7643_v7, %v7600_v45  ;;  %v7559_v7 = vadd.f32 %v13918_v44, %v7516_v41  ;;  %v15705_v41 = vperm.slane %v15685_v53, 6 }
 0x823   :  { %v9322_v21 = vadd.f32 %v9306_v17, %v9242_v16  ;;  %v7678_v60 = vadd.f32 %v7677_v40, %v7640_v29  ;;  %v13999_v35 = vpop.f32.mrf.mxu2  ;;  %v14014_v16 = vsub.f32 %v4720_v54, %v14005_v9 }
 0x824   :  { %8186 = vmatmul.f32.gmra.mxu0 %v12400_v61  ;;  %8220 = vmatmul.f32.gmra.mxu1 %v12381_v28  ;;  %v14003_v34 = vpop.f32.mrf.mxu3 }
 0x825   :  { %8324 = vmatmul.f32.gmra.mxu3 %v12400_v61  ;;  %9270 = vrot.lane.b32.xlu0 %v7678_v60, %s10147_s24  ;;  %v14009_v4 = vadd.f32 %v9434_v59, %v9322_v21  ;;  %v9356_v29 = vrot.slane %v7678_v60, 4  ;;  %v8847_v55 = vand.u32 4294901760, %v14014_v16  ;;  %v7606_v59 = vadd.f32 %v13923_v48, %v7559_v7 }
 0x826   :  { %v7520_v7 = vadd.f32 %v13937_v0, %v13914_v13 }
 0x827   :  { %8278 = vmatmul.f32.gmra.mxu2 %v12433_v62  ;;  %v8848_v15 = vsub.f32 %v14014_v16, %v8847_v55 }
 0x828   :  { %v7564_v13 = vadd.f32 %v13939_v22, %v7520_v7 }
 0x829   :  { %v9523_v10 = vpop.permute.xlu0 %9522  ;;  %v7647_v52 = vpop.f32.mrf.mxu0  ;;  %v8849_v48 = vand.u32 4294901760, %v8848_v15 }
 0x82a   :  { %v9545_v50 = vsel %vm4060_vm5, %v13883_v19, %v9523_v10  ;;  %v7681_v26 = vpop.f32.mrf.mxu1  ;;  %v7648_v45 = vadd.f32 %v7647_v52, %v7606_v59  ;;  %v15706_v52 = vand.u32 4294901760, %v13912_v18  ;;  %v15707_v59 = vperm.slane %v15685_v53, 7 }
 0x82b   :  { %v9561_v57 = vmul.f32 %v9545_v50, %v15704_v2  ;;  %v14023_v17 = vadd.f32 %v7681_v26, %v7644_v6  ;;  %v14025_v40 = vpop.f32.mrf.mxu2 }
 0x82c   :  { %8190 = vmatmul.f32.gmra.mxu0 %v12420_v8  ;;  %8224 = vmatmul.f32.gmra.mxu1 %v12400_v61  ;;  %v14029_v30 = vpop.f32.mrf.mxu3 }
 0x82d   :  { %v9577_v54 = vadd.f32 %v9561_v57, %v13850_v36  ;;  %v9484_v39 = vrot.slane %v14023_v17, 4  ;;  %8328 = vmatmul.f32.gmra.mxu3 %v12420_v8  ;;  %9398 = vrot.lane.b32.xlu0 %v9356_v29, %s10149_s28 }
 0x82f   :  { %8286 = vmatmul.f32.gmra.mxu2 %v12445_v46  ;;  %9526 = vrot.lane.b32.xlu1 %v9484_v39, %s10148_s25 }
 0x831   :  { %v14043_v21 = vpop.permute.xlu0 %9602  ;;  %v7651_v44 = vpop.f32.mrf.mxu0 }
 0x832   :  { %v9625_v36 = vsel %vm4189_vm8, %v13899_v33, %v14043_v21  ;;  %v7685_v60 = vpop.f32.mrf.mxu1 }
 0x833   :  { %v9641_v6 = vmul.f32 %v9625_v36, %v15705_v41  ;;  %v14051_v50 = vpop.f32.mrf.mxu2  ;;  %v7686_v2 = vadd.f32 %v7685_v60, %v7648_v45  ;;  %v14057_v57 = vpop.permute.xlu2 %9268 }
 0x834   :  { %8228 = vmatmul.f32.gmra.mxu1 %v12420_v8  ;;  %8352 = vmatmul.f32.vlgmr.msra.gmra.mxu0 %v12349_v63  ;;  %v14055_v26 = vpop.f32.mrf.mxu3 }
 0x835   :  { %v9657_v29 = vadd.f32 %v9641_v6, %v9577_v54  ;;  %8482 = vmatmul.f32.vlgmr.msra.gmra.mxu3 %v12341_v12  ;;  %8712 = vmatpush.msra.mxu0 %v15706_v52  ;;  %v9692_v0 = vrot.slane %v7686_v2, 4  ;;  %v7774_v52 = vadd.f32 %v13972_v27, %v13968_v51 }
 0x836   :  { %8850 = vmatpush.msra.mxu3 %v8849_v48 }
 0x837   :  { %8444 = vmatmul.f32.vlgmr.msra.gmra.mxu2 %v12341_v12  ;;  %9606 = vrot.lane.b32.xlu1 %v7686_v2, %s10151_s30 }
 0x838   :  { %8788 = vmatpush.msra.mxu2 %v14005_v9 }
 0x839   :  { %v14067_v39 = vpop.permute.xlu0 %9730  ;;  %v7813_v54 = vpop.f32.mrf.mxu0 }
 0x83a   :  { %v9753_v15 = vsel %vm4318_vm9, %v13925_v20, %v14067_v39  ;;  %v7689_v18 = vpop.f32.mrf.mxu1 }
 0x83b   :  { %v9769_v36 = vmul.f32 %v9753_v15, %v15707_v59  ;;  %v7747_v60 = vpop.f32.mrf.mxu2  ;;  %v15708_v15 = vperm.slane %v15698_v31, 5 }
 0x83c   :  { %8357 = vmatmul.f32.gmra.mxu0 %v12371_v14  ;;  %8396 = vmatmul.f32.vlgmr.msra.gmra.mxu1 %v12353_v1  ;;  %v7789_v45 = vpop.f32.mrf.mxu3 }
 0x83d   :  { %v9785_v41 = vadd.f32 %v9769_v36, %v9657_v29  ;;  %8486 = vmatmul.f32.gmra.mxu3 %v12355_v32  ;;  %8750 = vmatpush.msra.mxu1 %v13903_v25  ;;  %v14080_v6 = vpop.permute.xlu2 %9524  ;;  %v14082_v48 = vadd.f32 %v7789_v45, %v7747_v60  ;;  %v7612_v25 = vadd.f32 %v13947_v56, %v7564_v13  ;;  %v10133_v36 = vld [vmem:[%s15025_s1 + $0xb8] ss:$0 sm:$0xff] }
 0x83e   :  { %v9544_v53 = vsel %vm4060_vm5, %v9523_v10, %v14080_v6  ;;  %v7814_v29 = vadd.f32 %v7813_v54, %v7774_v52 }
 0x83f   :  { %v9562_v22 = vmul.f32 %v9544_v53, %v15708_v15  ;;  %8448 = vmatmul.f32.gmra.mxu2 %v12355_v32  ;;  %9734 = vrot.lane.b32.xlu1 %v9692_v0, %s10152_s9  ;;  %v7652_v10 = vadd.f32 %v7651_v44, %v7612_v25 }
 0x841   :  { %v9578_v2 = vadd.f32 %v9562_v22, %v14009_v4  ;;  %v14095_v7 = vpop.permute.xlu0 %9810  ;;  %v7818_v59 = vpop.f32.mrf.mxu0  ;;  %v7690_v54 = vadd.f32 %v7689_v18, %v7652_v10  ;;  %v7778_v18 = vadd.f32 %v14003_v34, %v13999_v35  ;;  %v15711_v34 = vld [vmem:[#allocation45_spill] sm:$0xff] }
 0x842   :  { %v9833_v51 = vsel %vm4415_vm7, %v13950_v42, %v14095_v7  ;;  %v7857_v27 = vpop.f32.mrf.mxu1 }
 0x843   :  { %v9849_v60 = vmul.f32 %v10133_v36, %v9833_v51  ;;  %v7858_v45 = vadd.f32 %v7857_v27, %v7814_v29  ;;  %v7905_v56 = vpop.f32.mrf.mxu2  ;;  %v7819_v29 = vadd.f32 %v7818_v59, %v7778_v18  ;;  %v15712_v36 = vperm.slane %v15711_v34, 0 }
 0x844   :  { %8362 = vmatmul.f32.gmra.mxu0 %v12391_v3  ;;  %8402 = vmatmul.f32.gmra.mxu1 %v12379_v43  ;;  %v7943_v4 = vpop.f32.mrf.mxu3 }
 0x845   :  { %v14106_v13 = vadd.f32 %v9849_v60, %v9785_v41  ;;  %v7906_v0 = vadd.f32 %v7905_v56, %v7858_v45  ;;  %8490 = vmatmul.f32.gmra.mxu3 %v12381_v28  ;;  %v14109_v53 = vpop.permute.xlu2 %9604  ;;  %v14111_v44 = vpop.permute.xlu1 %9188  ;;  %v15710_v41 = vperm.slane %v15698_v31, 6 }
 0x846   :  { %v9624_v52 = vsel %vm4189_vm8, %v14043_v21, %v14109_v53  ;;  %v9208_v15 = vsel %vm3657_vm3, %v13958_v5, %v14111_v44 }
 0x847   :  { %15709 = vst [vmem:[#allocation26_spill] sm:$0xff] %v14106_v13  ;;  %v9642_v22 = vmul.f32 %v9624_v52, %v15710_v41  ;;  %v7944_v25 = vadd.f32 %v7943_v4, %v7906_v0  ;;  %8452 = vmatmul.f32.gmra.mxu2 %v12381_v28  ;;  %9814 = vrot.lane.b32.xlu1 %v7690_v54, %s10150_s29  ;;  %v15714_v54 = vld [vmem:[#allocation4_spill] sm:$0xff] }
 0x848   :  { %v7782_v41 = vadd.f32 %v14029_v30, %v14025_v40 }
 0x849   :  { %v9658_v51 = vadd.f32 %v9642_v22, %v9578_v2  ;;  %v9149_v27 = vrot.slane %v7944_v25, 4  ;;  %9064 = vrot.lane.b32.xlu2 %v7944_v25, %s10145_s22  ;;  %v14128_v21 = vpop.permute.xlu0 %9060  ;;  %v7823_v10 = vpop.f32.mrf.mxu0  ;;  %v9288_v2 = vsel %vm3786_vm4, %v13983_v47, %v14057_v57  ;;  %v15715_v22 = vperm.slane %v15711_v34, 2 }
 0x84a   :  { %v9080_v5 = vsel %vm3512_vm2, %v13935_v49, %v14128_v21  ;;  %v7863_v35 = vpop.f32.mrf.mxu1  ;;  %v15713_v49 = vperm.slane %v15711_v34, 1 }
 0x84b   :  { %v9099_v60 = vmul.f32 %v9080_v5, %v15712_v36  ;;  %v7864_v45 = vadd.f32 %v7863_v35, %v7819_v29  ;;  %9192 = vrot.lane.b32.xlu0 %v9149_v27, %s10146_s23  ;;  %v7909_v59 = vpop.f32.mrf.mxu2  ;;  %v9307_v25 = vmul.f32 %v9288_v2, %v15715_v22  ;;  %v7824_v35 = vadd.f32 %v7823_v10, %v7782_v41  ;;  %v15717_v2 = vld [vmem:[#allocation7_spill] sm:$0xff] }
 0x84c   :  { %8367 = vmatmul.f32.gmra.mxu0 %v15627_v11  ;;  %8408 = vmatmul.f32.gmra.mxu1 %v15628_v38  ;;  %v7947_v56 = vpop.f32.mrf.mxu3  ;;  %v9227_v4 = vmul.f32 %v9208_v15, %v15713_v49  ;;  %v15716_v15 = vperm.slane %v15698_v31, 7  ;;  %v15718_v31 = vld [vmem:[#allocation63_spill] sm:$0xff] }
 0x84d   :  { %v9115_v0 = vadd.f32 %v9099_v60, %v15714_v54  ;;  %v7910_v52 = vadd.f32 %v7909_v59, %v7864_v45  ;;  %8494 = vmatmul.f32.gmra.mxu3 %v12400_v61  ;;  %v14147_v18 = vpop.permute.xlu2 %9732  ;;  %v10134_v54 = vld [vmem:[%s15025_s1 + $0xc0] ss:$0 sm:$0xff] }
 0x84e   :  { %v9752_v47 = vsel %vm4318_vm9, %v14067_v39, %v14147_v18 }
 0x84f   :  { %v9243_v29 = vadd.f32 %v9227_v4, %v9115_v0  ;;  %v9770_v27 = vmul.f32 %v9752_v47, %v15716_v15  ;;  %v7948_v5 = vadd.f32 %v7947_v56, %v7910_v52  ;;  %8456 = vmatmul.f32.gmra.mxu2 %v12400_v61  ;;  %v7786_v4 = vadd.f32 %v14055_v26, %v14051_v50  ;;  %v15721_v26 = vld [vmem:[#allocation62_spill] sm:$0xff]  ;;  %v15722_v15 = vld [vmem:[#allocation52_spill] sm:$0xff] }
 0x851   :  { %v9786_v36 = vadd.f32 %v9770_v27, %v9658_v51  ;;  %v14160_v60 = vadd.f32 %v9307_v25, %v9243_v29  ;;  %v9357_v40 = vrot.slane %v7948_v5, 4  ;;  %9272 = vrot.lane.b32.xlu1 %v7948_v5, %s10147_s24  ;;  %v7828_v30 = vpop.f32.mrf.mxu0 }
 0x852   :  { %v7869_v45 = vpop.f32.mrf.mxu1  ;;  %v7829_v41 = vadd.f32 %v7828_v30, %v7786_v4 }
 0x853   :  { %v7870_v39 = vadd.f32 %v7869_v45, %v7824_v35  ;;  %9400 = vrot.lane.b32.xlu2 %v9357_v40, %s10149_s28  ;;  %v7913_v59 = vpop.f32.mrf.mxu2 }
 0x854   :  { %8372 = vmatmul.f32.gmra.mxu0 %v15717_v2  ;;  %8414 = vmatmul.f32.gmra.mxu1 %v15718_v31  ;;  %v7951_v56 = vpop.f32.mrf.mxu3 }
 0x855   :  { %v7914_v49 = vadd.f32 %v7913_v59, %v7870_v39  ;;  %8498 = vmatmul.f32.gmra.mxu3 %v12420_v8  ;;  %v14167_v51 = vpop.permute.xlu2 %9812 }
 0x856   :  { %15719 = vst [vmem:[#allocation51_spill] sm:$0xff] %v14167_v51  ;;  %v9832_v10 = vsel %vm4415_vm7, %v14095_v7, %v14167_v51 }
 0x857   :  { %v9850_v0 = vmul.f32 %v10134_v54, %v9832_v10  ;;  %v14178_v52 = vadd.f32 %v7951_v56, %v7914_v49  ;;  %8460 = vmatmul.f32.gmra.mxu2 %v12420_v8 }
 0x859   :  { %v14181_v47 = vadd.f32 %v9850_v0, %v9786_v36  ;;  %v9485_v22 = vrot.slane %v14178_v52, 4  ;;  %v7833_v25 = vpop.f32.mrf.mxu0 }
 0x85a   :  { %v7875_v29 = vpop.f32.mrf.mxu1  ;;  %v7834_v35 = vadd.f32 %v7833_v25, %v14082_v48 }
 0x85b   :  { %15720 = vst [vmem:[#allocation35_spill] sm:$0xff] %v14181_v47  ;;  %v7876_v7 = vadd.f32 %v7875_v29, %v7829_v41  ;;  %9528 = vrot.lane.b32.xlu0 %v9485_v22, %s10148_s25  ;;  %v7917_v50 = vpop.f32.mrf.mxu2 }
 0x85c   :  { %8420 = vmatmul.f32.gmra.mxu1 %v15721_v26  ;;  %8524 = vmatmul.f32.vlgmr.msrb.gmra.mxu0 %v15722_v15  ;;  %v7955_v27 = vpop.f32.mrf.mxu3 }
 0x85d   :  { %v7918_v5 = vadd.f32 %v7917_v50, %v7876_v7  ;;  %8666 = vmatmul.f32.vlgmr.msrb.gmra.mxu3 %v12353_v1  ;;  %8889 = vmatpush.msrb.mxu0 %v14014_v16 }
 0x85e   :  { %9020 = vmatpush.msrb.mxu3 %v14005_v9 }
 0x85f   :  { %8622 = vmatmul.f32.vlgmr.msrb.gmra.mxu2 %v12349_v63  ;;  %v7956_v36 = vadd.f32 %v7955_v27, %v7918_v5 }
 0x860   :  { %8982 = vmatpush.msrb.mxu2 %v8847_v55 }
 0x861   :  { %v7985_v40 = vpop.f32.mrf.mxu0  ;;  %v9693_v55 = vrot.slane %v7956_v36, 4 }
 0x862   :  { %v7881_v30 = vpop.f32.mrf.mxu1 }
 0x863   :  { %v7882_v45 = vadd.f32 %v7881_v30, %v7834_v35  ;;  %9608 = vrot.lane.b32.xlu0 %v7956_v36, %s10151_s30  ;;  %v7921_v39 = vpop.f32.mrf.mxu2  ;;  %v14228_v36 = vpop.permute.xlu1 %9396 }
 0x864   :  { %8532 = vmatmul.f32.gmra.mxu0 %v15692_v23  ;;  %8582 = vmatmul.f32.vlgmr.msrb.gmra.mxu1 %v12341_v12  ;;  %v7959_v59 = vpop.f32.mrf.mxu3 }
 0x865   :  { %v7922_v56 = vadd.f32 %v7921_v39, %v7882_v45  ;;  %8932 = vmatpush.msrb.mxu1 %v14005_v9  ;;  %8672 = vmatmul.f32.gmra.mxu3 %v12379_v43 }
 0x867   :  { %v14199_v16 = vadd.f32 %v7959_v59, %v7922_v56  ;;  %8627 = vmatmul.f32.gmra.mxu2 %v12371_v14 }
 0x869   :  { %v7993_v48 = vpop.f32.mrf.mxu0 }
 0x86a   :  { %v8043_v49 = vpop.f32.mrf.mxu1 }
 0x86b   :  { %9736 = vrot.lane.b32.xlu0 %v9693_v55, %s10152_s9  ;;  %v8083_v10 = vpop.f32.mrf.mxu2  ;;  %v8044_v30 = vadd.f32 %v8043_v49, %v7985_v40 }
 0x86c   :  { %8540 = vmatmul.f32.gmra.mxu0 %v12415_v37  ;;  %8586 = vmatmul.f32.gmra.mxu1 %v12355_v32  ;;  %v8127_v4 = vpop.f32.mrf.mxu3 }
 0x86d   :  { %8678 = vmatmul.f32.gmra.mxu3 %v15628_v38  ;;  %v8084_v59 = vadd.f32 %v8083_v10, %v8044_v30  ;;  %v15723_v30 = vld [vmem:[#allocation39_spill] sm:$0xff] }
 0x86f   :  { %8632 = vmatmul.f32.gmra.mxu2 %v12391_v3  ;;  %v8128_v42 = vadd.f32 %v8127_v4, %v8084_v59  ;;  %v15724_v4 = vperm.slane %v15723_v30, 0 }
 0x871   :  { %v8001_v9 = vpop.f32.mrf.mxu0 }
 0x872   :  { %v8047_v54 = vpop.f32.mrf.mxu1 }
 0x873   :  { %v8088_v0 = vpop.f32.mrf.mxu2  ;;  %v8048_v20 = vadd.f32 %v8047_v54, %v7993_v48 }
 0x874   :  { %8548 = vmatmul.f32.gmra.mxu0 %v12433_v62  ;;  %8590 = vmatmul.f32.gmra.mxu1 %v12381_v28  ;;  %v8133_v41 = vpop.f32.mrf.mxu3 }
 0x875   :  { %8684 = vmatmul.f32.gmra.mxu3 %v15718_v31  ;;  %v8089_v54 = vadd.f32 %v8088_v0, %v8048_v20 }
 0x877   :  { %8637 = vmatmul.f32.gmra.mxu2 %v15627_v11  ;;  %v8134_v20 = vadd.f32 %v8133_v41, %v8089_v54 }
 0x879   :  { %v14211_v22 = vpop.f32.mrf.mxu0  ;;  %v14233_v13 = vpop.permute.xlu2 %9190 }
 0x87a   :  { %v8051_v25 = vpop.f32.mrf.mxu1  ;;  %v9207_v49 = vsel %vm3657_vm3, %v14111_v44, %v14233_v13 }
 0x87b   :  { %v8093_v29 = vpop.f32.mrf.mxu2  ;;  %v8052_v0 = vadd.f32 %v8051_v25, %v8001_v9 }
 0x87c   :  { %8556 = vmatmul.f32.gmra.mxu0 %v12445_v46  ;;  %8594 = vmatmul.f32.gmra.mxu1 %v12400_v61  ;;  %v14215_v7 = vpop.f32.mrf.mxu3 }
 0x87d   :  { %8690 = vmatmul.f32.gmra.mxu3 %v15721_v26 }
 0x87f   :  { %8642 = vmatmul.f32.gmra.mxu2 %v15717_v2 }
 0x881   :  { %v8017_v50 = vpop.f32.mrf.mxu0 }
 0x882   :  { %v14219_v27 = vpop.f32.mrf.mxu1 }
 0x883   :  { %v14221_v5 = vpop.f32.mrf.mxu2 }
 0x884   :  { %8598 = vmatmul.f32.gmra.mxu1 %v12420_v8  ;;  %8714 = vmatmul.f32.vlgmr.msra.gmra.mxu0 %v12341_v12  ;;  %v14225_v35 = vpop.f32.mrf.mxu3 }
 0x885   :  { %8852 = vmatmul.f32.vlgmr.msra.gmra.mxu3 %v12341_v12 }
 0x887   :  { %8794 = vmatmul.f32.vlgmr.msra.gmra.mxu2 %v15722_v15 }
 0x889   :  { %v8175_v45 = vpop.f32.mrf.mxu0 }
 0x88a   :  { %v8059_v39 = vpop.f32.mrf.mxu1 }
 0x88b   :  { %v8060_v56 = vadd.f32 %v8059_v39, %v8017_v50  ;;  %v8103_v55 = vpop.f32.mrf.mxu2  ;;  %v8176_v50 = vadd.f32 %v8175_v45, %v8128_v42  ;;  %v15725_v39 = vperm.slane %v15723_v30, 1 }
 0x88c   :  { %8718 = vmatmul.f32.gmra.mxu0 %v12355_v32  ;;  %8752 = vmatmul.f32.vlgmr.msra.gmra.mxu1 %v12341_v12  ;;  %v8151_v47 = vpop.f32.mrf.mxu3 }
 0x88d   :  { %v8104_v51 = vadd.f32 %v8103_v55, %v8060_v56  ;;  %8856 = vmatmul.f32.gmra.mxu3 %v12355_v32 }
 0x88f   :  { %v14236_v40 = vadd.f32 %v8151_v47, %v8104_v51  ;;  %v14238_v15 = vpop.permute.xlu1 %9062  ;;  %8802 = vmatmul.f32.gmra.mxu2 %v15692_v23  ;;  %v9228_v23 = vmul.f32 %v9207_v49, %v15725_v39 }
 0x890   :  { %v9079_v10 = vsel %vm3512_vm2, %v14128_v21, %v14238_v15 }
 0x891   :  { %v9100_v48 = vmul.f32 %v9079_v10, %v15724_v4  ;;  %v8179_v51 = vpop.f32.mrf.mxu0  ;;  %v15726_v10 = vperm.slane %v15723_v30, 2 }
 0x892   :  { %v8213_v47 = vpop.f32.mrf.mxu1  ;;  %v8180_v49 = vadd.f32 %v8179_v51, %v8134_v20 }
 0x893   :  { %v9116_v59 = vadd.f32 %v9100_v48, %v14023_v17  ;;  %v8214_v56 = vadd.f32 %v8213_v47, %v8176_v50  ;;  %v14254_v55 = vpop.f32.mrf.mxu2  ;;  %v8094_v47 = vadd.f32 %v8093_v29, %v8052_v0 }
 0x894   :  { %8722 = vmatmul.f32.gmra.mxu0 %v12381_v28  ;;  %8756 = vmatmul.f32.gmra.mxu1 %v12355_v32  ;;  %v14258_v44 = vpop.f32.mrf.mxu3 }
 0x895   :  { %v9150_v42 = vrot.slane %v8214_v56, 4  ;;  %9066 = vrot.lane.b32.xlu0 %v8214_v56, %s10145_s22  ;;  %v9244_v21 = vadd.f32 %v9228_v23, %v9116_v59  ;;  %8860 = vmatmul.f32.gmra.mxu3 %v12381_v28  ;;  %v8140_v29 = vadd.f32 %v14215_v7, %v8094_v47  ;;  %v15727_v23 = vperm.slane %v15711_v34, 3 }
 0x896   :  { %v8056_v56 = vadd.f32 %v14219_v27, %v14211_v22  ;;  %v15728_v7 = vperm.slane %v15723_v30, 3 }
 0x897   :  { %v14262_v45 = vpop.permute.xlu0 %9270  ;;  %9194 = vrot.lane.b32.xlu1 %v9150_v42, %s10146_s23  ;;  %8810 = vmatmul.f32.gmra.mxu2 %v12415_v37 }
 0x898   :  { %v9287_v17 = vsel %vm3786_vm4, %v14057_v57, %v14262_v45  ;;  %v9416_v57 = vsel %vm3915_vm6, %v13974_v58, %v14228_v36 }
 0x899   :  { %v9308_v50 = vmul.f32 %v9287_v17, %v15726_v10  ;;  %v8183_v4 = vpop.f32.mrf.mxu0  ;;  %v9435_v59 = vmul.f32 %v9416_v57, %v15727_v23 }
 0x89a   :  { %v8217_v48 = vpop.f32.mrf.mxu1  ;;  %v8184_v58 = vadd.f32 %v8183_v4, %v8140_v29  ;;  %v15730_v29 = vperm.slane %v15711_v34, 6 }
 0x89b   :  { %v9324_v41 = vadd.f32 %v9308_v50, %v9244_v21  ;;  %v8218_v9 = vadd.f32 %v8217_v48, %v8180_v49  ;;  %v14272_v25 = vpop.f32.mrf.mxu2  ;;  %v15729_v49 = vperm.slane %v15711_v34, 5 }
 0x89c   :  { %8726 = vmatmul.f32.gmra.mxu0 %v12400_v61  ;;  %8760 = vmatmul.f32.gmra.mxu1 %v12381_v28  ;;  %v14276_v37 = vpop.f32.mrf.mxu3 }
 0x89d   :  { %v9358_v54 = vrot.slane %v8218_v9, 4  ;;  %9274 = vrot.lane.b32.xlu2 %v8218_v9, %s10147_s24  ;;  %8864 = vmatmul.f32.gmra.mxu3 %v12400_v61 }
 0x89f   :  { %v14285_v51 = vpop.permute.xlu0 %9398  ;;  %9402 = vrot.lane.b32.xlu1 %v9358_v54, %s10149_s28  ;;  %8818 = vmatmul.f32.gmra.mxu2 %v12433_v62 }
 0x8a0   :  { %v9415_v39 = vsel %vm3915_vm6, %v14228_v36, %v14285_v51  ;;  %v9451_v36 = vadd.f32 %v9435_v59, %v14160_v60 }
 0x8a1   :  { %v9436_v42 = vmul.f32 %v9415_v39, %v15728_v7  ;;  %v14299_v21 = vpop.permute.xlu1 %9526  ;;  %v8187_v20 = vpop.f32.mrf.mxu0  ;;  %v15731_v7 = vperm.slane %v15711_v34, 7 }
 0x8a2   :  { %v9543_v62 = vsel %vm4060_vm5, %v14080_v6, %v14299_v21  ;;  %v8221_v0 = vpop.f32.mrf.mxu1  ;;  %v8099_v6 = vadd.f32 %v14221_v5, %v8056_v56 }
 0x8a3   :  { %v14306_v17 = vadd.f32 %v9436_v42, %v9324_v41  ;;  %v9563_v22 = vmul.f32 %v9543_v62, %v15729_v49  ;;  %v14310_v27 = vadd.f32 %v8221_v0, %v8184_v58  ;;  %v14312_v10 = vpop.f32.mrf.mxu2  ;;  %v14363_v34 = vpop.permute.xlu2 %9064 }
 0x8a4   :  { %8730 = vmatmul.f32.gmra.mxu0 %v12420_v8  ;;  %8764 = vmatmul.f32.gmra.mxu1 %v12400_v61  ;;  %v14316_v50 = vpop.f32.mrf.mxu3  ;;  %v8146_v48 = vadd.f32 %v14225_v35, %v8099_v6 }
 0x8a5   :  { %v9579_v4 = vadd.f32 %v9563_v22, %v9451_v36  ;;  %v9486_v60 = vrot.slane %v14310_v27, 4  ;;  %8868 = vmatmul.f32.gmra.mxu3 %v12420_v8 }
 0x8a6   :  { %v8188_v57 = vadd.f32 %v8187_v20, %v8146_v48 }
 0x8a7   :  { %9530 = vrot.lane.b32.xlu2 %v9486_v60, %s10148_s25  ;;  %8826 = vmatmul.f32.gmra.mxu2 %v12445_v46  ;;  %v9078_v60 = vsel %vm3512_vm2, %v14238_v15, %v14363_v34 }
 0x8a9   :  { %v14324_v47 = vpop.permute.xlu1 %9606  ;;  %v8191_v41 = vpop.f32.mrf.mxu0 }
 0x8aa   :  { %v9623_v9 = vsel %vm4189_vm8, %v14109_v53, %v14324_v47  ;;  %v8192_v5 = vadd.f32 %v8191_v41, %v14236_v40  ;;  %v8225_v54 = vpop.f32.mrf.mxu1  ;;  %v8318_v41 = vadd.f32 %v14276_v37, %v14272_v25 }
 0x8ab   :  { %v9643_v39 = vmul.f32 %v9623_v9, %v15730_v29  ;;  %v8279_v23 = vpop.f32.mrf.mxu2  ;;  %v14335_v59 = vadd.f32 %v8225_v54, %v8188_v57  ;;  %v15732_v9 = vld [vmem:[#allocation41_spill] sm:$0xff] }
 0x8ac   :  { %8768 = vmatmul.f32.gmra.mxu1 %v12420_v8  ;;  %8892 = vmatmul.f32.vlgmr.msrb.gmra.mxu0 %v12349_v63  ;;  %v8325_v46 = vpop.f32.mrf.mxu3  ;;  %v15733_v15 = vperm.slane %v15732_v9, 0  ;;  %v15734_v57 = vperm.slane %v15732_v9, 1 }
 0x8ad   :  { %v9659_v35 = vadd.f32 %v9643_v39, %v9579_v4  ;;  %v14337_v56 = vadd.f32 %v8325_v46, %v8279_v23  ;;  %9022 = vmatmul.f32.vlgmr.msrb.gmra.mxu3 %v12341_v12 }
 0x8af   :  { %9610 = vrot.lane.b32.xlu2 %v14335_v59, %s10151_s30  ;;  %8984 = vmatmul.f32.vlgmr.msrb.gmra.mxu2 %v12341_v12 }
 0x8b1   :  { %v14343_v53 = vpop.permute.xlu1 %9734  ;;  %v8353_v40 = vpop.f32.mrf.mxu0 }
 0x8b2   :  { %v9751_v63 = vsel %vm4318_vm9, %v14147_v18, %v14343_v53  ;;  %v8229_v58 = vpop.f32.mrf.mxu1  ;;  %v8314_v18 = vadd.f32 %v14258_v44, %v14254_v55 }
 0x8b3   :  { %v9771_v42 = vmul.f32 %v9751_v63, %v15731_v7  ;;  %v14351_v20 = vadd.f32 %v8229_v58, %v8192_v5  ;;  %v8287_v62 = vpop.f32.mrf.mxu2  ;;  %v9101_v5 = vmul.f32 %v9078_v60, %v15733_v15  ;;  %v15735_v58 = vperm.slane %v15732_v9, 2 }
 0x8b4   :  { %8897 = vmatmul.f32.gmra.mxu0 %v12371_v14  ;;  %8936 = vmatmul.f32.vlgmr.msrb.gmra.mxu1 %v12353_v1  ;;  %v8329_v12 = vpop.f32.mrf.mxu3  ;;  %v8354_v49 = vadd.f32 %v8353_v40, %v8314_v18 }
 0x8b5   :  { %v14355_v0 = vadd.f32 %v9771_v42, %v9659_v35  ;;  %v14357_v36 = vadd.f32 %v8329_v12, %v8287_v62  ;;  %9026 = vmatmul.f32.gmra.mxu3 %v12355_v32  ;;  %v9117_v46 = vadd.f32 %v9101_v5, %v14178_v52  ;;  %v15736_v62 = vperm.slane %v15732_v9, 3 }
 0x8b7   :  { %8988 = vmatmul.f32.gmra.mxu2 %v12355_v32 }
 0x8b9   :  { %v8358_v22 = vpop.f32.mrf.mxu0  ;;  %v14365_v14 = vpop.permute.xlu1 %9814 }
 0x8ba   :  { %v8397_v6 = vpop.f32.mrf.mxu1  ;;  %v8359_v54 = vadd.f32 %v8358_v22, %v8318_v41 }
 0x8bb   :  { %v8398_v1 = vadd.f32 %v8397_v6, %v8354_v49  ;;  %v8445_v4 = vpop.f32.mrf.mxu2 }
 0x8bc   :  { %8902 = vmatmul.f32.gmra.mxu0 %v12391_v3  ;;  %8942 = vmatmul.f32.gmra.mxu1 %v12379_v43  ;;  %v8483_v55 = vpop.f32.mrf.mxu3  ;;  %v14385_v43 = vpop.permute.xlu2 %9400 }
 0x8bd   :  { %v8446_v32 = vadd.f32 %v8445_v4, %v8398_v1  ;;  %v14373_v44 = vpop.permute.xlu0 %9192  ;;  %9030 = vmatmul.f32.gmra.mxu3 %v12381_v28 }
 0x8be   :  { %v9206_v48 = vsel %vm3657_vm3, %v14233_v13, %v14373_v44 }
 0x8bf   :  { %v8484_v3 = vadd.f32 %v8483_v55, %v8446_v32  ;;  %8992 = vmatmul.f32.gmra.mxu2 %v12381_v28  ;;  %v9229_v29 = vmul.f32 %v9206_v48, %v15734_v57  ;;  %v9414_v28 = vsel %vm3915_vm6, %v14285_v51, %v14385_v43  ;;  %v8322_v51 = vadd.f32 %v14316_v50, %v14312_v10 }
 0x8c0   :  { %v9437_v12 = vmul.f32 %v9414_v28, %v15736_v62  ;;  %v15737_v32 = vperm.slane %v15723_v30, 5 }
 0x8c1   :  { %v9151_v39 = vrot.slane %v8484_v3, 4  ;;  %9068 = vrot.lane.b32.xlu1 %v8484_v3, %s10145_s22  ;;  %v8363_v23 = vpop.f32.mrf.mxu0  ;;  %v9245_v63 = vadd.f32 %v9229_v29, %v9117_v46 }
 0x8c2   :  { %v8403_v13 = vpop.f32.mrf.mxu1 }
 0x8c3   :  { %v8404_v25 = vadd.f32 %v8403_v13, %v8359_v54  ;;  %9196 = vrot.lane.b32.xlu2 %v9151_v39, %s10146_s23  ;;  %v14392_v37 = vpop.permute.xlu1 %9272  ;;  %v8449_v35 = vpop.f32.mrf.mxu2 }
 0x8c4   :  { %v9286_v40 = vsel %vm3786_vm4, %v14262_v45, %v14392_v37  ;;  %8907 = vmatmul.f32.gmra.mxu0 %v15627_v11  ;;  %8948 = vmatmul.f32.gmra.mxu1 %v15628_v38  ;;  %v8487_v52 = vpop.f32.mrf.mxu3  ;;  %v8364_v11 = vadd.f32 %v8363_v23, %v8322_v51 }
 0x8c5   :  { %v9309_v7 = vmul.f32 %v9286_v40, %v15735_v58  ;;  %v8450_v42 = vadd.f32 %v8449_v35, %v8404_v25  ;;  %9034 = vmatmul.f32.gmra.mxu3 %v12400_v61 }
 0x8c7   :  { %v9325_v18 = vadd.f32 %v9309_v7, %v9245_v63  ;;  %v8488_v45 = vadd.f32 %v8487_v52, %v8450_v42  ;;  %8996 = vmatmul.f32.gmra.mxu2 %v12400_v61 }
 0x8c9   :  { %9276 = vrot.lane.b32.xlu0 %v8488_v45, %s10147_s24  ;;  %v8368_v38 = vpop.f32.mrf.mxu0  ;;  %v14413_v49 = vadd.f32 %v9437_v12, %v9325_v18  ;;  %v9359_v55 = vrot.slane %v8488_v45, 4 }
 0x8ca   :  { %v8369_v22 = vadd.f32 %v8368_v38, %v14337_v56  ;;  %v8409_v6 = vpop.f32.mrf.mxu1 }
 0x8cb   :  { %v8410_v1 = vadd.f32 %v8409_v6, %v8364_v11  ;;  %v8453_v4 = vpop.f32.mrf.mxu2 }
 0x8cc   :  { %8912 = vmatmul.f32.gmra.mxu0 %v15717_v2  ;;  %8954 = vmatmul.f32.gmra.mxu1 %v15718_v31  ;;  %v8491_v10 = vpop.f32.mrf.mxu3 }
 0x8cd   :  { %v8454_v50 = vadd.f32 %v8453_v4, %v8410_v1  ;;  %v9529_v60 = vpop.permute.xlu0 %9528  ;;  %9038 = vmatmul.f32.gmra.mxu3 %v12420_v8 }
 0x8ce   :  { %v9542_v61 = vsel %vm4060_vm5, %v14299_v21, %v9529_v60 }
 0x8cf   :  { %v9564_v56 = vmul.f32 %v9542_v61, %v15737_v32  ;;  %v14424_v48 = vadd.f32 %v8491_v10, %v8454_v50  ;;  %9000 = vmatmul.f32.gmra.mxu2 %v12420_v8 }
 0x8d1   :  { %v9580_v2 = vadd.f32 %v9564_v56, %v14306_v17  ;;  %v9487_v31 = vrot.slane %v14424_v48, 4  ;;  %9404 = vrot.lane.b32.xlu0 %v9359_v55, %s10149_s28  ;;  %v8373_v41 = vpop.f32.mrf.mxu0  ;;  %v15738_v17 = vperm.slane %v15723_v30, 6 }
 0x8d2   :  { %v8374_v15 = vadd.f32 %v8373_v41, %v14357_v36  ;;  %v8415_v5 = vpop.f32.mrf.mxu1 }
 0x8d3   :  { %v8416_v3 = vadd.f32 %v8415_v5, %v8369_v22  ;;  %9532 = vrot.lane.b32.xlu1 %v9487_v31, %s10148_s25  ;;  %v8457_v21 = vpop.f32.mrf.mxu2 }
 0x8d4   :  { %8960 = vmatmul.f32.gmra.mxu1 %v15721_v26  ;;  %v8495_v54 = vpop.f32.mrf.mxu3 }
 0x8d5   :  { %v8458_v57 = vadd.f32 %v8457_v21, %v8416_v3  ;;  %v9609_v29 = vpop.permute.xlu0 %9608 }
 0x8d6   :  { %v9622_v8 = vsel %vm4189_vm8, %v14324_v47, %v9609_v29  ;;  %v15739_v47 = vperm.slane %v15723_v30, 7 }
 0x8d7   :  { %v9644_v39 = vmul.f32 %v9622_v8, %v15738_v17  ;;  %v14438_v23 = vadd.f32 %v8495_v54, %v8458_v57  ;;  %v15740_v57 = vperm.slane %v15732_v9, 5 }
 0x8d9   :  { %v9660_v36 = vadd.f32 %v9644_v39, %v9580_v2  ;;  %v8525_v13 = vpop.f32.mrf.mxu0 }
 0x8da   :  { %v8421_v46 = vpop.f32.mrf.mxu1 }
 0x8db   :  { %v8422_v25 = vadd.f32 %v8421_v46, %v8374_v15  ;;  %v8461_v35 = vpop.f32.mrf.mxu2 }
 0x8dc   :  { %v8499_v28 = vpop.f32.mrf.mxu3 }
 0x8dd   :  { %v8462_v40 = vadd.f32 %v8461_v35, %v8422_v25  ;;  %v14440_v26 = vpop.permute.xlu0 %9736 }
 0x8de   :  { %v9750_v52 = vsel %vm4318_vm9, %v14343_v53, %v14440_v26 }
 0x8df   :  { %v9772_v63 = vmul.f32 %v9750_v52, %v15739_v47  ;;  %v14448_v58 = vadd.f32 %v8499_v28, %v8462_v40 }
 0x8e1   :  { %v14450_v7 = vadd.f32 %v9772_v63, %v9660_v36  ;;  %v8533_v42 = vpop.f32.mrf.mxu0 }
 0x8e2   :  { %v8583_v51 = vpop.f32.mrf.mxu1 }
 0x8e3   :  { %v8623_v62 = vpop.f32.mrf.mxu2  ;;  %v8584_v15 = vadd.f32 %v8583_v51, %v8525_v13 }
 0x8e4   :  { %v8667_v12 = vpop.f32.mrf.mxu3 }
 0x8e5   :  { %v8624_v36 = vadd.f32 %v8623_v62, %v8584_v15  ;;  %v15741_v62 = vperm.slane %v15732_v9, 6 }
 0x8e7   :  { %v8668_v40 = vadd.f32 %v8667_v12, %v8624_v36 }
 0x8e9   :  { %v8541_v18 = vpop.f32.mrf.mxu0 }
 0x8ea   :  { %v8587_v45 = vpop.f32.mrf.mxu1 }
 0x8eb   :  { %v8628_v11 = vpop.f32.mrf.mxu2  ;;  %v8588_v28 = vadd.f32 %v8587_v45, %v8533_v42 }
 0x8ec   :  { %v8673_v38 = vpop.f32.mrf.mxu3 }
 0x8f1   :  { %v8549_v22 = vpop.f32.mrf.mxu0 }
 0x8f2   :  { %v8591_v6 = vpop.f32.mrf.mxu1 }
 0x8f3   :  { %v8592_v1 = vadd.f32 %v8591_v6, %v8541_v18  ;;  %v8633_v4 = vpop.f32.mrf.mxu2  ;;  %v8629_v18 = vadd.f32 %v8628_v11, %v8588_v28 }
 0x8f4   :  { %v8679_v53 = vpop.f32.mrf.mxu3 }
 0x8f5   :  { %v8634_v10 = vadd.f32 %v8633_v4, %v8592_v1  ;;  %v8674_v12 = vadd.f32 %v8673_v38, %v8629_v18 }
 0x8f7   :  { %v14452_v30 = vadd.f32 %v8679_v53, %v8634_v10  ;;  %v14454_v50 = vpop.permute.xlu2 %9274 }
 0x8f9   :  { %v8557_v61 = vpop.f32.mrf.mxu0 }
 0x8fa   :  { %v8595_v55 = vpop.f32.mrf.mxu1 }
 0x8fb   :  { %v8596_v32 = vadd.f32 %v8595_v55, %v8549_v22  ;;  %v8638_v56 = vpop.f32.mrf.mxu2 }
 0x8fc   :  { %v8685_v2 = vpop.f32.mrf.mxu3 }
 0x8fd   :  { %v8639_v31 = vadd.f32 %v8638_v56, %v8596_v32 }
 0x8ff   :  { %v14456_v41 = vadd.f32 %v8685_v2, %v8639_v31 }
 0x901   :  { %v14458_v5 = vpop.permute.xlu2 %9530  ;;  %v8715_v3 = vpop.f32.mrf.mxu0 }
 0x902   :  { %v9541_v21 = vsel %vm4060_vm5, %v9529_v60, %v14458_v5  ;;  %v8599_v54 = vpop.f32.mrf.mxu1  ;;  %v8716_v47 = vadd.f32 %v8715_v3, %v8668_v40 }
 0x903   :  { %v9565_v8 = vmul.f32 %v9541_v21, %v15740_v57  ;;  %v8600_v17 = vadd.f32 %v8599_v54, %v8557_v61  ;;  %v8643_v39 = vpop.f32.mrf.mxu2 }
 0x904   :  { %v8691_v46 = vpop.f32.mrf.mxu3 }
 0x905   :  { %v9581_v25 = vadd.f32 %v9565_v8, %v14413_v49  ;;  %v8644_v35 = vadd.f32 %v8643_v39, %v8600_v17 }
 0x907   :  { %v14466_v13 = vadd.f32 %v8691_v46, %v8644_v35 }
 0x909   :  { %v14468_v52 = vpop.permute.xlu2 %9610  ;;  %v8719_v63 = vpop.f32.mrf.mxu0 }
 0x90a   :  { %v9621_v60 = vsel %vm4189_vm8, %v9609_v29, %v14468_v52  ;;  %v8753_v51 = vpop.f32.mrf.mxu1  ;;  %v8720_v4 = vadd.f32 %v8719_v63, %v8674_v12 }
 0x90b   :  { %v9645_v22 = vmul.f32 %v9621_v60, %v15741_v62  ;;  %v8795_v6 = vpop.f32.mrf.mxu2  ;;  %v8754_v49 = vadd.f32 %v8753_v51, %v8716_v47 }
 0x90c   :  { %v8853_v1 = vpop.f32.mrf.mxu3 }
 0x90d   :  { %v14475_v42 = vadd.f32 %v9645_v22, %v9581_v25  ;;  %v9152_v45 = vrot.slane %v8754_v49, 4  ;;  %9070 = vrot.lane.b32.xlu2 %v8754_v49, %s10145_s22  ;;  %v8854_v39 = vadd.f32 %v8853_v1, %v8795_v6 }
 0x90f   :  { %9198 = vrot.lane.b32.xlu0 %v9152_v45, %s10146_s23 }
 0x911   :  { %v8723_v53 = vpop.f32.mrf.mxu0 }
 0x912   :  { %v8757_v29 = vpop.f32.mrf.mxu1  ;;  %v8724_v51 = vadd.f32 %v8723_v53, %v14452_v30 }
 0x913   :  { %v8758_v10 = vadd.f32 %v8757_v29, %v8720_v4  ;;  %v8803_v61 = vpop.f32.mrf.mxu2 }
 0x914   :  { %v8857_v11 = vpop.f32.mrf.mxu3 }
 0x915   :  { %v9360_v55 = vrot.slane %v8758_v10, 4  ;;  %9278 = vrot.lane.b32.xlu1 %v8758_v10, %s10147_s24  ;;  %v8858_v60 = vadd.f32 %v8857_v11, %v8803_v61 }
 0x917   :  { %9406 = vrot.lane.b32.xlu2 %v9360_v55, %s10149_s28 }
 0x919   :  { %v8727_v32 = vpop.f32.mrf.mxu0 }
 0x91a   :  { %v8761_v56 = vpop.f32.mrf.mxu1 }
 0x91b   :  { %v8811_v2 = vpop.f32.mrf.mxu2  ;;  %v14487_v49 = vadd.f32 %v8761_v56, %v8724_v51 }
 0x91c   :  { %v8861_v31 = vpop.f32.mrf.mxu3 }
 0x91d   :  { %v9488_v4 = vrot.slane %v14487_v49, 4  ;;  %v8862_v11 = vadd.f32 %v8861_v31, %v8811_v2  ;;  %v8728_v2 = vadd.f32 %v8727_v32, %v14456_v41 }
 0x921   :  { %v14481_v15 = vpop.f32.mrf.mxu0 }
 0x922   :  { %v8765_v38 = vpop.f32.mrf.mxu1 }
 0x923   :  { %v8819_v3 = vpop.f32.mrf.mxu2 }
 0x924   :  { %v8865_v21 = vpop.f32.mrf.mxu3 }
 0x929   :  { %v8893_v8 = vpop.f32.mrf.mxu0 }
 0x92a   :  { %v14483_v54 = vpop.f32.mrf.mxu1  ;;  %v8894_v36 = vadd.f32 %v8893_v8, %v8854_v39 }
 0x92b   :  { %v8827_v57 = vpop.f32.mrf.mxu2 }
 0x92c   :  { %v8869_v17 = vpop.f32.mrf.mxu3 }
 0x931   :  { %v8898_v47 = vpop.f32.mrf.mxu0 }
 0x932   :  { %v8937_v46 = vpop.f32.mrf.mxu1  ;;  %v8899_v18 = vadd.f32 %v8898_v47, %v8858_v60  ;;  %v8870_v47 = vadd.f32 %v8869_v17, %v8827_v57 }
 0x933   :  { %v8938_v25 = vadd.f32 %v8937_v46, %v8894_v36  ;;  %v8985_v35 = vpop.f32.mrf.mxu2  ;;  %v9694_v46 = vrot.slane %v14335_v59, 4 }
 0x934   :  { %v9023_v28 = vpop.f32.mrf.mxu3 }
 0x935   :  { %v8986_v40 = vadd.f32 %v8985_v35, %v8938_v25  ;;  %v9695_v25 = vrot.slane %v14438_v23, 4 }
 0x937   :  { %v9024_v63 = vadd.f32 %v9023_v28, %v8986_v40  ;;  %v8866_v28 = vadd.f32 %v8865_v21, %v8819_v3 }
 0x939   :  { %v9153_v62 = vrot.slane %v9024_v63, 4  ;;  %9072 = vrot.lane.b32.xlu0 %v9024_v63, %s10145_s22  ;;  %v8903_v10 = vpop.f32.mrf.mxu0 }
 0x93a   :  { %v8943_v22 = vpop.f32.mrf.mxu1  ;;  %v8904_v8 = vadd.f32 %v8903_v10, %v8862_v11 }
 0x93b   :  { %v8944_v45 = vadd.f32 %v8943_v22, %v8899_v18  ;;  %9200 = vrot.lane.b32.xlu1 %v9153_v62, %s10146_s23  ;;  %v8989_v6 = vpop.f32.mrf.mxu2 }
 0x93c   :  { %v9027_v1 = vpop.f32.mrf.mxu3 }
 0x93d   :  { %v8990_v12 = vadd.f32 %v8989_v6, %v8944_v45  ;;  %v14520_v6 = vpop.permute.xlu1 %9194 }
 0x93f   :  { %v9028_v29 = vadd.f32 %v9027_v1, %v8990_v12  ;;  %v14522_v1 = vpop.permute.xlu2 %9196 }
 0x941   :  { %9280 = vrot.lane.b32.xlu2 %v9028_v29, %s10147_s24  ;;  %9534 = vrot.lane.b32.xlu0 %v9488_v4, %s10148_s25  ;;  %v9361_v61 = vrot.slane %v9028_v29, 4  ;;  %v8908_v55 = vpop.f32.mrf.mxu0 }
 0x942   :  { %v8949_v30 = vpop.f32.mrf.mxu1  ;;  %v8909_v60 = vadd.f32 %v8908_v55, %v8866_v28  ;;  %v15746_v28 = vld [vmem:[#allocation85_spill] sm:$0xff] }
 0x943   :  { %9612 = vrot.lane.b32.xlu1 %v14438_v23, %s10151_s30  ;;  %v8993_v53 = vpop.f32.mrf.mxu2  ;;  %v8950_v36 = vadd.f32 %v8949_v30, %v8904_v8 }
 0x944   :  { %v9031_v56 = vpop.f32.mrf.mxu3 }
 0x945   :  { %v8994_v31 = vadd.f32 %v8993_v53, %v8950_v36 }
 0x947   :  { %v14507_v59 = vadd.f32 %v9031_v56, %v8994_v31  ;;  %v15742_v56 = vld [vmem:[#allocation5_spill] sm:$0xff] }
 0x948   :  { %v15743_v8 = vperm.slane %v15742_v56, 0 }
 0x949   :  { %9408 = vrot.lane.b32.xlu2 %v9361_v61, %s10149_s28  ;;  %9816 = vrot.lane.b32.xlu0 %v14199_v16, %s10150_s29  ;;  %v8766_v16 = vadd.f32 %v8765_v38, %v8728_v2  ;;  %v9489_v32 = vrot.slane %v14507_v59, 4 }
 0x94a   :  { %v8955_v39 = vpop.f32.mrf.mxu1 }
 0x94b   :  { %9818 = vrot.lane.b32.xlu1 %v14351_v20, %s10150_s29  ;;  %v8997_v35 = vpop.f32.mrf.mxu2  ;;  %v8913_v20 = vpop.f32.mrf.mxu0  ;;  %v9696_v63 = vrot.slane %v8766_v16, 4  ;;  %v8956_v41 = vadd.f32 %v8955_v39, %v8909_v60  ;;  %v15748_v60 = vld [vmem:[#allocation69_spill] sm:$0xff] }
 0x94c   :  { %v9035_v40 = vpop.f32.mrf.mxu3  ;;  %v8914_v51 = vadd.f32 %v8913_v20, %v8870_v47  ;;  %v15747_v20 = vperm.slane %v15746_v28, 0 }
 0x94d   :  { %v8998_v3 = vadd.f32 %v8997_v35, %v8956_v41  ;;  %v15744_v35 = vperm.slane %v15742_v56, 1  ;;  %v15750_v41 = vld [vmem:[#allocation16_spill] sm:$0xff] }
 0x94f   :  { %v9036_v62 = vadd.f32 %v9035_v40, %v8998_v3 }
 0x951   :  { %9738 = vrot.lane.b32.xlu2 %v9694_v46, %s10152_s9  ;;  %9740 = vrot.lane.b32.xlu0 %v9695_v25, %s10152_s9  ;;  %v9697_v45 = vrot.slane %v9036_v62, 4  ;;  %v9205_v46 = vsel %vm3657_vm3, %v14373_v44, %v14520_v6  ;;  %v9285_v44 = vsel %vm3786_vm4, %v14392_v37, %v14454_v50  ;;  %v9546_v37 = vsel %vm4060_vm5, %v15750_v41, %v13883_v19  ;;  %v15765_v41 = vld [vmem:[#allocation37_spill] sm:$0xff] }
 0x952   :  { %v8961_v23 = vpop.f32.mrf.mxu1  ;;  %v9230_v2 = vmul.f32 %v9205_v46, %v15744_v35  ;;  %v15759_v46 = vperm.slane %v15742_v56, 3  ;;  %v15760_v35 = vperm.slane %v15746_v28, 2 }
 0x953   :  { %9820 = vrot.lane.b32.xlu1 %v14448_v58, %s10150_s29  ;;  %v8962_v18 = vadd.f32 %v8961_v23, %v8914_v51  ;;  %v9001_v38 = vpop.f32.mrf.mxu2  ;;  %v8732_v58 = vadd.f32 %v14481_v15, %v14466_v13  ;;  %v9067_v13 = vpop.permute.xlu0 %9066 }
 0x954   :  { %v9039_v57 = vpop.f32.mrf.mxu3  ;;  %v14524_v15 = vpop.permute.xlu1 %9402  ;;  %v9077_v11 = vsel %vm3512_vm2, %v14363_v34, %v9067_v13 }
 0x955   :  { %v9002_v21 = vadd.f32 %v9001_v38, %v8962_v18  ;;  %v8770_v17 = vadd.f32 %v14483_v54, %v8732_v58  ;;  %v9102_v39 = vmul.f32 %v9077_v11, %v15743_v8  ;;  %v15751_v18 = vld [vmem:[#allocation72_spill] sm:$0xff]  ;;  %v15758_v8 = vperm.slane %v15742_v56, 2 }
 0x956   :  { %v15753_v58 = vld [vmem:[#allocation64_spill] sm:$0xff] }
 0x957   :  { %v9040_v22 = vadd.f32 %v9039_v57, %v9002_v21  ;;  %v9118_v25 = vadd.f32 %v9102_v39, %v14310_v27  ;;  %v9413_v27 = vsel %vm3915_vm6, %v14385_v43, %v14524_v15  ;;  %v15752_v43 = vperm.slane %v15746_v28, 1  ;;  %v15754_v21 = vld [vmem:[#allocation66_spill] sm:$0xff] }
 0x958   :  { %v9552_v57 = vsel %vm4060_vm5, %v15754_v21, %v15753_v58  ;;  %v9310_v39 = vmul.f32 %v9285_v44, %v15758_v8 }
 0x959   :  { %9614 = vrot.lane.b32.xlu2 %v8766_v16, %s10151_s30  ;;  %9742 = vrot.lane.b32.xlu0 %v9696_v63, %s10152_s9  ;;  %v15745_v16 = vld [vmem:[#allocation57_spill] sm:$0xff]  ;;  %v15749_v63 = vld [vmem:[#allocation60_spill] sm:$0xff] }
 0x95b   :  { %9536 = vrot.lane.b32.xlu1 %v9489_v32, %s10148_s25  ;;  %v14528_v54 = vpop.permute.xlu0 %9276  ;;  %v9246_v32 = vadd.f32 %v9230_v2, %v9118_v25  ;;  %v9438_v25 = vmul.f32 %v9413_v27, %v15759_v46  ;;  %v15771_v46 = vperm.slane %v15746_v28, 6 }
 0x95c   :  { %v14530_v4 = vpop.permute.xlu1 %9068 }
 0x95d   :  { %v9326_v27 = vadd.f32 %v9310_v39, %v9246_v32  ;;  %v15772_v39 = vld [vmem:[#allocation73_spill] sm:$0xff] }
 0x961   :  { %9616 = vrot.lane.b32.xlu2 %v9036_v62, %s10151_s30  ;;  %9822 = vrot.lane.b32.xlu0 %v8770_v17, %s10150_s29  ;;  %v15755_v17 = vld [vmem:[#allocation67_spill] sm:$0xff]  ;;  %v15756_v62 = vld [vmem:[#allocation68_spill] sm:$0xff] }
 0x963   :  { %9824 = vrot.lane.b32.xlu1 %v9040_v22, %s10150_s29  ;;  %v14534_v10 = vpop.permute.xlu0 %9404  ;;  %v9632_v22 = vsel %vm4189_vm8, %v15756_v62, %v15755_v17 }
 0x964   :  { %v14536_v30 = vpop.permute.xlu1 %9532  ;;  %v9634_v32 = vmul.f32 %v9632_v22, %v15771_v46 }
 0x965   :  { %v9540_v19 = vsel %vm4060_vm5, %v14458_v5, %v14536_v30 }
 0x967   :  { %v14526_v12 = vpop.permute.xlu2 %9070 }
 0x969   :  { %9744 = vrot.lane.b32.xlu2 %v9697_v45, %s10152_s9  ;;  %v15757_v45 = vld [vmem:[#allocation65_spill] sm:$0xff] }
 0x971   :  { %v14532_v29 = vpop.permute.xlu2 %9406 }
 0x981   :  { %v14540_v61 = vpop.permute.xlu0 %9198 }
 0x987   :  { %v14545_v55 = vpop.permute.xlu1 %9278 }
 0x99b   :  { %v14538_v53 = vpop.permute.xlu2 %9280 }
 0x99c   :  { %v9297_v23 = vsel %vm3786_vm4, %v14538_v53, %v15748_v60  ;;  %v15763_v60 = vld [vmem:[#allocation27_spill] sm:$0xff] }
 0x99d   :  { %v9298_v2 = vmul.f32 %v9297_v23, %v15760_v35  ;;  %v15773_v35 = vld [vmem:[#allocation10_spill] sm:$0xff] }
 0x9a3   :  { %v14549_v36 = vpop.permute.xlu2 %9408 }
 0x9a4   :  { %v9425_v11 = vsel %vm3915_vm6, %v14549_v36, %v15757_v45  ;;  %v15769_v45 = vld [vmem:[#allocation70_spill] sm:$0xff] }
 0x9ab   :  { %v9073_v31 = vpop.permute.xlu0 %9072 }
 0x9ac   :  { %v9089_v34 = vsel %vm3512_vm2, %v9073_v31, %v15745_v16  ;;  %v14610_v16 = vpop.permute.xlu2 %9738 }
 0x9ad   :  { %v9090_v40 = vmul.f32 %v9089_v34, %v15747_v20  ;;  %v14563_v47 = vpop.permute.xlu1 %9200  ;;  %v15761_v20 = vld [vmem:[#allocation25_spill] sm:$0xff] }
 0x9ae   :  { %v9217_v51 = vsel %vm3657_vm3, %v14563_v47, %v15749_v63  ;;  %v9626_v63 = vsel %vm4189_vm8, %v15763_v60, %v13899_v33  ;;  %v15770_v33 = vld [vmem:[#allocation8_spill] sm:$0xff]  ;;  %v9454_v60 = vadd.f32 %v9438_v25, %v9326_v27  ;;  %v15778_v22 = vperm.slane %v15761_v20, 7 }
 0x9af   :  { %v9106_v38 = vadd.f32 %v9090_v40, %v15751_v18  ;;  %v9218_v3 = vmul.f32 %v9217_v51, %v15752_v43  ;;  %v15762_v40 = vperm.slane %v15761_v20, 5  ;;  %v15764_v51 = vld [vmem:[#allocation2_spill] sm:$0xff]  ;;  %v15766_v18 = vperm.slane %v15742_v56, 5 }
 0x9b0   :  { %v9754_v44 = vsel %vm4318_vm9, %v15765_v41, %v15764_v51  ;;  %v15767_v43 = vperm.slane %v15746_v28, 3  ;;  %v9840_v8 = vsel %vm4415_vm7, %v15770_v33, %v15769_v45  ;;  %v15779_v45 = vld [vmem:[#allocation14_spill] sm:$0xff]  ;;  %v9076_v25 = vsel %vm3512_vm2, %v9067_v13, %v14530_v4  ;;  %v10136_v13 = vld [vmem:[%s15025_s1 + $0xb0] ss:$0 sm:$0xff] }
 0x9b1   :  { %v9234_v34 = vadd.f32 %v9218_v3, %v9106_v38  ;;  %v9560_v5 = vmul.f32 %v9546_v37, %v15762_v40  ;;  %v9566_v23 = vmul.f32 %v9540_v19, %v15766_v18  ;;  %v15768_v37 = vperm.slane %v15746_v28, 5  ;;  %v15777_v18 = vld [vmem:[#allocation12_spill] sm:$0xff] }
 0x9b2   :  { %v9426_v38 = vmul.f32 %v9425_v11, %v15767_v43  ;;  %v9760_v19 = vsel %vm4318_vm9, %v15773_v35, %v15772_v39  ;;  %v15774_v11 = vld [vmem:[#allocation9_spill] sm:$0xff] }
 0x9b3   :  { %v9314_v3 = vadd.f32 %v9298_v2, %v9234_v34  ;;  %v14626_v58 = vpop.permute.xlu0 %9534  ;;  %v9554_v17 = vmul.f32 %v9552_v57, %v15768_v37  ;;  %v15775_v2 = vld [vmem:[#allocation79_spill] sm:$0xff]  ;;  %v15776_v57 = vperm.slane %v15761_v20, 6  ;;  %v9576_v43 = vadd.f32 %v9560_v5, %v15777_v18 }
 0x9b4   :  { %v9835_v34 = vsel %vm4415_vm7, %v15775_v2, %v15774_v11  ;;  %v9768_v37 = vmul.f32 %v9754_v44, %v15778_v22  ;;  %v9834_v46 = vsel %vm4415_vm7, %v15774_v11, %v15779_v45  ;;  %v15780_v5 = vperm.slane %v15742_v56, 6 }
 0x9b5   :  { %v9640_v40 = vmul.f32 %v9626_v63, %v15776_v57  ;;  %v9442_v51 = vadd.f32 %v9426_v38, %v9314_v3  ;;  %v14646_v41 = vpop.permute.xlu1 %9612  ;;  %v9582_v63 = vadd.f32 %v9566_v23, %v9454_v60  ;;  %v15781_v44 = vperm.slane %v15746_v28, 7  ;;  %v10135_v3 = vld [vmem:[%s15025_s1 + $0xa8] ss:$0 sm:$0xff]  ;;  %v10137_v28 = vld [vmem:[%s15025_s1 + $0x80] ss:$0 sm:$0xff] }
 0x9b6   :  { %v9620_v39 = vsel %vm4189_vm8, %v14468_v52, %v14646_v41  ;;  %v9847_v11 = vmul.f32 %v10135_v3, %v9835_v34  ;;  %v9074_v52 = vsel %vm3512_vm2, %v14526_v12, %v9073_v31  ;;  %v9848_v23 = vmul.f32 %v10136_v13, %v9834_v46  ;;  %v15782_v60 = vld [vmem:[#allocation74_spill] sm:$0xff] }
 0x9b7   :  { %v9570_v27 = vadd.f32 %v9554_v17, %v9442_v51  ;;  %v9646_v20 = vmul.f32 %v9620_v39, %v15780_v5  ;;  %v9762_v38 = vmul.f32 %v9760_v19, %v15781_v44  ;;  %v9656_v2 = vadd.f32 %v9640_v40, %v9576_v43  ;;  %v15783_v51 = vld [vmem:[#allocation43_spill] sm:$0xff] }
 0x9b8   :  { %v9842_v19 = vmul.f32 %v10137_v28, %v9840_v8  ;;  %v9877_v34 = vsel %vm117_vm1, %v15782_v60, 0.0  ;;  %v15784_v18 = vperm.slane %v15783_v51, 0  ;;  %v15785_v43 = vld [vmem:[#allocation51_spill] sm:$0xff]  ;;  %v15788_v8 = vld [vmem:[#allocation77_spill] sm:$0xff]  ;;  %v9204_v3 = vsel %vm3657_vm3, %v14520_v6, %v14522_v1 }
 0x9b9   :  { %v9650_v17 = vadd.f32 %v9634_v32, %v9570_v27  ;;  %v14675_v57 = vadd.f32 %v9646_v20, %v9582_v63  ;;  %v9784_v40 = vadd.f32 %v9768_v37, %v9656_v2  ;;  %v9831_v22 = vsel %vm4415_vm7, %v15785_v43, %v14365_v14  ;;  %v15786_v32 = vld [vmem:[#allocation44_spill] sm:$0xff]  ;;  %v14690_v63 = vpop.permute.xlu2 %9614 }
 0x9ba   :  { %v9103_v31 = vmul.f32 %v9076_v25, %v15784_v18  ;;  %v15787_v45 = vperm.slane %v15786_v32, 0  ;;  %v9879_v5 = vsel %vm117_vm1, %v15788_v8, 0.0  ;;  %v15789_v20 = vld [vmem:[#allocation24_spill] sm:$0xff]  ;;  %v9075_v37 = vsel %vm3512_vm2, %v14530_v4, %v14526_v12 }
 0x9bb   :  { %v9778_v39 = vadd.f32 %v9762_v38, %v9650_v17  ;;  %v9817_v27 = vpop.permute.xlu0 %9816  ;;  %v14695_v44 = vadd.f32 %v9847_v11, %v15789_v20  ;;  %v9202_v25 = vsel %vm3657_vm3, %v14540_v61, %v14563_v47  ;;  %v14705_v38 = vadd.f32 %v9848_v23, %v9784_v40  ;;  %v15790_v4 = vld [vmem:[#allocation80_spill] sm:$0xff]  ;;  %v10138_v47 = vld [vmem:[%s15025_s1 + $0xc8] ss:$0 sm:$0xff] }
 0x9bc   :  { %v9105_v46 = vmul.f32 %v9074_v52, %v15787_v45  ;;  %v9284_v11 = vsel %vm3786_vm4, %v14454_v50, %v14528_v54  ;;  %v9881_v2 = vsel %vm117_vm1, %v15790_v4, 0.0  ;;  %v9851_v13 = vmul.f32 %v10138_v47, %v9831_v22  ;;  %v15791_v17 = vld [vmem:[#allocation42_spill] sm:$0xff] }
 0x9bd   :  { %v14715_v52 = vadd.f32 %v9842_v19, %v9778_v39  ;;  %v9819_v12 = vpop.permute.xlu1 %9818  ;;  %v9119_v23 = vadd.f32 %v9103_v31, %v14424_v48  ;;  %v9203_v6 = vsel %vm3657_vm3, %v14522_v1, %v14540_v61  ;;  %v15792_v50 = vperm.slane %v15791_v17, 0  ;;  %v15796_v39 = vld [vmem:[#allocation82_spill] sm:$0xff] }
 0x9be   :  { %v9121_v19 = vadd.f32 %v9105_v46, %v14507_v59  ;;  %v15793_v18 = vperm.slane %v15786_v32, 1  ;;  %v15794_v22 = vperm.slane %v15783_v51, 1  ;;  %v15795_v48 = vperm.slane %v15783_v51, 2 }
 0x9bf   :  { %v9104_v28 = vmul.f32 %v9075_v37, %v15792_v50  ;;  %v9876_v43 = vsel %vm117_vm1, %v14715_v52, 0.0  ;;  %v9283_v1 = vsel %vm3786_vm4, %v14528_v54, %v14545_v55  ;;  %v9883_v59 = vsel %vm117_vm1, %v15796_v39, 0.0 }
 0x9c0   :  { %v9233_v40 = vmul.f32 %v9202_v25, %v15793_v18  ;;  %v9231_v45 = vmul.f32 %v9204_v3, %v15794_v22  ;;  %v9311_v31 = vmul.f32 %v9284_v11, %v15795_v48  ;;  %v9878_v61 = vadd.f32 %v9877_v34, %v9876_v43  ;;  %v15798_v3 = vld [vmem:[#allocation26_spill] sm:$0xff] }
 0x9c1   :  { %v9885_v46 = vsel %vm117_vm1, %v14695_v44, 0.0  ;;  %v9887_v20 = vsel %vm117_vm1, %v14705_v38, 0.0  ;;  %v15797_v37 = vperm.slane %v15791_v17, 1  ;;  %v9889_v11 = vsel %vm117_vm1, %v15798_v3, 0.0 }
 0x9c2   :  { %v9247_v47 = vadd.f32 %v9231_v45, %v9119_v23  ;;  %v9282_v54 = vsel %vm3786_vm4, %v14545_v55, %v14538_v53  ;;  %v9880_v34 = vadd.f32 %v9879_v5, %v9878_v61  ;;  %v9412_v50 = vsel %vm3915_vm6, %v14524_v15, %v14534_v10 }
 0x9c3   :  { %v9232_v25 = vmul.f32 %v9203_v6, %v15797_v37  ;;  %v9120_v18 = vadd.f32 %v9104_v28, %v14487_v49  ;;  %v15799_v43 = vperm.slane %v15791_v17, 2  ;;  %v9249_v22 = vadd.f32 %v9233_v40, %v9121_v19  ;;  %v9741_v48 = vpop.permute.xlu0 %9740  ;;  %v9617_v28 = vpop.permute.xlu2 %9616 }
 0x9c4   :  { %v14764_v23 = vadd.f32 %v9851_v13, %v14355_v0  ;;  %v9327_v45 = vadd.f32 %v9311_v31, %v9247_v47  ;;  %v9749_v53 = vsel %vm4318_vm9, %v14440_v26, %v14610_v16  ;;  %v9882_v55 = vadd.f32 %v9881_v2, %v9880_v34 }
 0x9c5   :  { %v9312_v6 = vmul.f32 %v9283_v1, %v15799_v43  ;;  %v9248_v5 = vadd.f32 %v9232_v25, %v9120_v18  ;;  %v15800_v15 = vperm.slane %v15786_v32, 2  ;;  %v9539_v49 = vsel %vm4060_vm5, %v14536_v30, %v14626_v58  ;;  %v14779_v13 = vpop.permute.xlu1 %9820 }
 0x9c6   :  { %v9830_v0 = vsel %vm4415_vm7, %v14365_v14, %v9817_v27  ;;  %v15801_v19 = vperm.slane %v15783_v51, 3  ;;  %v9411_v2 = vsel %vm3915_vm6, %v14534_v10, %v14532_v29  ;;  %v9884_v40 = vadd.f32 %v9883_v59, %v9882_v55  ;;  %v10139_v10 = vld [vmem:[%s15025_s1 + $0xd0] ss:$0 sm:$0xff] }
 0x9c7   :  { %v9313_v61 = vmul.f32 %v9282_v54, %v15800_v15  ;;  %v9748_v30 = vsel %vm4318_vm9, %v14610_v16, %v9741_v48  ;;  %v9328_v31 = vadd.f32 %v9312_v6, %v9248_v5  ;;  %v9410_v14 = vsel %vm3915_vm6, %v14532_v29, %v14549_v36 }
 0x9c8   :  { %v9439_v26 = vmul.f32 %v9412_v50, %v15801_v19  ;;  %v15802_v1 = vperm.slane %v15732_v9, 7  ;;  %v15803_v47 = vperm.slane %v15783_v51, 5  ;;  %v9852_v59 = vmul.f32 %v10139_v10, %v9830_v0  ;;  %v15804_v50 = vld [vmem:[#allocation35_spill] sm:$0xff] }
 0x9c9   :  { %v9329_v25 = vadd.f32 %v9313_v61, %v9249_v22  ;;  %v9886_v34 = vadd.f32 %v9885_v46, %v9884_v40  ;;  %v9829_v16 = vsel %vm4415_vm7, %v9817_v27, %v9819_v12  ;;  %v9891_v18 = vsel %vm117_vm1, %v15804_v50, 0.0 }
 0x9ca   :  { %v9773_v37 = vmul.f32 %v9749_v53, %v15802_v1  ;;  %v9567_v54 = vmul.f32 %v9539_v49, %v15803_v47  ;;  %v9893_v9 = vsel %vm117_vm1, %v14764_v23, 0.0  ;;  %v15805_v29 = vperm.slane %v15791_v17, 3 }
 0x9cb   :  { %v15806_v43 = vperm.slane %v15742_v56, 7  ;;  %v9455_v22 = vadd.f32 %v9439_v26, %v9327_v45  ;;  %v15807_v53 = vperm.slane %v15786_v32, 3  ;;  %v9888_v46 = vadd.f32 %v9887_v20, %v9886_v34  ;;  %v10140_v56 = vld [vmem:[%s15025_s1 + $0xd8] ss:$0 sm:$0xff]  ;;  %v9743_v61 = vpop.permute.xlu0 %9742 }
 0x9cc   :  { %v9440_v36 = vmul.f32 %v9411_v2, %v15805_v29  ;;  %v9828_v27 = vsel %vm4415_vm7, %v9819_v12, %v14779_v13  ;;  %v9789_v5 = vadd.f32 %v9773_v37, %v14475_v42  ;;  %v9619_v15 = vsel %vm4189_vm8, %v14646_v41, %v14690_v63  ;;  %v10141_v2 = vld [vmem:[%s15025_s1 + $0xe0] ss:$0 sm:$0xff] }
 0x9cd   :  { %v9774_v6 = vmul.f32 %v9748_v30, %v15806_v43  ;;  %v9441_v55 = vmul.f32 %v9410_v14, %v15807_v53  ;;  %v9853_v45 = vmul.f32 %v10140_v56, %v9829_v16  ;;  %v9583_v0 = vadd.f32 %v9567_v54, %v9455_v22  ;;  %v9537_v30 = vpop.permute.xlu1 %9536  ;;  %v9745_v14 = vpop.permute.xlu2 %9744 }
 0x9ce   :  { %v9456_v49 = vadd.f32 %v9440_v36, %v9328_v31  ;;  %v14825_v20 = vadd.f32 %v9852_v59, %v14450_v7  ;;  %v9890_v19 = vadd.f32 %v9889_v11, %v9888_v46  ;;  %v9618_v42 = vsel %vm4189_vm8, %v14690_v63, %v9617_v28 }
 0x9cf   :  { %v9457_v12 = vadd.f32 %v9441_v55, %v9329_v25  ;;  %v9633_v41 = vsel %vm4189_vm8, %v9617_v28, %v15756_v62  ;;  %v9790_v26 = vadd.f32 %v9774_v6, %v14675_v57  ;;  %v9854_v40 = vmul.f32 %v10141_v2, %v9828_v27 }
 0x9d0   :  { %v9892_v7 = vadd.f32 %v9891_v18, %v9890_v19  ;;  %v9747_v11 = vsel %vm4318_vm9, %v9741_v48, %v9743_v61  ;;  %v9538_v63 = vsel %vm4060_vm5, %v14626_v58, %v9537_v30  ;;  %v9553_v62 = vsel %vm4060_vm5, %v9537_v30, %v15754_v21 }
 0x9d1   :  { %v15808_v57 = vperm.slane %v15783_v51, 6  ;;  %v14847_v31 = vadd.f32 %v9853_v45, %v9789_v5  ;;  %v15809_v1 = vperm.slane %v15791_v17, 5  ;;  %v15810_v25 = vperm.slane %v15786_v32, 5 }
 0x9d2   :  { %v15811_v47 = vperm.slane %v15791_v17, 6  ;;  %v15812_v58 = vperm.slane %v15786_v32, 6  ;;  %v9894_v59 = vadd.f32 %v9893_v9, %v9892_v7  ;;  %v9895_v21 = vsel %vm117_vm1, %v14825_v20, 0.0 }
 0x9d3   :  { %v9647_v28 = vmul.f32 %v9619_v15, %v15808_v57  ;;  %v9568_v37 = vmul.f32 %v9538_v63, %v15809_v1  ;;  %v9569_v48 = vmul.f32 %v9553_v62, %v15810_v25  ;;  %v9746_v34 = vsel %vm4318_vm9, %v9743_v61, %v9745_v14  ;;  %v9823_v27 = vpop.permute.xlu0 %9822 }
 0x9d4   :  { %v9648_v54 = vmul.f32 %v9618_v42, %v15811_v47  ;;  %v9649_v10 = vmul.f32 %v9633_v41, %v15812_v58  ;;  %v15813_v16 = vperm.slane %v15783_v51, 7  ;;  %v9896_v43 = vadd.f32 %v9895_v21, %v9894_v59 }
 0x9d5   :  { %v9584_v29 = vadd.f32 %v9568_v37, %v9456_v49  ;;  %v9585_v36 = vadd.f32 %v9569_v48, %v9457_v12  ;;  %v9761_v6 = vsel %vm4318_vm9, %v9745_v14, %v15773_v35  ;;  %v14866_v22 = vadd.f32 %v9854_v40, %v9790_v26  ;;  %v10142_v49 = vld [vmem:[%s15025_s1 + $0xe8] ss:$0 sm:$0xff]  ;;  %v9825_v19 = vpop.permute.xlu1 %9824  ;;  %v10143_v26 = vld [vmem:[%s15025_s1 + $0xf0] ss:$0 sm:$0xff]  ;;  %v10144_v40 = vld [vmem:[%s15025_s1 + $0xf8] ss:$0 sm:$0xff] }
 0x9d6   :  { %v9775_v18 = vmul.f32 %v9747_v11, %v15813_v16  ;;  %v9663_v53 = vadd.f32 %v9647_v28, %v9583_v0  ;;  %v9897_v9 = vsel %vm117_vm1, %v14847_v31, 0.0  ;;  %v15814_v51 = vperm.slane %v15791_v17, 7 }
 0x9d7   :  { %v9664_v55 = vadd.f32 %v9648_v54, %v9584_v29  ;;  %v9665_v46 = vadd.f32 %v9649_v10, %v9585_v36  ;;  %v9898_v5 = vadd.f32 %v9897_v9, %v9896_v43  ;;  %v9827_v56 = vsel %vm4415_vm7, %v14779_v13, %v9823_v27 }
 0x9d8   :  { %v9776_v15 = vmul.f32 %v9746_v34, %v15814_v51  ;;  %v15815_v45 = vperm.slane %v15786_v32, 7  ;;  %v9791_v61 = vadd.f32 %v9775_v18, %v9663_v53  ;;  %v9855_v0 = vmul.f32 %v10142_v49, %v9827_v56 }
 0x9d9   :  { %v9899_v12 = vsel %vm117_vm1, %v14866_v22, 0.0  ;;  %v9826_v17 = vsel %vm4415_vm7, %v9823_v27, %v9825_v19  ;;  %v9841_v13 = vsel %vm4415_vm7, %v9825_v19, %v15770_v33 }
 0x9da   :  { %v9777_v35 = vmul.f32 %v9761_v6, %v15815_v45  ;;  %v9792_v42 = vadd.f32 %v9776_v15, %v9664_v55  ;;  %v9871_v32 = vadd.f32 %v9855_v0, %v9791_v61  ;;  %v9856_v2 = vmul.f32 %v10143_v26, %v9826_v17 }
 0x9db   :  { %v9857_v30 = vmul.f32 %v10144_v40, %v9841_v13  ;;  %v9900_v7 = vadd.f32 %v9899_v12, %v9898_v5 }
 0x9dc   :  { %v9793_v41 = vadd.f32 %v9777_v35, %v9665_v46  ;;  %v9901_v11 = vsel %vm117_vm1, %v9871_v32, 0.0  ;;  %v9872_v63 = vadd.f32 %v9856_v2, %v9792_v42 }
 0x9dd   :  { %v9902_v57 = vadd.f32 %v9901_v11, %v9900_v7 }
 0x9de   :  { %v9873_v62 = vadd.f32 %v9857_v30, %v9793_v41  ;;  %v9903_v24 = vsel %vm117_vm1, %v9872_v63, 0.0 }
 0x9df   :  { %v9904_v33 = vadd.f32 %v9903_v24, %v9902_v57 }
 0x9e0   :  { %v9905_v28 = vsel %vm117_vm1, %v9873_v62, 0.0 }
 0x9e1   :  { %v9906_v14 = vadd.f32 %v9905_v28, %v9904_v33 }
 0x9e3   :  { %9907 = vadd.xlane.f32.xlu2 %v9906_v14 }
 0xa56   :  { %v9908_v1 = vpop.xlane.xlu2 %9907 }
 0xa57   :  { %v9909_v37 = vmul.f32 0.00048828125, %v9908_v1 }
 0xa59   :  { %v14897_v25 = vsub.f32 %v14715_v52, %v9909_v37  ;;  %v14900_v48 = vsub.f32 %v15782_v60, %v9909_v37  ;;  %v14903_v47 = vsub.f32 %v15788_v8, %v9909_v37  ;;  %v14906_v54 = vsub.f32 %v15790_v4, %v9909_v37 }
 0xa5a   :  { %v14913_v59 = vsub.f32 %v15796_v39, %v9909_v37  ;;  %v14918_v60 = vsub.f32 %v14695_v44, %v9909_v37  ;;  %v14925_v16 = vsub.f32 %v14705_v38, %v9909_v37  ;;  %v14931_v44 = vsub.f32 %v15798_v3, %v9909_v37 }
 0xa5b   :  { %v9926_v58 = vmul.f32 %v14897_v25, %v14897_v25  ;;  %v9927_v10 = vmul.f32 %v14900_v48, %v14900_v48  ;;  %v9928_v52 = vmul.f32 %v14903_v47, %v14903_v47  ;;  %v9929_v8 = vmul.f32 %v14906_v54, %v14906_v54 }
 0xa5c   :  { %v9930_v39 = vmul.f32 %v14913_v59, %v14913_v59  ;;  %v9931_v36 = vmul.f32 %v14918_v60, %v14918_v60  ;;  %v14937_v53 = vsub.f32 %v15804_v50, %v9909_v37  ;;  %v9932_v38 = vmul.f32 %v14925_v16, %v14925_v16 }
 0xa5d   :  { %v9942_v4 = vsel %vm117_vm1, %v9926_v58, 0.0  ;;  %v9943_v21 = vsel %vm117_vm1, %v9927_v10, 0.0  ;;  %v9945_v18 = vsel %vm117_vm1, %v9928_v52, 0.0  ;;  %v9947_v43 = vsel %vm117_vm1, %v9929_v8, 0.0 }
 0xa5e   :  { %v9944_v34 = vadd.f32 %v9943_v21, %v9942_v4  ;;  %v9949_v9 = vsel %vm117_vm1, %v9930_v39, 0.0  ;;  %v14943_v46 = vsub.f32 %v14764_v23, %v9909_v37  ;;  %v9933_v3 = vmul.f32 %v14931_v44, %v14931_v44 }
 0xa5f   :  { %v9951_v27 = vsel %vm117_vm1, %v9931_v36, 0.0  ;;  %v14949_v51 = vsub.f32 %v14825_v20, %v9909_v37  ;;  %v9934_v50 = vmul.f32 %v14937_v53, %v14937_v53  ;;  %v9953_v15 = vsel %vm117_vm1, %v9932_v38, 0.0 }
 0xa60   :  { %v9946_v29 = vadd.f32 %v9945_v18, %v9944_v34  ;;  %v14955_v45 = vsub.f32 %v14847_v31, %v9909_v37  ;;  %v9935_v23 = vmul.f32 %v14943_v46, %v14943_v46  ;;  %v9955_v35 = vsel %vm117_vm1, %v9933_v3, 0.0  ;;  %v9874_v18 = vld [vmem:[%s15029_s6] sm:$0xf] }
 0xa61   :  { %v9922_v49 = vsub.f32 %v14866_v22, %v9909_v37  ;;  %v9936_v20 = vmul.f32 %v14949_v51, %v14949_v51  ;;  %v9957_v0 = vsel %vm117_vm1, %v9934_v50, 0.0  ;;  %v9923_v12 = vsub.f32 %v9871_v32, %v9909_v37 }
 0xa62   :  { %v9948_v6 = vadd.f32 %v9947_v43, %v9946_v29  ;;  %v9937_v42 = vmul.f32 %v14955_v45, %v14955_v45  ;;  %v9959_v31 = vsel %vm117_vm1, %v9935_v23, 0.0  ;;  %v9924_v13 = vsub.f32 %v9872_v63, %v9909_v37  ;;  %v9875_v43 = vld [vmem:[%s15030_s7] sm:$0xf] }
 0xa63   :  { %v9938_v41 = vmul.f32 %v9922_v49, %v9922_v49  ;;  %v9961_v26 = vsel %vm117_vm1, %v9936_v20, 0.0  ;;  %v9925_v40 = vsub.f32 %v9873_v62, %v9909_v37  ;;  %v9939_v22 = vmul.f32 %v9923_v12, %v9923_v12 }
 0xa64   :  { %v9950_v55 = vadd.f32 %v9949_v9, %v9948_v6  ;;  %v9963_v30 = vsel %vm117_vm1, %v9937_v42, 0.0  ;;  %v9940_v11 = vmul.f32 %v9924_v13, %v9924_v13 }
 0xa65   :  { %v9965_v57 = vsel %vm117_vm1, %v9938_v41, 0.0  ;;  %v9941_v24 = vmul.f32 %v9925_v40, %v9925_v40  ;;  %v9967_v33 = vsel %vm117_vm1, %v9939_v22, 0.0 }
 0xa66   :  { %v9952_v5 = vadd.f32 %v9951_v27, %v9950_v55  ;;  %v9969_v14 = vsel %vm117_vm1, %v9940_v11, 0.0 }
 0xa67   :  { %v9971_v1 = vsel %vm117_vm1, %v9941_v24, 0.0 }
 0xa68   :  { %v9954_v56 = vadd.f32 %v9953_v15, %v9952_v5 }
 0xa6a   :  { %v9956_v61 = vadd.f32 %v9955_v35, %v9954_v56 }
 0xa6c   :  { %v9958_v19 = vadd.f32 %v9957_v0, %v9956_v61 }
 0xa6e   :  { %v9960_v17 = vadd.f32 %v9959_v31, %v9958_v19 }
 0xa70   :  { %v9962_v2 = vadd.f32 %v9961_v26, %v9960_v17 }
 0xa72   :  { %v9964_v7 = vadd.f32 %v9963_v30, %v9962_v2 }
 0xa74   :  { %v9966_v32 = vadd.f32 %v9965_v57, %v9964_v7 }
 0xa76   :  { %v9968_v28 = vadd.f32 %v9967_v33, %v9966_v32 }
 0xa78   :  { %v9970_v63 = vadd.f32 %v9969_v14, %v9968_v28 }
 0xa7a   :  { %v9972_v58 = vadd.f32 %v9971_v1, %v9970_v63 }
 0xa7c   :  { %9973 = vadd.xlane.f32.xlu0 %v9972_v58 }
 0xaef   :  { %v9974_v62 = vpop.xlane.xlu0 %9973 }
 0xaf0   :  { %v9975_v37 = vmul.f32 0.00048828125, %v9974_v62 }
 0xaf2   :  { %v9976_v10 = vadd.f32 1e-05, %v9975_v37 }
 0xaf4   :  { %10127 = vrsqrt.f32 %v9976_v10  ;;  %vm9983_vm0 = vweird.f32 %v9976_v10 }
 0xafa   :  { %v10128_v52 = vpop.eup %10127 }
 0xafb   :  { %v9978_v8 = vmul.f32 %v10128_v52, %v9976_v10  ;;  %vm9984_vm15 = vweird.f32 %v10128_v52 }
 0xafc   :  { %vm9985_vm2 = vmor %vm9983_vm0, %vm9984_vm15 }
 0xafd   :  { %v9979_v4 = vmul.f32 %v10128_v52, %v9978_v8 }
 0xaff   :  { %v9980_v21 = vmul.f32 0.5, %v9979_v4 }
 0xb01   :  { %v9981_v34 = vsub.f32 1.5, %v9980_v21 }
 0xb03   :  { %v9982_v39 = vmul.f32 %v10128_v52, %v9981_v34 }
 0xb05   :  { %v9986_v29 = vsel %vm9985_vm2, %v10128_v52, %v9982_v39 }
 0xb06   :  { %v9987_v36 = vmul.f32 %v9986_v29, %v9874_v18 }
 0xb08   :  { %9990 = vperm.xlu1 %10107, %v9987_v36  }
 0xb10   :  { %10011 = vperm.xlu1 %10107, %v9875_v43  }
 0xb7a   :  { %v9991_v6 = vpop.permute.xlu1 %9990 }
 0xb7b   :  { %v9993_v38 = vmul.f32 %v9991_v6, %v14897_v25  ;;  %v9994_v9 = vmul.f32 %v9991_v6, %v14900_v48  ;;  %v9995_v55 = vmul.f32 %v9991_v6, %v14903_v47  ;;  %v9996_v3 = vmul.f32 %v9991_v6, %v14906_v54 }
 0xb7c   :  { %v9997_v27 = vmul.f32 %v9991_v6, %v14913_v59  ;;  %v9998_v5 = vmul.f32 %v9991_v6, %v14918_v60  ;;  %v9999_v50 = vmul.f32 %v9991_v6, %v14925_v16  ;;  %v10000_v15 = vmul.f32 %v9991_v6, %v14931_v44 }
 0xb7d   :  { %v10001_v56 = vmul.f32 %v9991_v6, %v14937_v53  ;;  %v10002_v23 = vmul.f32 %v9991_v6, %v14943_v46  ;;  %v10003_v25 = vmul.f32 %v9991_v6, %v14949_v51  ;;  %v10004_v48 = vmul.f32 %v9991_v6, %v14955_v45 }
 0xb7e   :  { %v10005_v47 = vmul.f32 %v9991_v6, %v9922_v49  ;;  %v10006_v20 = vmul.f32 %v9991_v6, %v9923_v12  ;;  %v10008_v59 = vmul.f32 %v9991_v6, %v9925_v40  ;;  %v10007_v19 = vmul.f32 %v9991_v6, %v9924_v13 }
 0xb82   :  { %v10012_v35 = vpop.permute.xlu1 %10011 }
 0xb83   :  { %v10015_v61 = vadd.f32 %v10012_v35, %v9994_v9  ;;  %v10017_v54 = vadd.f32 %v10012_v35, %v9996_v3  ;;  %v10019_v0 = vadd.f32 %v10012_v35, %v9998_v5  ;;  %v10021_v60 = vadd.f32 %v10012_v35, %v10000_v15 }
 0xb84   :  { %v10014_v16 = vadd.f32 %v10012_v35, %v9993_v38  ;;  %v10023_v42 = vadd.f32 %v10012_v35, %v10002_v23  ;;  %v10025_v44 = vadd.f32 %v10012_v35, %v10004_v48  ;;  %v10016_v31 = vadd.f32 %v10012_v35, %v9995_v55 }
 0xb85   :  { %v10018_v53 = vadd.f32 %v10012_v35, %v9997_v27  ;;  %v10027_v17 = vadd.f32 %v10012_v35, %v10006_v20  ;;  %v10029_v46 = vadd.f32 %v10012_v35, %v10008_v59  ;;  %v10020_v41 = vadd.f32 %v10012_v35, %v9999_v50 }
 0xb86   :  { %v10022_v51 = vadd.f32 %v10012_v35, %v10001_v56  ;;  %v10031_v26 = vmax.f32 %v10015_v61, 0.0  ;;  %v10033_v2 = vmax.f32 %v10017_v54, 0.0  ;;  %v10024_v45 = vadd.f32 %v10012_v35, %v10003_v25 }
 0xb87   :  { %v10026_v49 = vadd.f32 %v10012_v35, %v10005_v47  ;;  %v10035_v22 = vmax.f32 %v10019_v0, 0.0  ;;  %v10037_v30 = vmax.f32 %v10021_v60, 0.0  ;;  %v10028_v12 = vadd.f32 %v10012_v35, %v10007_v19 }
 0xb88   :  { %v10030_v40 = vmax.f32 %v10014_v16, 0.0  ;;  %v10039_v7 = vmax.f32 %v10023_v42, 0.0  ;;  %v10041_v11 = vmax.f32 %v10025_v44, 0.0  ;;  %v10032_v13 = vmax.f32 %v10016_v31, 0.0 }
 0xb89   :  { %v10034_v57 = vmax.f32 %v10018_v53, 0.0  ;;  %v10043_v32 = vmax.f32 %v10027_v17, 0.0  ;;  %v10045_v24 = vmax.f32 %v10029_v46, 0.0  ;;  %v10062_v33 = vrot.slane %v10031_v26, 4 }
 0xb8a   :  { %v10063_v28 = vrot.slane %v10033_v2, 4  ;;  %v10064_v14 = vrot.slane %v10035_v22, 4  ;;  %v10065_v63 = vrot.slane %v10037_v30, 4  ;;  %v10036_v1 = vmax.f32 %v10020_v41, 0.0 }
 0xb8b   :  { %v10038_v58 = vmax.f32 %v10022_v51, 0.0  ;;  %v10066_v62 = vrot.slane %v10039_v7, 4  ;;  %v10067_v37 = vrot.slane %v10041_v11, 4  ;;  %v10068_v10 = vrot.slane %v10043_v32, 4 }
 0xb8c   :  { %v10070_v52 = vsel %vm117_vm1, %v10030_v40, %v10062_v33  ;;  %v10071_v8 = vsel %vm117_vm1, %v10032_v13, %v10063_v28  ;;  %v10072_v4 = vsel %vm117_vm1, %v10034_v57, %v10064_v14  ;;  %v10040_v21 = vmax.f32 %v10024_v45, 0.0 }
 0xb8d   :  { %v10069_v34 = vrot.slane %v10045_v24, 4  ;;  %v10073_v39 = vsel %vm117_vm1, %v10036_v1, %v10065_v63  ;;  %10086 = vst [vmem:[%s15031_s8] sm:$0xff] %v10070_v52  ;;  %v10042_v18 = vmax.f32 %v10026_v49, 0.0  ;;  %v10074_v29 = vsel %vm117_vm1, %v10038_v58, %v10066_v62 }
 0xb8e   :  { %10087 = vst [vmem:[%s15031_s8 + $0x8] sm:$0xff] %v10071_v8  ;;  %v10044_v36 = vmax.f32 %v10028_v12, 0.0  ;;  %v10075_v43 = vsel %vm117_vm1, %v10040_v21, %v10067_v37 }
 0xb8f   :  { %10088 = vst [vmem:[%s15031_s8 + $0x10] sm:$0xff] %v10072_v4  ;;  %v10076_v6 = vsel %vm117_vm1, %v10042_v18, %v10068_v10 }
 0xb90   :  { %10089 = vst [vmem:[%s15031_s8 + $0x18] sm:$0xff] %v10073_v39  ;;  %v10077_v38 = vsel %vm117_vm1, %v10044_v36, %v10069_v34 }
 0xb91   :  { %10090 = vst [vmem:[%s15031_s8 + $0x20] sm:$0xff] %v10074_v29 }
 0xb92   :  { %10091 = vst [vmem:[%s15031_s8 + $0x28] sm:$0xff] %v10075_v43 }
 0xb93   :  { %10092 = vst [vmem:[%s15031_s8 + $0x30] sm:$0xff] %v10076_v6 }
 0xb94   :  { %10093 = vst [vmem:[%s15031_s8 + $0x38] sm:$0xff] %v10077_v38 }

</bundles_post_ra>
